<compile_context>
chip_gen: v7x
topology: tpu7x:2x2x1
jax: 0.10.0
libtpu: 0.0.40
codegen_flags: <defaults>
</compile_context>

<pallas_src>
import math
import functools

import jax
import jax.numpy as jnp
from jax.experimental import pallas as pl
from jax.experimental.pallas import tpu as pltpu


def _round_up(x, m):
    return (x + m - 1) // m * m


def _choose_tile(M, K, Cout):
    # Cap the f32 epilogue tile (~256 KiB) and each per-operand input block (~1 MiB),
    # keep blocks sublane-aligned (multiple of 8).
    t_acc = max(8, (65536 // max(Cout, 1)) // 8 * 8)
    t_in = max(8, ((1 << 20) // max(2 * K, 1)) // 8 * 8)
    tile = min(512, t_acc, t_in, _round_up(M, 8))
    return max(tile, 8)


# ---------------------------------------------------------------------------
# Kernel 1: ReLU(x @ w + b) — one MXU dot per block, f32 accumulate + epilogue.
# ---------------------------------------------------------------------------
def _matmul_bias_relu_kernel(x_ref, w_ref, b_ref, o_ref):
    acc = jnp.dot(x_ref[...], w_ref[...], preferred_element_type=jnp.float32)
    acc = jnp.maximum(acc + b_ref[...], 0.0)
    o_ref[...] = acc.astype(o_ref.dtype)


def fused_matmul_bias_relu(x, w, b, out_dtype):
    """x: (M, K), w: (K, Cout), b: (1, Cout) f32.  Returns ReLU(x @ w + b)."""
    M, K = x.shape
    Cout = w.shape[1]
    tile = _choose_tile(M, K, Cout)
    m_pad = _round_up(M, tile)
    if m_pad != M:
        x = jnp.pad(x, ((0, m_pad - M), (0, 0)))   # zero rows -> discarded below

    out = pl.pallas_call(
        _matmul_bias_relu_kernel,
        out_shape=jax.ShapeDtypeStruct((m_pad, Cout), out_dtype),
        grid=(m_pad // tile,),
        in_specs=[
            pl.BlockSpec((tile, K), lambda i: (i, 0)),
            pl.BlockSpec((K, Cout), lambda i: (0, 0)),   # weights resident across grid
            pl.BlockSpec((1, Cout), lambda i: (0, 0)),   # bias resident
        ],
        out_specs=pl.BlockSpec((tile, Cout), lambda i: (i, 0)),
        compiler_params=pltpu.CompilerParams(
            dimension_semantics=("parallel",)),
    )(x, w, b)

    if m_pad != M:
        out = out[:M]
    return out


# ---------------------------------------------------------------------------
# Kernel 2: fused conv + bias + ReLU + 2x2 max-pool:
#     out = ReLU(max_j(x_j @ w) + b),  j over the 4 pooling-window positions.
# (ReLU is monotonic and the bias is shared, so this equals pool(ReLU(conv+b)).)
# ---------------------------------------------------------------------------
def _matmul_bias_relu_pool_kernel(x00_ref, x01_ref, x10_ref, x11_ref,
                                  w_ref, b_ref, o_ref):
    w = w_ref[...]
    acc = jnp.dot(x00_ref[...], w, preferred_element_type=jnp.float32)
    acc = jnp.maximum(acc, jnp.dot(x01_ref[...], w, preferred_element_type=jnp.float32))
    acc = jnp.maximum(acc, jnp.dot(x10_ref[...], w, preferred_element_type=jnp.float32))
    acc = jnp.maximum(acc, jnp.dot(x11_ref[...], w, preferred_element_type=jnp.float32))
    acc = jnp.maximum(acc + b_ref[...], 0.0)
    o_ref[...] = acc.astype(o_ref.dtype)


def fused_matmul_bias_relu_pool(xs, w, b, out_dtype):
    """xs: 4 arrays (M4, K) (one per 2x2 pooling position, same row order).
    Returns ReLU(max_j(xs[j] @ w) + b), shape (M4, Cout)."""
    M4, K = xs[0].shape
    Cout = w.shape[1]
    tile = _choose_tile(M4, K, Cout)
    m_pad = _round_up(M4, tile)
    if m_pad != M4:
        xs = tuple(jnp.pad(x, ((0, m_pad - M4), (0, 0))) for x in xs)

    in_block = pl.BlockSpec((tile, K), lambda i: (i, 0))
    out = pl.pallas_call(
        _matmul_bias_relu_pool_kernel,
        out_shape=jax.ShapeDtypeStruct((m_pad, Cout), out_dtype),
        grid=(m_pad // tile,),
        in_specs=[in_block, in_block, in_block, in_block,
                  pl.BlockSpec((K, Cout), lambda i: (0, 0)),   # weights resident
                  pl.BlockSpec((1, Cout), lambda i: (0, 0))],  # bias resident
        out_specs=pl.BlockSpec((tile, Cout), lambda i: (i, 0)),
        compiler_params=pltpu.CompilerParams(
            dimension_semantics=("parallel",)),
    )(*xs, w, b)

    if m_pad != M4:
        out = out[:M4]
    return out


# ---------------------------------------------------------------------------
# Conv / pool wrappers (data rearrangement is XLA glue; all MACs run in Pallas)
# ---------------------------------------------------------------------------
def _im2col(x, padding):
    """x: (B, H, W, Cin) -> patches (B, Ho, Wo, 9*Cin), tap-major / cin-minor
    (matches w.reshape(9*Cin, Cout) for w of shape (3, 3, Cin, Cout))."""
    B, H, W, Cin = x.shape
    if padding == "same":
        xp = jnp.pad(x, ((0, 0), (1, 1), (1, 1), (0, 0)))
        Ho, Wo = H, W
    elif padding == "valid":
        xp = x
        Ho, Wo = H - 2, W - 2
    else:
        raise ValueError(padding)
    cols = [xp[:, dy:dy + Ho, dx:dx + Wo, :] for dy in range(3) for dx in range(3)]
    return jnp.concatenate(cols, axis=-1), Ho, Wo


def conv3x3_relu(x, w, b, *, padding, compute_dtype=jnp.bfloat16):
    """3x3 conv + bias + ReLU as a single im2col matmul Pallas kernel."""
    B, _, _, Cin = x.shape
    Cout = w.shape[-1]
    patches, Ho, Wo = _im2col(x, padding)
    p = patches.reshape(B * Ho * Wo, 9 * Cin).astype(compute_dtype)
    out = fused_matmul_bias_relu(
        p,
        w.reshape(9 * Cin, Cout).astype(compute_dtype),
        b.reshape(1, Cout).astype(jnp.float32),
        out_dtype=compute_dtype)
    return out.reshape(B, Ho, Wo, Cout)


def conv3x3_relu_pool(x, w, b, *, padding, compute_dtype=jnp.bfloat16):
    """3x3 conv + bias + ReLU + 2x2 PointwiseMaxPool fused into one Pallas kernel."""
    B, _, _, Cin = x.shape
    Cout = w.shape[-1]
    K = 9 * Cin
    patches, Ho, Wo = _im2col(x, padding)
    Hp, Wp = Ho // 2, Wo // 2
    xs = tuple(
        patches[:, dy::2, dx::2, :][:, :Hp, :Wp, :]
        .reshape(B * Hp * Wp, K).astype(compute_dtype)
        for dy in range(2) for dx in range(2))
    out = fused_matmul_bias_relu_pool(
        xs,
        w.reshape(K, Cout).astype(compute_dtype),
        b.reshape(1, Cout).astype(jnp.float32),
        out_dtype=compute_dtype)
    return out.reshape(B, Hp, Wp, Cout)


# ---------------------------------------------------------------------------
# Parameters (deterministic synthetic init; see TODO(synk) above)
# ---------------------------------------------------------------------------
def _conv_init(key, cin, cout, N):
    kw, kb = jax.random.split(key)
    fan_in = cin * 9
    w = jax.random.normal(kw, (3, 3, cin, cout), jnp.float32) / math.sqrt(fan_in)
    # R2Conv bias lives in the invariant subspace: one scalar per output field,
    # broadcast over that field's N group channels.
    b_field = jax.random.normal(kb, (cout // N,), jnp.float32) * 0.1
    b = jnp.repeat(b_field, N)
    return w, b


def make_params(key, obs_channel=2, n_out=128, N=4):
    c1 = (n_out // 8) * N
    c2 = (n_out // 4) * N
    c3 = (n_out // 2) * N
    c4 = n_out * N
    dims = [(obs_channel, c1), (c1, c2), (c2, c3), (c3, c4), (c4, c4), (c4, c4)]
    keys = jax.random.split(key, len(dims))
    return [_conv_init(k, ci, co, N) for k, (ci, co) in zip(keys, dims)]


# ---------------------------------------------------------------------------
# Forward pass (mirrors EquivariantEncoder64_2.forward)
# ---------------------------------------------------------------------------
def encoder_forward(params, x_nchw, compute_dtype=jnp.bfloat16):
    (w1, b1), (w2, b2), (w3, b3), (w4, b4), (w5, b5), (w6, b6) = params
    x = jnp.transpose(x_nchw, (0, 2, 3, 1)).astype(jnp.float32)                      # NCHW -> NHWC
    x = conv3x3_relu_pool(x, w1, b1, padding="same", compute_dtype=compute_dtype)    # 64 -> 32
    x = conv3x3_relu_pool(x, w2, b2, padding="same", compute_dtype=compute_dtype)    # 32 -> 16
    x = conv3x3_relu_pool(x, w3, b3, padding="same", compute_dtype=compute_dtype)    # 16 -> 8
    x = conv3x3_relu(x, w4, b4, padding="same", compute_dtype=compute_dtype)         # 8
    x = conv3x3_relu_pool(x, w5, b5, padding="valid", compute_dtype=compute_dtype)   # 8 -> 6 -> 3
    x = conv3x3_relu(x, w6, b6, padding="valid", compute_dtype=compute_dtype)        # 3 -> 1
    return jnp.transpose(x, (0, 3, 1, 2)).astype(jnp.float32)                        # NHWC -> NCHW


# ---------------------------------------------------------------------------
# Pure-JAX reference (lax.conv) for a correctness check of the Pallas path
# ---------------------------------------------------------------------------
def encoder_forward_ref(params, x_nchw):
    def conv(x, w, b, pad):
        y = jax.lax.conv_general_dilated(
            x, jnp.transpose(w, (3, 2, 0, 1)),           # (Cout, Cin, kh, kw)
            window_strides=(1, 1), padding=pad,
            dimension_numbers=("NCHW", "OIHW", "NCHW"))
        return jax.nn.relu(y + b[None, :, None, None])

    def pool(x):
        return jnp.maximum(
            jnp.maximum(x[:, :, 0::2, 0::2], x[:, :, 0::2, 1::2]),
            jnp.maximum(x[:, :, 1::2, 0::2], x[:, :, 1::2, 1::2]))

    (w1, b1), (w2, b2), (w3, b3), (w4, b4), (w5, b5), (w6, b6) = params
    x = x_nchw.astype(jnp.float32)
    x = pool(conv(x, w1, b1, "SAME"))
    x = pool(conv(x, w2, b2, "SAME"))
    x = pool(conv(x, w3, b3, "SAME"))
    x = conv(x, w4, b4, "SAME")
    x = pool(conv(x, w5, b5, "VALID"))
    x = conv(x, w6, b6, "VALID")
    return x


# ---------------------------------------------------------------------------
if __name__ == "__main__":
    key = jax.random.PRNGKey(0)
    kx, kp = jax.random.split(key)

    # Small channel widths (n_out=16 instead of the default 128); spatial must be
    # 64 because the tail (valid conv -> pool -> valid conv) requires 64x64 input.
    B, obs_channel, n_out, N = 2, 2, 16, 4
    H = W = 64

    x = jax.random.normal(kx, (B, obs_channel, H, W), jnp.float32)
    params = make_params(kp, obs_channel=obs_channel, n_out=n_out, N=N)

    # Correctness: f32 Pallas path vs. pure-JAX lax.conv reference.
    fwd_f32 = jax.jit(functools.partial(encoder_forward, params,
                                        compute_dtype=jnp.float32))
    out_f32 = jax.block_until_ready(fwd_f32(x))
    ref = jax.block_until_ready(
        jax.jit(functools.partial(encoder_forward_ref, params))(x))
    assert out_f32.shape == (B, n_out * N, 1, 1), out_f32.shape
    rel_err = float(jnp.max(jnp.abs(out_f32 - ref)) / (jnp.max(jnp.abs(ref)) + 1e-6))
    assert rel_err < 5e-2, rel_err

    # Performance path: bf16 matmul operands, f32 accumulate + f32 epilogue.
    fwd = jax.jit(functools.partial(encoder_forward, params,
                                    compute_dtype=jnp.bfloat16))
    out = jax.block_until_ready(fwd(x))
    assert out.shape == (B, n_out * N, 1, 1), out.shape
    assert bool(jnp.all(jnp.isfinite(out)))
    print("KERNEL_OK")
</pallas_src>

<mosaic_0001>
module attributes {stable_mosaic.version = 11 : i64} {
  func.func @_matmul_bias_relu_pool_kernel(%arg0: i32, %arg1: memref<512x18xf32, #tpu.memory_space<vmem>>, %arg2: memref<512x18xf32, #tpu.memory_space<vmem>>, %arg3: memref<512x18xf32, #tpu.memory_space<vmem>>, %arg4: memref<512x18xf32, #tpu.memory_space<vmem>>, %arg5: memref<18x8xf32, #tpu.memory_space<vmem>>, %arg6: memref<1x8xf32, #tpu.memory_space<vmem>>, %arg7: memref<512x8xf32, #tpu.memory_space<vmem>>) attributes {dimension_semantics = [#tpu.dimension_semantics<parallel>], iteration_bounds = array<i64: 4>, scalar_prefetch = 0 : i64, scratch_operands = 0 : i64, tpu.core_type = #tpu.core_type<tc>, window_params = [{transform_indices = @transform_0, window_bounds = array<i64: 512, 18>}, {transform_indices = @transform_1, window_bounds = array<i64: 512, 18>}, {transform_indices = @transform_2, window_bounds = array<i64: 512, 18>}, {transform_indices = @transform_3, window_bounds = array<i64: 512, 18>}, {pipeline_mode = #tpu.pipeline_mode<synchronous>, transform_indices = @transform_4, window_bounds = array<i64: 18, 8>}, {pipeline_mode = #tpu.pipeline_mode<synchronous>, transform_indices = @transform_5, window_bounds = array<i64: 1, 8>}, {transform_indices = @transform_6, window_bounds = array<i64: 512, 8>}]} {
    %c0 = arith.constant 0 : index
    %c0_0 = arith.constant 0 : index
    %0 = vector.load %arg5[%c0, %c0_0] : memref<18x8xf32, #tpu.memory_space<vmem>>, vector<18x8xf32>
    %c0_1 = arith.constant 0 : index
    %c0_2 = arith.constant 0 : index
    %1 = vector.load %arg1[%c0_1, %c0_2] : memref<512x18xf32, #tpu.memory_space<vmem>>, vector<512x18xf32>
    %cst = arith.constant dense<0.000000e+00> : vector<512x8xf32>
    %2 = tpu.matmul %1, %0, %cst {dimension_numbers = #tpu.dot_dimension_numbers<[1], [0], [0], [1], [0, 0, 1, 1], [], []>} : vector<512x18xf32>, vector<18x8xf32>, vector<512x8xf32> -> vector<512x8xf32>
    %c0_3 = arith.constant 0 : index
    %c0_4 = arith.constant 0 : index
    %3 = vector.load %arg2[%c0_3, %c0_4] : memref<512x18xf32, #tpu.memory_space<vmem>>, vector<512x18xf32>
    %cst_5 = arith.constant dense<0.000000e+00> : vector<512x8xf32>
    %4 = tpu.matmul %3, %0, %cst_5 {dimension_numbers = #tpu.dot_dimension_numbers<[1], [0], [0], [1], [0, 0, 1, 1], [], []>} : vector<512x18xf32>, vector<18x8xf32>, vector<512x8xf32> -> vector<512x8xf32>
    %5 = arith.maximumf %2, %4 : vector<512x8xf32>
    %c0_6 = arith.constant 0 : index
    %c0_7 = arith.constant 0 : index
    %6 = vector.load %arg3[%c0_6, %c0_7] : memref<512x18xf32, #tpu.memory_space<vmem>>, vector<512x18xf32>
    %cst_8 = arith.constant dense<0.000000e+00> : vector<512x8xf32>
    %7 = tpu.matmul %6, %0, %cst_8 {dimension_numbers = #tpu.dot_dimension_numbers<[1], [0], [0], [1], [0, 0, 1, 1], [], []>} : vector<512x18xf32>, vector<18x8xf32>, vector<512x8xf32> -> vector<512x8xf32>
    %8 = arith.maximumf %5, %7 : vector<512x8xf32>
    %c0_9 = arith.constant 0 : index
    %c0_10 = arith.constant 0 : index
    %9 = vector.load %arg4[%c0_9, %c0_10] : memref<512x18xf32, #tpu.memory_space<vmem>>, vector<512x18xf32>
    %cst_11 = arith.constant dense<0.000000e+00> : vector<512x8xf32>
    %10 = tpu.matmul %9, %0, %cst_11 {dimension_numbers = #tpu.dot_dimension_numbers<[1], [0], [0], [1], [0, 0, 1, 1], [], []>} : vector<512x18xf32>, vector<18x8xf32>, vector<512x8xf32> -> vector<512x8xf32>
    %11 = arith.maximumf %8, %10 : vector<512x8xf32>
    %c0_12 = arith.constant 0 : index
    %c0_13 = arith.constant 0 : index
    %12 = vector.load %arg6[%c0_12, %c0_13] : memref<1x8xf32, #tpu.memory_space<vmem>>, vector<1x8xf32>
    %13 = vector.broadcast %12 : vector<1x8xf32> to vector<512x8xf32>
    %14 = arith.addf %11, %13 : vector<512x8xf32>
    %cst_14 = arith.constant 0.000000e+00 : f32
    %15 = vector.broadcast %cst_14 : f32 to vector<512x8xf32>
    %16 = arith.maximumf %14, %15 : vector<512x8xf32>
    %c0_15 = arith.constant 0 : index
    %c0_16 = arith.constant 0 : index
    %17 = vector.load %arg7[%c0_15, %c0_16] : memref<512x8xf32, #tpu.memory_space<vmem>>, vector<512x8xf32>
    tpu.vector_store %arg7[%c0_15, %c0_16], %16 {strides = array<i32>} : memref<512x8xf32, #tpu.memory_space<vmem>>, vector<512x8xf32>,
    return
  }
  func.func @transform_0(%arg0: i32) -> (i32, i32) {
    %c0_i32 = arith.constant 0 : i32
    %c0_i32_0 = arith.constant 0 : i32
    return %arg0, %c0_i32 : i32, i32
  }
  func.func @transform_1(%arg0: i32) -> (i32, i32) {
    %c0_i32 = arith.constant 0 : i32
    %c0_i32_0 = arith.constant 0 : i32
    return %arg0, %c0_i32 : i32, i32
  }
  func.func @transform_2(%arg0: i32) -> (i32, i32) {
    %c0_i32 = arith.constant 0 : i32
    %c0_i32_0 = arith.constant 0 : i32
    return %arg0, %c0_i32 : i32, i32
  }
  func.func @transform_3(%arg0: i32) -> (i32, i32) {
    %c0_i32 = arith.constant 0 : i32
    %c0_i32_0 = arith.constant 0 : i32
    return %arg0, %c0_i32 : i32, i32
  }
  func.func @transform_4(%arg0: i32) -> (i32, i32) {
    %c0_i32 = arith.constant 0 : i32
    %c0_i32_0 = arith.constant 0 : i32
    %c0_i32_1 = arith.constant 0 : i32
    return %c0_i32, %c0_i32_0 : i32, i32
  }
  func.func @transform_5(%arg0: i32) -> (i32, i32) {
    %c0_i32 = arith.constant 0 : i32
    %c0_i32_0 = arith.constant 0 : i32
    %c0_i32_1 = arith.constant 0 : i32
    return %c0_i32, %c0_i32_0 : i32, i32
  }
  func.func @transform_6(%arg0: i32) -> (i32, i32) {
    %c0_i32 = arith.constant 0 : i32
    %c0_i32_0 = arith.constant 0 : i32
    return %arg0, %c0_i32 : i32, i32
  }
}

module attributes {stable_mosaic.version = 11 : i64} {
  func.func @_matmul_bias_relu_pool_kernel(%arg0: i32, %arg1: memref<512x72xf32, #tpu.memory_space<vmem>>, %arg2: memref<512x72xf32, #tpu.memory_space<vmem>>, %arg3: memref<512x72xf32, #tpu.memory_space<vmem>>, %arg4: memref<512x72xf32, #tpu.memory_space<vmem>>, %arg5: memref<72x16xf32, #tpu.memory_space<vmem>>, %arg6: memref<1x16xf32, #tpu.memory_space<vmem>>, %arg7: memref<512x16xf32, #tpu.memory_space<vmem>>) attributes {dimension_semantics = [#tpu.dimension_semantics<parallel>], iteration_bounds = array<i64: 1>, scalar_prefetch = 0 : i64, scratch_operands = 0 : i64, tpu.core_type = #tpu.core_type<tc>, window_params = [{transform_indices = @transform_0, window_bounds = array<i64: 512, 72>}, {transform_indices = @transform_1, window_bounds = array<i64: 512, 72>}, {transform_indices = @transform_2, window_bounds = array<i64: 512, 72>}, {transform_indices = @transform_3, window_bounds = array<i64: 512, 72>}, {pipeline_mode = #tpu.pipeline_mode<synchronous>, transform_indices = @transform_4, window_bounds = array<i64: 72, 16>}, {pipeline_mode = #tpu.pipeline_mode<synchronous>, transform_indices = @transform_5, window_bounds = array<i64: 1, 16>}, {transform_indices = @transform_6, window_bounds = array<i64: 512, 16>}]} {
    %c0 = arith.constant 0 : index
    %c0_0 = arith.constant 0 : index
    %0 = vector.load %arg5[%c0, %c0_0] : memref<72x16xf32, #tpu.memory_space<vmem>>, vector<72x16xf32>
    %c0_1 = arith.constant 0 : index
    %c0_2 = arith.constant 0 : index
    %1 = vector.load %arg1[%c0_1, %c0_2] : memref<512x72xf32, #tpu.memory_space<vmem>>, vector<512x72xf32>
    %cst = arith.constant dense<0.000000e+00> : vector<512x16xf32>
    %2 = tpu.matmul %1, %0, %cst {dimension_numbers = #tpu.dot_dimension_numbers<[1], [0], [0], [1], [0, 0, 1, 1], [], []>} : vector<512x72xf32>, vector<72x16xf32>, vector<512x16xf32> -> vector<512x16xf32>
    %c0_3 = arith.constant 0 : index
    %c0_4 = arith.constant 0 : index
    %3 = vector.load %arg2[%c0_3, %c0_4] : memref<512x72xf32, #tpu.memory_space<vmem>>, vector<512x72xf32>
    %cst_5 = arith.constant dense<0.000000e+00> : vector<512x16xf32>
    %4 = tpu.matmul %3, %0, %cst_5 {dimension_numbers = #tpu.dot_dimension_numbers<[1], [0], [0], [1], [0, 0, 1, 1], [], []>} : vector<512x72xf32>, vector<72x16xf32>, vector<512x16xf32> -> vector<512x16xf32>
    %5 = arith.maximumf %2, %4 : vector<512x16xf32>
    %c0_6 = arith.constant 0 : index
    %c0_7 = arith.constant 0 : index
    %6 = vector.load %arg3[%c0_6, %c0_7] : memref<512x72xf32, #tpu.memory_space<vmem>>, vector<512x72xf32>
    %cst_8 = arith.constant dense<0.000000e+00> : vector<512x16xf32>
    %7 = tpu.matmul %6, %0, %cst_8 {dimension_numbers = #tpu.dot_dimension_numbers<[1], [0], [0], [1], [0, 0, 1, 1], [], []>} : vector<512x72xf32>, vector<72x16xf32>, vector<512x16xf32> -> vector<512x16xf32>
    %8 = arith.maximumf %5, %7 : vector<512x16xf32>
    %c0_9 = arith.constant 0 : index
    %c0_10 = arith.constant 0 : index
    %9 = vector.load %arg4[%c0_9, %c0_10] : memref<512x72xf32, #tpu.memory_space<vmem>>, vector<512x72xf32>
    %cst_11 = arith.constant dense<0.000000e+00> : vector<512x16xf32>
    %10 = tpu.matmul %9, %0, %cst_11 {dimension_numbers = #tpu.dot_dimension_numbers<[1], [0], [0], [1], [0, 0, 1, 1], [], []>} : vector<512x72xf32>, vector<72x16xf32>, vector<512x16xf32> -> vector<512x16xf32>
    %11 = arith.maximumf %8, %10 : vector<512x16xf32>
    %c0_12 = arith.constant 0 : index
    %c0_13 = arith.constant 0 : index
    %12 = vector.load %arg6[%c0_12, %c0_13] : memref<1x16xf32, #tpu.memory_space<vmem>>, vector<1x16xf32>
    %13 = vector.broadcast %12 : vector<1x16xf32> to vector<512x16xf32>
    %14 = arith.addf %11, %13 : vector<512x16xf32>
    %cst_14 = arith.constant 0.000000e+00 : f32
    %15 = vector.broadcast %cst_14 : f32 to vector<512x16xf32>
    %16 = arith.maximumf %14, %15 : vector<512x16xf32>
    %c0_15 = arith.constant 0 : index
    %c0_16 = arith.constant 0 : index
    %17 = vector.load %arg7[%c0_15, %c0_16] : memref<512x16xf32, #tpu.memory_space<vmem>>, vector<512x16xf32>
    tpu.vector_store %arg7[%c0_15, %c0_16], %16 {strides = array<i32>} : memref<512x16xf32, #tpu.memory_space<vmem>>, vector<512x16xf32>,
    return
  }
  func.func @transform_0(%arg0: i32) -> (i32, i32) {
    %c0_i32 = arith.constant 0 : i32
    %c0_i32_0 = arith.constant 0 : i32
    return %arg0, %c0_i32 : i32, i32
  }
  func.func @transform_1(%arg0: i32) -> (i32, i32) {
    %c0_i32 = arith.constant 0 : i32
    %c0_i32_0 = arith.constant 0 : i32
    return %arg0, %c0_i32 : i32, i32
  }
  func.func @transform_2(%arg0: i32) -> (i32, i32) {
    %c0_i32 = arith.constant 0 : i32
    %c0_i32_0 = arith.constant 0 : i32
    return %arg0, %c0_i32 : i32, i32
  }
  func.func @transform_3(%arg0: i32) -> (i32, i32) {
    %c0_i32 = arith.constant 0 : i32
    %c0_i32_0 = arith.constant 0 : i32
    return %arg0, %c0_i32 : i32, i32
  }
  func.func @transform_4(%arg0: i32) -> (i32, i32) {
    %c0_i32 = arith.constant 0 : i32
    %c0_i32_0 = arith.constant 0 : i32
    %c0_i32_1 = arith.constant 0 : i32
    return %c0_i32, %c0_i32_0 : i32, i32
  }
  func.func @transform_5(%arg0: i32) -> (i32, i32) {
    %c0_i32 = arith.constant 0 : i32
    %c0_i32_0 = arith.constant 0 : i32
    %c0_i32_1 = arith.constant 0 : i32
    return %c0_i32, %c0_i32_0 : i32, i32
  }
  func.func @transform_6(%arg0: i32) -> (i32, i32) {
    %c0_i32 = arith.constant 0 : i32
    %c0_i32_0 = arith.constant 0 : i32
    return %arg0, %c0_i32 : i32, i32
  }
}

module attributes {stable_mosaic.version = 11 : i64} {
  func.func @_matmul_bias_relu_pool_kernel(%arg0: i32, %arg1: memref<128x144xf32, #tpu.memory_space<vmem>>, %arg2: memref<128x144xf32, #tpu.memory_space<vmem>>, %arg3: memref<128x144xf32, #tpu.memory_space<vmem>>, %arg4: memref<128x144xf32, #tpu.memory_space<vmem>>, %arg5: memref<144x32xf32, #tpu.memory_space<vmem>>, %arg6: memref<1x32xf32, #tpu.memory_space<vmem>>, %arg7: memref<128x32xf32, #tpu.memory_space<vmem>>) attributes {dimension_semantics = [#tpu.dimension_semantics<parallel>], iteration_bounds = array<i64: 1>, scalar_prefetch = 0 : i64, scratch_operands = 0 : i64, tpu.core_type = #tpu.core_type<tc>, window_params = [{transform_indices = @transform_0, window_bounds = array<i64: 128, 144>}, {transform_indices = @transform_1, window_bounds = array<i64: 128, 144>}, {transform_indices = @transform_2, window_bounds = array<i64: 128, 144>}, {transform_indices = @transform_3, window_bounds = array<i64: 128, 144>}, {pipeline_mode = #tpu.pipeline_mode<synchronous>, transform_indices = @transform_4, window_bounds = array<i64: 144, 32>}, {pipeline_mode = #tpu.pipeline_mode<synchronous>, transform_indices = @transform_5, window_bounds = array<i64: 1, 32>}, {transform_indices = @transform_6, window_bounds = array<i64: 128, 32>}]} {
    %c0 = arith.constant 0 : index
    %c0_0 = arith.constant 0 : index
    %0 = vector.load %arg5[%c0, %c0_0] : memref<144x32xf32, #tpu.memory_space<vmem>>, vector<144x32xf32>
    %c0_1 = arith.constant 0 : index
    %c0_2 = arith.constant 0 : index
    %1 = vector.load %arg1[%c0_1, %c0_2] : memref<128x144xf32, #tpu.memory_space<vmem>>, vector<128x144xf32>
    %cst = arith.constant dense<0.000000e+00> : vector<128x32xf32>
    %2 = tpu.matmul %1, %0, %cst {dimension_numbers = #tpu.dot_dimension_numbers<[1], [0], [0], [1], [0, 0, 1, 1], [], []>} : vector<128x144xf32>, vector<144x32xf32>, vector<128x32xf32> -> vector<128x32xf32>
    %c0_3 = arith.constant 0 : index
    %c0_4 = arith.constant 0 : index
    %3 = vector.load %arg2[%c0_3, %c0_4] : memref<128x144xf32, #tpu.memory_space<vmem>>, vector<128x144xf32>
    %cst_5 = arith.constant dense<0.000000e+00> : vector<128x32xf32>
    %4 = tpu.matmul %3, %0, %cst_5 {dimension_numbers = #tpu.dot_dimension_numbers<[1], [0], [0], [1], [0, 0, 1, 1], [], []>} : vector<128x144xf32>, vector<144x32xf32>, vector<128x32xf32> -> vector<128x32xf32>
    %5 = arith.maximumf %2, %4 : vector<128x32xf32>
    %c0_6 = arith.constant 0 : index
    %c0_7 = arith.constant 0 : index
    %6 = vector.load %arg3[%c0_6, %c0_7] : memref<128x144xf32, #tpu.memory_space<vmem>>, vector<128x144xf32>
    %cst_8 = arith.constant dense<0.000000e+00> : vector<128x32xf32>
    %7 = tpu.matmul %6, %0, %cst_8 {dimension_numbers = #tpu.dot_dimension_numbers<[1], [0], [0], [1], [0, 0, 1, 1], [], []>} : vector<128x144xf32>, vector<144x32xf32>, vector<128x32xf32> -> vector<128x32xf32>
    %8 = arith.maximumf %5, %7 : vector<128x32xf32>
    %c0_9 = arith.constant 0 : index
    %c0_10 = arith.constant 0 : index
    %9 = vector.load %arg4[%c0_9, %c0_10] : memref<128x144xf32, #tpu.memory_space<vmem>>, vector<128x144xf32>
    %cst_11 = arith.constant dense<0.000000e+00> : vector<128x32xf32>
    %10 = tpu.matmul %9, %0, %cst_11 {dimension_numbers = #tpu.dot_dimension_numbers<[1], [0], [0], [1], [0, 0, 1, 1], [], []>} : vector<128x144xf32>, vector<144x32xf32>, vector<128x32xf32> -> vector<128x32xf32>
    %11 = arith.maximumf %8, %10 : vector<128x32xf32>
    %c0_12 = arith.constant 0 : index
    %c0_13 = arith.constant 0 : index
    %12 = vector.load %arg6[%c0_12, %c0_13] : memref<1x32xf32, #tpu.memory_space<vmem>>, vector<1x32xf32>
    %13 = vector.broadcast %12 : vector<1x32xf32> to vector<128x32xf32>
    %14 = arith.addf %11, %13 : vector<128x32xf32>
    %cst_14 = arith.constant 0.000000e+00 : f32
    %15 = vector.broadcast %cst_14 : f32 to vector<128x32xf32>
    %16 = arith.maximumf %14, %15 : vector<128x32xf32>
    %c0_15 = arith.constant 0 : index
    %c0_16 = arith.constant 0 : index
    %17 = vector.load %arg7[%c0_15, %c0_16] : memref<128x32xf32, #tpu.memory_space<vmem>>, vector<128x32xf32>
    tpu.vector_store %arg7[%c0_15, %c0_16], %16 {strides = array<i32>} : memref<128x32xf32, #tpu.memory_space<vmem>>, vector<128x32xf32>,
    return
  }
  func.func @transform_0(%arg0: i32) -> (i32, i32) {
    %c0_i32 = arith.constant 0 : i32
    %c0_i32_0 = arith.constant 0 : i32
    return %arg0, %c0_i32 : i32, i32
  }
  func.func @transform_1(%arg0: i32) -> (i32, i32) {
    %c0_i32 = arith.constant 0 : i32
    %c0_i32_0 = arith.constant 0 : i32
    return %arg0, %c0_i32 : i32, i32
  }
  func.func @transform_2(%arg0: i32) -> (i32, i32) {
    %c0_i32 = arith.constant 0 : i32
    %c0_i32_0 = arith.constant 0 : i32
    return %arg0, %c0_i32 : i32, i32
  }
  func.func @transform_3(%arg0: i32) -> (i32, i32) {
    %c0_i32 = arith.constant 0 : i32
    %c0_i32_0 = arith.constant 0 : i32
    return %arg0, %c0_i32 : i32, i32
  }
  func.func @transform_4(%arg0: i32) -> (i32, i32) {
    %c0_i32 = arith.constant 0 : i32
    %c0_i32_0 = arith.constant 0 : i32
    %c0_i32_1 = arith.constant 0 : i32
    return %c0_i32, %c0_i32_0 : i32, i32
  }
  func.func @transform_5(%arg0: i32) -> (i32, i32) {
    %c0_i32 = arith.constant 0 : i32
    %c0_i32_0 = arith.constant 0 : i32
    %c0_i32_1 = arith.constant 0 : i32
    return %c0_i32, %c0_i32_0 : i32, i32
  }
  func.func @transform_6(%arg0: i32) -> (i32, i32) {
    %c0_i32 = arith.constant 0 : i32
    %c0_i32_0 = arith.constant 0 : i32
    return %arg0, %c0_i32 : i32, i32
  }
}

module attributes {stable_mosaic.version = 11 : i64} {
  func.func @_matmul_bias_relu_kernel(%arg0: i32, %arg1: memref<128x288xf32, #tpu.memory_space<vmem>>, %arg2: memref<288x64xf32, #tpu.memory_space<vmem>>, %arg3: memref<1x64xf32, #tpu.memory_space<vmem>>, %arg4: memref<128x64xf32, #tpu.memory_space<vmem>>) attributes {dimension_semantics = [#tpu.dimension_semantics<parallel>], iteration_bounds = array<i64: 1>, scalar_prefetch = 0 : i64, scratch_operands = 0 : i64, tpu.core_type = #tpu.core_type<tc>, window_params = [{transform_indices = @transform_0, window_bounds = array<i64: 128, 288>}, {pipeline_mode = #tpu.pipeline_mode<synchronous>, transform_indices = @transform_1, window_bounds = array<i64: 288, 64>}, {pipeline_mode = #tpu.pipeline_mode<synchronous>, transform_indices = @transform_2, window_bounds = array<i64: 1, 64>}, {transform_indices = @transform_3, window_bounds = array<i64: 128, 64>}]} {
    %c0 = arith.constant 0 : index
    %c0_0 = arith.constant 0 : index
    %0 = vector.load %arg1[%c0, %c0_0] : memref<128x288xf32, #tpu.memory_space<vmem>>, vector<128x288xf32>
    %c0_1 = arith.constant 0 : index
    %c0_2 = arith.constant 0 : index
    %1 = vector.load %arg2[%c0_1, %c0_2] : memref<288x64xf32, #tpu.memory_space<vmem>>, vector<288x64xf32>
    %cst = arith.constant dense<0.000000e+00> : vector<128x64xf32>
    %2 = tpu.matmul %0, %1, %cst {dimension_numbers = #tpu.dot_dimension_numbers<[1], [0], [0], [1], [0, 0, 1, 1], [], []>} : vector<128x288xf32>, vector<288x64xf32>, vector<128x64xf32> -> vector<128x64xf32>
    %c0_3 = arith.constant 0 : index
    %c0_4 = arith.constant 0 : index
    %3 = vector.load %arg3[%c0_3, %c0_4] : memref<1x64xf32, #tpu.memory_space<vmem>>, vector<1x64xf32>
    %4 = vector.broadcast %3 : vector<1x64xf32> to vector<128x64xf32>
    %5 = arith.addf %2, %4 : vector<128x64xf32>
    %cst_5 = arith.constant 0.000000e+00 : f32
    %6 = vector.broadcast %cst_5 : f32 to vector<128x64xf32>
    %7 = arith.maximumf %5, %6 : vector<128x64xf32>
    %c0_6 = arith.constant 0 : index
    %c0_7 = arith.constant 0 : index
    %8 = vector.load %arg4[%c0_6, %c0_7] : memref<128x64xf32, #tpu.memory_space<vmem>>, vector<128x64xf32>
    tpu.vector_store %arg4[%c0_6, %c0_7], %7 {strides = array<i32>} : memref<128x64xf32, #tpu.memory_space<vmem>>, vector<128x64xf32>,
    return
  }
  func.func @transform_0(%arg0: i32) -> (i32, i32) {
    %c0_i32 = arith.constant 0 : i32
    %c0_i32_0 = arith.constant 0 : i32
    return %arg0, %c0_i32 : i32, i32
  }
  func.func @transform_1(%arg0: i32) -> (i32, i32) {
    %c0_i32 = arith.constant 0 : i32
    %c0_i32_0 = arith.constant 0 : i32
    %c0_i32_1 = arith.constant 0 : i32
    return %c0_i32, %c0_i32_0 : i32, i32
  }
  func.func @transform_2(%arg0: i32) -> (i32, i32) {
    %c0_i32 = arith.constant 0 : i32
    %c0_i32_0 = arith.constant 0 : i32
    %c0_i32_1 = arith.constant 0 : i32
    return %c0_i32, %c0_i32_0 : i32, i32
  }
  func.func @transform_3(%arg0: i32) -> (i32, i32) {
    %c0_i32 = arith.constant 0 : i32
    %c0_i32_0 = arith.constant 0 : i32
    return %arg0, %c0_i32 : i32, i32
  }
}

module attributes {stable_mosaic.version = 11 : i64} {
  func.func @_matmul_bias_relu_kernel(%arg0: i32, %arg1: memref<8x576xf32, #tpu.memory_space<vmem>>, %arg2: memref<576x64xf32, #tpu.memory_space<vmem>>, %arg3: memref<1x64xf32, #tpu.memory_space<vmem>>, %arg4: memref<8x64xf32, #tpu.memory_space<vmem>>) attributes {dimension_semantics = [#tpu.dimension_semantics<parallel>], iteration_bounds = array<i64: 1>, scalar_prefetch = 0 : i64, scratch_operands = 0 : i64, tpu.core_type = #tpu.core_type<tc>, window_params = [{transform_indices = @transform_0, window_bounds = array<i64: 8, 576>}, {pipeline_mode = #tpu.pipeline_mode<synchronous>, transform_indices = @transform_1, window_bounds = array<i64: 576, 64>}, {pipeline_mode = #tpu.pipeline_mode<synchronous>, transform_indices = @transform_2, window_bounds = array<i64: 1, 64>}, {transform_indices = @transform_3, window_bounds = array<i64: 8, 64>}]} {
    %c0 = arith.constant 0 : index
    %c0_0 = arith.constant 0 : index
    %0 = vector.load %arg1[%c0, %c0_0] : memref<8x576xf32, #tpu.memory_space<vmem>>, vector<8x576xf32>
    %c0_1 = arith.constant 0 : index
    %c0_2 = arith.constant 0 : index
    %1 = vector.load %arg2[%c0_1, %c0_2] : memref<576x64xf32, #tpu.memory_space<vmem>>, vector<576x64xf32>
    %cst = arith.constant dense<0.000000e+00> : vector<8x64xf32>
    %2 = tpu.matmul %0, %1, %cst {dimension_numbers = #tpu.dot_dimension_numbers<[1], [0], [0], [1], [0, 0, 1, 1], [], []>} : vector<8x576xf32>, vector<576x64xf32>, vector<8x64xf32> -> vector<8x64xf32>
    %c0_3 = arith.constant 0 : index
    %c0_4 = arith.constant 0 : index
    %3 = vector.load %arg3[%c0_3, %c0_4] : memref<1x64xf32, #tpu.memory_space<vmem>>, vector<1x64xf32>
    %4 = vector.broadcast %3 : vector<1x64xf32> to vector<8x64xf32>
    %5 = arith.addf %2, %4 : vector<8x64xf32>
    %cst_5 = arith.constant 0.000000e+00 : f32
    %6 = vector.broadcast %cst_5 : f32 to vector<8x64xf32>
    %7 = arith.maximumf %5, %6 : vector<8x64xf32>
    %c0_6 = arith.constant 0 : index
    %c0_7 = arith.constant 0 : index
    %8 = vector.load %arg4[%c0_6, %c0_7] : memref<8x64xf32, #tpu.memory_space<vmem>>, vector<8x64xf32>
    tpu.vector_store %arg4[%c0_6, %c0_7], %7 {strides = array<i32>} : memref<8x64xf32, #tpu.memory_space<vmem>>, vector<8x64xf32>,
    return
  }
  func.func @transform_0(%arg0: i32) -> (i32, i32) {
    %c0_i32 = arith.constant 0 : i32
    %c0_i32_0 = arith.constant 0 : i32
    return %arg0, %c0_i32 : i32, i32
  }
  func.func @transform_1(%arg0: i32) -> (i32, i32) {
    %c0_i32 = arith.constant 0 : i32
    %c0_i32_0 = arith.constant 0 : i32
    %c0_i32_1 = arith.constant 0 : i32
    return %c0_i32, %c0_i32_0 : i32, i32
  }
  func.func @transform_2(%arg0: i32) -> (i32, i32) {
    %c0_i32 = arith.constant 0 : i32
    %c0_i32_0 = arith.constant 0 : i32
    %c0_i32_1 = arith.constant 0 : i32
    return %c0_i32, %c0_i32_0 : i32, i32
  }
  func.func @transform_3(%arg0: i32) -> (i32, i32) {
    %c0_i32 = arith.constant 0 : i32
    %c0_i32_0 = arith.constant 0 : i32
    return %arg0, %c0_i32 : i32, i32
  }
}

module attributes {stable_mosaic.version = 11 : i64} {
  func.func @_matmul_bias_relu_pool_kernel(%arg0: i32, %arg1: memref<24x576xf32, #tpu.memory_space<vmem>>, %arg2: memref<24x576xf32, #tpu.memory_space<vmem>>, %arg3: memref<24x576xf32, #tpu.memory_space<vmem>>, %arg4: memref<24x576xf32, #tpu.memory_space<vmem>>, %arg5: memref<576x64xf32, #tpu.memory_space<vmem>>, %arg6: memref<1x64xf32, #tpu.memory_space<vmem>>, %arg7: memref<24x64xf32, #tpu.memory_space<vmem>>) attributes {dimension_semantics = [#tpu.dimension_semantics<parallel>], iteration_bounds = array<i64: 1>, scalar_prefetch = 0 : i64, scratch_operands = 0 : i64, tpu.core_type = #tpu.core_type<tc>, window_params = [{transform_indices = @transform_0, window_bounds = array<i64: 24, 576>}, {transform_indices = @transform_1, window_bounds = array<i64: 24, 576>}, {transform_indices = @transform_2, window_bounds = array<i64: 24, 576>}, {transform_indices = @transform_3, window_bounds = array<i64: 24, 576>}, {pipeline_mode = #tpu.pipeline_mode<synchronous>, transform_indices = @transform_4, window_bounds = array<i64: 576, 64>}, {pipeline_mode = #tpu.pipeline_mode<synchronous>, transform_indices = @transform_5, window_bounds = array<i64: 1, 64>}, {transform_indices = @transform_6, window_bounds = array<i64: 24, 64>}]} {
    %c0 = arith.constant 0 : index
    %c0_0 = arith.constant 0 : index
    %0 = vector.load %arg5[%c0, %c0_0] : memref<576x64xf32, #tpu.memory_space<vmem>>, vector<576x64xf32>
    %c0_1 = arith.constant 0 : index
    %c0_2 = arith.constant 0 : index
    %1 = vector.load %arg1[%c0_1, %c0_2] : memref<24x576xf32, #tpu.memory_space<vmem>>, vector<24x576xf32>
    %cst = arith.constant dense<0.000000e+00> : vector<24x64xf32>
    %2 = tpu.matmul %1, %0, %cst {dimension_numbers = #tpu.dot_dimension_numbers<[1], [0], [0], [1], [0, 0, 1, 1], [], []>} : vector<24x576xf32>, vector<576x64xf32>, vector<24x64xf32> -> vector<24x64xf32>
    %c0_3 = arith.constant 0 : index
    %c0_4 = arith.constant 0 : index
    %3 = vector.load %arg2[%c0_3, %c0_4] : memref<24x576xf32, #tpu.memory_space<vmem>>, vector<24x576xf32>
    %cst_5 = arith.constant dense<0.000000e+00> : vector<24x64xf32>
    %4 = tpu.matmul %3, %0, %cst_5 {dimension_numbers = #tpu.dot_dimension_numbers<[1], [0], [0], [1], [0, 0, 1, 1], [], []>} : vector<24x576xf32>, vector<576x64xf32>, vector<24x64xf32> -> vector<24x64xf32>
    %5 = arith.maximumf %2, %4 : vector<24x64xf32>
    %c0_6 = arith.constant 0 : index
    %c0_7 = arith.constant 0 : index
    %6 = vector.load %arg3[%c0_6, %c0_7] : memref<24x576xf32, #tpu.memory_space<vmem>>, vector<24x576xf32>
    %cst_8 = arith.constant dense<0.000000e+00> : vector<24x64xf32>
    %7 = tpu.matmul %6, %0, %cst_8 {dimension_numbers = #tpu.dot_dimension_numbers<[1], [0], [0], [1], [0, 0, 1, 1], [], []>} : vector<24x576xf32>, vector<576x64xf32>, vector<24x64xf32> -> vector<24x64xf32>
    %8 = arith.maximumf %5, %7 : vector<24x64xf32>
    %c0_9 = arith.constant 0 : index
    %c0_10 = arith.constant 0 : index
    %9 = vector.load %arg4[%c0_9, %c0_10] : memref<24x576xf32, #tpu.memory_space<vmem>>, vector<24x576xf32>
    %cst_11 = arith.constant dense<0.000000e+00> : vector<24x64xf32>
    %10 = tpu.matmul %9, %0, %cst_11 {dimension_numbers = #tpu.dot_dimension_numbers<[1], [0], [0], [1], [0, 0, 1, 1], [], []>} : vector<24x576xf32>, vector<576x64xf32>, vector<24x64xf32> -> vector<24x64xf32>
    %11 = arith.maximumf %8, %10 : vector<24x64xf32>
    %c0_12 = arith.constant 0 : index
    %c0_13 = arith.constant 0 : index
    %12 = vector.load %arg6[%c0_12, %c0_13] : memref<1x64xf32, #tpu.memory_space<vmem>>, vector<1x64xf32>
    %13 = vector.broadcast %12 : vector<1x64xf32> to vector<24x64xf32>
    %14 = arith.addf %11, %13 : vector<24x64xf32>
    %cst_14 = arith.constant 0.000000e+00 : f32
    %15 = vector.broadcast %cst_14 : f32 to vector<24x64xf32>
    %16 = arith.maximumf %14, %15 : vector<24x64xf32>
    %c0_15 = arith.constant 0 : index
    %c0_16 = arith.constant 0 : index
    %17 = vector.load %arg7[%c0_15, %c0_16] : memref<24x64xf32, #tpu.memory_space<vmem>>, vector<24x64xf32>
    tpu.vector_store %arg7[%c0_15, %c0_16], %16 {strides = array<i32>} : memref<24x64xf32, #tpu.memory_space<vmem>>, vector<24x64xf32>,
    return
  }
  func.func @transform_0(%arg0: i32) -> (i32, i32) {
    %c0_i32 = arith.constant 0 : i32
    %c0_i32_0 = arith.constant 0 : i32
    return %arg0, %c0_i32 : i32, i32
  }
  func.func @transform_1(%arg0: i32) -> (i32, i32) {
    %c0_i32 = arith.constant 0 : i32
    %c0_i32_0 = arith.constant 0 : i32
    return %arg0, %c0_i32 : i32, i32
  }
  func.func @transform_2(%arg0: i32) -> (i32, i32) {
    %c0_i32 = arith.constant 0 : i32
    %c0_i32_0 = arith.constant 0 : i32
    return %arg0, %c0_i32 : i32, i32
  }
  func.func @transform_3(%arg0: i32) -> (i32, i32) {
    %c0_i32 = arith.constant 0 : i32
    %c0_i32_0 = arith.constant 0 : i32
    return %arg0, %c0_i32 : i32, i32
  }
  func.func @transform_4(%arg0: i32) -> (i32, i32) {
    %c0_i32 = arith.constant 0 : i32
    %c0_i32_0 = arith.constant 0 : i32
    %c0_i32_1 = arith.constant 0 : i32
    return %c0_i32, %c0_i32_0 : i32, i32
  }
  func.func @transform_5(%arg0: i32) -> (i32, i32) {
    %c0_i32 = arith.constant 0 : i32
    %c0_i32_0 = arith.constant 0 : i32
    %c0_i32_1 = arith.constant 0 : i32
    return %c0_i32, %c0_i32_0 : i32, i32
  }
  func.func @transform_6(%arg0: i32) -> (i32, i32) {
    %c0_i32 = arith.constant 0 : i32
    %c0_i32_0 = arith.constant 0 : i32
    return %arg0, %c0_i32 : i32, i32
  }
}

</mosaic_0001>

<bundles_post_ra>
// kernel: encoder_forward.6
= control target key start
LH: loop header
LB: loop body
LE: loop exit
PB: predicated region body
PF: predicated region fallthrough
CT: control target
= control target key end

     0   :  { %s4398_s21 = smov 0   ;;  %s5743_s0 = inlined_call_operand.vmem [shape: f32[2048,18], index: 0, kind: input, shape index: {}]   ;;  %s5744_s1 = inlined_call_operand.vmem [shape: f32[2048,18], index: 1, kind: input, shape index: {}]   ;;  %s5745_s2 = inlined_call_operand.vmem [shape: f32[2048,18], index: 2, kind: input, shape index: {}]   ;;  %s5746_s3 = inlined_call_operand.vmem [shape: f32[2048,18], index: 3, kind: input, shape index: {}]   ;;  %s5747_s4 = inlined_call_operand.vmem [shape: f32[18,8], index: 4, kind: input, shape index: {}]   ;;  %s5748_s5 = inlined_call_operand.vmem [shape: f32[1,8], index: 5, kind: input, shape index: {}]   ;;  %s5749_s6 = inlined_call_operand.vmem [shape: f32[2048,8], index: 6, kind: output, shape index: {}]  }
   0x1 LB: > { %s3377_s22 = sadd.s32 4294967295, %s4361_s21   ;;  %p3381_p0 = scmp.ge.s32.totalorder %s4361_s21, 1  ;;  %s4361_s21 = sphi %s4398_s21, %s16_s21  }
   0x2   : > { %p246_p1 = scmp.lt.s32.totalorder %s4361_s21, 5 }
   0x4   : > { %p247_p2 = pnand %p3381_p0, %p246_p1 }
   0x6   : > { %250 = sbr.rel (%p247_p2) target bundleno = 496 (0x1f0), region = 44 }
   0xd   : > { %v321_v0 = vld [vmem:[%s5747_s4] sm:$0xff]  ;;  %v322_v1 = vld [vmem:[%s5747_s4 + $0x8] sm:$0xff]  ;;  %s3382_s27 = sshll.u32 %s3377_s22, 6  ;;  %v323_v3 = vld [vmem:[%s5747_s4 + $0x10] sm:$0x3]  ;;  %vm581_vm0 = vcmask 1041408  }
   0xe   : > { %v4331_v2 = vpack.c.bf16 %v322_v1, %v321_v0  ;;  %p292_p3 = scmp.lt.s32.totalorder %s3382_s27, 255  ;;  %vm388_vm1 = vcmask 146432   ;;  %vm3220_vm2 = vcmask 64512  }
  0x10   : > { %4332 = vmatprep.subr.bf16.mxu0 %v4331_v2  ;;  %4336 = vmatprep.subr.bf16.mxu1 %v4331_v2  ;;  %s6049_s27 = smov (!%p292_p3, %s3382_s27), 255 }
  0x11   : > { %4334 = vmatpush3.bf16.msra.mxu0 %v4331_v2  ;;  %4338 = vmatpush3.bf16.msra.mxu1 %v4331_v2  ;;  %s4417_s30 = sshll.u32 %s6049_s27, 3 }
  0x12   : > { %3927 = vmatprep.subr.msk.mxu0 %vm581_vm0, %v323_v3  ;;  %4029 = vmatprep.subr.msk.mxu1 %vm581_vm0, %v323_v3  ;;  %s4423_s9 = scalar_lea.vmem %s5743_s0, %s4417_s30  ;;  %s4429_s12 = scalar_lea.vmem %s5744_s1, %s4417_s30 }
  0x13   : > { %v324_v4 = vld [vmem:[%s4423_s9] sm:$0xff]  ;;  %v325_v6 = vld [vmem:[%s4423_s9 + $0x8] sm:$0xff]  ;;  %v326_v8 = vld [vmem:[%s4423_s9 + $0x10] sm:$0xff]  ;;  %s4689_s15 = scalar_lea.vmem %s5745_s2, %s4417_s30  ;;  %s4695_s18 = scalar_lea.vmem %s5746_s3, %s4417_s30 }
  0x14   : > { %v970_v5 = vld [vmem:[%s4429_s12] sm:$0xff]  ;;  %3929 = vmatprep.mubr.msk.f32.mxu0 %vm388_vm1, %v324_v4  ;;  %v971_v7 = vld [vmem:[%s4429_s12 + $0x8] sm:$0xff]  ;;  %v972_v9 = vld [vmem:[%s4429_s12 + $0x10] sm:$0xff]  ;;  %s5364_s24 = scalar_lea.vmem %s5749_s6, %s4417_s30 }
  0x15   : > { %3928 = vmatpush3.msk.msra.mxu0 %vm581_vm0, %v323_v3  ;;  %4030 = vmatpush3.msk.msra.mxu1 %vm581_vm0, %v323_v3  ;;  %v327_v10 = vld [vmem:[%s4423_s9 + $0x18] sm:$0xff]  ;;  %v328_v12 = vld [vmem:[%s4423_s9 + $0x20] sm:$0xff]  ;;  %v329_v14 = vld [vmem:[%s4423_s9 + $0x28] sm:$0xff] }
  0x16   : > { %4031 = vmatprep.mubr.msk.f32.mxu1 %vm388_vm1, %v970_v5  ;;  %3930 = vmatmul.mubr.msk.f32.vlgmr.msra.gmra.mrb[0].mxu0 %vm388_vm1, %v325_v6  ;;  %v973_v11 = vld [vmem:[%s4429_s12 + $0x18] sm:$0xff]  ;;  %v974_v13 = vld [vmem:[%s4429_s12 + $0x20] sm:$0xff]  ;;  %v975_v15 = vld [vmem:[%s4429_s12 + $0x28] sm:$0xff] }
  0x17   : > { %4032 = vmatmul.mubr.msk.f32.vlgmr.msra.gmra.mrb[0].mxu1 %vm388_vm1, %v971_v7  ;;  %4340 = vmatprep.subr.bf16.mxu0 %v4331_v2  ;;  %v330_v16 = vld [vmem:[%s4423_s9 + $0x30] sm:$0xff]  ;;  %v331_v18 = vld [vmem:[%s4423_s9 + $0x38] sm:$0xff]  ;;  %v332_v20 = vld [vmem:[%s4423_s9 + $0x40] sm:$0xff] }
  0x18   : > { %4344 = vmatprep.subr.bf16.mxu1 %v4331_v2  ;;  %4342 = vmatpush3.bf16.msra.mxu0 %v4331_v2  ;;  %v976_v17 = vld [vmem:[%s4429_s12 + $0x30] sm:$0xff]  ;;  %v977_v19 = vld [vmem:[%s4429_s12 + $0x38] sm:$0xff]  ;;  %v978_v21 = vld [vmem:[%s4429_s12 + $0x40] sm:$0xff] }
  0x19   : > { %3932 = vmatprep.mubr.msk.f32.mxu0 %vm388_vm1, %v326_v8  ;;  %4034 = vmatprep.mubr.msk.f32.mxu1 %vm388_vm1, %v972_v9  ;;  %v333_v22 = vld [vmem:[%s4423_s9 + $0x48] sm:$0xff]  ;;  %v334_v24 = vld [vmem:[%s4423_s9 + $0x50] sm:$0xff]  ;;  %v335_v26 = vld [vmem:[%s4423_s9 + $0x58] sm:$0xff] }
  0x1a   : > { %4346 = vmatpush3.bf16.msra.mxu1 %v4331_v2  ;;  %3933 = vmatmul.mubr.msk.f32.gmra.mrb[2].mxu0 %vm388_vm1, %v327_v10  ;;  %v979_v23 = vld [vmem:[%s4429_s12 + $0x48] sm:$0xff]  ;;  %v980_v25 = vld [vmem:[%s4429_s12 + $0x50] sm:$0xff]  ;;  %v981_v27 = vld [vmem:[%s4429_s12 + $0x58] sm:$0xff] }
  0x1b   : > { %4035 = vmatmul.mubr.msk.f32.gmra.mrb[2].mxu1 %vm388_vm1, %v973_v11  ;;  %3935 = vmatprep.mubr.msk.f32.mxu0 %vm388_vm1, %v328_v12  ;;  %v336_v28 = vld [vmem:[%s4423_s9 + $0x60] sm:$0xff]  ;;  %v337_v30 = vld [vmem:[%s4423_s9 + $0x68] sm:$0xff]  ;;  %v338_v32 = vld [vmem:[%s4423_s9 + $0x70] sm:$0xff] }
  0x1c   : > { %4037 = vmatprep.mubr.msk.f32.mxu1 %vm388_vm1, %v974_v13  ;;  %4131 = vmatprep.subr.msk.mxu0 %vm581_vm0, %v323_v3  ;;  %v982_v29 = vld [vmem:[%s4429_s12 + $0x60] sm:$0xff]  ;;  %v983_v31 = vld [vmem:[%s4429_s12 + $0x68] sm:$0xff]  ;;  %v984_v33 = vld [vmem:[%s4429_s12 + $0x70] sm:$0xff] }
  0x1d   : > { %4233 = vmatprep.subr.msk.mxu1 %vm581_vm0, %v323_v3  ;;  %4132 = vmatpush3.msk.msra.mxu0 %vm581_vm0, %v323_v3  ;;  %v339_v34 = vld [vmem:[%s4423_s9 + $0x78] sm:$0xff]  ;;  %v340_v36 = vld [vmem:[%s4423_s9 + $0x80] sm:$0xff]  ;;  %v341_v38 = vld [vmem:[%s4423_s9 + $0x88] sm:$0xff] }
  0x1e   : > { %4234 = vmatpush3.msk.msra.mxu1 %vm581_vm0, %v323_v3  ;;  %3936 = vmatmul.mubr.msk.f32.gmra.mrb[4].mxu0 %vm388_vm1, %v329_v14  ;;  %v985_v35 = vld [vmem:[%s4429_s12 + $0x78] sm:$0xff]  ;;  %v986_v37 = vld [vmem:[%s4429_s12 + $0x80] sm:$0xff]  ;;  %v987_v39 = vld [vmem:[%s4429_s12 + $0x88] sm:$0xff] }
  0x1f   : > { %4038 = vmatmul.mubr.msk.f32.gmra.mrb[4].mxu1 %vm388_vm1, %v975_v15  ;;  %3938 = vmatprep.mubr.msk.f32.mxu0 %vm388_vm1, %v330_v16  ;;  %v342_v40 = vld [vmem:[%s4423_s9 + $0x90] sm:$0xff]  ;;  %v343_v42 = vld [vmem:[%s4423_s9 + $0x98] sm:$0xff]  ;;  %v344_v44 = vld [vmem:[%s4423_s9 + $0xa0] sm:$0xff] }
  0x20   : > { %4040 = vmatprep.mubr.msk.f32.mxu1 %vm388_vm1, %v976_v17  ;;  %v988_v41 = vld [vmem:[%s4429_s12 + $0x90] sm:$0xff]  ;;  %v989_v43 = vld [vmem:[%s4429_s12 + $0x98] sm:$0xff]  ;;  %v990_v45 = vld [vmem:[%s4429_s12 + $0xa0] sm:$0xff] }
  0x21   : > { %v345_v46 = vld [vmem:[%s4423_s9 + $0xa8] sm:$0xff]  ;;  %v346_v48 = vld [vmem:[%s4423_s9 + $0xb0] sm:$0xff]  ;;  %v347_v50 = vld [vmem:[%s4423_s9 + $0xb8] sm:$0xff] }
  0x22   : > { %3939 = vmatmul.mubr.msk.f32.gmra.mrb[6].mxu0 %vm388_vm1, %v331_v18  ;;  %v991_v47 = vld [vmem:[%s4429_s12 + $0xa8] sm:$0xff]  ;;  %v992_v49 = vld [vmem:[%s4429_s12 + $0xb0] sm:$0xff]  ;;  %v993_v51 = vld [vmem:[%s4429_s12 + $0xb8] sm:$0xff] }
  0x23   : > { %4041 = vmatmul.mubr.msk.f32.gmra.mrb[6].mxu1 %vm388_vm1, %v977_v19  ;;  %3941 = vmatprep.mubr.msk.f32.mxu0 %vm388_vm1, %v332_v20  ;;  %v348_v52 = vld [vmem:[%s4423_s9 + $0xc0] sm:$0xff]  ;;  %v349_v54 = vld [vmem:[%s4423_s9 + $0xc8] sm:$0xff]  ;;  %v350_v56 = vld [vmem:[%s4423_s9 + $0xd0] sm:$0xff] }
  0x24   : > { %4043 = vmatprep.mubr.msk.f32.mxu1 %vm388_vm1, %v978_v21  ;;  %v994_v53 = vld [vmem:[%s4429_s12 + $0xc0] sm:$0xff]  ;;  %v995_v55 = vld [vmem:[%s4429_s12 + $0xc8] sm:$0xff]  ;;  %v996_v57 = vld [vmem:[%s4429_s12 + $0xd0] sm:$0xff] }
  0x25   : > { %v351_v58 = vld [vmem:[%s4423_s9 + $0xd8] sm:$0xff]  ;;  %v352_v60 = vld [vmem:[%s4423_s9 + $0xe0] sm:$0xff]  ;;  %v353_v62 = vld [vmem:[%s4423_s9 + $0xe8] sm:$0xff] }
  0x26   : > { %3942 = vmatmul.mubr.msk.f32.gmra.mrb[8].mxu0 %vm388_vm1, %v333_v22  ;;  %v997_v59 = vld [vmem:[%s4429_s12 + $0xd8] sm:$0xff]  ;;  %v998_v61 = vld [vmem:[%s4429_s12 + $0xe0] sm:$0xff]  ;;  %v999_v63 = vld [vmem:[%s4429_s12 + $0xe8] sm:$0xff] }
  0x27   : > { %4044 = vmatmul.mubr.msk.f32.gmra.mrb[8].mxu1 %vm388_vm1, %v979_v23  ;;  %3944 = vmatprep.mubr.msk.f32.mxu0 %vm388_vm1, %v334_v24  ;;  %v354_v0 = vld [vmem:[%s4423_s9 + $0xf0] sm:$0xff]  ;;  %v355_v2 = vld [vmem:[%s4423_s9 + $0xf8] sm:$0xff]  ;;  %v356_v4 = vld [vmem:[%s4423_s9 + $0x100] sm:$0xff] }
  0x28   : > { %4046 = vmatprep.mubr.msk.f32.mxu1 %vm388_vm1, %v980_v25  ;;  %v1000_v1 = vld [vmem:[%s4429_s12 + $0xf0] sm:$0xff]  ;;  %v1001_v3 = vld [vmem:[%s4429_s12 + $0xf8] sm:$0xff]  ;;  %v1002_v5 = vld [vmem:[%s4429_s12 + $0x100] sm:$0xff] }
  0x29   : > { %v357_v6 = vld [vmem:[%s4423_s9 + $0x108] sm:$0xff]  ;;  %v358_v8 = vld [vmem:[%s4423_s9 + $0x110] sm:$0xff]  ;;  %v359_v10 = vld [vmem:[%s4423_s9 + $0x118] sm:$0xff] }
  0x2a   : > { %3945 = vmatmul.mubr.msk.f32.gmra.mrb[10].mxu0 %vm388_vm1, %v335_v26  ;;  %v1003_v7 = vld [vmem:[%s4429_s12 + $0x108] sm:$0xff]  ;;  %v1004_v9 = vld [vmem:[%s4429_s12 + $0x110] sm:$0xff]  ;;  %v1005_v11 = vld [vmem:[%s4429_s12 + $0x118] sm:$0xff] }
  0x2b   : > { %4047 = vmatmul.mubr.msk.f32.gmra.mrb[10].mxu1 %vm388_vm1, %v981_v27  ;;  %3947 = vmatprep.mubr.msk.f32.mxu0 %vm388_vm1, %v336_v28  ;;  %v360_v12 = vld [vmem:[%s4423_s9 + $0x120] sm:$0xff]  ;;  %v361_v14 = vld [vmem:[%s4423_s9 + $0x128] sm:$0xff]  ;;  %v362_v16 = vld [vmem:[%s4423_s9 + $0x130] sm:$0xff] }
  0x2c   : > { %4049 = vmatprep.mubr.msk.f32.mxu1 %vm388_vm1, %v982_v29  ;;  %v1006_v13 = vld [vmem:[%s4429_s12 + $0x120] sm:$0xff]  ;;  %v1007_v15 = vld [vmem:[%s4429_s12 + $0x128] sm:$0xff]  ;;  %v1008_v17 = vld [vmem:[%s4429_s12 + $0x130] sm:$0xff] }
  0x2d   : > { %v363_v18 = vld [vmem:[%s4423_s9 + $0x138] sm:$0xff]  ;;  %v364_v20 = vld [vmem:[%s4423_s9 + $0x140] sm:$0xff]  ;;  %v365_v22 = vld [vmem:[%s4423_s9 + $0x148] sm:$0xff] }
  0x2e   : > { %3948 = vmatmul.mubr.msk.f32.gmra.mrb[12].mxu0 %vm388_vm1, %v337_v30  ;;  %v1009_v19 = vld [vmem:[%s4429_s12 + $0x138] sm:$0xff]  ;;  %v1010_v21 = vld [vmem:[%s4429_s12 + $0x140] sm:$0xff]  ;;  %v1011_v23 = vld [vmem:[%s4429_s12 + $0x148] sm:$0xff] }
  0x2f   : > { %4050 = vmatmul.mubr.msk.f32.gmra.mrb[12].mxu1 %vm388_vm1, %v983_v31  ;;  %3950 = vmatprep.mubr.msk.f32.mxu0 %vm388_vm1, %v338_v32  ;;  %v366_v24 = vld [vmem:[%s4423_s9 + $0x150] sm:$0xff]  ;;  %v367_v26 = vld [vmem:[%s4423_s9 + $0x158] sm:$0xff]  ;;  %v368_v28 = vld [vmem:[%s4423_s9 + $0x160] sm:$0xff] }
  0x30   : > { %4052 = vmatprep.mubr.msk.f32.mxu1 %vm388_vm1, %v984_v33  ;;  %v1012_v25 = vld [vmem:[%s4429_s12 + $0x150] sm:$0xff]  ;;  %v1013_v27 = vld [vmem:[%s4429_s12 + $0x158] sm:$0xff]  ;;  %v1014_v29 = vld [vmem:[%s4429_s12 + $0x160] sm:$0xff] }
  0x31   : > { %v369_v30 = vld [vmem:[%s4423_s9 + $0x168] sm:$0xff]  ;;  %v370_v32 = vld [vmem:[%s4423_s9 + $0x170] sm:$0xff] }
  0x32   : > { %3951 = vmatmul.mubr.msk.f32.gmra.mrb[14].mxu0 %vm388_vm1, %v339_v34  ;;  %v1015_v31 = vld [vmem:[%s4429_s12 + $0x168] sm:$0xff]  ;;  %v1016_v33 = vld [vmem:[%s4429_s12 + $0x170] sm:$0xff]  ;;  %v371_v34 = vld [vmem:[%s4423_s9 + $0x178] sm:$0xff] }
  0x33   : > { %4053 = vmatmul.mubr.msk.f32.gmra.mrb[14].mxu1 %vm388_vm1, %v985_v35  ;;  %3953 = vmatprep.mubr.msk.f32.mxu0 %vm388_vm1, %v340_v36  ;;  %v1017_v35 = vld [vmem:[%s4429_s12 + $0x178] sm:$0xff]  ;;  %v372_v36 = vld [vmem:[%s4423_s9 + $0x180] sm:$0xff] }
  0x34   : > { %4055 = vmatprep.mubr.msk.f32.mxu1 %vm388_vm1, %v986_v37  ;;  %v1018_v37 = vld [vmem:[%s4429_s12 + $0x180] sm:$0xff] }
  0x36   : > { %3954 = vmatmul.mubr.msk.f32.gmra.mrb[16].mxu0 %vm388_vm1, %v341_v38  ;;  %v373_v38 = vld [vmem:[%s4423_s9 + $0x188] sm:$0xff] }
  0x37   : > { %4056 = vmatmul.mubr.msk.f32.gmra.mrb[16].mxu1 %vm388_vm1, %v987_v39  ;;  %3956 = vmatprep.mubr.msk.f32.mxu0 %vm388_vm1, %v342_v40  ;;  %v1019_v39 = vld [vmem:[%s4429_s12 + $0x188] sm:$0xff]  ;;  %v374_v40 = vld [vmem:[%s4423_s9 + $0x190] sm:$0xff] }
  0x38   : > { %4058 = vmatprep.mubr.msk.f32.mxu1 %vm388_vm1, %v988_v41  ;;  %v1020_v41 = vld [vmem:[%s4429_s12 + $0x190] sm:$0xff] }
  0x3a   : > { %3957 = vmatmul.mubr.msk.f32.gmra.mrb[18].mxu0 %vm388_vm1, %v343_v42  ;;  %v375_v42 = vld [vmem:[%s4423_s9 + $0x198] sm:$0xff] }
  0x3b   : > { %4059 = vmatmul.mubr.msk.f32.gmra.mrb[18].mxu1 %vm388_vm1, %v989_v43  ;;  %3959 = vmatprep.mubr.msk.f32.mxu0 %vm388_vm1, %v344_v44  ;;  %v1021_v43 = vld [vmem:[%s4429_s12 + $0x198] sm:$0xff]  ;;  %v376_v44 = vld [vmem:[%s4423_s9 + $0x1a0] sm:$0xff] }
  0x3c   : > { %4061 = vmatprep.mubr.msk.f32.mxu1 %vm388_vm1, %v990_v45  ;;  %v1022_v45 = vld [vmem:[%s4429_s12 + $0x1a0] sm:$0xff] }
  0x3e   : > { %3960 = vmatmul.mubr.msk.f32.gmra.mrb[20].mxu0 %vm388_vm1, %v345_v46  ;;  %v377_v46 = vld [vmem:[%s4423_s9 + $0x1a8] sm:$0xff] }
  0x3f   : > { %4062 = vmatmul.mubr.msk.f32.gmra.mrb[20].mxu1 %vm388_vm1, %v991_v47  ;;  %3962 = vmatprep.mubr.msk.f32.mxu0 %vm388_vm1, %v346_v48  ;;  %v1023_v47 = vld [vmem:[%s4429_s12 + $0x1a8] sm:$0xff]  ;;  %v378_v48 = vld [vmem:[%s4423_s9 + $0x1b0] sm:$0xff] }
  0x40   : > { %4064 = vmatprep.mubr.msk.f32.mxu1 %vm388_vm1, %v992_v49  ;;  %v1024_v49 = vld [vmem:[%s4429_s12 + $0x1b0] sm:$0xff] }
  0x42   : > { %3963 = vmatmul.mubr.msk.f32.gmra.mrb[22].mxu0 %vm388_vm1, %v347_v50  ;;  %v379_v50 = vld [vmem:[%s4423_s9 + $0x1b8] sm:$0xff] }
  0x43   : > { %4065 = vmatmul.mubr.msk.f32.gmra.mrb[22].mxu1 %vm388_vm1, %v993_v51  ;;  %3965 = vmatprep.mubr.msk.f32.mxu0 %vm388_vm1, %v348_v52  ;;  %v1025_v51 = vld [vmem:[%s4429_s12 + $0x1b8] sm:$0xff]  ;;  %v380_v52 = vld [vmem:[%s4423_s9 + $0x1c0] sm:$0xff] }
  0x44   : > { %4067 = vmatprep.mubr.msk.f32.mxu1 %vm388_vm1, %v994_v53  ;;  %v1026_v53 = vld [vmem:[%s4429_s12 + $0x1c0] sm:$0xff] }
  0x46   : > { %3966 = vmatmul.mubr.msk.f32.gmra.mrb[24].mxu0 %vm388_vm1, %v349_v54  ;;  %v381_v54 = vld [vmem:[%s4423_s9 + $0x1c8] sm:$0xff] }
  0x47   : > { %4068 = vmatmul.mubr.msk.f32.gmra.mrb[24].mxu1 %vm388_vm1, %v995_v55  ;;  %3968 = vmatprep.mubr.msk.f32.mxu0 %vm388_vm1, %v350_v56  ;;  %v1027_v55 = vld [vmem:[%s4429_s12 + $0x1c8] sm:$0xff]  ;;  %v382_v56 = vld [vmem:[%s4423_s9 + $0x1d0] sm:$0xff] }
  0x48   : > { %4070 = vmatprep.mubr.msk.f32.mxu1 %vm388_vm1, %v996_v57  ;;  %v1028_v57 = vld [vmem:[%s4429_s12 + $0x1d0] sm:$0xff] }
  0x4a   : > { %3969 = vmatmul.mubr.msk.f32.gmra.mrb[26].mxu0 %vm388_vm1, %v351_v58  ;;  %v383_v58 = vld [vmem:[%s4423_s9 + $0x1d8] sm:$0xff] }
  0x4b   : > { %4071 = vmatmul.mubr.msk.f32.gmra.mrb[26].mxu1 %vm388_vm1, %v997_v59  ;;  %3971 = vmatprep.mubr.msk.f32.mxu0 %vm388_vm1, %v352_v60  ;;  %v1029_v59 = vld [vmem:[%s4429_s12 + $0x1d8] sm:$0xff]  ;;  %v384_v60 = vld [vmem:[%s4423_s9 + $0x1e0] sm:$0xff] }
  0x4c   : > { %4073 = vmatprep.mubr.msk.f32.mxu1 %vm388_vm1, %v998_v61  ;;  %v1030_v61 = vld [vmem:[%s4429_s12 + $0x1e0] sm:$0xff] }
  0x4e   : > { %3972 = vmatmul.mubr.msk.f32.gmra.mrb[28].mxu0 %vm388_vm1, %v353_v62  ;;  %v385_v62 = vld [vmem:[%s4423_s9 + $0x1e8] sm:$0xff] }
  0x4f   : > { %4074 = vmatmul.mubr.msk.f32.gmra.mrb[28].mxu1 %vm388_vm1, %v999_v63  ;;  %3974 = vmatprep.mubr.msk.f32.mxu0 %vm388_vm1, %v354_v0  ;;  %v1031_v63 = vld [vmem:[%s4429_s12 + $0x1e8] sm:$0xff]  ;;  %v386_v0 = vld [vmem:[%s4423_s9 + $0x1f0] sm:$0xff] }
  0x50   : > { %4076 = vmatprep.mubr.msk.f32.mxu1 %vm388_vm1, %v1000_v1  ;;  %v1032_v1 = vld [vmem:[%s4429_s12 + $0x1f0] sm:$0xff] }
  0x52   : > { %3975 = vmatmul.mubr.msk.f32.gmra.mrb[30].mxu0 %vm388_vm1, %v355_v2  ;;  %v387_v2 = vld [vmem:[%s4423_s9 + $0x1f8] sm:$0xff] }
  0x53   : > { %4077 = vmatmul.mubr.msk.f32.gmra.mrb[30].mxu1 %vm388_vm1, %v1001_v3  ;;  %3977 = vmatprep.mubr.msk.f32.mxu0 %vm388_vm1, %v356_v4  ;;  %v1033_v3 = vld [vmem:[%s4429_s12 + $0x1f8] sm:$0xff]  ;;  %v1675_v4 = vld [vmem:[%s4689_s15] sm:$0xff] }
  0x54   : > { %4079 = vmatprep.mubr.msk.f32.mxu1 %vm388_vm1, %v1002_v5  ;;  %v2380_v5 = vld [vmem:[%s4695_s18] sm:$0xff] }
  0x56   : > { %3978 = vmatmul.mubr.msk.f32.gmra.mrb[32].mxu0 %vm388_vm1, %v357_v6  ;;  %v1676_v6 = vld [vmem:[%s4689_s15 + $0x8] sm:$0xff] }
  0x57   : > { %4080 = vmatmul.mubr.msk.f32.gmra.mrb[32].mxu1 %vm388_vm1, %v1003_v7  ;;  %3980 = vmatprep.mubr.msk.f32.mxu0 %vm388_vm1, %v358_v8  ;;  %v2381_v7 = vld [vmem:[%s4695_s18 + $0x8] sm:$0xff]  ;;  %v1677_v8 = vld [vmem:[%s4689_s15 + $0x10] sm:$0xff] }
  0x58   : > { %4082 = vmatprep.mubr.msk.f32.mxu1 %vm388_vm1, %v1004_v9  ;;  %v2382_v9 = vld [vmem:[%s4695_s18 + $0x10] sm:$0xff] }
  0x5a   : > { %3981 = vmatmul.mubr.msk.f32.gmra.mrb[34].mxu0 %vm388_vm1, %v359_v10  ;;  %v1678_v10 = vld [vmem:[%s4689_s15 + $0x18] sm:$0xff] }
  0x5b   : > { %4083 = vmatmul.mubr.msk.f32.gmra.mrb[34].mxu1 %vm388_vm1, %v1005_v11  ;;  %3983 = vmatprep.mubr.msk.f32.mxu0 %vm388_vm1, %v360_v12  ;;  %v2383_v11 = vld [vmem:[%s4695_s18 + $0x18] sm:$0xff]  ;;  %v1679_v12 = vld [vmem:[%s4689_s15 + $0x20] sm:$0xff] }
  0x5c   : > { %4085 = vmatprep.mubr.msk.f32.mxu1 %vm388_vm1, %v1006_v13  ;;  %v2384_v13 = vld [vmem:[%s4695_s18 + $0x20] sm:$0xff] }
  0x5e   : > { %3984 = vmatmul.mubr.msk.f32.gmra.mrb[36].mxu0 %vm388_vm1, %v361_v14  ;;  %v1680_v14 = vld [vmem:[%s4689_s15 + $0x28] sm:$0xff] }
  0x5f   : > { %4086 = vmatmul.mubr.msk.f32.gmra.mrb[36].mxu1 %vm388_vm1, %v1007_v15  ;;  %3986 = vmatprep.mubr.msk.f32.mxu0 %vm388_vm1, %v362_v16  ;;  %v2385_v15 = vld [vmem:[%s4695_s18 + $0x28] sm:$0xff]  ;;  %v1681_v16 = vld [vmem:[%s4689_s15 + $0x30] sm:$0xff] }
  0x60   : > { %4088 = vmatprep.mubr.msk.f32.mxu1 %vm388_vm1, %v1008_v17  ;;  %v2386_v17 = vld [vmem:[%s4695_s18 + $0x30] sm:$0xff] }
  0x62   : > { %3987 = vmatmul.mubr.msk.f32.gmra.mrb[38].mxu0 %vm388_vm1, %v363_v18  ;;  %v1682_v18 = vld [vmem:[%s4689_s15 + $0x38] sm:$0xff] }
  0x63   : > { %4089 = vmatmul.mubr.msk.f32.gmra.mrb[38].mxu1 %vm388_vm1, %v1009_v19  ;;  %3989 = vmatprep.mubr.msk.f32.mxu0 %vm388_vm1, %v364_v20  ;;  %v2387_v19 = vld [vmem:[%s4695_s18 + $0x38] sm:$0xff]  ;;  %v1683_v20 = vld [vmem:[%s4689_s15 + $0x40] sm:$0xff] }
  0x64   : > { %4091 = vmatprep.mubr.msk.f32.mxu1 %vm388_vm1, %v1010_v21  ;;  %v2388_v21 = vld [vmem:[%s4695_s18 + $0x40] sm:$0xff] }
  0x66   : > { %3990 = vmatmul.mubr.msk.f32.gmra.mrb[40].mxu0 %vm388_vm1, %v365_v22  ;;  %v1684_v22 = vld [vmem:[%s4689_s15 + $0x48] sm:$0xff] }
  0x67   : > { %4092 = vmatmul.mubr.msk.f32.gmra.mrb[40].mxu1 %vm388_vm1, %v1011_v23  ;;  %3992 = vmatprep.mubr.msk.f32.mxu0 %vm388_vm1, %v366_v24  ;;  %v2389_v23 = vld [vmem:[%s4695_s18 + $0x48] sm:$0xff]  ;;  %v1685_v24 = vld [vmem:[%s4689_s15 + $0x50] sm:$0xff] }
  0x68   : > { %4094 = vmatprep.mubr.msk.f32.mxu1 %vm388_vm1, %v1012_v25  ;;  %v2390_v25 = vld [vmem:[%s4695_s18 + $0x50] sm:$0xff] }
  0x6a   : > { %3993 = vmatmul.mubr.msk.f32.gmra.mrb[42].mxu0 %vm388_vm1, %v367_v26  ;;  %v1686_v26 = vld [vmem:[%s4689_s15 + $0x58] sm:$0xff] }
  0x6b   : > { %4095 = vmatmul.mubr.msk.f32.gmra.mrb[42].mxu1 %vm388_vm1, %v1013_v27  ;;  %3995 = vmatprep.mubr.msk.f32.mxu0 %vm388_vm1, %v368_v28  ;;  %v2391_v27 = vld [vmem:[%s4695_s18 + $0x58] sm:$0xff]  ;;  %v1687_v28 = vld [vmem:[%s4689_s15 + $0x60] sm:$0xff] }
  0x6c   : > { %4097 = vmatprep.mubr.msk.f32.mxu1 %vm388_vm1, %v1014_v29  ;;  %v2392_v29 = vld [vmem:[%s4695_s18 + $0x60] sm:$0xff] }
  0x6e   : > { %3996 = vmatmul.mubr.msk.f32.gmra.mrb[44].mxu0 %vm388_vm1, %v369_v30  ;;  %v1688_v30 = vld [vmem:[%s4689_s15 + $0x68] sm:$0xff] }
  0x6f   : > { %4098 = vmatmul.mubr.msk.f32.gmra.mrb[44].mxu1 %vm388_vm1, %v1015_v31  ;;  %3998 = vmatprep.mubr.msk.f32.mxu0 %vm388_vm1, %v370_v32  ;;  %v2393_v31 = vld [vmem:[%s4695_s18 + $0x68] sm:$0xff]  ;;  %v1689_v32 = vld [vmem:[%s4689_s15 + $0x70] sm:$0xff] }
  0x70   : > { %4100 = vmatprep.mubr.msk.f32.mxu1 %vm388_vm1, %v1016_v33  ;;  %v2394_v33 = vld [vmem:[%s4695_s18 + $0x70] sm:$0xff] }
  0x72   : > { %3999 = vmatmul.mubr.msk.f32.gmra.mrb[46].mxu0 %vm388_vm1, %v371_v34  ;;  %v1690_v34 = vld [vmem:[%s4689_s15 + $0x78] sm:$0xff] }
  0x73   : > { %4101 = vmatmul.mubr.msk.f32.gmra.mrb[46].mxu1 %vm388_vm1, %v1017_v35  ;;  %4001 = vmatprep.mubr.msk.f32.mxu0 %vm388_vm1, %v372_v36  ;;  %v2395_v35 = vld [vmem:[%s4695_s18 + $0x78] sm:$0xff]  ;;  %v1691_v36 = vld [vmem:[%s4689_s15 + $0x80] sm:$0xff] }
  0x74   : > { %4103 = vmatprep.mubr.msk.f32.mxu1 %vm388_vm1, %v1018_v37  ;;  %v2396_v37 = vld [vmem:[%s4695_s18 + $0x80] sm:$0xff] }
  0x76   : > { %4002 = vmatmul.mubr.msk.f32.gmra.mrb[48].mxu0 %vm388_vm1, %v373_v38  ;;  %v1692_v38 = vld [vmem:[%s4689_s15 + $0x88] sm:$0xff] }
  0x77   : > { %4104 = vmatmul.mubr.msk.f32.gmra.mrb[48].mxu1 %vm388_vm1, %v1019_v39  ;;  %4004 = vmatprep.mubr.msk.f32.mxu0 %vm388_vm1, %v374_v40  ;;  %v2397_v39 = vld [vmem:[%s4695_s18 + $0x88] sm:$0xff]  ;;  %v1693_v40 = vld [vmem:[%s4689_s15 + $0x90] sm:$0xff] }
  0x78   : > { %4106 = vmatprep.mubr.msk.f32.mxu1 %vm388_vm1, %v1020_v41  ;;  %v2398_v41 = vld [vmem:[%s4695_s18 + $0x90] sm:$0xff] }
  0x7a   : > { %4005 = vmatmul.mubr.msk.f32.gmra.mrb[50].mxu0 %vm388_vm1, %v375_v42  ;;  %v1694_v42 = vld [vmem:[%s4689_s15 + $0x98] sm:$0xff] }
  0x7b   : > { %4107 = vmatmul.mubr.msk.f32.gmra.mrb[50].mxu1 %vm388_vm1, %v1021_v43  ;;  %4007 = vmatprep.mubr.msk.f32.mxu0 %vm388_vm1, %v376_v44  ;;  %v2399_v43 = vld [vmem:[%s4695_s18 + $0x98] sm:$0xff]  ;;  %v1695_v44 = vld [vmem:[%s4689_s15 + $0xa0] sm:$0xff] }
  0x7c   : > { %4109 = vmatprep.mubr.msk.f32.mxu1 %vm388_vm1, %v1022_v45  ;;  %v2400_v45 = vld [vmem:[%s4695_s18 + $0xa0] sm:$0xff] }
  0x7e   : > { %4008 = vmatmul.mubr.msk.f32.gmra.mrb[52].mxu0 %vm388_vm1, %v377_v46  ;;  %v1696_v46 = vld [vmem:[%s4689_s15 + $0xa8] sm:$0xff] }
  0x7f   : > { %4110 = vmatmul.mubr.msk.f32.gmra.mrb[52].mxu1 %vm388_vm1, %v1023_v47  ;;  %4010 = vmatprep.mubr.msk.f32.mxu0 %vm388_vm1, %v378_v48  ;;  %v2401_v47 = vld [vmem:[%s4695_s18 + $0xa8] sm:$0xff]  ;;  %v1697_v48 = vld [vmem:[%s4689_s15 + $0xb0] sm:$0xff] }
  0x80   : > { %4112 = vmatprep.mubr.msk.f32.mxu1 %vm388_vm1, %v1024_v49  ;;  %v2402_v49 = vld [vmem:[%s4695_s18 + $0xb0] sm:$0xff] }
  0x82   : > { %4011 = vmatmul.mubr.msk.f32.gmra.mrb[54].mxu0 %vm388_vm1, %v379_v50  ;;  %v1698_v50 = vld [vmem:[%s4689_s15 + $0xb8] sm:$0xff] }
  0x83   : > { %4113 = vmatmul.mubr.msk.f32.gmra.mrb[54].mxu1 %vm388_vm1, %v1025_v51  ;;  %4013 = vmatprep.mubr.msk.f32.mxu0 %vm388_vm1, %v380_v52  ;;  %v2403_v51 = vld [vmem:[%s4695_s18 + $0xb8] sm:$0xff]  ;;  %v1699_v52 = vld [vmem:[%s4689_s15 + $0xc0] sm:$0xff] }
  0x84   : > { %4115 = vmatprep.mubr.msk.f32.mxu1 %vm388_vm1, %v1026_v53  ;;  %v2404_v53 = vld [vmem:[%s4695_s18 + $0xc0] sm:$0xff] }
  0x86   : > { %4014 = vmatmul.mubr.msk.f32.gmra.mrb[56].mxu0 %vm388_vm1, %v381_v54  ;;  %v1700_v54 = vld [vmem:[%s4689_s15 + $0xc8] sm:$0xff] }
  0x87   : > { %4116 = vmatmul.mubr.msk.f32.gmra.mrb[56].mxu1 %vm388_vm1, %v1027_v55  ;;  %4016 = vmatprep.mubr.msk.f32.mxu0 %vm388_vm1, %v382_v56  ;;  %v2405_v55 = vld [vmem:[%s4695_s18 + $0xc8] sm:$0xff]  ;;  %v1701_v56 = vld [vmem:[%s4689_s15 + $0xd0] sm:$0xff] }
  0x88   : > { %4118 = vmatprep.mubr.msk.f32.mxu1 %vm388_vm1, %v1028_v57  ;;  %v2406_v57 = vld [vmem:[%s4695_s18 + $0xd0] sm:$0xff] }
  0x8a   : > { %4017 = vmatmul.mubr.msk.f32.gmra.mrb[58].mxu0 %vm388_vm1, %v383_v58  ;;  %v1702_v58 = vld [vmem:[%s4689_s15 + $0xd8] sm:$0xff] }
  0x8b   : > { %4119 = vmatmul.mubr.msk.f32.gmra.mrb[58].mxu1 %vm388_vm1, %v1029_v59  ;;  %4019 = vmatprep.mubr.msk.f32.mxu0 %vm388_vm1, %v384_v60  ;;  %v2407_v59 = vld [vmem:[%s4695_s18 + $0xd8] sm:$0xff]  ;;  %v1703_v60 = vld [vmem:[%s4689_s15 + $0xe0] sm:$0xff] }
  0x8c   : > { %4121 = vmatprep.mubr.msk.f32.mxu1 %vm388_vm1, %v1030_v61  ;;  %v2408_v61 = vld [vmem:[%s4695_s18 + $0xe0] sm:$0xff] }
  0x8e   : > { %4020 = vmatmul.mubr.msk.f32.gmra.mrb[60].mxu0 %vm388_vm1, %v385_v62  ;;  %v1704_v62 = vld [vmem:[%s4689_s15 + $0xe8] sm:$0xff] }
  0x8f   : > { %4122 = vmatmul.mubr.msk.f32.gmra.mrb[60].mxu1 %vm388_vm1, %v1031_v63  ;;  %4022 = vmatprep.mubr.msk.f32.mxu0 %vm388_vm1, %v386_v0  ;;  %v2409_v63 = vld [vmem:[%s4695_s18 + $0xe8] sm:$0xff]  ;;  %v1705_v0 = vld [vmem:[%s4689_s15 + $0xf0] sm:$0xff] }
  0x90   : > { %4124 = vmatprep.mubr.msk.f32.mxu1 %vm388_vm1, %v1032_v1  ;;  %v2410_v1 = vld [vmem:[%s4695_s18 + $0xf0] sm:$0xff] }
  0x92   : > { %4023 = vmatmul.mubr.msk.f32.gmra.mrb[62].mxu0 %vm388_vm1, %v387_v2  ;;  %v1706_v2 = vld [vmem:[%s4689_s15 + $0xf8] sm:$0xff] }
  0x93   : > { %4125 = vmatmul.mubr.msk.f32.gmra.mrb[62].mxu1 %vm388_vm1, %v1033_v3  ;;  %4133 = vmatprep.mubr.msk.f32.mxu0 %vm388_vm1, %v1675_v4  ;;  %v2411_v3 = vld [vmem:[%s4695_s18 + $0xf8] sm:$0xff]  ;;  %v1707_v4 = vld [vmem:[%s4689_s15 + $0x100] sm:$0xff] }
  0x94   : > { %4235 = vmatprep.mubr.msk.f32.mxu1 %vm388_vm1, %v2380_v5  ;;  %v2412_v5 = vld [vmem:[%s4695_s18 + $0x100] sm:$0xff] }
  0x96   : > { %4134 = vmatmul.mubr.msk.f32.vlgmr.msra.gmra.mrb[64].mxu0 %vm388_vm1, %v1676_v6  ;;  %v1708_v6 = vld [vmem:[%s4689_s15 + $0x108] sm:$0xff] }
  0x97   : > { %4236 = vmatmul.mubr.msk.f32.vlgmr.msra.gmra.mrb[64].mxu1 %vm388_vm1, %v2381_v7  ;;  %4136 = vmatprep.mubr.msk.f32.mxu0 %vm388_vm1, %v1677_v8  ;;  %v2413_v7 = vld [vmem:[%s4695_s18 + $0x108] sm:$0xff]  ;;  %v1709_v8 = vld [vmem:[%s4689_s15 + $0x110] sm:$0xff] }
  0x98   : > { %4238 = vmatprep.mubr.msk.f32.mxu1 %vm388_vm1, %v2382_v9  ;;  %v2414_v9 = vld [vmem:[%s4695_s18 + $0x110] sm:$0xff] }
  0x9a   : > { %4137 = vmatmul.mubr.msk.f32.gmra.mrb[66].mxu0 %vm388_vm1, %v1678_v10  ;;  %v1710_v10 = vld [vmem:[%s4689_s15 + $0x118] sm:$0xff] }
  0x9b   : > { %4239 = vmatmul.mubr.msk.f32.gmra.mrb[66].mxu1 %vm388_vm1, %v2383_v11  ;;  %4139 = vmatprep.mubr.msk.f32.mxu0 %vm388_vm1, %v1679_v12  ;;  %v2415_v11 = vld [vmem:[%s4695_s18 + $0x118] sm:$0xff]  ;;  %v1711_v12 = vld [vmem:[%s4689_s15 + $0x120] sm:$0xff] }
  0x9c   : > { %4241 = vmatprep.mubr.msk.f32.mxu1 %vm388_vm1, %v2384_v13  ;;  %v2416_v13 = vld [vmem:[%s4695_s18 + $0x120] sm:$0xff] }
  0x9e   : > { %4140 = vmatmul.mubr.msk.f32.gmra.mrb[68].mxu0 %vm388_vm1, %v1680_v14  ;;  %v1712_v14 = vld [vmem:[%s4689_s15 + $0x128] sm:$0xff] }
  0x9f   : > { %4242 = vmatmul.mubr.msk.f32.gmra.mrb[68].mxu1 %vm388_vm1, %v2385_v15  ;;  %4142 = vmatprep.mubr.msk.f32.mxu0 %vm388_vm1, %v1681_v16  ;;  %v2417_v15 = vld [vmem:[%s4695_s18 + $0x128] sm:$0xff]  ;;  %v1713_v16 = vld [vmem:[%s4689_s15 + $0x130] sm:$0xff] }
  0xa0   : > { %4244 = vmatprep.mubr.msk.f32.mxu1 %vm388_vm1, %v2386_v17  ;;  %v2418_v17 = vld [vmem:[%s4695_s18 + $0x130] sm:$0xff] }
  0xa2   : > { %4143 = vmatmul.mubr.msk.f32.gmra.mrb[70].mxu0 %vm388_vm1, %v1682_v18  ;;  %v1714_v18 = vld [vmem:[%s4689_s15 + $0x138] sm:$0xff] }
  0xa3   : > { %4245 = vmatmul.mubr.msk.f32.gmra.mrb[70].mxu1 %vm388_vm1, %v2387_v19  ;;  %4145 = vmatprep.mubr.msk.f32.mxu0 %vm388_vm1, %v1683_v20  ;;  %v2419_v19 = vld [vmem:[%s4695_s18 + $0x138] sm:$0xff]  ;;  %v1715_v20 = vld [vmem:[%s4689_s15 + $0x140] sm:$0xff] }
  0xa4   : > { %4247 = vmatprep.mubr.msk.f32.mxu1 %vm388_vm1, %v2388_v21  ;;  %v2420_v21 = vld [vmem:[%s4695_s18 + $0x140] sm:$0xff] }
  0xa6   : > { %4146 = vmatmul.mubr.msk.f32.gmra.mrb[72].mxu0 %vm388_vm1, %v1684_v22  ;;  %v1716_v22 = vld [vmem:[%s4689_s15 + $0x148] sm:$0xff] }
  0xa7   : > { %4248 = vmatmul.mubr.msk.f32.gmra.mrb[72].mxu1 %vm388_vm1, %v2389_v23  ;;  %4148 = vmatprep.mubr.msk.f32.mxu0 %vm388_vm1, %v1685_v24  ;;  %v2421_v23 = vld [vmem:[%s4695_s18 + $0x148] sm:$0xff]  ;;  %v1717_v24 = vld [vmem:[%s4689_s15 + $0x150] sm:$0xff] }
  0xa8   : > { %4250 = vmatprep.mubr.msk.f32.mxu1 %vm388_vm1, %v2390_v25  ;;  %v2422_v25 = vld [vmem:[%s4695_s18 + $0x150] sm:$0xff] }
  0xaa   : > { %4149 = vmatmul.mubr.msk.f32.gmra.mrb[74].mxu0 %vm388_vm1, %v1686_v26  ;;  %v1718_v26 = vld [vmem:[%s4689_s15 + $0x158] sm:$0xff] }
  0xab   : > { %4251 = vmatmul.mubr.msk.f32.gmra.mrb[74].mxu1 %vm388_vm1, %v2391_v27  ;;  %4151 = vmatprep.mubr.msk.f32.mxu0 %vm388_vm1, %v1687_v28  ;;  %v2423_v27 = vld [vmem:[%s4695_s18 + $0x158] sm:$0xff]  ;;  %v1719_v28 = vld [vmem:[%s4689_s15 + $0x160] sm:$0xff] }
  0xac   : > { %4253 = vmatprep.mubr.msk.f32.mxu1 %vm388_vm1, %v2392_v29  ;;  %v2424_v29 = vld [vmem:[%s4695_s18 + $0x160] sm:$0xff] }
  0xae   : > { %4152 = vmatmul.mubr.msk.f32.gmra.mrb[76].mxu0 %vm388_vm1, %v1688_v30 }
  0xaf   : > { %4254 = vmatmul.mubr.msk.f32.gmra.mrb[76].mxu1 %vm388_vm1, %v2393_v31  ;;  %4154 = vmatprep.mubr.msk.f32.mxu0 %vm388_vm1, %v1689_v32 }
  0xb0   : > { %4256 = vmatprep.mubr.msk.f32.mxu1 %vm388_vm1, %v2394_v33 }
  0xb2   : > { %4155 = vmatmul.mubr.msk.f32.gmra.mrb[78].mxu0 %vm388_vm1, %v1690_v34 }
  0xb3   : > { %4257 = vmatmul.mubr.msk.f32.gmra.mrb[78].mxu1 %vm388_vm1, %v2395_v35  ;;  %4157 = vmatprep.mubr.msk.f32.mxu0 %vm388_vm1, %v1691_v36  ;;  %v1720_v36 = vld [vmem:[%s4689_s15 + $0x168] sm:$0xff] }
  0xb4   : > { %4259 = vmatprep.mubr.msk.f32.mxu1 %vm388_vm1, %v2396_v37  ;;  %v2425_v37 = vld [vmem:[%s4695_s18 + $0x168] sm:$0xff] }
  0xb6   : > { %4158 = vmatmul.mubr.msk.f32.gmra.mrb[80].mxu0 %vm388_vm1, %v1692_v38  ;;  %v1721_v38 = vld [vmem:[%s4689_s15 + $0x170] sm:$0xff] }
  0xb7   : > { %4260 = vmatmul.mubr.msk.f32.gmra.mrb[80].mxu1 %vm388_vm1, %v2397_v39  ;;  %4160 = vmatprep.mubr.msk.f32.mxu0 %vm388_vm1, %v1693_v40  ;;  %v2426_v39 = vld [vmem:[%s4695_s18 + $0x170] sm:$0xff] }
  0xb8   : > { %4262 = vmatprep.mubr.msk.f32.mxu1 %vm388_vm1, %v2398_v41 }
  0xba   : > { %4161 = vmatmul.mubr.msk.f32.gmra.mrb[82].mxu0 %vm388_vm1, %v1694_v42 }
  0xbb   : > { %4263 = vmatmul.mubr.msk.f32.gmra.mrb[82].mxu1 %vm388_vm1, %v2399_v43  ;;  %4163 = vmatprep.mubr.msk.f32.mxu0 %vm388_vm1, %v1695_v44 }
  0xbc   : > { %4265 = vmatprep.mubr.msk.f32.mxu1 %vm388_vm1, %v2400_v45 }
  0xbe   : > { %4164 = vmatmul.mubr.msk.f32.gmra.mrb[84].mxu0 %vm388_vm1, %v1696_v46  ;;  %v1722_v46 = vld [vmem:[%s4689_s15 + $0x178] sm:$0xff] }
  0xbf   : > { %4266 = vmatmul.mubr.msk.f32.gmra.mrb[84].mxu1 %vm388_vm1, %v2401_v47  ;;  %4166 = vmatprep.mubr.msk.f32.mxu0 %vm388_vm1, %v1697_v48  ;;  %v2427_v47 = vld [vmem:[%s4695_s18 + $0x178] sm:$0xff]  ;;  %v1723_v48 = vld [vmem:[%s4689_s15 + $0x180] sm:$0xff] }
  0xc0   : > { %4268 = vmatprep.mubr.msk.f32.mxu1 %vm388_vm1, %v2402_v49  ;;  %v2428_v49 = vld [vmem:[%s4695_s18 + $0x180] sm:$0xff] }
  0xc2   : > { %4167 = vmatmul.mubr.msk.f32.gmra.mrb[86].mxu0 %vm388_vm1, %v1698_v50 }
  0xc3   : > { %4269 = vmatmul.mubr.msk.f32.gmra.mrb[86].mxu1 %vm388_vm1, %v2403_v51  ;;  %4169 = vmatprep.mubr.msk.f32.mxu0 %vm388_vm1, %v1699_v52 }
  0xc4   : > { %4271 = vmatprep.mubr.msk.f32.mxu1 %vm388_vm1, %v2404_v53 }
  0xc6   : > { %4170 = vmatmul.mubr.msk.f32.gmra.mrb[88].mxu0 %vm388_vm1, %v1700_v54 }
  0xc7   : > { %4272 = vmatmul.mubr.msk.f32.gmra.mrb[88].mxu1 %vm388_vm1, %v2405_v55  ;;  %4172 = vmatprep.mubr.msk.f32.mxu0 %vm388_vm1, %v1701_v56  ;;  %v1724_v56 = vld [vmem:[%s4689_s15 + $0x188] sm:$0xff] }
  0xc8   : > { %4274 = vmatprep.mubr.msk.f32.mxu1 %vm388_vm1, %v2406_v57  ;;  %v2429_v57 = vld [vmem:[%s4695_s18 + $0x188] sm:$0xff] }
  0xca   : > { %4173 = vmatmul.mubr.msk.f32.gmra.mrb[90].mxu0 %vm388_vm1, %v1702_v58  ;;  %v1725_v58 = vld [vmem:[%s4689_s15 + $0x190] sm:$0xff] }
  0xcb   : > { %4275 = vmatmul.mubr.msk.f32.gmra.mrb[90].mxu1 %vm388_vm1, %v2407_v59  ;;  %4175 = vmatprep.mubr.msk.f32.mxu0 %vm388_vm1, %v1703_v60  ;;  %v2430_v59 = vld [vmem:[%s4695_s18 + $0x190] sm:$0xff] }
  0xcc   : > { %4277 = vmatprep.mubr.msk.f32.mxu1 %vm388_vm1, %v2408_v61 }
  0xce   : > { %4176 = vmatmul.mubr.msk.f32.gmra.mrb[92].mxu0 %vm388_vm1, %v1704_v62 }
  0xcf   : > { %4278 = vmatmul.mubr.msk.f32.gmra.mrb[92].mxu1 %vm388_vm1, %v2409_v63  ;;  %4178 = vmatprep.mubr.msk.f32.mxu0 %vm388_vm1, %v1705_v0 }
  0xd0   : > { %4280 = vmatprep.mubr.msk.f32.mxu1 %vm388_vm1, %v2410_v1 }
  0xd2   : > { %4179 = vmatmul.mubr.msk.f32.gmra.mrb[94].mxu0 %vm388_vm1, %v1706_v2  ;;  %v1726_v2 = vld [vmem:[%s4689_s15 + $0x198] sm:$0xff] }
  0xd3   : > { %4281 = vmatmul.mubr.msk.f32.gmra.mrb[94].mxu1 %vm388_vm1, %v2411_v3  ;;  %4181 = vmatprep.mubr.msk.f32.mxu0 %vm388_vm1, %v1707_v4  ;;  %v2431_v3 = vld [vmem:[%s4695_s18 + $0x198] sm:$0xff]  ;;  %v1727_v4 = vld [vmem:[%s4689_s15 + $0x1a0] sm:$0xff] }
  0xd4   : > { %4283 = vmatprep.mubr.msk.f32.mxu1 %vm388_vm1, %v2412_v5  ;;  %v2432_v5 = vld [vmem:[%s4695_s18 + $0x1a0] sm:$0xff] }
  0xd6   : > { %4182 = vmatmul.mubr.msk.f32.gmra.mrb[96].mxu0 %vm388_vm1, %v1708_v6 }
  0xd7   : > { %4284 = vmatmul.mubr.msk.f32.gmra.mrb[96].mxu1 %vm388_vm1, %v2413_v7  ;;  %4184 = vmatprep.mubr.msk.f32.mxu0 %vm388_vm1, %v1709_v8 }
  0xd8   : > { %4286 = vmatprep.mubr.msk.f32.mxu1 %vm388_vm1, %v2414_v9 }
  0xda   : > { %4185 = vmatmul.mubr.msk.f32.gmra.mrb[98].mxu0 %vm388_vm1, %v1710_v10 }
  0xdb   : > { %4287 = vmatmul.mubr.msk.f32.gmra.mrb[98].mxu1 %vm388_vm1, %v2415_v11  ;;  %4187 = vmatprep.mubr.msk.f32.mxu0 %vm388_vm1, %v1711_v12  ;;  %v1728_v12 = vld [vmem:[%s4689_s15 + $0x1a8] sm:$0xff] }
  0xdc   : > { %4289 = vmatprep.mubr.msk.f32.mxu1 %vm388_vm1, %v2416_v13  ;;  %v2433_v13 = vld [vmem:[%s4695_s18 + $0x1a8] sm:$0xff] }
  0xde   : > { %4188 = vmatmul.mubr.msk.f32.gmra.mrb[100].mxu0 %vm388_vm1, %v1712_v14  ;;  %v1729_v14 = vld [vmem:[%s4689_s15 + $0x1b0] sm:$0xff] }
  0xdf   : > { %4290 = vmatmul.mubr.msk.f32.gmra.mrb[100].mxu1 %vm388_vm1, %v2417_v15  ;;  %4190 = vmatprep.mubr.msk.f32.mxu0 %vm388_vm1, %v1713_v16  ;;  %v2434_v15 = vld [vmem:[%s4695_s18 + $0x1b0] sm:$0xff] }
  0xe0   : > { %4292 = vmatprep.mubr.msk.f32.mxu1 %vm388_vm1, %v2418_v17 }
  0xe2   : > { %4191 = vmatmul.mubr.msk.f32.gmra.mrb[102].mxu0 %vm388_vm1, %v1714_v18 }
  0xe3   : > { %4293 = vmatmul.mubr.msk.f32.gmra.mrb[102].mxu1 %vm388_vm1, %v2419_v19  ;;  %4193 = vmatprep.mubr.msk.f32.mxu0 %vm388_vm1, %v1715_v20 }
  0xe4   : > { %4295 = vmatprep.mubr.msk.f32.mxu1 %vm388_vm1, %v2420_v21 }
  0xe6   : > { %4194 = vmatmul.mubr.msk.f32.gmra.mrb[104].mxu0 %vm388_vm1, %v1716_v22  ;;  %v1730_v22 = vld [vmem:[%s4689_s15 + $0x1b8] sm:$0xff] }
  0xe7   : > { %4296 = vmatmul.mubr.msk.f32.gmra.mrb[104].mxu1 %vm388_vm1, %v2421_v23  ;;  %4196 = vmatprep.mubr.msk.f32.mxu0 %vm388_vm1, %v1717_v24  ;;  %v2435_v23 = vld [vmem:[%s4695_s18 + $0x1b8] sm:$0xff]  ;;  %v1731_v24 = vld [vmem:[%s4689_s15 + $0x1c0] sm:$0xff] }
  0xe8   : > { %4298 = vmatprep.mubr.msk.f32.mxu1 %vm388_vm1, %v2422_v25  ;;  %v2436_v25 = vld [vmem:[%s4695_s18 + $0x1c0] sm:$0xff] }
  0xe9   : > { %v4881_v30 = vpop.f32.mrb[0].mxu0 }
  0xea   : > { %v4883_v31 = vpop.f32.mrb[0].mxu1  ;;  %v4887_v33 = vpop.f32.mrb[1].mxu0  ;;  %4197 = vmatmul.mubr.msk.f32.gmra.mrb[106].mxu0 %vm388_vm1, %v1718_v26 }
  0xeb   : > { %v4889_v34 = vpop.f32.mrb[1].mxu1  ;;  %4299 = vmatmul.mubr.msk.f32.gmra.mrb[106].mxu1 %vm388_vm1, %v2423_v27  ;;  %4199 = vmatprep.mubr.msk.f32.mxu0 %vm388_vm1, %v1719_v28 }
  0xec   : > { %4301 = vmatprep.mubr.msk.f32.mxu1 %vm388_vm1, %v2424_v29 }
  0xed   : > { %v4901_v40 = vpop.f32.mrb[2].mxu0 }
  0xee   : > { %v4903_v41 = vpop.f32.mrb[2].mxu1  ;;  %v4907_v43 = vpop.f32.mrb[3].mxu0  ;;  %4200 = vmatmul.mubr.msk.f32.gmra.mrb[108].mxu0 %vm388_vm1, %v1720_v36 }
  0xef   : > { %v4909_v44 = vpop.f32.mrb[3].mxu1  ;;  %4302 = vmatmul.mubr.msk.f32.gmra.mrb[108].mxu1 %vm388_vm1, %v2425_v37  ;;  %4202 = vmatprep.mubr.msk.f32.mxu0 %vm388_vm1, %v1721_v38  ;;  %v1732_v38 = vld [vmem:[%s4689_s15 + $0x1c8] sm:$0xff] }
  0xf0   : > { %4304 = vmatprep.mubr.msk.f32.mxu1 %vm388_vm1, %v2426_v39  ;;  %v2437_v39 = vld [vmem:[%s4695_s18 + $0x1c8] sm:$0xff] }
  0xf1   : > { %v4921_v50 = vpop.f32.mrb[4].mxu0 }
  0xf2   : > { %v4923_v51 = vpop.f32.mrb[4].mxu1  ;;  %v4927_v53 = vpop.f32.mrb[5].mxu0  ;;  %4203 = vmatmul.mubr.msk.f32.gmra.mrb[110].mxu0 %vm388_vm1, %v1722_v46  ;;  %v1733_v46 = vld [vmem:[%s4689_s15 + $0x1d0] sm:$0xff] }
  0xf3   : > { %v4929_v54 = vpop.f32.mrb[5].mxu1  ;;  %4305 = vmatmul.mubr.msk.f32.gmra.mrb[110].mxu1 %vm388_vm1, %v2427_v47  ;;  %4205 = vmatprep.mubr.msk.f32.mxu0 %vm388_vm1, %v1723_v48  ;;  %v2438_v47 = vld [vmem:[%s4695_s18 + $0x1d0] sm:$0xff] }
  0xf4   : > { %4307 = vmatprep.mubr.msk.f32.mxu1 %vm388_vm1, %v2428_v49 }
  0xf5   : > { %v4941_v60 = vpop.f32.mrb[6].mxu0 }
  0xf6   : > { %v4943_v61 = vpop.f32.mrb[6].mxu1  ;;  %v4947_v63 = vpop.f32.mrb[7].mxu0  ;;  %4206 = vmatmul.mubr.msk.f32.gmra.mrb[112].mxu0 %vm388_vm1, %v1724_v56 }
  0xf7   : > { %v4949_v0 = vpop.f32.mrb[7].mxu1  ;;  %4308 = vmatmul.mubr.msk.f32.gmra.mrb[112].mxu1 %vm388_vm1, %v2429_v57  ;;  %4208 = vmatprep.mubr.msk.f32.mxu0 %vm388_vm1, %v1725_v58 }
  0xf8   : > { %4310 = vmatprep.mubr.msk.f32.mxu1 %vm388_vm1, %v2430_v59 }
  0xf9   : > { %v4961_v6 = vpop.f32.mrb[8].mxu0 }
  0xfa   : > { %v4963_v7 = vpop.f32.mrb[8].mxu1  ;;  %v4967_v9 = vpop.f32.mrb[9].mxu0  ;;  %4209 = vmatmul.mubr.msk.f32.gmra.mrb[114].mxu0 %vm388_vm1, %v1726_v2  ;;  %v1734_v2 = vld [vmem:[%s4689_s15 + $0x1d8] sm:$0xff] }
  0xfb   : > { %v4969_v10 = vpop.f32.mrb[9].mxu1  ;;  %4311 = vmatmul.mubr.msk.f32.gmra.mrb[114].mxu1 %vm388_vm1, %v2431_v3  ;;  %4211 = vmatprep.mubr.msk.f32.mxu0 %vm388_vm1, %v1727_v4  ;;  %v2439_v3 = vld [vmem:[%s4695_s18 + $0x1d8] sm:$0xff]  ;;  %v1735_v4 = vld [vmem:[%s4689_s15 + $0x1e0] sm:$0xff] }
  0xfc   : > { %4313 = vmatprep.mubr.msk.f32.mxu1 %vm388_vm1, %v2432_v5  ;;  %v2440_v5 = vld [vmem:[%s4695_s18 + $0x1e0] sm:$0xff] }
  0xfd   : > { %v4981_v16 = vpop.f32.mrb[10].mxu0 }
  0xfe   : > { %v4983_v17 = vpop.f32.mrb[10].mxu1  ;;  %v4987_v19 = vpop.f32.mrb[11].mxu0  ;;  %4212 = vmatmul.mubr.msk.f32.gmra.mrb[116].mxu0 %vm388_vm1, %v1728_v12 }
  0xff   : > { %v4989_v20 = vpop.f32.mrb[11].mxu1  ;;  %4314 = vmatmul.mubr.msk.f32.gmra.mrb[116].mxu1 %vm388_vm1, %v2433_v13  ;;  %4214 = vmatprep.mubr.msk.f32.mxu0 %vm388_vm1, %v1729_v14  ;;  %v2443_v14 = vld [vmem:[%s4695_s18 + $0x1f8] sm:$0xff] }
 0x100   : > { %4316 = vmatprep.mubr.msk.f32.mxu1 %vm388_vm1, %v2434_v15 }
 0x101   : > { %v5001_v26 = vpop.f32.mrb[12].mxu0 }
 0x102   : > { %v5003_v27 = vpop.f32.mrb[12].mxu1  ;;  %v5007_v29 = vpop.f32.mrb[13].mxu0  ;;  %4215 = vmatmul.mubr.msk.f32.gmra.mrb[118].mxu0 %vm388_vm1, %v1730_v22 }
 0x103   : > { %v5009_v36 = vpop.f32.mrb[13].mxu1  ;;  %4317 = vmatmul.mubr.msk.f32.gmra.mrb[118].mxu1 %vm388_vm1, %v2435_v23  ;;  %4217 = vmatprep.mubr.msk.f32.mxu0 %vm388_vm1, %v1731_v24  ;;  %v1736_v24 = vld [vmem:[%s4689_s15 + $0x1e8] sm:$0xff] }
 0x104   : > { %4319 = vmatprep.mubr.msk.f32.mxu1 %vm388_vm1, %v2436_v25  ;;  %v2441_v25 = vld [vmem:[%s4695_s18 + $0x1e8] sm:$0xff] }
 0x105   : > { %v5021_v48 = vpop.f32.mrb[14].mxu0 }
 0x106   : > { %v5023_v49 = vpop.f32.mrb[14].mxu1  ;;  %v5027_v57 = vpop.f32.mrb[15].mxu0  ;;  %4218 = vmatmul.mubr.msk.f32.gmra.mrb[120].mxu0 %vm388_vm1, %v1732_v38  ;;  %v1737_v38 = vld [vmem:[%s4689_s15 + $0x1f0] sm:$0xff] }
 0x107   : > { %v5029_v58 = vpop.f32.mrb[15].mxu1  ;;  %4320 = vmatmul.mubr.msk.f32.gmra.mrb[120].mxu1 %vm388_vm1, %v2437_v39  ;;  %4220 = vmatprep.mubr.msk.f32.mxu0 %vm388_vm1, %v1733_v46  ;;  %v2442_v39 = vld [vmem:[%s4695_s18 + $0x1f0] sm:$0xff] }
 0x108   : > { %4322 = vmatprep.mubr.msk.f32.mxu1 %vm388_vm1, %v2438_v47 }
 0x109   : > { %v5041_v12 = vpop.f32.mrb[16].mxu0 }
 0x10a   : > { %v5043_v13 = vpop.f32.mrb[16].mxu1  ;;  %v5047_v15 = vpop.f32.mrb[17].mxu0  ;;  %4221 = vmatmul.mubr.msk.f32.gmra.mrb[122].mxu0 %vm388_vm1, %v1734_v2 }
 0x10b   : > { %v5049_v22 = vpop.f32.mrb[17].mxu1  ;;  %4323 = vmatmul.mubr.msk.f32.gmra.mrb[122].mxu1 %vm388_vm1, %v2439_v3  ;;  %4223 = vmatprep.mubr.msk.f32.mxu0 %vm388_vm1, %v1735_v4  ;;  %v5906_v4 = vmax.f32 %v4881_v30, %v4883_v31  ;;  %v5908_v30 = vmax.f32 %v4901_v40, %v4903_v41 }
 0x10c   : > { %4325 = vmatprep.mubr.msk.f32.mxu1 %vm388_vm1, %v2440_v5  ;;  %v1738_v5 = vld [vmem:[%s4689_s15 + $0x1f8] sm:$0xff] }
 0x10d   : > { %v5061_v46 = vpop.f32.mrb[18].mxu0 }
 0x10e   : > { %v5063_v47 = vpop.f32.mrb[18].mxu1  ;;  %v5067_v3 = vpop.f32.mrb[19].mxu0  ;;  %4224 = vmatmul.mubr.msk.f32.gmra.mrb[124].mxu0 %vm388_vm1, %v1736_v24 }
 0x10f   : > { %v5069_v23 = vpop.f32.mrb[19].mxu1  ;;  %4326 = vmatmul.mubr.msk.f32.gmra.mrb[124].mxu1 %vm388_vm1, %v2441_v25  ;;  %4226 = vmatprep.mubr.msk.f32.mxu0 %vm388_vm1, %v1737_v38 }
 0x110   : > { %4328 = vmatprep.mubr.msk.f32.mxu1 %vm388_vm1, %v2442_v39 }
 0x111   : > { %v5079_v59 = vpop.f32.mrb[20].mxu0 }
 0x112   : > { %v5081_v2 = vpop.f32.mrb[20].mxu1  ;;  %v5085_v37 = vpop.f32.mrb[21].mxu0  ;;  %4227 = vmatmul.mubr.msk.f32.gmra.mrb[126].mxu0 %vm388_vm1, %v1738_v5 }
 0x113   : > { %v5087_v24 = vpop.f32.mrb[21].mxu1  ;;  %4329 = vmatmul.mubr.msk.f32.gmra.mrb[126].mxu1 %vm388_vm1, %v2443_v14 }
 0x115   : > { %v5093_v38 = vpop.f32.mrb[22].mxu0 }
 0x116   : > { %v5095_v39 = vpop.f32.mrb[22].mxu1  ;;  %v5099_v28 = vpop.f32.mrb[23].mxu0 }
 0x117   : > { %v5101_v56 = vpop.f32.mrb[23].mxu1 }
 0x119   : > { %v5105_v5 = vpop.f32.mrb[24].mxu0 }
 0x11a   : > { %v5107_v14 = vpop.f32.mrb[24].mxu1  ;;  %v5111_v18 = vpop.f32.mrb[25].mxu0 }
 0x11b   : > { %5828 = vst [vmem:[#allocation2_spill] sm:$0xff] %v5111_v18  ;;  %v5113_v11 = vpop.f32.mrb[25].mxu1 }
 0x11c   : > { %5829 = vst [vmem:[#allocation3_spill] sm:$0xff] %v5113_v11  ;;  %v5907_v11 = vmax.f32 %v4887_v33, %v4889_v34  ;;  %v5909_v34 = vmax.f32 %v4907_v43, %v4909_v44  ;;  %v5911_v44 = vmax.f32 %v4927_v53, %v4929_v54  ;;  %v5913_v54 = vmax.f32 %v4947_v63, %v4949_v0 }
 0x11d   : > { %v5117_v8 = vpop.f32.mrb[26].mxu0  ;;  %v5915_v0 = vmax.f32 %v4967_v9, %v4969_v10  ;;  %v5917_v10 = vmax.f32 %v4987_v19, %v4989_v20  ;;  %v5919_v20 = vmax.f32 %v5007_v29, %v5009_v36  ;;  %v5921_v36 = vmax.f32 %v5027_v57, %v5029_v58 }
 0x11e   : > { %5830 = vst [vmem:[#allocation4_spill] sm:$0xff] %v5117_v8  ;;  %v5119_v1 = vpop.f32.mrb[26].mxu1  ;;  %v5123_v62 = vpop.f32.mrb[27].mxu0  ;;  %v5923_v58 = vmax.f32 %v5047_v15, %v5049_v22  ;;  %v5925_v22 = vmax.f32 %v5067_v3, %v5069_v23  ;;  %v5927_v3 = vmax.f32 %v5085_v37, %v5087_v24  ;;  %v5929_v24 = vmax.f32 %v5099_v28, %v5101_v56 }
 0x11f   : > { %5831 = vst [vmem:[#allocation5_spill] sm:$0xff] %v5119_v1  ;;  %5832 = vst [vmem:[#allocation6_spill] sm:$0xff] %v5123_v62  ;;  %v5125_v55 = vpop.f32.mrb[27].mxu1 }
 0x120   : > { %5833 = vst [vmem:[#allocation7_spill] sm:$0xff] %v5125_v55 }
 0x121   : > { %v5129_v52 = vpop.f32.mrb[28].mxu0 }
 0x122   : > { %5834 = vst [vmem:[#allocation8_spill] sm:$0xff] %v5129_v52  ;;  %v5131_v45 = vpop.f32.mrb[28].mxu1  ;;  %v5135_v42 = vpop.f32.mrb[29].mxu0  ;;  %v5931_v56 = vld [vmem:[#allocation2_spill] sm:$0xff] }
 0x123   : > { %5835 = vst [vmem:[#allocation9_spill] sm:$0xff] %v5131_v45  ;;  %5836 = vst [vmem:[#allocation10_spill] sm:$0xff] %v5135_v42  ;;  %v5137_v35 = vpop.f32.mrb[29].mxu1 }
 0x124   : > { %5837 = vst [vmem:[#allocation11_spill] sm:$0xff] %v5137_v35 }
 0x125   : > { %v5141_v32 = vpop.f32.mrb[30].mxu0 }
 0x126   : > { %5838 = vst [vmem:[#allocation12_spill] sm:$0xff] %v5141_v32  ;;  %v5143_v1 = vpop.f32.mrb[30].mxu1  ;;  %v5147_v55 = vpop.f32.mrb[31].mxu0 }
 0x127   : > { %5839 = vst [vmem:[#allocation13_spill] sm:$0xff] %v5143_v1  ;;  %5840 = vst [vmem:[#allocation14_spill] sm:$0xff] %v5147_v55  ;;  %v5149_v62 = vpop.f32.mrb[31].mxu1 }
 0x128   : > { %5841 = vst [vmem:[#allocation15_spill] sm:$0xff] %v5149_v62 }
 0x129   : > { %v5153_v45 = vpop.f32.mrb[32].mxu0 }
 0x12a   : > { %5842 = vst [vmem:[#allocation16_spill] sm:$0xff] %v5153_v45  ;;  %v5155_v52 = vpop.f32.mrb[32].mxu1  ;;  %v5159_v35 = vpop.f32.mrb[33].mxu0 }
 0x12b   : > { %5843 = vst [vmem:[#allocation17_spill] sm:$0xff] %v5155_v52  ;;  %5844 = vst [vmem:[#allocation18_spill] sm:$0xff] %v5159_v35  ;;  %v5161_v42 = vpop.f32.mrb[33].mxu1 }
 0x12c   : > { %5845 = vst [vmem:[#allocation19_spill] sm:$0xff] %v5161_v42 }
 0x12d   : > { %v5165_v1 = vpop.f32.mrb[34].mxu0 }
 0x12e   : > { %5846 = vst [vmem:[#allocation20_spill] sm:$0xff] %v5165_v1  ;;  %v5167_v32 = vpop.f32.mrb[34].mxu1  ;;  %v5171_v62 = vpop.f32.mrb[35].mxu0 }
 0x12f   : > { %5847 = vst [vmem:[#allocation21_spill] sm:$0xff] %v5167_v32  ;;  %5848 = vst [vmem:[#allocation22_spill] sm:$0xff] %v5171_v62  ;;  %v5173_v55 = vpop.f32.mrb[35].mxu1 }
 0x130   : > { %5849 = vst [vmem:[#allocation23_spill] sm:$0xff] %v5173_v55 }
 0x131   : > { %v5177_v52 = vpop.f32.mrb[36].mxu0 }
 0x132   : > { %5850 = vst [vmem:[#allocation24_spill] sm:$0xff] %v5177_v52  ;;  %v5179_v45 = vpop.f32.mrb[36].mxu1  ;;  %v5183_v42 = vpop.f32.mrb[37].mxu0 }
 0x133   : > { %5851 = vst [vmem:[#allocation25_spill] sm:$0xff] %v5179_v45  ;;  %5852 = vst [vmem:[#allocation26_spill] sm:$0xff] %v5183_v42  ;;  %v5185_v35 = vpop.f32.mrb[37].mxu1 }
 0x134   : > { %5853 = vst [vmem:[#allocation27_spill] sm:$0xff] %v5185_v35 }
 0x135   : > { %v5189_v32 = vpop.f32.mrb[38].mxu0 }
 0x136   : > { %5854 = vst [vmem:[#allocation28_spill] sm:$0xff] %v5189_v32  ;;  %v5191_v1 = vpop.f32.mrb[38].mxu1  ;;  %v5195_v55 = vpop.f32.mrb[39].mxu0 }
 0x137   : > { %5855 = vst [vmem:[#allocation29_spill] sm:$0xff] %v5191_v1  ;;  %5856 = vst [vmem:[#allocation30_spill] sm:$0xff] %v5195_v55  ;;  %v5197_v62 = vpop.f32.mrb[39].mxu1 }
 0x138   : > { %5857 = vst [vmem:[#allocation31_spill] sm:$0xff] %v5197_v62 }
 0x139   : > { %v5201_v45 = vpop.f32.mrb[40].mxu0 }
 0x13a   : > { %5858 = vst [vmem:[#allocation32_spill] sm:$0xff] %v5201_v45  ;;  %v5203_v52 = vpop.f32.mrb[40].mxu1  ;;  %v5207_v35 = vpop.f32.mrb[41].mxu0 }
 0x13b   : > { %5859 = vst [vmem:[#allocation33_spill] sm:$0xff] %v5203_v52  ;;  %5860 = vst [vmem:[#allocation34_spill] sm:$0xff] %v5207_v35  ;;  %v5209_v42 = vpop.f32.mrb[41].mxu1 }
 0x13c   : > { %5861 = vst [vmem:[#allocation35_spill] sm:$0xff] %v5209_v42 }
 0x13d   : > { %v5213_v1 = vpop.f32.mrb[42].mxu0 }
 0x13e   : > { %5862 = vst [vmem:[#allocation36_spill] sm:$0xff] %v5213_v1  ;;  %v5215_v32 = vpop.f32.mrb[42].mxu1  ;;  %v5219_v62 = vpop.f32.mrb[43].mxu0 }
 0x13f   : > { %5863 = vst [vmem:[#allocation37_spill] sm:$0xff] %v5215_v32  ;;  %5864 = vst [vmem:[#allocation38_spill] sm:$0xff] %v5219_v62  ;;  %v5221_v55 = vpop.f32.mrb[43].mxu1 }
 0x140   : > { %5865 = vst [vmem:[#allocation39_spill] sm:$0xff] %v5221_v55 }
 0x141   : > { %v5225_v52 = vpop.f32.mrb[44].mxu0 }
 0x142   : > { %5866 = vst [vmem:[#allocation40_spill] sm:$0xff] %v5225_v52  ;;  %v5227_v45 = vpop.f32.mrb[44].mxu1  ;;  %v5231_v42 = vpop.f32.mrb[45].mxu0 }
 0x143   : > { %5867 = vst [vmem:[#allocation41_spill] sm:$0xff] %v5227_v45  ;;  %5868 = vst [vmem:[#allocation42_spill] sm:$0xff] %v5231_v42  ;;  %v5233_v35 = vpop.f32.mrb[45].mxu1 }
 0x144   : > { %5869 = vst [vmem:[#allocation43_spill] sm:$0xff] %v5233_v35 }
 0x145   : > { %v5237_v32 = vpop.f32.mrb[46].mxu0 }
 0x146   : > { %5870 = vst [vmem:[#allocation44_spill] sm:$0xff] %v5237_v32  ;;  %v5239_v1 = vpop.f32.mrb[46].mxu1  ;;  %v5243_v55 = vpop.f32.mrb[47].mxu0 }
 0x147   : > { %5871 = vst [vmem:[#allocation45_spill] sm:$0xff] %v5239_v1  ;;  %5872 = vst [vmem:[#allocation46_spill] sm:$0xff] %v5243_v55  ;;  %v5245_v62 = vpop.f32.mrb[47].mxu1 }
 0x148   : > { %5873 = vst [vmem:[#allocation47_spill] sm:$0xff] %v5245_v62 }
 0x149   : > { %v5249_v45 = vpop.f32.mrb[48].mxu0 }
 0x14a   : > { %5874 = vst [vmem:[#allocation48_spill] sm:$0xff] %v5249_v45  ;;  %v5251_v52 = vpop.f32.mrb[48].mxu1  ;;  %v5255_v35 = vpop.f32.mrb[49].mxu0 }
 0x14b   : > { %5875 = vst [vmem:[#allocation49_spill] sm:$0xff] %v5251_v52  ;;  %5876 = vst [vmem:[#allocation50_spill] sm:$0xff] %v5255_v35  ;;  %v5257_v42 = vpop.f32.mrb[49].mxu1 }
 0x14c   : > { %5877 = vst [vmem:[#allocation51_spill] sm:$0xff] %v5257_v42 }
 0x14d   : > { %v5261_v1 = vpop.f32.mrb[50].mxu0 }
 0x14e   : > { %5878 = vst [vmem:[#allocation52_spill] sm:$0xff] %v5261_v1  ;;  %v5263_v32 = vpop.f32.mrb[50].mxu1  ;;  %v5267_v62 = vpop.f32.mrb[51].mxu0 }
 0x14f   : > { %5879 = vst [vmem:[#allocation53_spill] sm:$0xff] %v5263_v32  ;;  %5880 = vst [vmem:[#allocation54_spill] sm:$0xff] %v5267_v62  ;;  %v5269_v55 = vpop.f32.mrb[51].mxu1 }
 0x150   : > { %5881 = vst [vmem:[#allocation55_spill] sm:$0xff] %v5269_v55 }
 0x151   : > { %v5273_v52 = vpop.f32.mrb[52].mxu0 }
 0x152   : > { %5882 = vst [vmem:[#allocation56_spill] sm:$0xff] %v5273_v52  ;;  %v5275_v45 = vpop.f32.mrb[52].mxu1  ;;  %v5279_v42 = vpop.f32.mrb[53].mxu0 }
 0x153   : > { %5883 = vst [vmem:[#allocation57_spill] sm:$0xff] %v5275_v45  ;;  %5884 = vst [vmem:[#allocation58_spill] sm:$0xff] %v5279_v42  ;;  %v5281_v35 = vpop.f32.mrb[53].mxu1 }
 0x154   : > { %5885 = vst [vmem:[#allocation59_spill] sm:$0xff] %v5281_v35 }
 0x155   : > { %v5285_v32 = vpop.f32.mrb[54].mxu0 }
 0x156   : > { %5886 = vst [vmem:[#allocation60_spill] sm:$0xff] %v5285_v32  ;;  %v5287_v1 = vpop.f32.mrb[54].mxu1  ;;  %v5291_v55 = vpop.f32.mrb[55].mxu0 }
 0x157   : > { %5887 = vst [vmem:[#allocation61_spill] sm:$0xff] %v5287_v1  ;;  %5888 = vst [vmem:[#allocation62_spill] sm:$0xff] %v5291_v55  ;;  %v5293_v62 = vpop.f32.mrb[55].mxu1 }
 0x158   : > { %5889 = vst [vmem:[#allocation63_spill] sm:$0xff] %v5293_v62 }
 0x159   : > { %v5297_v45 = vpop.f32.mrb[56].mxu0 }
 0x15a   : > { %5890 = vst [vmem:[#allocation64_spill] sm:$0xff] %v5297_v45  ;;  %v5299_v52 = vpop.f32.mrb[56].mxu1  ;;  %v5303_v35 = vpop.f32.mrb[57].mxu0 }
 0x15b   : > { %5891 = vst [vmem:[#allocation65_spill] sm:$0xff] %v5299_v52  ;;  %5892 = vst [vmem:[#allocation66_spill] sm:$0xff] %v5303_v35  ;;  %v5305_v42 = vpop.f32.mrb[57].mxu1 }
 0x15c   : > { %5893 = vst [vmem:[#allocation67_spill] sm:$0xff] %v5305_v42 }
 0x15d   : > { %v5309_v1 = vpop.f32.mrb[58].mxu0 }
 0x15e   : > { %5894 = vst [vmem:[#allocation68_spill] sm:$0xff] %v5309_v1  ;;  %v5311_v32 = vpop.f32.mrb[58].mxu1  ;;  %v5315_v62 = vpop.f32.mrb[59].mxu0 }
 0x15f   : > { %5895 = vst [vmem:[#allocation69_spill] sm:$0xff] %v5311_v32  ;;  %5896 = vst [vmem:[#allocation70_spill] sm:$0xff] %v5315_v62  ;;  %v5317_v55 = vpop.f32.mrb[59].mxu1 }
 0x160   : > { %5897 = vst [vmem:[#allocation71_spill] sm:$0xff] %v5317_v55 }
 0x161   : > { %v5321_v52 = vpop.f32.mrb[60].mxu0 }
 0x162   : > { %5898 = vst [vmem:[#allocation72_spill] sm:$0xff] %v5321_v52  ;;  %v5323_v45 = vpop.f32.mrb[60].mxu1  ;;  %v5327_v42 = vpop.f32.mrb[61].mxu0 }
 0x163   : > { %5899 = vst [vmem:[#allocation73_spill] sm:$0xff] %v5323_v45  ;;  %5900 = vst [vmem:[#allocation74_spill] sm:$0xff] %v5327_v42  ;;  %v5329_v35 = vpop.f32.mrb[61].mxu1 }
 0x164   : > { %5901 = vst [vmem:[#allocation75_spill] sm:$0xff] %v5329_v35 }
 0x165   : > { %v5333_v32 = vpop.f32.mrb[62].mxu0 }
 0x166   : > { %5902 = vst [vmem:[#allocation76_spill] sm:$0xff] %v5333_v32  ;;  %v5335_v1 = vpop.f32.mrb[62].mxu1  ;;  %v5339_v55 = vpop.f32.mrb[63].mxu0 }
 0x167   : > { %5903 = vst [vmem:[#allocation77_spill] sm:$0xff] %v5335_v1  ;;  %5904 = vst [vmem:[#allocation78_spill] sm:$0xff] %v5339_v55  ;;  %v5341_v62 = vpop.f32.mrb[63].mxu1  ;;  %v5354_v1 = vld [vmem:[%s5748_s5] ss:$0 sm:$0xff] }
 0x168   : > { %5905 = vst [vmem:[#allocation79_spill] sm:$0xff] %v5341_v62 }
 0x169   : > { %v4135_v45 = vpop.f32.mrb[64].mxu0 }
 0x16a   : > { %v4237_v52 = vpop.f32.mrb[64].mxu1  ;;  %v2317_v35 = vmax.f32 %v5906_v4, %v4135_v45  ;;  %v1997_v42 = vpop.f32.mrb[65].mxu0 }
 0x16b   : > { %v2702_v8 = vpop.f32.mrb[65].mxu1  ;;  %v2316_v21 = vmax.f32 %v5907_v11, %v1997_v42  ;;  %v5910_v11 = vmax.f32 %v4921_v50, %v4923_v51  ;;  %v5912_v51 = vmax.f32 %v4941_v60, %v4943_v61  ;;  %v5914_v61 = vmax.f32 %v4961_v6, %v4963_v7 }
 0x16c   : > { %v3022_v32 = vmax.f32 %v2317_v35, %v4237_v52  ;;  %v5916_v7 = vmax.f32 %v4981_v16, %v4983_v17  ;;  %v5918_v17 = vmax.f32 %v5001_v26, %v5003_v27  ;;  %v5920_v27 = vmax.f32 %v5021_v48, %v5023_v49 }
 0x16d   : > { %v3021_v25 = vmax.f32 %v2316_v21, %v2702_v8  ;;  %v4138_v62 = vpop.f32.mrb[66].mxu0  ;;  %v5922_v49 = vmax.f32 %v5041_v12, %v5043_v13  ;;  %v5924_v13 = vmax.f32 %v5061_v46, %v5063_v47  ;;  %v5926_v47 = vmax.f32 %v5079_v59, %v5081_v2 }
 0x16e   : > { %v4240_v55 = vpop.f32.mrb[66].mxu1  ;;  %v3093_v18 = vadd.f32 %v5354_v1, %v3022_v32  ;;  %v2319_v31 = vmax.f32 %v5908_v30, %v4138_v62  ;;  %v2007_v45 = vpop.f32.mrb[67].mxu0  ;;  %v5928_v2 = vmax.f32 %v5093_v38, %v5095_v39  ;;  %v5930_v39 = vmax.f32 %v5105_v5, %v5107_v14  ;;  %v5934_v14 = vld [vmem:[#allocation4_spill] sm:$0xff] }
 0x16f   : > { %v2712_v4 = vpop.f32.mrb[67].mxu1  ;;  %v3092_v33 = vadd.f32 %v5354_v1, %v3021_v25  ;;  %v2318_v32 = vmax.f32 %v5909_v34, %v2007_v45 }
 0x170   : > { %v3157_v35 = vmax.f32 %v3093_v18, 0.0  ;;  %v3024_v42 = vmax.f32 %v2319_v31, %v4240_v55 }
 0x171   : > { %v3156_v40 = vmax.f32 %v3092_v33, 0.0  ;;  %v3023_v41 = vmax.f32 %v2318_v32, %v2712_v4  ;;  %v4141_v52 = vpop.f32.mrb[68].mxu0 }
 0x172   : > { %v4243_v62 = vpop.f32.mrb[68].mxu1  ;;  %3222 = vst.msk [vmem:[%s5364_s24 + $0x8] sm:$0xff] %vm3220_vm2, %v3157_v35  ;;  %v3095_v8 = vadd.f32 %v5354_v1, %v3024_v42  ;;  %v2321_v21 = vmax.f32 %v5910_v11, %v4141_v52  ;;  %v2017_v25 = vpop.f32.mrb[69].mxu0 }
 0x173   : > { %v2722_v30 = vpop.f32.mrb[69].mxu1  ;;  %3221 = vst.msk [vmem:[%s5364_s24] sm:$0xff] %vm3220_vm2, %v3156_v40  ;;  %v3094_v43 = vadd.f32 %v5354_v1, %v3023_v41  ;;  %v2320_v55 = vmax.f32 %v5911_v44, %v2017_v25 }
 0x174   : > { %v3159_v18 = vmax.f32 %v3095_v8, 0.0  ;;  %v3026_v31 = vmax.f32 %v2321_v21, %v4243_v62 }
 0x175   : > { %v3158_v45 = vmax.f32 %v3094_v43, 0.0  ;;  %v3025_v4 = vmax.f32 %v2320_v55, %v2722_v30  ;;  %v4144_v33 = vpop.f32.mrb[70].mxu0 }
 0x176   : > { %v4246_v34 = vpop.f32.mrb[70].mxu1  ;;  %3224 = vst.msk [vmem:[%s5364_s24 + $0x18] sm:$0xff] %vm3220_vm2, %v3159_v18  ;;  %v3097_v50 = vadd.f32 %v5354_v1, %v3026_v31  ;;  %v2323_v32 = vmax.f32 %v5912_v51, %v4144_v33  ;;  %v2027_v35 = vpop.f32.mrb[71].mxu0 }
 0x177   : > { %v2732_v42 = vpop.f32.mrb[71].mxu1  ;;  %3223 = vst.msk [vmem:[%s5364_s24 + $0x10] sm:$0xff] %vm3220_vm2, %v3158_v45  ;;  %v3096_v53 = vadd.f32 %v5354_v1, %v3025_v4  ;;  %v2322_v40 = vmax.f32 %v5913_v54, %v2027_v35 }
 0x178   : > { %v3161_v41 = vmax.f32 %v3097_v50, 0.0  ;;  %v3028_v52 = vmax.f32 %v2323_v32, %v4246_v34 }
 0x179   : > { %v3160_v62 = vmax.f32 %v3096_v53, 0.0  ;;  %v3027_v8 = vmax.f32 %v2322_v40, %v2732_v42  ;;  %v4147_v11 = vpop.f32.mrb[72].mxu0 }
 0x17a   : > { %v4249_v21 = vpop.f32.mrb[72].mxu1  ;;  %3226 = vst.msk [vmem:[%s5364_s24 + $0x28] sm:$0xff] %vm3220_vm2, %v3161_v41  ;;  %v3099_v60 = vadd.f32 %v5354_v1, %v3028_v52  ;;  %v2325_v25 = vmax.f32 %v5914_v61, %v4147_v11  ;;  %v2037_v30 = vpop.f32.mrb[73].mxu0 }
 0x17b   : > { %v2742_v43 = vpop.f32.mrb[73].mxu1  ;;  %3225 = vst.msk [vmem:[%s5364_s24 + $0x20] sm:$0xff] %vm3220_vm2, %v3160_v62  ;;  %v3098_v63 = vadd.f32 %v5354_v1, %v3027_v8  ;;  %v2324_v44 = vmax.f32 %v5915_v0, %v2037_v30 }
 0x17c   : > { %v3163_v55 = vmax.f32 %v3099_v60, 0.0  ;;  %v3030_v18 = vmax.f32 %v2325_v25, %v4249_v21 }
 0x17d   : > { %v3162_v31 = vmax.f32 %v3098_v63, 0.0  ;;  %v3029_v45 = vmax.f32 %v2324_v44, %v2742_v43  ;;  %v4150_v4 = vpop.f32.mrb[74].mxu0 }
 0x17e   : > { %v4252_v33 = vpop.f32.mrb[74].mxu1  ;;  %3228 = vst.msk [vmem:[%s5364_s24 + $0x38] sm:$0xff] %vm3220_vm2, %v3163_v55  ;;  %v3101_v6 = vadd.f32 %v5354_v1, %v3030_v18  ;;  %v2327_v34 = vmax.f32 %v5916_v7, %v4150_v4  ;;  %v2047_v50 = vpop.f32.mrb[75].mxu0 }
 0x17f   : > { %v2752_v51 = vpop.f32.mrb[75].mxu1  ;;  %3227 = vst.msk [vmem:[%s5364_s24 + $0x30] sm:$0xff] %vm3220_vm2, %v3162_v31  ;;  %v3100_v9 = vadd.f32 %v5354_v1, %v3029_v45  ;;  %v2326_v32 = vmax.f32 %v5917_v10, %v2047_v50 }
 0x180   : > { %v3165_v35 = vmax.f32 %v3101_v6, 0.0  ;;  %v3032_v42 = vmax.f32 %v2327_v34, %v4252_v33 }
 0x181   : > { %v3164_v53 = vmax.f32 %v3100_v9, 0.0  ;;  %v3031_v54 = vmax.f32 %v2326_v32, %v2752_v51  ;;  %v4153_v40 = vpop.f32.mrb[76].mxu0 }
 0x182   : > { %v4255_v41 = vpop.f32.mrb[76].mxu1  ;;  %3230 = vst.msk [vmem:[%s5364_s24 + $0x48] sm:$0xff] %vm3220_vm2, %v3165_v35  ;;  %v3103_v16 = vadd.f32 %v5354_v1, %v3032_v42  ;;  %v2329_v52 = vmax.f32 %v5918_v17, %v4153_v40  ;;  %v2057_v62 = vpop.f32.mrb[77].mxu0 }
 0x183   : > { %v2762_v8 = vpop.f32.mrb[77].mxu1  ;;  %3229 = vst.msk [vmem:[%s5364_s24 + $0x40] sm:$0xff] %vm3220_vm2, %v3164_v53  ;;  %v3102_v19 = vadd.f32 %v5354_v1, %v3031_v54  ;;  %v2328_v11 = vmax.f32 %v5919_v20, %v2057_v62 }
 0x184   : > { %v3167_v21 = vmax.f32 %v3103_v16, 0.0  ;;  %v3034_v60 = vmax.f32 %v2329_v52, %v4255_v41 }
 0x185   : > { %v3166_v61 = vmax.f32 %v3102_v19, 0.0  ;;  %v3033_v25 = vmax.f32 %v2328_v11, %v2762_v8  ;;  %v4156_v30 = vpop.f32.mrb[78].mxu0 }
 0x186   : > { %v4258_v43 = vpop.f32.mrb[78].mxu1  ;;  %3232 = vst.msk [vmem:[%s5364_s24 + $0x58] sm:$0xff] %vm3220_vm2, %v3167_v21  ;;  %v3105_v26 = vadd.f32 %v5354_v1, %v3034_v60  ;;  %v2331_v63 = vmax.f32 %v5920_v27, %v4156_v30  ;;  %v2067_v0 = vpop.f32.mrb[79].mxu0 }
 0x187   : > { %v2772_v44 = vpop.f32.mrb[79].mxu1  ;;  %3231 = vst.msk [vmem:[%s5364_s24 + $0x50] sm:$0xff] %vm3220_vm2, %v3166_v61  ;;  %v3104_v29 = vadd.f32 %v5354_v1, %v3033_v25  ;;  %v2330_v55 = vmax.f32 %v5921_v36, %v2067_v0 }
 0x188   : > { %v3169_v18 = vmax.f32 %v3105_v26, 0.0  ;;  %v3036_v31 = vmax.f32 %v2331_v63, %v4258_v43 }
 0x189   : > { %v3168_v45 = vmax.f32 %v3104_v29, 0.0  ;;  %v3035_v4 = vmax.f32 %v2330_v55, %v2772_v44  ;;  %v4159_v33 = vpop.f32.mrb[80].mxu0 }
 0x18a   : > { %v4261_v6 = vpop.f32.mrb[80].mxu1  ;;  %3234 = vst.msk [vmem:[%s5364_s24 + $0x68] sm:$0xff] %vm3220_vm2, %v3169_v18  ;;  %v3107_v48 = vadd.f32 %v5354_v1, %v3036_v31  ;;  %v2333_v7 = vmax.f32 %v5922_v49, %v4159_v33  ;;  %v2077_v34 = vpop.f32.mrb[81].mxu0 }
 0x18b   : > { %v2782_v50 = vpop.f32.mrb[81].mxu1  ;;  %3233 = vst.msk [vmem:[%s5364_s24 + $0x60] sm:$0xff] %vm3220_vm2, %v3168_v45  ;;  %v3106_v57 = vadd.f32 %v5354_v1, %v3035_v4  ;;  %v2332_v51 = vmax.f32 %v5923_v58, %v2077_v34 }
 0x18c   : > { %v3171_v9 = vmax.f32 %v3107_v48, 0.0  ;;  %v3038_v10 = vmax.f32 %v2333_v7, %v4261_v6  ;;  %v5932_v7 = vld [vmem:[#allocation3_spill] sm:$0xff] }
 0x18d   : > { %v3170_v32 = vmax.f32 %v3106_v57, 0.0  ;;  %v3037_v35 = vmax.f32 %v2332_v51, %v2782_v50  ;;  %v4162_v42 = vpop.f32.mrb[82].mxu0  ;;  %v5933_v34 = vmax.f32 %v5931_v56, %v5932_v7 }
 0x18e   : > { %v4264_v53 = vpop.f32.mrb[82].mxu1  ;;  %3236 = vst.msk [vmem:[%s5364_s24 + $0x78] sm:$0xff] %vm3220_vm2, %v3171_v9  ;;  %v3109_v12 = vadd.f32 %v5354_v1, %v3038_v10  ;;  %v2335_v54 = vmax.f32 %v5924_v13, %v4162_v42  ;;  %v2087_v40 = vpop.f32.mrb[83].mxu0 }
 0x18f   : > { %v2792_v41 = vpop.f32.mrb[83].mxu1  ;;  %3235 = vst.msk [vmem:[%s5364_s24 + $0x70] sm:$0xff] %vm3220_vm2, %v3170_v32  ;;  %v3108_v15 = vadd.f32 %v5354_v1, %v3037_v35  ;;  %v2334_v16 = vmax.f32 %v5925_v22, %v2087_v40  ;;  %v5935_v35 = vld [vmem:[#allocation5_spill] sm:$0xff]  ;;  %v5937_v40 = vld [vmem:[#allocation6_spill] sm:$0xff] }
 0x190   : > { %v3173_v17 = vmax.f32 %v3109_v12, 0.0  ;;  %v3040_v52 = vmax.f32 %v2335_v54, %v4264_v53  ;;  %v5936_v42 = vmax.f32 %v5934_v14, %v5935_v35 }
 0x191   : > { %v3172_v62 = vmax.f32 %v3108_v15, 0.0  ;;  %v3039_v8 = vmax.f32 %v2334_v16, %v2792_v41  ;;  %v4165_v19 = vpop.f32.mrb[84].mxu0  ;;  %v5938_v41 = vld [vmem:[#allocation7_spill] sm:$0xff] }
 0x192   : > { %v4267_v20 = vpop.f32.mrb[84].mxu1  ;;  %3238 = vst.msk [vmem:[%s5364_s24 + $0x88] sm:$0xff] %vm3220_vm2, %v3173_v17  ;;  %v3111_v46 = vadd.f32 %v5354_v1, %v3040_v52  ;;  %v2337_v11 = vmax.f32 %v5926_v47, %v4165_v19  ;;  %v2097_v21 = vpop.f32.mrb[85].mxu0  ;;  %v5939_v15 = vmax.f32 %v5937_v40, %v5938_v41  ;;  %v5941_v47 = vld [vmem:[#allocation9_spill] sm:$0xff] }
 0x193   : > { %v2802_v60 = vpop.f32.mrb[85].mxu1  ;;  %3237 = vst.msk [vmem:[%s5364_s24 + $0x80] sm:$0xff] %vm3220_vm2, %v3172_v62  ;;  %v3110_v23 = vadd.f32 %v5354_v1, %v3039_v8  ;;  %v2336_v61 = vmax.f32 %v5927_v3, %v2097_v21 }
 0x194   : > { %v3175_v25 = vmax.f32 %v3111_v46, 0.0  ;;  %v3042_v30 = vmax.f32 %v2337_v11, %v4267_v20  ;;  %v5940_v46 = vld [vmem:[#allocation8_spill] sm:$0xff] }
 0x195   : > { %v3174_v43 = vmax.f32 %v3110_v23, 0.0  ;;  %v3041_v26 = vmax.f32 %v2336_v61, %v2802_v60  ;;  %v4168_v27 = vpop.f32.mrb[86].mxu0  ;;  %v5942_v11 = vmax.f32 %v5940_v46, %v5941_v47  ;;  %v5943_v61 = vld [vmem:[#allocation10_spill] sm:$0xff] }
 0x196   : > { %v4270_v63 = vpop.f32.mrb[86].mxu1  ;;  %3240 = vst.msk [vmem:[%s5364_s24 + $0x98] sm:$0xff] %vm3220_vm2, %v3175_v25  ;;  %v3113_v59 = vadd.f32 %v5354_v1, %v3042_v30  ;;  %v2339_v0 = vmax.f32 %v5928_v2, %v4168_v27  ;;  %v2107_v44 = vpop.f32.mrb[87].mxu0  ;;  %v5944_v25 = vld [vmem:[#allocation11_spill] sm:$0xff] }
 0x197   : > { %v2812_v29 = vpop.f32.mrb[87].mxu1  ;;  %3239 = vst.msk [vmem:[%s5364_s24 + $0x90] sm:$0xff] %vm3220_vm2, %v3174_v43  ;;  %v3112_v37 = vadd.f32 %v5354_v1, %v3041_v26  ;;  %v2338_v36 = vmax.f32 %v5929_v24, %v2107_v44  ;;  %v5945_v30 = vmax.f32 %v5943_v61, %v5944_v25 }
 0x198   : > { %v3177_v55 = vmax.f32 %v3113_v59, 0.0  ;;  %v3044_v18 = vmax.f32 %v2339_v0, %v4270_v63 }
 0x199   : > { %v3176_v31 = vmax.f32 %v3112_v37, 0.0  ;;  %v3043_v45 = vmax.f32 %v2338_v36, %v2812_v29  ;;  %v4171_v4 = vpop.f32.mrb[88].mxu0  ;;  %v5946_v29 = vld [vmem:[#allocation12_spill] sm:$0xff]  ;;  %v5947_v37 = vld [vmem:[#allocation13_spill] sm:$0xff] }
 0x19a   : > { %v4273_v33 = vpop.f32.mrb[88].mxu1  ;;  %3242 = vst.msk [vmem:[%s5364_s24 + $0xa8] sm:$0xff] %vm3220_vm2, %v3177_v55  ;;  %v3115_v38 = vadd.f32 %v5354_v1, %v3044_v18  ;;  %v2341_v6 = vmax.f32 %v5930_v39, %v4171_v4  ;;  %v2117_v48 = vpop.f32.mrb[89].mxu0  ;;  %v5948_v24 = vmax.f32 %v5946_v29, %v5947_v37  ;;  %v5950_v4 = vld [vmem:[#allocation15_spill] sm:$0xff] }
 0x19b   : > { %v2822_v49 = vpop.f32.mrb[89].mxu1  ;;  %3241 = vst.msk [vmem:[%s5364_s24 + $0xa0] sm:$0xff] %vm3220_vm2, %v3176_v31  ;;  %v3114_v28 = vadd.f32 %v5354_v1, %v3043_v45  ;;  %v2340_v50 = vmax.f32 %v5933_v34, %v2117_v48  ;;  %v5949_v45 = vld [vmem:[#allocation14_spill] sm:$0xff]  ;;  %v5952_v34 = vld [vmem:[#allocation16_spill] sm:$0xff] }
 0x19c   : > { %v3179_v57 = vmax.f32 %v3115_v38, 0.0  ;;  %v3046_v58 = vmax.f32 %v2341_v6, %v4273_v33  ;;  %v5951_v33 = vmax.f32 %v5949_v45, %v5950_v4 }
 0x19d   : > { %v3178_v51 = vmax.f32 %v3114_v28, 0.0  ;;  %v3045_v9 = vmax.f32 %v2340_v50, %v2822_v49  ;;  %v4174_v10 = vpop.f32.mrb[90].mxu0  ;;  %v5953_v50 = vld [vmem:[#allocation17_spill] sm:$0xff] }
 0x19e   : > { %v4276_v32 = vpop.f32.mrb[90].mxu1  ;;  %3244 = vst.msk [vmem:[%s5364_s24 + $0xb8] sm:$0xff] %vm3220_vm2, %v3179_v57  ;;  %v3117_v5 = vadd.f32 %v5354_v1, %v3046_v58  ;;  %v2343_v53 = vmax.f32 %v5936_v42, %v4174_v10  ;;  %v2127_v12 = vpop.f32.mrb[91].mxu0  ;;  %v5954_v57 = vmax.f32 %v5952_v34, %v5953_v50 }
 0x19f   : > { %v2832_v13 = vpop.f32.mrb[91].mxu1  ;;  %3243 = vst.msk [vmem:[%s5364_s24 + $0xb0] sm:$0xff] %vm3220_vm2, %v3178_v51  ;;  %v3116_v54 = vadd.f32 %v5354_v1, %v3045_v9  ;;  %v2342_v22 = vmax.f32 %v5939_v15, %v2127_v12  ;;  %v5958_v15 = vld [vmem:[#allocation20_spill] sm:$0xff] }
 0x1a0   : > { %v3181_v16 = vmax.f32 %v3117_v5, 0.0  ;;  %v3048_v17 = vmax.f32 %v2343_v53, %v4276_v32  ;;  %v5955_v32 = vld [vmem:[#allocation18_spill] sm:$0xff]  ;;  %v5956_v5 = vld [vmem:[#allocation19_spill] sm:$0xff] }
 0x1a1   : > { %v3180_v52 = vmax.f32 %v3116_v54, 0.0  ;;  %v3047_v62 = vmax.f32 %v2342_v22, %v2832_v13  ;;  %v4177_v8 = vpop.f32.mrb[92].mxu0  ;;  %v5957_v14 = vmax.f32 %v5955_v32, %v5956_v5  ;;  %v5959_v22 = vld [vmem:[#allocation21_spill] sm:$0xff] }
 0x1a2   : > { %v4279_v19 = vpop.f32.mrb[92].mxu1  ;;  %3246 = vst.msk [vmem:[%s5364_s24 + $0xc8] sm:$0xff] %vm3220_vm2, %v3181_v16  ;;  %v3119_v20 = vadd.f32 %v5354_v1, %v3048_v17  ;;  %v2345_v21 = vmax.f32 %v5942_v11, %v4177_v8  ;;  %v2137_v60 = vpop.f32.mrb[93].mxu0  ;;  %v5960_v16 = vmax.f32 %v5958_v15, %v5959_v22 }
 0x1a3   : > { %v2842_v23 = vpop.f32.mrb[93].mxu1  ;;  %3245 = vst.msk [vmem:[%s5364_s24 + $0xc0] sm:$0xff] %vm3220_vm2, %v3180_v52  ;;  %v3118_v3 = vadd.f32 %v5354_v1, %v3047_v62  ;;  %v2344_v43 = vmax.f32 %v5945_v30, %v2137_v60  ;;  %v5964_v30 = vld [vmem:[#allocation24_spill] sm:$0xff] }
 0x1a4   : > { %v3183_v26 = vmax.f32 %v3119_v20, 0.0  ;;  %v3050_v27 = vmax.f32 %v2345_v21, %v4279_v19  ;;  %v5961_v19 = vld [vmem:[#allocation22_spill] sm:$0xff]  ;;  %v5962_v20 = vld [vmem:[#allocation23_spill] sm:$0xff] }
 0x1a5   : > { %v3182_v63 = vmax.f32 %v3118_v3, 0.0  ;;  %v3049_v59 = vmax.f32 %v2344_v43, %v2842_v23  ;;  %v4180_v2 = vpop.f32.mrb[94].mxu0  ;;  %v5963_v46 = vmax.f32 %v5961_v19, %v5962_v20  ;;  %v5965_v43 = vld [vmem:[#allocation25_spill] sm:$0xff] }
 0x1a6   : > { %v4282_v0 = vpop.f32.mrb[94].mxu1  ;;  %3248 = vst.msk [vmem:[%s5364_s24 + $0xd8] sm:$0xff] %vm3220_vm2, %v3183_v26  ;;  %v3121_v44 = vadd.f32 %v5354_v1, %v3050_v27  ;;  %v2347_v36 = vmax.f32 %v5948_v24, %v4180_v2  ;;  %v2147_v55 = vpop.f32.mrb[95].mxu0  ;;  %v5966_v26 = vmax.f32 %v5964_v30, %v5965_v43 }
 0x1a7   : > { %v2852_v18 = vpop.f32.mrb[95].mxu1  ;;  %3247 = vst.msk [vmem:[%s5364_s24 + $0xd0] sm:$0xff] %vm3220_vm2, %v3182_v63  ;;  %v3120_v31 = vadd.f32 %v5354_v1, %v3049_v59  ;;  %v2346_v38 = vmax.f32 %v5951_v33, %v2147_v55  ;;  %v5970_v33 = vld [vmem:[#allocation28_spill] sm:$0xff] }
 0x1a8   : > { %v3185_v39 = vmax.f32 %v3121_v44, 0.0  ;;  %v3052_v6 = vmax.f32 %v2347_v36, %v4282_v0  ;;  %v5967_v0 = vld [vmem:[#allocation26_spill] sm:$0xff]  ;;  %v5968_v44 = vld [vmem:[#allocation27_spill] sm:$0xff] }
 0x1a9   : > { %v3184_v48 = vmax.f32 %v3120_v31, 0.0  ;;  %v3051_v49 = vmax.f32 %v2346_v38, %v2852_v18  ;;  %v4183_v28 = vpop.f32.mrb[96].mxu0  ;;  %v5969_v29 = vmax.f32 %v5967_v0, %v5968_v44  ;;  %v5971_v38 = vld [vmem:[#allocation29_spill] sm:$0xff] }
 0x1aa   : > { %v4285_v56 = vpop.f32.mrb[96].mxu1  ;;  %3250 = vst.msk [vmem:[%s5364_s24 + $0xe8] sm:$0xff] %vm3220_vm2, %v3185_v39  ;;  %v3123_v7 = vadd.f32 %v5354_v1, %v3052_v6  ;;  %v2349_v58 = vmax.f32 %v5954_v57, %v4183_v28  ;;  %v2157_v51 = vpop.f32.mrb[97].mxu0  ;;  %v5972_v39 = vmax.f32 %v5970_v33, %v5971_v38 }
 0x1ab   : > { %v2862_v9 = vpop.f32.mrb[97].mxu1  ;;  %3249 = vst.msk [vmem:[%s5364_s24 + $0xe0] sm:$0xff] %vm3220_vm2, %v3184_v48  ;;  %v3122_v10 = vadd.f32 %v5354_v1, %v3051_v49  ;;  %v2348_v35 = vmax.f32 %v5957_v14, %v2157_v51  ;;  %v5976_v14 = vld [vmem:[#allocation32_spill] sm:$0xff] }
 0x1ac   : > { %v3187_v42 = vmax.f32 %v3123_v7, 0.0  ;;  %v3054_v53 = vmax.f32 %v2349_v58, %v4285_v56  ;;  %v5973_v56 = vld [vmem:[#allocation30_spill] sm:$0xff]  ;;  %v5974_v7 = vld [vmem:[#allocation31_spill] sm:$0xff] }
 0x1ad   : > { %v3186_v12 = vmax.f32 %v3122_v10, 0.0  ;;  %v3053_v13 = vmax.f32 %v2348_v35, %v2862_v9  ;;  %v4186_v54 = vpop.f32.mrb[98].mxu0  ;;  %v5975_v34 = vmax.f32 %v5973_v56, %v5974_v7  ;;  %v5977_v35 = vld [vmem:[#allocation33_spill] sm:$0xff] }
 0x1ae   : > { %v4288_v40 = vpop.f32.mrb[98].mxu1  ;;  %3252 = vst.msk [vmem:[%s5364_s24 + $0xf8] sm:$0xff] %vm3220_vm2, %v3187_v42  ;;  %v3125_v41 = vadd.f32 %v5354_v1, %v3054_v53  ;;  %v2351_v17 = vmax.f32 %v5960_v16, %v4186_v54  ;;  %v2167_v52 = vpop.f32.mrb[99].mxu0  ;;  %v5978_v42 = vmax.f32 %v5976_v14, %v5977_v35 }
 0x1af   : > { %v2872_v62 = vpop.f32.mrb[99].mxu1  ;;  %3251 = vst.msk [vmem:[%s5364_s24 + $0xf0] sm:$0xff] %vm3220_vm2, %v3186_v12  ;;  %v3124_v8 = vadd.f32 %v5354_v1, %v3053_v13  ;;  %v2350_v47 = vmax.f32 %v5963_v46, %v2167_v52  ;;  %v5982_v46 = vld [vmem:[#allocation36_spill] sm:$0xff] }
 0x1b0   : > { %v3189_v11 = vmax.f32 %v3125_v41, 0.0  ;;  %v3056_v21 = vmax.f32 %v2351_v17, %v4288_v40  ;;  %v5979_v40 = vld [vmem:[#allocation34_spill] sm:$0xff]  ;;  %v5980_v41 = vld [vmem:[#allocation35_spill] sm:$0xff] }
 0x1b1   : > { %v3188_v60 = vmax.f32 %v3124_v8, 0.0  ;;  %v3055_v23 = vmax.f32 %v2350_v47, %v2872_v62  ;;  %v4189_v3 = vpop.f32.mrb[100].mxu0  ;;  %v5981_v15 = vmax.f32 %v5979_v40, %v5980_v41  ;;  %v5983_v47 = vld [vmem:[#allocation37_spill] sm:$0xff] }
 0x1b2   : > { %v4291_v61 = vpop.f32.mrb[100].mxu1  ;;  %3254 = vst.msk [vmem:[%s5364_s24 + $0x108] sm:$0xff] %vm3220_vm2, %v3189_v11  ;;  %v3127_v25 = vadd.f32 %v5354_v1, %v3056_v21  ;;  %v2353_v27 = vmax.f32 %v5966_v26, %v4189_v3  ;;  %v2177_v63 = vpop.f32.mrb[101].mxu0  ;;  %v5984_v11 = vmax.f32 %v5982_v46, %v5983_v47 }
 0x1b3   : > { %v2882_v59 = vpop.f32.mrb[101].mxu1  ;;  %3253 = vst.msk [vmem:[%s5364_s24 + $0x100] sm:$0xff] %vm3220_vm2, %v3188_v60  ;;  %v3126_v2 = vadd.f32 %v5354_v1, %v3055_v23  ;;  %v2352_v37 = vmax.f32 %v5969_v29, %v2177_v63  ;;  %v5988_v29 = vld [vmem:[#allocation40_spill] sm:$0xff] }
 0x1b4   : > { %v3191_v24 = vmax.f32 %v3127_v25, 0.0  ;;  %v3058_v36 = vmax.f32 %v2353_v27, %v4291_v61  ;;  %v5985_v61 = vld [vmem:[#allocation38_spill] sm:$0xff]  ;;  %v5986_v25 = vld [vmem:[#allocation39_spill] sm:$0xff] }
 0x1b5   : > { %v3190_v55 = vmax.f32 %v3126_v2, 0.0  ;;  %v3057_v18 = vmax.f32 %v2352_v37, %v2882_v59  ;;  %v4192_v31 = vpop.f32.mrb[102].mxu0  ;;  %v5987_v30 = vmax.f32 %v5985_v61, %v5986_v25  ;;  %v5989_v37 = vld [vmem:[#allocation41_spill] sm:$0xff] }
 0x1b6   : > { %v4294_v45 = vpop.f32.mrb[102].mxu1  ;;  %3256 = vst.msk [vmem:[%s5364_s24 + $0x118] sm:$0xff] %vm3220_vm2, %v3191_v24  ;;  %v3129_v4 = vadd.f32 %v5354_v1, %v3058_v36  ;;  %v2355_v6 = vmax.f32 %v5972_v39, %v4192_v31  ;;  %v2187_v48 = vpop.f32.mrb[103].mxu0  ;;  %v5990_v24 = vmax.f32 %v5988_v29, %v5989_v37 }
 0x1b7   : > { %v2892_v49 = vpop.f32.mrb[103].mxu1  ;;  %3255 = vst.msk [vmem:[%s5364_s24 + $0x110] sm:$0xff] %vm3220_vm2, %v3190_v55  ;;  %v3128_v28 = vadd.f32 %v5354_v1, %v3057_v18  ;;  %v2354_v50 = vmax.f32 %v5975_v34, %v2187_v48  ;;  %v5994_v34 = vld [vmem:[#allocation44_spill] sm:$0xff] }
 0x1b8   : > { %v3193_v57 = vmax.f32 %v3129_v4, 0.0  ;;  %v3060_v58 = vmax.f32 %v2355_v6, %v4294_v45  ;;  %v5991_v45 = vld [vmem:[#allocation42_spill] sm:$0xff]  ;;  %v5992_v4 = vld [vmem:[#allocation43_spill] sm:$0xff] }
 0x1b9   : > { %v3192_v51 = vmax.f32 %v3128_v28, 0.0  ;;  %v3059_v9 = vmax.f32 %v2354_v50, %v2892_v49  ;;  %v4195_v10 = vpop.f32.mrb[104].mxu0  ;;  %v5993_v33 = vmax.f32 %v5991_v45, %v5992_v4  ;;  %v5995_v50 = vld [vmem:[#allocation45_spill] sm:$0xff] }
 0x1ba   : > { %v4297_v32 = vpop.f32.mrb[104].mxu1  ;;  %3258 = vst.msk [vmem:[%s5364_s24 + $0x128] sm:$0xff] %vm3220_vm2, %v3193_v57  ;;  %v3131_v5 = vadd.f32 %v5354_v1, %v3060_v58  ;;  %v2357_v53 = vmax.f32 %v5978_v42, %v4195_v10  ;;  %v2197_v12 = vpop.f32.mrb[105].mxu0  ;;  %v5996_v57 = vmax.f32 %v5994_v34, %v5995_v50 }
 0x1bb   : > { %v2902_v13 = vpop.f32.mrb[105].mxu1  ;;  %3257 = vst.msk [vmem:[%s5364_s24 + $0x120] sm:$0xff] %vm3220_vm2, %v3192_v51  ;;  %v3130_v54 = vadd.f32 %v5354_v1, %v3059_v9  ;;  %v2356_v22 = vmax.f32 %v5981_v15, %v2197_v12  ;;  %v6000_v15 = vld [vmem:[#allocation48_spill] sm:$0xff] }
 0x1bc   : > { %v3195_v16 = vmax.f32 %v3131_v5, 0.0  ;;  %v3062_v17 = vmax.f32 %v2357_v53, %v4297_v32  ;;  %v5997_v32 = vld [vmem:[#allocation46_spill] sm:$0xff]  ;;  %v5998_v5 = vld [vmem:[#allocation47_spill] sm:$0xff] }
 0x1bd   : > { %v3194_v52 = vmax.f32 %v3130_v54, 0.0  ;;  %v3061_v62 = vmax.f32 %v2356_v22, %v2902_v13  ;;  %v4198_v8 = vpop.f32.mrb[106].mxu0  ;;  %v5999_v14 = vmax.f32 %v5997_v32, %v5998_v5  ;;  %v6001_v22 = vld [vmem:[#allocation49_spill] sm:$0xff] }
 0x1be   : > { %v4300_v19 = vpop.f32.mrb[106].mxu1  ;;  %3260 = vst.msk [vmem:[%s5364_s24 + $0x138] sm:$0xff] %vm3220_vm2, %v3195_v16  ;;  %v3133_v20 = vadd.f32 %v5354_v1, %v3062_v17  ;;  %v2359_v21 = vmax.f32 %v5984_v11, %v4198_v8  ;;  %v2207_v60 = vpop.f32.mrb[107].mxu0  ;;  %v6002_v16 = vmax.f32 %v6000_v15, %v6001_v22 }
 0x1bf   : > { %v2912_v23 = vpop.f32.mrb[107].mxu1  ;;  %3259 = vst.msk [vmem:[%s5364_s24 + $0x130] sm:$0xff] %vm3220_vm2, %v3194_v52  ;;  %v3132_v3 = vadd.f32 %v5354_v1, %v3061_v62  ;;  %v2358_v43 = vmax.f32 %v5987_v30, %v2207_v60  ;;  %v6006_v30 = vld [vmem:[#allocation52_spill] sm:$0xff] }
 0x1c0   : > { %v3197_v26 = vmax.f32 %v3133_v20, 0.0  ;;  %v3064_v27 = vmax.f32 %v2359_v21, %v4300_v19  ;;  %v6003_v19 = vld [vmem:[#allocation50_spill] sm:$0xff]  ;;  %v6004_v20 = vld [vmem:[#allocation51_spill] sm:$0xff] }
 0x1c1   : > { %v3196_v63 = vmax.f32 %v3132_v3, 0.0  ;;  %v3063_v59 = vmax.f32 %v2358_v43, %v2912_v23  ;;  %v4201_v2 = vpop.f32.mrb[108].mxu0  ;;  %v6005_v46 = vmax.f32 %v6003_v19, %v6004_v20  ;;  %v6007_v43 = vld [vmem:[#allocation53_spill] sm:$0xff] }
 0x1c2   : > { %v4303_v0 = vpop.f32.mrb[108].mxu1  ;;  %3262 = vst.msk [vmem:[%s5364_s24 + $0x148] sm:$0xff] %vm3220_vm2, %v3197_v26  ;;  %v3135_v44 = vadd.f32 %v5354_v1, %v3064_v27  ;;  %v2361_v36 = vmax.f32 %v5990_v24, %v4201_v2  ;;  %v2217_v55 = vpop.f32.mrb[109].mxu0  ;;  %v6008_v26 = vmax.f32 %v6006_v30, %v6007_v43 }
 0x1c3   : > { %v2922_v18 = vpop.f32.mrb[109].mxu1  ;;  %3261 = vst.msk [vmem:[%s5364_s24 + $0x140] sm:$0xff] %vm3220_vm2, %v3196_v63  ;;  %v3134_v31 = vadd.f32 %v5354_v1, %v3063_v59  ;;  %v2360_v38 = vmax.f32 %v5993_v33, %v2217_v55  ;;  %v6012_v33 = vld [vmem:[#allocation56_spill] sm:$0xff] }
 0x1c4   : > { %v3199_v39 = vmax.f32 %v3135_v44, 0.0  ;;  %v3066_v6 = vmax.f32 %v2361_v36, %v4303_v0  ;;  %v6009_v0 = vld [vmem:[#allocation54_spill] sm:$0xff]  ;;  %v6010_v44 = vld [vmem:[#allocation55_spill] sm:$0xff] }
 0x1c5   : > { %v3198_v48 = vmax.f32 %v3134_v31, 0.0  ;;  %v3065_v49 = vmax.f32 %v2360_v38, %v2922_v18  ;;  %v4204_v28 = vpop.f32.mrb[110].mxu0  ;;  %v6011_v29 = vmax.f32 %v6009_v0, %v6010_v44  ;;  %v6013_v38 = vld [vmem:[#allocation57_spill] sm:$0xff] }
 0x1c6   : > { %v4306_v56 = vpop.f32.mrb[110].mxu1  ;;  %3264 = vst.msk [vmem:[%s5364_s24 + $0x158] sm:$0xff] %vm3220_vm2, %v3199_v39  ;;  %v3137_v7 = vadd.f32 %v5354_v1, %v3066_v6  ;;  %v2363_v58 = vmax.f32 %v5996_v57, %v4204_v28  ;;  %v2227_v51 = vpop.f32.mrb[111].mxu0  ;;  %v6014_v39 = vmax.f32 %v6012_v33, %v6013_v38 }
 0x1c7   : > { %v2932_v9 = vpop.f32.mrb[111].mxu1  ;;  %3263 = vst.msk [vmem:[%s5364_s24 + $0x150] sm:$0xff] %vm3220_vm2, %v3198_v48  ;;  %v3136_v10 = vadd.f32 %v5354_v1, %v3065_v49  ;;  %v2362_v35 = vmax.f32 %v5999_v14, %v2227_v51  ;;  %v6018_v14 = vld [vmem:[#allocation60_spill] sm:$0xff] }
 0x1c8   : > { %v3201_v42 = vmax.f32 %v3137_v7, 0.0  ;;  %v3068_v53 = vmax.f32 %v2363_v58, %v4306_v56  ;;  %v6015_v56 = vld [vmem:[#allocation58_spill] sm:$0xff]  ;;  %v6016_v7 = vld [vmem:[#allocation59_spill] sm:$0xff] }
 0x1c9   : > { %v3200_v12 = vmax.f32 %v3136_v10, 0.0  ;;  %v3067_v13 = vmax.f32 %v2362_v35, %v2932_v9  ;;  %v4207_v54 = vpop.f32.mrb[112].mxu0  ;;  %v6017_v34 = vmax.f32 %v6015_v56, %v6016_v7  ;;  %v6019_v35 = vld [vmem:[#allocation61_spill] sm:$0xff] }
 0x1ca   : > { %v4309_v40 = vpop.f32.mrb[112].mxu1  ;;  %3266 = vst.msk [vmem:[%s5364_s24 + $0x168] sm:$0xff] %vm3220_vm2, %v3201_v42  ;;  %v3139_v41 = vadd.f32 %v5354_v1, %v3068_v53  ;;  %v2365_v17 = vmax.f32 %v6002_v16, %v4207_v54  ;;  %v2237_v52 = vpop.f32.mrb[113].mxu0  ;;  %v6020_v42 = vmax.f32 %v6018_v14, %v6019_v35 }
 0x1cb   : > { %v2942_v62 = vpop.f32.mrb[113].mxu1  ;;  %3265 = vst.msk [vmem:[%s5364_s24 + $0x160] sm:$0xff] %vm3220_vm2, %v3200_v12  ;;  %v3138_v8 = vadd.f32 %v5354_v1, %v3067_v13  ;;  %v2364_v47 = vmax.f32 %v6005_v46, %v2237_v52  ;;  %v6024_v46 = vld [vmem:[#allocation64_spill] sm:$0xff] }
 0x1cc   : > { %v3203_v11 = vmax.f32 %v3139_v41, 0.0  ;;  %v3070_v21 = vmax.f32 %v2365_v17, %v4309_v40  ;;  %v6021_v40 = vld [vmem:[#allocation62_spill] sm:$0xff]  ;;  %v6022_v41 = vld [vmem:[#allocation63_spill] sm:$0xff] }
 0x1cd   : > { %v3202_v60 = vmax.f32 %v3138_v8, 0.0  ;;  %v3069_v23 = vmax.f32 %v2364_v47, %v2942_v62  ;;  %v4210_v3 = vpop.f32.mrb[114].mxu0  ;;  %v6023_v15 = vmax.f32 %v6021_v40, %v6022_v41  ;;  %v6025_v47 = vld [vmem:[#allocation65_spill] sm:$0xff] }
 0x1ce   : > { %v4312_v61 = vpop.f32.mrb[114].mxu1  ;;  %3268 = vst.msk [vmem:[%s5364_s24 + $0x178] sm:$0xff] %vm3220_vm2, %v3203_v11  ;;  %v3141_v25 = vadd.f32 %v5354_v1, %v3070_v21  ;;  %v2367_v27 = vmax.f32 %v6008_v26, %v4210_v3  ;;  %v2247_v63 = vpop.f32.mrb[115].mxu0  ;;  %v6026_v11 = vmax.f32 %v6024_v46, %v6025_v47 }
 0x1cf   : > { %v2952_v59 = vpop.f32.mrb[115].mxu1  ;;  %3267 = vst.msk [vmem:[%s5364_s24 + $0x170] sm:$0xff] %vm3220_vm2, %v3202_v60  ;;  %v3140_v2 = vadd.f32 %v5354_v1, %v3069_v23  ;;  %v2366_v37 = vmax.f32 %v6011_v29, %v2247_v63  ;;  %v6030_v29 = vld [vmem:[#allocation68_spill] sm:$0xff] }
 0x1d0   : > { %v3205_v24 = vmax.f32 %v3141_v25, 0.0  ;;  %v3072_v36 = vmax.f32 %v2367_v27, %v4312_v61  ;;  %v6027_v61 = vld [vmem:[#allocation66_spill] sm:$0xff]  ;;  %v6028_v25 = vld [vmem:[#allocation67_spill] sm:$0xff] }
 0x1d1   : > { %v3204_v55 = vmax.f32 %v3140_v2, 0.0  ;;  %v3071_v18 = vmax.f32 %v2366_v37, %v2952_v59  ;;  %v4213_v31 = vpop.f32.mrb[116].mxu0  ;;  %v6029_v30 = vmax.f32 %v6027_v61, %v6028_v25  ;;  %v6031_v37 = vld [vmem:[#allocation69_spill] sm:$0xff] }
 0x1d2   : > { %v4315_v45 = vpop.f32.mrb[116].mxu1  ;;  %3270 = vst.msk [vmem:[%s5364_s24 + $0x188] sm:$0xff] %vm3220_vm2, %v3205_v24  ;;  %v3143_v4 = vadd.f32 %v5354_v1, %v3072_v36  ;;  %v2369_v6 = vmax.f32 %v6014_v39, %v4213_v31  ;;  %v2257_v48 = vpop.f32.mrb[117].mxu0  ;;  %v6032_v24 = vmax.f32 %v6030_v29, %v6031_v37 }
 0x1d3   : > { %v2962_v49 = vpop.f32.mrb[117].mxu1  ;;  %3269 = vst.msk [vmem:[%s5364_s24 + $0x180] sm:$0xff] %vm3220_vm2, %v3204_v55  ;;  %v3142_v28 = vadd.f32 %v5354_v1, %v3071_v18  ;;  %v2368_v50 = vmax.f32 %v6017_v34, %v2257_v48  ;;  %v6036_v34 = vld [vmem:[#allocation72_spill] sm:$0xff] }
 0x1d4   : > { %v3207_v57 = vmax.f32 %v3143_v4, 0.0  ;;  %v3074_v58 = vmax.f32 %v2369_v6, %v4315_v45  ;;  %v6033_v45 = vld [vmem:[#allocation70_spill] sm:$0xff]  ;;  %v6034_v4 = vld [vmem:[#allocation71_spill] sm:$0xff] }
 0x1d5   : > { %v3206_v51 = vmax.f32 %v3142_v28, 0.0  ;;  %v3073_v9 = vmax.f32 %v2368_v50, %v2962_v49  ;;  %v4216_v10 = vpop.f32.mrb[118].mxu0  ;;  %v6035_v33 = vmax.f32 %v6033_v45, %v6034_v4  ;;  %v6037_v50 = vld [vmem:[#allocation73_spill] sm:$0xff] }
 0x1d6   : > { %v4318_v32 = vpop.f32.mrb[118].mxu1  ;;  %3272 = vst.msk [vmem:[%s5364_s24 + $0x198] sm:$0xff] %vm3220_vm2, %v3207_v57  ;;  %v3145_v5 = vadd.f32 %v5354_v1, %v3074_v58  ;;  %v2371_v53 = vmax.f32 %v6020_v42, %v4216_v10  ;;  %v2267_v12 = vpop.f32.mrb[119].mxu0  ;;  %v6038_v57 = vmax.f32 %v6036_v34, %v6037_v50 }
 0x1d7   : > { %v2972_v13 = vpop.f32.mrb[119].mxu1  ;;  %3271 = vst.msk [vmem:[%s5364_s24 + $0x190] sm:$0xff] %vm3220_vm2, %v3206_v51  ;;  %v3144_v54 = vadd.f32 %v5354_v1, %v3073_v9  ;;  %v2370_v22 = vmax.f32 %v6023_v15, %v2267_v12  ;;  %v6042_v15 = vld [vmem:[#allocation76_spill] sm:$0xff] }
 0x1d8   : > { %v3209_v16 = vmax.f32 %v3145_v5, 0.0  ;;  %v3076_v17 = vmax.f32 %v2371_v53, %v4318_v32  ;;  %v6039_v32 = vld [vmem:[#allocation74_spill] sm:$0xff]  ;;  %v6040_v5 = vld [vmem:[#allocation75_spill] sm:$0xff] }
 0x1d9   : > { %v3208_v52 = vmax.f32 %v3144_v54, 0.0  ;;  %v3075_v62 = vmax.f32 %v2370_v22, %v2972_v13  ;;  %v4219_v8 = vpop.f32.mrb[120].mxu0  ;;  %v6041_v14 = vmax.f32 %v6039_v32, %v6040_v5  ;;  %v6043_v22 = vld [vmem:[#allocation77_spill] sm:$0xff] }
 0x1da   : > { %v4321_v19 = vpop.f32.mrb[120].mxu1  ;;  %3274 = vst.msk [vmem:[%s5364_s24 + $0x1a8] sm:$0xff] %vm3220_vm2, %v3209_v16  ;;  %v3147_v20 = vadd.f32 %v5354_v1, %v3076_v17  ;;  %v2373_v21 = vmax.f32 %v6026_v11, %v4219_v8  ;;  %v2277_v60 = vpop.f32.mrb[121].mxu0  ;;  %v6044_v16 = vmax.f32 %v6042_v15, %v6043_v22 }
 0x1db   : > { %v2982_v23 = vpop.f32.mrb[121].mxu1  ;;  %3273 = vst.msk [vmem:[%s5364_s24 + $0x1a0] sm:$0xff] %vm3220_vm2, %v3208_v52  ;;  %v3146_v3 = vadd.f32 %v5354_v1, %v3075_v62  ;;  %v2372_v43 = vmax.f32 %v6029_v30, %v2277_v60 }
 0x1dc   : > { %v3211_v26 = vmax.f32 %v3147_v20, 0.0  ;;  %v3078_v27 = vmax.f32 %v2373_v21, %v4321_v19  ;;  %v6045_v19 = vld [vmem:[#allocation78_spill] sm:$0xff]  ;;  %v6046_v20 = vld [vmem:[#allocation79_spill] sm:$0xff] }
 0x1dd   : > { %v3210_v63 = vmax.f32 %v3146_v3, 0.0  ;;  %v3077_v59 = vmax.f32 %v2372_v43, %v2982_v23  ;;  %v4222_v2 = vpop.f32.mrb[122].mxu0  ;;  %v6047_v46 = vmax.f32 %v6045_v19, %v6046_v20 }
 0x1de   : > { %v4324_v0 = vpop.f32.mrb[122].mxu1  ;;  %3276 = vst.msk [vmem:[%s5364_s24 + $0x1b8] sm:$0xff] %vm3220_vm2, %v3211_v26  ;;  %v3149_v44 = vadd.f32 %v5354_v1, %v3078_v27  ;;  %v2375_v36 = vmax.f32 %v6032_v24, %v4222_v2  ;;  %v2287_v55 = vpop.f32.mrb[123].mxu0 }
 0x1df   : > { %v2992_v18 = vpop.f32.mrb[123].mxu1  ;;  %3275 = vst.msk [vmem:[%s5364_s24 + $0x1b0] sm:$0xff] %vm3220_vm2, %v3210_v63  ;;  %v3148_v31 = vadd.f32 %v5354_v1, %v3077_v59  ;;  %v2374_v38 = vmax.f32 %v6035_v33, %v2287_v55 }
 0x1e0   : > { %v3213_v39 = vmax.f32 %v3149_v44, 0.0  ;;  %v3080_v6 = vmax.f32 %v2375_v36, %v4324_v0 }
 0x1e1   : > { %v3212_v48 = vmax.f32 %v3148_v31, 0.0  ;;  %v3079_v49 = vmax.f32 %v2374_v38, %v2992_v18  ;;  %v4225_v28 = vpop.f32.mrb[124].mxu0 }
 0x1e2   : > { %v4327_v56 = vpop.f32.mrb[124].mxu1  ;;  %3278 = vst.msk [vmem:[%s5364_s24 + $0x1c8] sm:$0xff] %vm3220_vm2, %v3213_v39  ;;  %v3151_v7 = vadd.f32 %v5354_v1, %v3080_v6  ;;  %v2377_v58 = vmax.f32 %v6038_v57, %v4225_v28  ;;  %v2297_v51 = vpop.f32.mrb[125].mxu0 }
 0x1e3   : > { %v3002_v9 = vpop.f32.mrb[125].mxu1  ;;  %3277 = vst.msk [vmem:[%s5364_s24 + $0x1c0] sm:$0xff] %vm3220_vm2, %v3212_v48  ;;  %v3150_v10 = vadd.f32 %v5354_v1, %v3079_v49  ;;  %v2376_v35 = vmax.f32 %v6041_v14, %v2297_v51 }
 0x1e4   : > { %v3215_v42 = vmax.f32 %v3151_v7, 0.0  ;;  %v3082_v53 = vmax.f32 %v2377_v58, %v4327_v56 }
 0x1e5   : > { %v3214_v12 = vmax.f32 %v3150_v10, 0.0  ;;  %v3081_v13 = vmax.f32 %v2376_v35, %v3002_v9  ;;  %v4228_v54 = vpop.f32.mrb[126].mxu0 }
 0x1e6   : > { %v4330_v40 = vpop.f32.mrb[126].mxu1  ;;  %3280 = vst.msk [vmem:[%s5364_s24 + $0x1d8] sm:$0xff] %vm3220_vm2, %v3215_v42  ;;  %v3153_v41 = vadd.f32 %v5354_v1, %v3082_v53  ;;  %v2379_v17 = vmax.f32 %v6044_v16, %v4228_v54  ;;  %v2307_v52 = vpop.f32.mrb[127].mxu0 }
 0x1e7   : > { %v3012_v62 = vpop.f32.mrb[127].mxu1  ;;  %3279 = vst.msk [vmem:[%s5364_s24 + $0x1d0] sm:$0xff] %vm3220_vm2, %v3214_v12  ;;  %v3152_v8 = vadd.f32 %v5354_v1, %v3081_v13  ;;  %v2378_v47 = vmax.f32 %v6047_v46, %v2307_v52 }
 0x1e8   : > { %v3217_v11 = vmax.f32 %v3153_v41, 0.0  ;;  %v3084_v21 = vmax.f32 %v2379_v17, %v4330_v40 }
 0x1e9   : > { %v3216_v60 = vmax.f32 %v3152_v8, 0.0  ;;  %v3083_v23 = vmax.f32 %v2378_v47, %v3012_v62 }
 0x1ea   : > { %3282 = vst.msk [vmem:[%s5364_s24 + $0x1e8] sm:$0xff] %vm3220_vm2, %v3217_v11  ;;  %v3155_v3 = vadd.f32 %v5354_v1, %v3084_v21 }
 0x1eb   : > { %3281 = vst.msk [vmem:[%s5364_s24 + $0x1e0] sm:$0xff] %vm3220_vm2, %v3216_v60  ;;  %v3154_v61 = vadd.f32 %v5354_v1, %v3083_v23 }
 0x1ec   : > { %v3219_v25 = vmax.f32 %v3155_v3, 0.0 }
 0x1ed   : > { %v3218_v30 = vmax.f32 %v3154_v61, 0.0 }
 0x1ee   : > { %3284 = vst.msk [vmem:[%s5364_s24 + $0x1f8] sm:$0xff] %vm3220_vm2, %v3219_v25 }
 0x1ef   : > { %3283 = vst.msk [vmem:[%s5364_s24 + $0x1f0] sm:$0xff] %vm3220_vm2, %v3218_v30 }
 0x1f0 PF: > { %s16_s21 = sadd.s32 1, %s4361_s21  }
 0x1f1   : > { %p13_p4 = scmp.ge.s32.totalorder %s16_s21, 6  }
 0x1f3   :  { %15 = sbr.rel (!%p13_p4) target bundleno = 1 (0x1), region = 83 }

// kernel: encoder_forward.7
= control target key start
LH: loop header
LB: loop body
LE: loop exit
PB: predicated region body
PF: predicated region fallthrough
CT: control target
= control target key end

     0   :  { %vm96_vm0 = vcmask 588800   ;;  %vm2924_vm1 = vcmask 130048   ;;  %s6059_s4 = inlined_call_operand.vmem [shape: f32[72,16], index: 4, kind: input, shape index: {}]   ;;  %s6060_s0 = inlined_call_operand.vmem [shape: f32[512,72], index: 0, kind: input, shape index: {}]   ;;  %s6061_s1 = inlined_call_operand.vmem [shape: f32[512,72], index: 1, kind: input, shape index: {}]   ;;  %s6062_s2 = inlined_call_operand.vmem [shape: f32[512,72], index: 2, kind: input, shape index: {}]   ;;  %s6063_s3 = inlined_call_operand.vmem [shape: f32[512,72], index: 3, kind: input, shape index: {}]   ;;  %s6064_s5 = inlined_call_operand.vmem [shape: f32[1,16], index: 5, kind: input, shape index: {}]   ;;  %s6065_s6 = inlined_call_operand.vmem [shape: f32[512,16], index: 6, kind: output, shape index: {}]  }
   0x1   :  { %v23_v0 = vld [vmem:[%s6059_s4] sm:$0xff]  ;;  %v24_v1 = vld [vmem:[%s6059_s4 + $0x8] sm:$0xff]  ;;  %v25_v2 = vld [vmem:[%s6059_s4 + $0x10] sm:$0xff] }
   0x2   :  { %v3998_v3 = vpack.c.bf16 %v24_v1, %v23_v0  ;;  %v26_v4 = vld [vmem:[%s6059_s4 + $0x18] sm:$0xff]  ;;  %v27_v6 = vld [vmem:[%s6059_s4 + $0x20] sm:$0xff]  ;;  %v28_v7 = vld [vmem:[%s6059_s4 + $0x28] sm:$0xff] }
   0x3   :  { %v4002_v5 = vpack.c.bf16 %v26_v4, %v25_v2  ;;  %v32_v8 = vld [vmem:[%s6060_s0] sm:$0xff]  ;;  %v4006_v10 = vpack.c.bf16 %v28_v7, %v27_v6  ;;  %v29_v11 = vld [vmem:[%s6059_s4 + $0x30] sm:$0xff]  ;;  %v30_v12 = vld [vmem:[%s6059_s4 + $0x38] sm:$0xff] }
   0x4   :  { %3999 = vmatprep.subr.bf16.mxu0 %v3998_v3  ;;  %4015 = vmatprep.subr.bf16.mxu1 %v3998_v3  ;;  %v674_v9 = vld [vmem:[%s6061_s1] sm:$0xff]  ;;  %v4010_v13 = vpack.c.bf16 %v30_v12, %v29_v11  ;;  %v33_v15 = vld [vmem:[%s6060_s0 + $0x8] sm:$0xff]  ;;  %v34_v17 = vld [vmem:[%s6060_s0 + $0x10] sm:$0xff] }
   0x5   :  { %4001 = vmatpush3.bf16.msra.mxu0 %v3998_v3  ;;  %4017 = vmatpush3.bf16.msra.mxu1 %v3998_v3  ;;  %v4132_v14 = vld [vmem:[%s6059_s4 + $0x40] sm:$0xff]  ;;  %v675_v16 = vld [vmem:[%s6061_s1 + $0x8] sm:$0xff]  ;;  %v676_v18 = vld [vmem:[%s6061_s1 + $0x10] sm:$0xff] }
   0x6   :  { %4003 = vmatprep.subr.bf16.mxu0 %v4002_v5  ;;  %4019 = vmatprep.subr.bf16.mxu1 %v4002_v5  ;;  %v35_v19 = vld [vmem:[%s6060_s0 + $0x18] sm:$0xff]  ;;  %v36_v21 = vld [vmem:[%s6060_s0 + $0x20] sm:$0xff]  ;;  %v37_v23 = vld [vmem:[%s6060_s0 + $0x28] sm:$0xff] }
   0x7   :  { %3560 = vmatprep.mubr.msk.f32.mxu0 %vm96_vm0, %v32_v8  ;;  %3674 = vmatprep.mubr.msk.f32.mxu1 %vm96_vm0, %v674_v9  ;;  %v677_v20 = vld [vmem:[%s6061_s1 + $0x18] sm:$0xff]  ;;  %v678_v22 = vld [vmem:[%s6061_s1 + $0x20] sm:$0xff]  ;;  %v679_v24 = vld [vmem:[%s6061_s1 + $0x28] sm:$0xff] }
   0x8   :  { %v38_v25 = vld [vmem:[%s6060_s0 + $0x30] sm:$0xff]  ;;  %v39_v27 = vld [vmem:[%s6060_s0 + $0x38] sm:$0xff]  ;;  %v40_v29 = vld [vmem:[%s6060_s0 + $0x40] sm:$0xff] }
   0x9   :  { %4005 = vmatpush3.bf16.msra.mxu0 %v4002_v5  ;;  %4021 = vmatpush3.bf16.msra.mxu1 %v4002_v5  ;;  %v680_v26 = vld [vmem:[%s6061_s1 + $0x30] sm:$0xff]  ;;  %v681_v28 = vld [vmem:[%s6061_s1 + $0x38] sm:$0xff]  ;;  %v682_v30 = vld [vmem:[%s6061_s1 + $0x40] sm:$0xff] }
   0xa   :  { %4007 = vmatprep.subr.bf16.mxu0 %v4006_v10  ;;  %4023 = vmatprep.subr.bf16.mxu1 %v4006_v10  ;;  %v41_v31 = vld [vmem:[%s6060_s0 + $0x48] sm:$0xff]  ;;  %v42_v33 = vld [vmem:[%s6060_s0 + $0x50] sm:$0xff]  ;;  %v43_v35 = vld [vmem:[%s6060_s0 + $0x58] sm:$0xff] }
   0xb   :  { %v683_v32 = vld [vmem:[%s6061_s1 + $0x48] sm:$0xff]  ;;  %v684_v34 = vld [vmem:[%s6061_s1 + $0x50] sm:$0xff]  ;;  %v685_v36 = vld [vmem:[%s6061_s1 + $0x58] sm:$0xff] }
   0xc   :  { %v44_v37 = vld [vmem:[%s6060_s0 + $0x60] sm:$0xff]  ;;  %v45_v39 = vld [vmem:[%s6060_s0 + $0x68] sm:$0xff]  ;;  %v46_v41 = vld [vmem:[%s6060_s0 + $0x70] sm:$0xff] }
   0xd   :  { %4009 = vmatpush3.bf16.msra.mxu0 %v4006_v10  ;;  %4025 = vmatpush3.bf16.msra.mxu1 %v4006_v10  ;;  %v686_v38 = vld [vmem:[%s6061_s1 + $0x60] sm:$0xff]  ;;  %v687_v40 = vld [vmem:[%s6061_s1 + $0x68] sm:$0xff]  ;;  %v688_v42 = vld [vmem:[%s6061_s1 + $0x70] sm:$0xff] }
   0xe   :  { %4011 = vmatprep.subr.bf16.mxu0 %v4010_v13  ;;  %4027 = vmatprep.subr.bf16.mxu1 %v4010_v13  ;;  %v47_v43 = vld [vmem:[%s6060_s0 + $0x78] sm:$0xff]  ;;  %v48_v45 = vld [vmem:[%s6060_s0 + $0x80] sm:$0xff]  ;;  %v49_v47 = vld [vmem:[%s6060_s0 + $0x88] sm:$0xff] }
   0xf   :  { %v689_v44 = vld [vmem:[%s6061_s1 + $0x78] sm:$0xff]  ;;  %v690_v46 = vld [vmem:[%s6061_s1 + $0x80] sm:$0xff]  ;;  %v691_v48 = vld [vmem:[%s6061_s1 + $0x88] sm:$0xff] }
  0x10   :  { %v50_v49 = vld [vmem:[%s6060_s0 + $0x90] sm:$0xff]  ;;  %v51_v51 = vld [vmem:[%s6060_s0 + $0x98] sm:$0xff]  ;;  %v52_v53 = vld [vmem:[%s6060_s0 + $0xa0] sm:$0xff] }
  0x11   :  { %4013 = vmatpush3.bf16.msra.mxu0 %v4010_v13  ;;  %4029 = vmatpush3.bf16.msra.mxu1 %v4010_v13  ;;  %v692_v50 = vld [vmem:[%s6061_s1 + $0x90] sm:$0xff]  ;;  %v693_v52 = vld [vmem:[%s6061_s1 + $0x98] sm:$0xff]  ;;  %v694_v54 = vld [vmem:[%s6061_s1 + $0xa0] sm:$0xff] }
  0x12   :  { %3558 = vmatprep.subr.mxu0 %v4132_v14  ;;  %3672 = vmatprep.subr.mxu1 %v4132_v14  ;;  %v53_v55 = vld [vmem:[%s6060_s0 + $0xa8] sm:$0xff]  ;;  %v54_v57 = vld [vmem:[%s6060_s0 + $0xb0] sm:$0xff]  ;;  %v55_v59 = vld [vmem:[%s6060_s0 + $0xb8] sm:$0xff] }
  0x13   :  { %v695_v56 = vld [vmem:[%s6061_s1 + $0xa8] sm:$0xff]  ;;  %v696_v58 = vld [vmem:[%s6061_s1 + $0xb0] sm:$0xff]  ;;  %v697_v60 = vld [vmem:[%s6061_s1 + $0xb8] sm:$0xff] }
  0x14   :  { %v56_v61 = vld [vmem:[%s6060_s0 + $0xc0] sm:$0xff]  ;;  %v57_v63 = vld [vmem:[%s6060_s0 + $0xc8] sm:$0xff]  ;;  %v58_v1 = vld [vmem:[%s6060_s0 + $0xd0] sm:$0xff] }
  0x15   :  { %3559 = vmatpush3.msra.mxu0 %v4132_v14  ;;  %3673 = vmatpush3.msra.mxu1 %v4132_v14  ;;  %v698_v62 = vld [vmem:[%s6061_s1 + $0xc0] sm:$0xff]  ;;  %v699_v0 = vld [vmem:[%s6061_s1 + $0xc8] sm:$0xff]  ;;  %v700_v2 = vld [vmem:[%s6061_s1 + $0xd0] sm:$0xff] }
  0x16   :  { %3561 = vmatmul.mubr.msk.f32.vlgmr.msra.gmra.mrb[0].mxu0 %vm96_vm0, %v33_v15  ;;  %3675 = vmatmul.mubr.msk.f32.vlgmr.msra.gmra.mrb[0].mxu1 %vm96_vm0, %v675_v16  ;;  %v701_v4 = vld [vmem:[%s6061_s1 + $0xd8] sm:$0xff]  ;;  %v702_v6 = vld [vmem:[%s6061_s1 + $0xe0] sm:$0xff]  ;;  %v61_v7 = vld [vmem:[%s6060_s0 + $0xe8] sm:$0xff] }
  0x17   :  { %4031 = vmatprep.subr.bf16.mxu0 %v3998_v3  ;;  %4047 = vmatprep.subr.bf16.mxu1 %v3998_v3  ;;  %v703_v8 = vld [vmem:[%s6061_s1 + $0xe8] sm:$0xff]  ;;  %v62_v9 = vld [vmem:[%s6060_s0 + $0xf0] sm:$0xff]  ;;  %v63_v11 = vld [vmem:[%s6060_s0 + $0xf8] sm:$0xff] }
  0x18   :  { %4033 = vmatpush3.bf16.msra.mxu0 %v3998_v3  ;;  %3563 = vmatprep.mubr.msk.f32.mxu0 %vm96_vm0, %v34_v17  ;;  %v705_v12 = vld [vmem:[%s6061_s1 + $0xf8] sm:$0xff]  ;;  %v65_v15 = vld [vmem:[%s6060_s0 + $0x108] sm:$0xff]  ;;  %v66_v17 = vld [vmem:[%s6060_s0 + $0x110] sm:$0xff] }
  0x19   :  { %3677 = vmatprep.mubr.msk.f32.mxu1 %vm96_vm0, %v676_v18  ;;  %4049 = vmatpush3.bf16.msra.mxu1 %v3998_v3  ;;  %v59_v3 = vld [vmem:[%s6060_s0 + $0xd8] sm:$0xff]  ;;  %v707_v16 = vld [vmem:[%s6061_s1 + $0x108] sm:$0xff]  ;;  %v708_v18 = vld [vmem:[%s6061_s1 + $0x110] sm:$0xff] }
  0x1a   :  { %3564 = vmatmul.mubr.msk.f32.gmra.mrb[2].mxu0 %vm96_vm0, %v35_v19  ;;  %3678 = vmatmul.mubr.msk.f32.gmra.mrb[2].mxu1 %vm96_vm0, %v677_v20  ;;  %v67_v19 = vld [vmem:[%s6060_s0 + $0x118] sm:$0xff] }
  0x1b   :  { %3566 = vmatprep.mubr.msk.f32.mxu0 %vm96_vm0, %v36_v21  ;;  %3680 = vmatprep.mubr.msk.f32.mxu1 %vm96_vm0, %v678_v22  ;;  %v709_v20 = vld [vmem:[%s6061_s1 + $0x118] sm:$0xff]  ;;  %v68_v21 = vld [vmem:[%s6060_s0 + $0x120] sm:$0xff] }
  0x1c   :  { %4035 = vmatprep.subr.bf16.mxu0 %v4002_v5  ;;  %4051 = vmatprep.subr.bf16.mxu1 %v4002_v5  ;;  %v710_v22 = vld [vmem:[%s6061_s1 + $0x120] sm:$0xff] }
  0x1d   :  { %4037 = vmatpush3.bf16.msra.mxu0 %v4002_v5  ;;  %4053 = vmatpush3.bf16.msra.mxu1 %v4002_v5  ;;  %v60_v5 = vld [vmem:[%s6060_s0 + $0xe0] sm:$0xff] }
  0x1e   :  { %3567 = vmatmul.mubr.msk.f32.gmra.mrb[4].mxu0 %vm96_vm0, %v37_v23  ;;  %3681 = vmatmul.mubr.msk.f32.gmra.mrb[4].mxu1 %vm96_vm0, %v679_v24  ;;  %v69_v23 = vld [vmem:[%s6060_s0 + $0x128] sm:$0xff] }
  0x1f   :  { %3569 = vmatprep.mubr.msk.f32.mxu0 %vm96_vm0, %v38_v25  ;;  %3683 = vmatprep.mubr.msk.f32.mxu1 %vm96_vm0, %v680_v26  ;;  %v711_v24 = vld [vmem:[%s6061_s1 + $0x128] sm:$0xff]  ;;  %v70_v25 = vld [vmem:[%s6060_s0 + $0x130] sm:$0xff] }
  0x20   :  { %4039 = vmatprep.subr.bf16.mxu0 %v4006_v10  ;;  %4055 = vmatprep.subr.bf16.mxu1 %v4006_v10  ;;  %v712_v26 = vld [vmem:[%s6061_s1 + $0x130] sm:$0xff] }
  0x21   :  { %4041 = vmatpush3.bf16.msra.mxu0 %v4006_v10  ;;  %4057 = vmatpush3.bf16.msra.mxu1 %v4006_v10  ;;  %v704_v10 = vld [vmem:[%s6061_s1 + $0xf0] sm:$0xff] }
  0x22   :  { %3570 = vmatmul.mubr.msk.f32.gmra.mrb[6].mxu0 %vm96_vm0, %v39_v27  ;;  %3684 = vmatmul.mubr.msk.f32.gmra.mrb[6].mxu1 %vm96_vm0, %v681_v28  ;;  %v71_v27 = vld [vmem:[%s6060_s0 + $0x138] sm:$0xff] }
  0x23   :  { %3572 = vmatprep.mubr.msk.f32.mxu0 %vm96_vm0, %v40_v29  ;;  %3686 = vmatprep.mubr.msk.f32.mxu1 %vm96_vm0, %v682_v30  ;;  %v713_v28 = vld [vmem:[%s6061_s1 + $0x138] sm:$0xff]  ;;  %v72_v29 = vld [vmem:[%s6060_s0 + $0x140] sm:$0xff] }
  0x24   :  { %4043 = vmatprep.subr.bf16.mxu0 %v4010_v13  ;;  %4059 = vmatprep.subr.bf16.mxu1 %v4010_v13  ;;  %v714_v30 = vld [vmem:[%s6061_s1 + $0x140] sm:$0xff] }
  0x25   :  { %4045 = vmatpush3.bf16.msra.mxu0 %v4010_v13  ;;  %4061 = vmatpush3.bf16.msra.mxu1 %v4010_v13  ;;  %v64_v13 = vld [vmem:[%s6060_s0 + $0x100] sm:$0xff] }
  0x26   :  { %3573 = vmatmul.mubr.msk.f32.gmra.mrb[8].mxu0 %vm96_vm0, %v41_v31  ;;  %3687 = vmatmul.mubr.msk.f32.gmra.mrb[8].mxu1 %vm96_vm0, %v683_v32  ;;  %v73_v31 = vld [vmem:[%s6060_s0 + $0x148] sm:$0xff] }
  0x27   :  { %3575 = vmatprep.mubr.msk.f32.mxu0 %vm96_vm0, %v42_v33  ;;  %3689 = vmatprep.mubr.msk.f32.mxu1 %vm96_vm0, %v684_v34  ;;  %v715_v32 = vld [vmem:[%s6061_s1 + $0x148] sm:$0xff]  ;;  %v74_v33 = vld [vmem:[%s6060_s0 + $0x150] sm:$0xff] }
  0x28   :  { %3786 = vmatprep.subr.mxu0 %v4132_v14  ;;  %3900 = vmatprep.subr.mxu1 %v4132_v14  ;;  %v716_v34 = vld [vmem:[%s6061_s1 + $0x150] sm:$0xff] }
  0x29   :  { %3787 = vmatpush3.msra.mxu0 %v4132_v14  ;;  %3901 = vmatpush3.msra.mxu1 %v4132_v14  ;;  %v706_v14 = vld [vmem:[%s6061_s1 + $0x100] sm:$0xff] }
  0x2a   :  { %3576 = vmatmul.mubr.msk.f32.gmra.mrb[10].mxu0 %vm96_vm0, %v43_v35  ;;  %3690 = vmatmul.mubr.msk.f32.gmra.mrb[10].mxu1 %vm96_vm0, %v685_v36  ;;  %v75_v35 = vld [vmem:[%s6060_s0 + $0x158] sm:$0xff] }
  0x2b   :  { %3578 = vmatprep.mubr.msk.f32.mxu0 %vm96_vm0, %v44_v37  ;;  %3692 = vmatprep.mubr.msk.f32.mxu1 %vm96_vm0, %v686_v38  ;;  %v717_v36 = vld [vmem:[%s6061_s1 + $0x158] sm:$0xff]  ;;  %v76_v37 = vld [vmem:[%s6060_s0 + $0x160] sm:$0xff] }
  0x2c   :  { %v718_v38 = vld [vmem:[%s6061_s1 + $0x160] sm:$0xff] }
  0x2e   :  { %3579 = vmatmul.mubr.msk.f32.gmra.mrb[12].mxu0 %vm96_vm0, %v45_v39  ;;  %3693 = vmatmul.mubr.msk.f32.gmra.mrb[12].mxu1 %vm96_vm0, %v687_v40  ;;  %v77_v39 = vld [vmem:[%s6060_s0 + $0x168] sm:$0xff] }
  0x2f   :  { %3581 = vmatprep.mubr.msk.f32.mxu0 %vm96_vm0, %v46_v41  ;;  %3695 = vmatprep.mubr.msk.f32.mxu1 %vm96_vm0, %v688_v42  ;;  %v719_v40 = vld [vmem:[%s6061_s1 + $0x168] sm:$0xff]  ;;  %v78_v41 = vld [vmem:[%s6060_s0 + $0x170] sm:$0xff] }
  0x30   :  { %v720_v42 = vld [vmem:[%s6061_s1 + $0x170] sm:$0xff] }
  0x32   :  { %3582 = vmatmul.mubr.msk.f32.gmra.mrb[14].mxu0 %vm96_vm0, %v47_v43  ;;  %3696 = vmatmul.mubr.msk.f32.gmra.mrb[14].mxu1 %vm96_vm0, %v689_v44  ;;  %v79_v43 = vld [vmem:[%s6060_s0 + $0x178] sm:$0xff] }
  0x33   :  { %3584 = vmatprep.mubr.msk.f32.mxu0 %vm96_vm0, %v48_v45  ;;  %3698 = vmatprep.mubr.msk.f32.mxu1 %vm96_vm0, %v690_v46  ;;  %v721_v44 = vld [vmem:[%s6061_s1 + $0x178] sm:$0xff]  ;;  %v80_v45 = vld [vmem:[%s6060_s0 + $0x180] sm:$0xff] }
  0x34   :  { %v722_v46 = vld [vmem:[%s6061_s1 + $0x180] sm:$0xff] }
  0x36   :  { %3585 = vmatmul.mubr.msk.f32.gmra.mrb[16].mxu0 %vm96_vm0, %v49_v47  ;;  %3699 = vmatmul.mubr.msk.f32.gmra.mrb[16].mxu1 %vm96_vm0, %v691_v48  ;;  %v81_v47 = vld [vmem:[%s6060_s0 + $0x188] sm:$0xff] }
  0x37   :  { %3587 = vmatprep.mubr.msk.f32.mxu0 %vm96_vm0, %v50_v49  ;;  %3701 = vmatprep.mubr.msk.f32.mxu1 %vm96_vm0, %v692_v50  ;;  %v723_v48 = vld [vmem:[%s6061_s1 + $0x188] sm:$0xff]  ;;  %v82_v49 = vld [vmem:[%s6060_s0 + $0x190] sm:$0xff] }
  0x38   :  { %v724_v50 = vld [vmem:[%s6061_s1 + $0x190] sm:$0xff] }
  0x3a   :  { %3588 = vmatmul.mubr.msk.f32.gmra.mrb[18].mxu0 %vm96_vm0, %v51_v51  ;;  %3702 = vmatmul.mubr.msk.f32.gmra.mrb[18].mxu1 %vm96_vm0, %v693_v52  ;;  %v83_v51 = vld [vmem:[%s6060_s0 + $0x198] sm:$0xff] }
  0x3b   :  { %3590 = vmatprep.mubr.msk.f32.mxu0 %vm96_vm0, %v52_v53  ;;  %3704 = vmatprep.mubr.msk.f32.mxu1 %vm96_vm0, %v694_v54  ;;  %v725_v52 = vld [vmem:[%s6061_s1 + $0x198] sm:$0xff]  ;;  %v84_v53 = vld [vmem:[%s6060_s0 + $0x1a0] sm:$0xff] }
  0x3c   :  { %v726_v54 = vld [vmem:[%s6061_s1 + $0x1a0] sm:$0xff] }
  0x3e   :  { %3591 = vmatmul.mubr.msk.f32.gmra.mrb[20].mxu0 %vm96_vm0, %v53_v55  ;;  %3705 = vmatmul.mubr.msk.f32.gmra.mrb[20].mxu1 %vm96_vm0, %v695_v56  ;;  %v85_v55 = vld [vmem:[%s6060_s0 + $0x1a8] sm:$0xff] }
  0x3f   :  { %3593 = vmatprep.mubr.msk.f32.mxu0 %vm96_vm0, %v54_v57  ;;  %3707 = vmatprep.mubr.msk.f32.mxu1 %vm96_vm0, %v696_v58  ;;  %v727_v56 = vld [vmem:[%s6061_s1 + $0x1a8] sm:$0xff]  ;;  %v86_v57 = vld [vmem:[%s6060_s0 + $0x1b0] sm:$0xff] }
  0x40   :  { %v728_v58 = vld [vmem:[%s6061_s1 + $0x1b0] sm:$0xff] }
  0x42   :  { %3594 = vmatmul.mubr.msk.f32.gmra.mrb[22].mxu0 %vm96_vm0, %v55_v59  ;;  %3708 = vmatmul.mubr.msk.f32.gmra.mrb[22].mxu1 %vm96_vm0, %v697_v60  ;;  %v87_v59 = vld [vmem:[%s6060_s0 + $0x1b8] sm:$0xff] }
  0x43   :  { %3596 = vmatprep.mubr.msk.f32.mxu0 %vm96_vm0, %v56_v61  ;;  %3710 = vmatprep.mubr.msk.f32.mxu1 %vm96_vm0, %v698_v62  ;;  %v729_v60 = vld [vmem:[%s6061_s1 + $0x1b8] sm:$0xff]  ;;  %v88_v61 = vld [vmem:[%s6060_s0 + $0x1c0] sm:$0xff] }
  0x44   :  { %v730_v62 = vld [vmem:[%s6061_s1 + $0x1c0] sm:$0xff] }
  0x46   :  { %3597 = vmatmul.mubr.msk.f32.gmra.mrb[24].mxu0 %vm96_vm0, %v57_v63  ;;  %3711 = vmatmul.mubr.msk.f32.gmra.mrb[24].mxu1 %vm96_vm0, %v699_v0  ;;  %v89_v63 = vld [vmem:[%s6060_s0 + $0x1c8] sm:$0xff] }
  0x47   :  { %3599 = vmatprep.mubr.msk.f32.mxu0 %vm96_vm0, %v58_v1  ;;  %3713 = vmatprep.mubr.msk.f32.mxu1 %vm96_vm0, %v700_v2  ;;  %v731_v0 = vld [vmem:[%s6061_s1 + $0x1c8] sm:$0xff]  ;;  %v90_v1 = vld [vmem:[%s6060_s0 + $0x1d0] sm:$0xff] }
  0x48   :  { %v732_v2 = vld [vmem:[%s6061_s1 + $0x1d0] sm:$0xff] }
  0x4a   :  { %3600 = vmatmul.mubr.msk.f32.gmra.mrb[26].mxu0 %vm96_vm0, %v59_v3  ;;  %3714 = vmatmul.mubr.msk.f32.gmra.mrb[26].mxu1 %vm96_vm0, %v701_v4  ;;  %v91_v3 = vld [vmem:[%s6060_s0 + $0x1d8] sm:$0xff] }
  0x4b   :  { %3602 = vmatprep.mubr.msk.f32.mxu0 %vm96_vm0, %v60_v5  ;;  %3716 = vmatprep.mubr.msk.f32.mxu1 %vm96_vm0, %v702_v6  ;;  %v733_v4 = vld [vmem:[%s6061_s1 + $0x1d8] sm:$0xff]  ;;  %v92_v5 = vld [vmem:[%s6060_s0 + $0x1e0] sm:$0xff] }
  0x4c   :  { %v734_v6 = vld [vmem:[%s6061_s1 + $0x1e0] sm:$0xff] }
  0x4e   :  { %3603 = vmatmul.mubr.msk.f32.gmra.mrb[28].mxu0 %vm96_vm0, %v61_v7  ;;  %3717 = vmatmul.mubr.msk.f32.gmra.mrb[28].mxu1 %vm96_vm0, %v703_v8  ;;  %v93_v7 = vld [vmem:[%s6060_s0 + $0x1e8] sm:$0xff] }
  0x4f   :  { %3605 = vmatprep.mubr.msk.f32.mxu0 %vm96_vm0, %v62_v9  ;;  %3719 = vmatprep.mubr.msk.f32.mxu1 %vm96_vm0, %v704_v10  ;;  %v735_v8 = vld [vmem:[%s6061_s1 + $0x1e8] sm:$0xff]  ;;  %v94_v9 = vld [vmem:[%s6060_s0 + $0x1f0] sm:$0xff] }
  0x50   :  { %v736_v10 = vld [vmem:[%s6061_s1 + $0x1f0] sm:$0xff] }
  0x52   :  { %3606 = vmatmul.mubr.msk.f32.gmra.mrb[30].mxu0 %vm96_vm0, %v63_v11  ;;  %3720 = vmatmul.mubr.msk.f32.gmra.mrb[30].mxu1 %vm96_vm0, %v705_v12  ;;  %v95_v11 = vld [vmem:[%s6060_s0 + $0x1f8] sm:$0xff] }
  0x53   :  { %3608 = vmatprep.mubr.msk.f32.mxu0 %vm96_vm0, %v64_v13  ;;  %3722 = vmatprep.mubr.msk.f32.mxu1 %vm96_vm0, %v706_v14  ;;  %v737_v12 = vld [vmem:[%s6061_s1 + $0x1f8] sm:$0xff]  ;;  %v1379_v13 = vld [vmem:[%s6062_s2] sm:$0xff] }
  0x54   :  { %v2084_v14 = vld [vmem:[%s6063_s3] sm:$0xff] }
  0x56   :  { %3609 = vmatmul.mubr.msk.f32.gmra.mrb[32].mxu0 %vm96_vm0, %v65_v15  ;;  %3723 = vmatmul.mubr.msk.f32.gmra.mrb[32].mxu1 %vm96_vm0, %v707_v16  ;;  %v1380_v15 = vld [vmem:[%s6062_s2 + $0x8] sm:$0xff] }
  0x57   :  { %3611 = vmatprep.mubr.msk.f32.mxu0 %vm96_vm0, %v66_v17  ;;  %3725 = vmatprep.mubr.msk.f32.mxu1 %vm96_vm0, %v708_v18  ;;  %v2085_v16 = vld [vmem:[%s6063_s3 + $0x8] sm:$0xff]  ;;  %v1381_v17 = vld [vmem:[%s6062_s2 + $0x10] sm:$0xff] }
  0x58   :  { %v2086_v18 = vld [vmem:[%s6063_s3 + $0x10] sm:$0xff] }
  0x5a   :  { %3612 = vmatmul.mubr.msk.f32.gmra.mrb[34].mxu0 %vm96_vm0, %v67_v19  ;;  %3726 = vmatmul.mubr.msk.f32.gmra.mrb[34].mxu1 %vm96_vm0, %v709_v20  ;;  %v1382_v19 = vld [vmem:[%s6062_s2 + $0x18] sm:$0xff] }
  0x5b   :  { %3614 = vmatprep.mubr.msk.f32.mxu0 %vm96_vm0, %v68_v21  ;;  %3728 = vmatprep.mubr.msk.f32.mxu1 %vm96_vm0, %v710_v22  ;;  %v2087_v20 = vld [vmem:[%s6063_s3 + $0x18] sm:$0xff]  ;;  %v1383_v21 = vld [vmem:[%s6062_s2 + $0x20] sm:$0xff] }
  0x5c   :  { %v2088_v22 = vld [vmem:[%s6063_s3 + $0x20] sm:$0xff] }
  0x5e   :  { %3615 = vmatmul.mubr.msk.f32.gmra.mrb[36].mxu0 %vm96_vm0, %v69_v23  ;;  %3729 = vmatmul.mubr.msk.f32.gmra.mrb[36].mxu1 %vm96_vm0, %v711_v24  ;;  %v1384_v23 = vld [vmem:[%s6062_s2 + $0x28] sm:$0xff] }
  0x5f   :  { %3617 = vmatprep.mubr.msk.f32.mxu0 %vm96_vm0, %v70_v25  ;;  %3731 = vmatprep.mubr.msk.f32.mxu1 %vm96_vm0, %v712_v26  ;;  %v2089_v24 = vld [vmem:[%s6063_s3 + $0x28] sm:$0xff]  ;;  %v1385_v25 = vld [vmem:[%s6062_s2 + $0x30] sm:$0xff] }
  0x60   :  { %v2090_v26 = vld [vmem:[%s6063_s3 + $0x30] sm:$0xff] }
  0x62   :  { %3618 = vmatmul.mubr.msk.f32.gmra.mrb[38].mxu0 %vm96_vm0, %v71_v27  ;;  %3732 = vmatmul.mubr.msk.f32.gmra.mrb[38].mxu1 %vm96_vm0, %v713_v28  ;;  %v1386_v27 = vld [vmem:[%s6062_s2 + $0x38] sm:$0xff] }
  0x63   :  { %3620 = vmatprep.mubr.msk.f32.mxu0 %vm96_vm0, %v72_v29  ;;  %3734 = vmatprep.mubr.msk.f32.mxu1 %vm96_vm0, %v714_v30  ;;  %v2091_v28 = vld [vmem:[%s6063_s3 + $0x38] sm:$0xff]  ;;  %v1387_v29 = vld [vmem:[%s6062_s2 + $0x40] sm:$0xff] }
  0x64   :  { %v2092_v30 = vld [vmem:[%s6063_s3 + $0x40] sm:$0xff] }
  0x66   :  { %3621 = vmatmul.mubr.msk.f32.gmra.mrb[40].mxu0 %vm96_vm0, %v73_v31  ;;  %3735 = vmatmul.mubr.msk.f32.gmra.mrb[40].mxu1 %vm96_vm0, %v715_v32  ;;  %v1388_v31 = vld [vmem:[%s6062_s2 + $0x48] sm:$0xff] }
  0x67   :  { %3623 = vmatprep.mubr.msk.f32.mxu0 %vm96_vm0, %v74_v33  ;;  %3737 = vmatprep.mubr.msk.f32.mxu1 %vm96_vm0, %v716_v34  ;;  %v2093_v32 = vld [vmem:[%s6063_s3 + $0x48] sm:$0xff]  ;;  %v1389_v33 = vld [vmem:[%s6062_s2 + $0x50] sm:$0xff] }
  0x68   :  { %v2094_v34 = vld [vmem:[%s6063_s3 + $0x50] sm:$0xff] }
  0x6a   :  { %3624 = vmatmul.mubr.msk.f32.gmra.mrb[42].mxu0 %vm96_vm0, %v75_v35  ;;  %3738 = vmatmul.mubr.msk.f32.gmra.mrb[42].mxu1 %vm96_vm0, %v717_v36  ;;  %v1390_v35 = vld [vmem:[%s6062_s2 + $0x58] sm:$0xff] }
  0x6b   :  { %3626 = vmatprep.mubr.msk.f32.mxu0 %vm96_vm0, %v76_v37  ;;  %3740 = vmatprep.mubr.msk.f32.mxu1 %vm96_vm0, %v718_v38  ;;  %v2095_v36 = vld [vmem:[%s6063_s3 + $0x58] sm:$0xff]  ;;  %v1391_v37 = vld [vmem:[%s6062_s2 + $0x60] sm:$0xff] }
  0x6c   :  { %v2096_v38 = vld [vmem:[%s6063_s3 + $0x60] sm:$0xff] }
  0x6e   :  { %3627 = vmatmul.mubr.msk.f32.gmra.mrb[44].mxu0 %vm96_vm0, %v77_v39  ;;  %3741 = vmatmul.mubr.msk.f32.gmra.mrb[44].mxu1 %vm96_vm0, %v719_v40  ;;  %v1392_v39 = vld [vmem:[%s6062_s2 + $0x68] sm:$0xff] }
  0x6f   :  { %3629 = vmatprep.mubr.msk.f32.mxu0 %vm96_vm0, %v78_v41  ;;  %3743 = vmatprep.mubr.msk.f32.mxu1 %vm96_vm0, %v720_v42  ;;  %v2097_v40 = vld [vmem:[%s6063_s3 + $0x68] sm:$0xff]  ;;  %v1393_v41 = vld [vmem:[%s6062_s2 + $0x70] sm:$0xff] }
  0x70   :  { %v2098_v42 = vld [vmem:[%s6063_s3 + $0x70] sm:$0xff] }
  0x72   :  { %3630 = vmatmul.mubr.msk.f32.gmra.mrb[46].mxu0 %vm96_vm0, %v79_v43  ;;  %3744 = vmatmul.mubr.msk.f32.gmra.mrb[46].mxu1 %vm96_vm0, %v721_v44  ;;  %v1394_v43 = vld [vmem:[%s6062_s2 + $0x78] sm:$0xff] }
  0x73   :  { %3632 = vmatprep.mubr.msk.f32.mxu0 %vm96_vm0, %v80_v45  ;;  %3746 = vmatprep.mubr.msk.f32.mxu1 %vm96_vm0, %v722_v46  ;;  %v2099_v44 = vld [vmem:[%s6063_s3 + $0x78] sm:$0xff]  ;;  %v1395_v45 = vld [vmem:[%s6062_s2 + $0x80] sm:$0xff] }
  0x74   :  { %v2100_v46 = vld [vmem:[%s6063_s3 + $0x80] sm:$0xff] }
  0x76   :  { %3633 = vmatmul.mubr.msk.f32.gmra.mrb[48].mxu0 %vm96_vm0, %v81_v47  ;;  %3747 = vmatmul.mubr.msk.f32.gmra.mrb[48].mxu1 %vm96_vm0, %v723_v48  ;;  %v1396_v47 = vld [vmem:[%s6062_s2 + $0x88] sm:$0xff] }
  0x77   :  { %3635 = vmatprep.mubr.msk.f32.mxu0 %vm96_vm0, %v82_v49  ;;  %3749 = vmatprep.mubr.msk.f32.mxu1 %vm96_vm0, %v724_v50  ;;  %v2101_v48 = vld [vmem:[%s6063_s3 + $0x88] sm:$0xff]  ;;  %v1397_v49 = vld [vmem:[%s6062_s2 + $0x90] sm:$0xff] }
  0x78   :  { %v2102_v50 = vld [vmem:[%s6063_s3 + $0x90] sm:$0xff] }
  0x7a   :  { %3636 = vmatmul.mubr.msk.f32.gmra.mrb[50].mxu0 %vm96_vm0, %v83_v51  ;;  %3750 = vmatmul.mubr.msk.f32.gmra.mrb[50].mxu1 %vm96_vm0, %v725_v52  ;;  %v1398_v51 = vld [vmem:[%s6062_s2 + $0x98] sm:$0xff] }
  0x7b   :  { %3638 = vmatprep.mubr.msk.f32.mxu0 %vm96_vm0, %v84_v53  ;;  %3752 = vmatprep.mubr.msk.f32.mxu1 %vm96_vm0, %v726_v54  ;;  %v2103_v52 = vld [vmem:[%s6063_s3 + $0x98] sm:$0xff]  ;;  %v1399_v53 = vld [vmem:[%s6062_s2 + $0xa0] sm:$0xff] }
  0x7c   :  { %v2104_v54 = vld [vmem:[%s6063_s3 + $0xa0] sm:$0xff] }
  0x7e   :  { %3639 = vmatmul.mubr.msk.f32.gmra.mrb[52].mxu0 %vm96_vm0, %v85_v55  ;;  %3753 = vmatmul.mubr.msk.f32.gmra.mrb[52].mxu1 %vm96_vm0, %v727_v56  ;;  %v1400_v55 = vld [vmem:[%s6062_s2 + $0xa8] sm:$0xff] }
  0x7f   :  { %3641 = vmatprep.mubr.msk.f32.mxu0 %vm96_vm0, %v86_v57  ;;  %3755 = vmatprep.mubr.msk.f32.mxu1 %vm96_vm0, %v728_v58  ;;  %v2105_v56 = vld [vmem:[%s6063_s3 + $0xa8] sm:$0xff]  ;;  %v1401_v57 = vld [vmem:[%s6062_s2 + $0xb0] sm:$0xff] }
  0x80   :  { %v2106_v58 = vld [vmem:[%s6063_s3 + $0xb0] sm:$0xff] }
  0x82   :  { %3642 = vmatmul.mubr.msk.f32.gmra.mrb[54].mxu0 %vm96_vm0, %v87_v59  ;;  %3756 = vmatmul.mubr.msk.f32.gmra.mrb[54].mxu1 %vm96_vm0, %v729_v60  ;;  %v1402_v59 = vld [vmem:[%s6062_s2 + $0xb8] sm:$0xff] }
  0x83   :  { %3644 = vmatprep.mubr.msk.f32.mxu0 %vm96_vm0, %v88_v61  ;;  %3758 = vmatprep.mubr.msk.f32.mxu1 %vm96_vm0, %v730_v62  ;;  %v2107_v60 = vld [vmem:[%s6063_s3 + $0xb8] sm:$0xff]  ;;  %v1403_v61 = vld [vmem:[%s6062_s2 + $0xc0] sm:$0xff] }
  0x84   :  { %v2108_v62 = vld [vmem:[%s6063_s3 + $0xc0] sm:$0xff] }
  0x86   :  { %3645 = vmatmul.mubr.msk.f32.gmra.mrb[56].mxu0 %vm96_vm0, %v89_v63  ;;  %3759 = vmatmul.mubr.msk.f32.gmra.mrb[56].mxu1 %vm96_vm0, %v731_v0  ;;  %v1404_v63 = vld [vmem:[%s6062_s2 + $0xc8] sm:$0xff] }
  0x87   :  { %3647 = vmatprep.mubr.msk.f32.mxu0 %vm96_vm0, %v90_v1  ;;  %3761 = vmatprep.mubr.msk.f32.mxu1 %vm96_vm0, %v732_v2  ;;  %v2109_v0 = vld [vmem:[%s6063_s3 + $0xc8] sm:$0xff]  ;;  %v1405_v1 = vld [vmem:[%s6062_s2 + $0xd0] sm:$0xff] }
  0x88   :  { %v2110_v2 = vld [vmem:[%s6063_s3 + $0xd0] sm:$0xff] }
  0x8a   :  { %3648 = vmatmul.mubr.msk.f32.gmra.mrb[58].mxu0 %vm96_vm0, %v91_v3  ;;  %3762 = vmatmul.mubr.msk.f32.gmra.mrb[58].mxu1 %vm96_vm0, %v733_v4  ;;  %v1406_v3 = vld [vmem:[%s6062_s2 + $0xd8] sm:$0xff] }
  0x8b   :  { %3650 = vmatprep.mubr.msk.f32.mxu0 %vm96_vm0, %v92_v5  ;;  %3764 = vmatprep.mubr.msk.f32.mxu1 %vm96_vm0, %v734_v6  ;;  %v2111_v4 = vld [vmem:[%s6063_s3 + $0xd8] sm:$0xff]  ;;  %v1407_v5 = vld [vmem:[%s6062_s2 + $0xe0] sm:$0xff] }
  0x8c   :  { %v2112_v6 = vld [vmem:[%s6063_s3 + $0xe0] sm:$0xff] }
  0x8e   :  { %3651 = vmatmul.mubr.msk.f32.gmra.mrb[60].mxu0 %vm96_vm0, %v93_v7  ;;  %3765 = vmatmul.mubr.msk.f32.gmra.mrb[60].mxu1 %vm96_vm0, %v735_v8  ;;  %v1408_v7 = vld [vmem:[%s6062_s2 + $0xe8] sm:$0xff] }
  0x8f   :  { %3653 = vmatprep.mubr.msk.f32.mxu0 %vm96_vm0, %v94_v9  ;;  %3767 = vmatprep.mubr.msk.f32.mxu1 %vm96_vm0, %v736_v10  ;;  %v2113_v8 = vld [vmem:[%s6063_s3 + $0xe8] sm:$0xff]  ;;  %v1409_v9 = vld [vmem:[%s6062_s2 + $0xf0] sm:$0xff] }
  0x90   :  { %v2114_v10 = vld [vmem:[%s6063_s3 + $0xf0] sm:$0xff] }
  0x92   :  { %3654 = vmatmul.mubr.msk.f32.gmra.mrb[62].mxu0 %vm96_vm0, %v95_v11  ;;  %3768 = vmatmul.mubr.msk.f32.gmra.mrb[62].mxu1 %vm96_vm0, %v737_v12  ;;  %v1410_v11 = vld [vmem:[%s6062_s2 + $0xf8] sm:$0xff] }
  0x93   :  { %3788 = vmatprep.mubr.msk.f32.mxu0 %vm96_vm0, %v1379_v13  ;;  %3902 = vmatprep.mubr.msk.f32.mxu1 %vm96_vm0, %v2084_v14  ;;  %v2115_v12 = vld [vmem:[%s6063_s3 + $0xf8] sm:$0xff]  ;;  %v1411_v13 = vld [vmem:[%s6062_s2 + $0x100] sm:$0xff] }
  0x94   :  { %v2116_v14 = vld [vmem:[%s6063_s3 + $0x100] sm:$0xff] }
  0x96   :  { %3789 = vmatmul.mubr.msk.f32.vlgmr.msra.gmra.mrb[64].mxu0 %vm96_vm0, %v1380_v15  ;;  %3903 = vmatmul.mubr.msk.f32.vlgmr.msra.gmra.mrb[64].mxu1 %vm96_vm0, %v2085_v16  ;;  %v1412_v15 = vld [vmem:[%s6062_s2 + $0x108] sm:$0xff] }
  0x97   :  { %3791 = vmatprep.mubr.msk.f32.mxu0 %vm96_vm0, %v1381_v17  ;;  %3905 = vmatprep.mubr.msk.f32.mxu1 %vm96_vm0, %v2086_v18  ;;  %v2117_v16 = vld [vmem:[%s6063_s3 + $0x108] sm:$0xff]  ;;  %v1413_v17 = vld [vmem:[%s6062_s2 + $0x110] sm:$0xff] }
  0x98   :  { %v2118_v18 = vld [vmem:[%s6063_s3 + $0x110] sm:$0xff] }
  0x9a   :  { %3792 = vmatmul.mubr.msk.f32.gmra.mrb[66].mxu0 %vm96_vm0, %v1382_v19  ;;  %3906 = vmatmul.mubr.msk.f32.gmra.mrb[66].mxu1 %vm96_vm0, %v2087_v20  ;;  %v1414_v19 = vld [vmem:[%s6062_s2 + $0x118] sm:$0xff] }
  0x9b   :  { %3794 = vmatprep.mubr.msk.f32.mxu0 %vm96_vm0, %v1383_v21  ;;  %3908 = vmatprep.mubr.msk.f32.mxu1 %vm96_vm0, %v2088_v22  ;;  %v2119_v20 = vld [vmem:[%s6063_s3 + $0x118] sm:$0xff]  ;;  %v1415_v21 = vld [vmem:[%s6062_s2 + $0x120] sm:$0xff] }
  0x9c   :  { %v2120_v22 = vld [vmem:[%s6063_s3 + $0x120] sm:$0xff] }
  0x9e   :  { %3795 = vmatmul.mubr.msk.f32.gmra.mrb[68].mxu0 %vm96_vm0, %v1384_v23  ;;  %3909 = vmatmul.mubr.msk.f32.gmra.mrb[68].mxu1 %vm96_vm0, %v2089_v24  ;;  %v1416_v23 = vld [vmem:[%s6062_s2 + $0x128] sm:$0xff] }
  0x9f   :  { %3797 = vmatprep.mubr.msk.f32.mxu0 %vm96_vm0, %v1385_v25  ;;  %3911 = vmatprep.mubr.msk.f32.mxu1 %vm96_vm0, %v2090_v26  ;;  %v2121_v24 = vld [vmem:[%s6063_s3 + $0x128] sm:$0xff]  ;;  %v1417_v25 = vld [vmem:[%s6062_s2 + $0x130] sm:$0xff] }
  0xa0   :  { %v2122_v26 = vld [vmem:[%s6063_s3 + $0x130] sm:$0xff] }
  0xa2   :  { %3798 = vmatmul.mubr.msk.f32.gmra.mrb[70].mxu0 %vm96_vm0, %v1386_v27  ;;  %3912 = vmatmul.mubr.msk.f32.gmra.mrb[70].mxu1 %vm96_vm0, %v2091_v28  ;;  %v1418_v27 = vld [vmem:[%s6062_s2 + $0x138] sm:$0xff] }
  0xa3   :  { %3800 = vmatprep.mubr.msk.f32.mxu0 %vm96_vm0, %v1387_v29  ;;  %3914 = vmatprep.mubr.msk.f32.mxu1 %vm96_vm0, %v2092_v30  ;;  %v2123_v28 = vld [vmem:[%s6063_s3 + $0x138] sm:$0xff]  ;;  %v1419_v29 = vld [vmem:[%s6062_s2 + $0x140] sm:$0xff] }
  0xa4   :  { %v2124_v30 = vld [vmem:[%s6063_s3 + $0x140] sm:$0xff] }
  0xa6   :  { %3801 = vmatmul.mubr.msk.f32.gmra.mrb[72].mxu0 %vm96_vm0, %v1388_v31  ;;  %3915 = vmatmul.mubr.msk.f32.gmra.mrb[72].mxu1 %vm96_vm0, %v2093_v32  ;;  %v1420_v31 = vld [vmem:[%s6062_s2 + $0x148] sm:$0xff] }
  0xa7   :  { %3803 = vmatprep.mubr.msk.f32.mxu0 %vm96_vm0, %v1389_v33  ;;  %3917 = vmatprep.mubr.msk.f32.mxu1 %vm96_vm0, %v2094_v34  ;;  %v2125_v32 = vld [vmem:[%s6063_s3 + $0x148] sm:$0xff]  ;;  %v1421_v33 = vld [vmem:[%s6062_s2 + $0x150] sm:$0xff] }
  0xa8   :  { %v2126_v34 = vld [vmem:[%s6063_s3 + $0x150] sm:$0xff] }
  0xaa   :  { %3804 = vmatmul.mubr.msk.f32.gmra.mrb[74].mxu0 %vm96_vm0, %v1390_v35  ;;  %3918 = vmatmul.mubr.msk.f32.gmra.mrb[74].mxu1 %vm96_vm0, %v2095_v36  ;;  %v1422_v35 = vld [vmem:[%s6062_s2 + $0x158] sm:$0xff] }
  0xab   :  { %3806 = vmatprep.mubr.msk.f32.mxu0 %vm96_vm0, %v1391_v37  ;;  %3920 = vmatprep.mubr.msk.f32.mxu1 %vm96_vm0, %v2096_v38  ;;  %v2127_v36 = vld [vmem:[%s6063_s3 + $0x158] sm:$0xff]  ;;  %v1423_v37 = vld [vmem:[%s6062_s2 + $0x160] sm:$0xff] }
  0xac   :  { %v2128_v38 = vld [vmem:[%s6063_s3 + $0x160] sm:$0xff] }
  0xae   :  { %3807 = vmatmul.mubr.msk.f32.gmra.mrb[76].mxu0 %vm96_vm0, %v1392_v39  ;;  %3921 = vmatmul.mubr.msk.f32.gmra.mrb[76].mxu1 %vm96_vm0, %v2097_v40 }
  0xaf   :  { %3809 = vmatprep.mubr.msk.f32.mxu0 %vm96_vm0, %v1393_v41  ;;  %3923 = vmatprep.mubr.msk.f32.mxu1 %vm96_vm0, %v2098_v42 }
  0xb2   :  { %3810 = vmatmul.mubr.msk.f32.gmra.mrb[78].mxu0 %vm96_vm0, %v1394_v43  ;;  %3924 = vmatmul.mubr.msk.f32.gmra.mrb[78].mxu1 %vm96_vm0, %v2099_v44 }
  0xb3   :  { %3812 = vmatprep.mubr.msk.f32.mxu0 %vm96_vm0, %v1395_v45  ;;  %3926 = vmatprep.mubr.msk.f32.mxu1 %vm96_vm0, %v2100_v46  ;;  %v1424_v45 = vld [vmem:[%s6062_s2 + $0x168] sm:$0xff] }
  0xb4   :  { %v2129_v46 = vld [vmem:[%s6063_s3 + $0x168] sm:$0xff] }
  0xb6   :  { %3813 = vmatmul.mubr.msk.f32.gmra.mrb[80].mxu0 %vm96_vm0, %v1396_v47  ;;  %3927 = vmatmul.mubr.msk.f32.gmra.mrb[80].mxu1 %vm96_vm0, %v2101_v48  ;;  %v1425_v47 = vld [vmem:[%s6062_s2 + $0x170] sm:$0xff] }
  0xb7   :  { %3815 = vmatprep.mubr.msk.f32.mxu0 %vm96_vm0, %v1397_v49  ;;  %3929 = vmatprep.mubr.msk.f32.mxu1 %vm96_vm0, %v2102_v50  ;;  %v2130_v48 = vld [vmem:[%s6063_s3 + $0x170] sm:$0xff] }
  0xba   :  { %3816 = vmatmul.mubr.msk.f32.gmra.mrb[82].mxu0 %vm96_vm0, %v1398_v51  ;;  %3930 = vmatmul.mubr.msk.f32.gmra.mrb[82].mxu1 %vm96_vm0, %v2103_v52 }
  0xbb   :  { %3818 = vmatprep.mubr.msk.f32.mxu0 %vm96_vm0, %v1399_v53  ;;  %3932 = vmatprep.mubr.msk.f32.mxu1 %vm96_vm0, %v2104_v54 }
  0xbe   :  { %3819 = vmatmul.mubr.msk.f32.gmra.mrb[84].mxu0 %vm96_vm0, %v1400_v55  ;;  %3933 = vmatmul.mubr.msk.f32.gmra.mrb[84].mxu1 %vm96_vm0, %v2105_v56  ;;  %v1426_v55 = vld [vmem:[%s6062_s2 + $0x178] sm:$0xff] }
  0xbf   :  { %3821 = vmatprep.mubr.msk.f32.mxu0 %vm96_vm0, %v1401_v57  ;;  %3935 = vmatprep.mubr.msk.f32.mxu1 %vm96_vm0, %v2106_v58  ;;  %v2131_v56 = vld [vmem:[%s6063_s3 + $0x178] sm:$0xff]  ;;  %v1427_v57 = vld [vmem:[%s6062_s2 + $0x180] sm:$0xff] }
  0xc0   :  { %v2132_v58 = vld [vmem:[%s6063_s3 + $0x180] sm:$0xff] }
  0xc2   :  { %3822 = vmatmul.mubr.msk.f32.gmra.mrb[86].mxu0 %vm96_vm0, %v1402_v59  ;;  %3936 = vmatmul.mubr.msk.f32.gmra.mrb[86].mxu1 %vm96_vm0, %v2107_v60 }
  0xc3   :  { %3824 = vmatprep.mubr.msk.f32.mxu0 %vm96_vm0, %v1403_v61  ;;  %3938 = vmatprep.mubr.msk.f32.mxu1 %vm96_vm0, %v2108_v62 }
  0xc6   :  { %3825 = vmatmul.mubr.msk.f32.gmra.mrb[88].mxu0 %vm96_vm0, %v1404_v63  ;;  %3939 = vmatmul.mubr.msk.f32.gmra.mrb[88].mxu1 %vm96_vm0, %v2109_v0 }
  0xc7   :  { %3827 = vmatprep.mubr.msk.f32.mxu0 %vm96_vm0, %v1405_v1  ;;  %3941 = vmatprep.mubr.msk.f32.mxu1 %vm96_vm0, %v2110_v2  ;;  %v1428_v1 = vld [vmem:[%s6062_s2 + $0x188] sm:$0xff] }
  0xc8   :  { %v2133_v2 = vld [vmem:[%s6063_s3 + $0x188] sm:$0xff] }
  0xca   :  { %3828 = vmatmul.mubr.msk.f32.gmra.mrb[90].mxu0 %vm96_vm0, %v1406_v3  ;;  %3942 = vmatmul.mubr.msk.f32.gmra.mrb[90].mxu1 %vm96_vm0, %v2111_v4  ;;  %v1429_v3 = vld [vmem:[%s6062_s2 + $0x190] sm:$0xff] }
  0xcb   :  { %3830 = vmatprep.mubr.msk.f32.mxu0 %vm96_vm0, %v1407_v5  ;;  %3944 = vmatprep.mubr.msk.f32.mxu1 %vm96_vm0, %v2112_v6  ;;  %v2134_v4 = vld [vmem:[%s6063_s3 + $0x190] sm:$0xff] }
  0xce   :  { %3831 = vmatmul.mubr.msk.f32.gmra.mrb[92].mxu0 %vm96_vm0, %v1408_v7  ;;  %3945 = vmatmul.mubr.msk.f32.gmra.mrb[92].mxu1 %vm96_vm0, %v2113_v8 }
  0xcf   :  { %3833 = vmatprep.mubr.msk.f32.mxu0 %vm96_vm0, %v1409_v9  ;;  %3947 = vmatprep.mubr.msk.f32.mxu1 %vm96_vm0, %v2114_v10 }
  0xd2   :  { %3834 = vmatmul.mubr.msk.f32.gmra.mrb[94].mxu0 %vm96_vm0, %v1410_v11  ;;  %3948 = vmatmul.mubr.msk.f32.gmra.mrb[94].mxu1 %vm96_vm0, %v2115_v12  ;;  %v1430_v11 = vld [vmem:[%s6062_s2 + $0x198] sm:$0xff] }
  0xd3   :  { %3836 = vmatprep.mubr.msk.f32.mxu0 %vm96_vm0, %v1411_v13  ;;  %3950 = vmatprep.mubr.msk.f32.mxu1 %vm96_vm0, %v2116_v14  ;;  %v2135_v12 = vld [vmem:[%s6063_s3 + $0x198] sm:$0xff]  ;;  %v1431_v13 = vld [vmem:[%s6062_s2 + $0x1a0] sm:$0xff] }
  0xd4   :  { %v2136_v14 = vld [vmem:[%s6063_s3 + $0x1a0] sm:$0xff] }
  0xd6   :  { %3837 = vmatmul.mubr.msk.f32.gmra.mrb[96].mxu0 %vm96_vm0, %v1412_v15  ;;  %3951 = vmatmul.mubr.msk.f32.gmra.mrb[96].mxu1 %vm96_vm0, %v2117_v16 }
  0xd7   :  { %3839 = vmatprep.mubr.msk.f32.mxu0 %vm96_vm0, %v1413_v17  ;;  %3953 = vmatprep.mubr.msk.f32.mxu1 %vm96_vm0, %v2118_v18 }
  0xda   :  { %3840 = vmatmul.mubr.msk.f32.gmra.mrb[98].mxu0 %vm96_vm0, %v1414_v19  ;;  %3954 = vmatmul.mubr.msk.f32.gmra.mrb[98].mxu1 %vm96_vm0, %v2119_v20 }
  0xdb   :  { %3842 = vmatprep.mubr.msk.f32.mxu0 %vm96_vm0, %v1415_v21  ;;  %3956 = vmatprep.mubr.msk.f32.mxu1 %vm96_vm0, %v2120_v22  ;;  %v1432_v21 = vld [vmem:[%s6062_s2 + $0x1a8] sm:$0xff] }
  0xdc   :  { %v2137_v22 = vld [vmem:[%s6063_s3 + $0x1a8] sm:$0xff] }
  0xde   :  { %3843 = vmatmul.mubr.msk.f32.gmra.mrb[100].mxu0 %vm96_vm0, %v1416_v23  ;;  %3957 = vmatmul.mubr.msk.f32.gmra.mrb[100].mxu1 %vm96_vm0, %v2121_v24  ;;  %v1433_v23 = vld [vmem:[%s6062_s2 + $0x1b0] sm:$0xff] }
  0xdf   :  { %3845 = vmatprep.mubr.msk.f32.mxu0 %vm96_vm0, %v1417_v25  ;;  %3959 = vmatprep.mubr.msk.f32.mxu1 %vm96_vm0, %v2122_v26  ;;  %v2138_v24 = vld [vmem:[%s6063_s3 + $0x1b0] sm:$0xff] }
  0xe2   :  { %3846 = vmatmul.mubr.msk.f32.gmra.mrb[102].mxu0 %vm96_vm0, %v1418_v27  ;;  %3960 = vmatmul.mubr.msk.f32.gmra.mrb[102].mxu1 %vm96_vm0, %v2123_v28 }
  0xe3   :  { %3848 = vmatprep.mubr.msk.f32.mxu0 %vm96_vm0, %v1419_v29  ;;  %3962 = vmatprep.mubr.msk.f32.mxu1 %vm96_vm0, %v2124_v30  ;;  %v5551_v30 = vld [vmem:[%s6064_s5] ss:$0 sm:$0xff] }
  0xe6   :  { %3849 = vmatmul.mubr.msk.f32.gmra.mrb[104].mxu0 %vm96_vm0, %v1420_v31  ;;  %3963 = vmatmul.mubr.msk.f32.gmra.mrb[104].mxu1 %vm96_vm0, %v2125_v32  ;;  %v1434_v31 = vld [vmem:[%s6062_s2 + $0x1b8] sm:$0xff] }
  0xe7   :  { %3851 = vmatprep.mubr.msk.f32.mxu0 %vm96_vm0, %v1421_v33  ;;  %3965 = vmatprep.mubr.msk.f32.mxu1 %vm96_vm0, %v2126_v34  ;;  %v2139_v32 = vld [vmem:[%s6063_s3 + $0x1b8] sm:$0xff]  ;;  %v1435_v33 = vld [vmem:[%s6062_s2 + $0x1c0] sm:$0xff] }
  0xe8   :  { %v2140_v34 = vld [vmem:[%s6063_s3 + $0x1c0] sm:$0xff] }
  0xe9   :  { %v5002_v39 = vpop.f32.mrb[0].mxu0  ;;  %v5004_v40 = vpop.f32.mrb[0].mxu1 }
  0xea   :  { %v5008_v42 = vpop.f32.mrb[1].mxu0  ;;  %v5010_v43 = vpop.f32.mrb[1].mxu1  ;;  %3852 = vmatmul.mubr.msk.f32.gmra.mrb[106].mxu0 %vm96_vm0, %v1422_v35  ;;  %3966 = vmatmul.mubr.msk.f32.gmra.mrb[106].mxu1 %vm96_vm0, %v2127_v36 }
  0xeb   :  { %3854 = vmatprep.mubr.msk.f32.mxu0 %vm96_vm0, %v1423_v37  ;;  %3968 = vmatprep.mubr.msk.f32.mxu1 %vm96_vm0, %v2128_v38 }
  0xed   :  { %v5030_v49 = vpop.f32.mrb[2].mxu0  ;;  %v5032_v50 = vpop.f32.mrb[2].mxu1 }
  0xee   :  { %v5036_v52 = vpop.f32.mrb[3].mxu0  ;;  %v5038_v53 = vpop.f32.mrb[3].mxu1  ;;  %3855 = vmatmul.mubr.msk.f32.gmra.mrb[108].mxu0 %vm96_vm0, %v1424_v45  ;;  %3969 = vmatmul.mubr.msk.f32.gmra.mrb[108].mxu1 %vm96_vm0, %v2129_v46 }
  0xef   :  { %3857 = vmatprep.mubr.msk.f32.mxu0 %vm96_vm0, %v1425_v47  ;;  %3971 = vmatprep.mubr.msk.f32.mxu1 %vm96_vm0, %v2130_v48  ;;  %v1436_v47 = vld [vmem:[%s6062_s2 + $0x1c8] sm:$0xff] }
  0xf0   :  { %v2141_v48 = vld [vmem:[%s6063_s3 + $0x1c8] sm:$0xff] }
  0xf1   :  { %v5058_v59 = vpop.f32.mrb[4].mxu0  ;;  %v5060_v60 = vpop.f32.mrb[4].mxu1 }
  0xf2   :  { %v5064_v62 = vpop.f32.mrb[5].mxu0  ;;  %v5066_v63 = vpop.f32.mrb[5].mxu1  ;;  %3858 = vmatmul.mubr.msk.f32.gmra.mrb[110].mxu0 %vm96_vm0, %v1426_v55  ;;  %3972 = vmatmul.mubr.msk.f32.gmra.mrb[110].mxu1 %vm96_vm0, %v2131_v56  ;;  %v1437_v55 = vld [vmem:[%s6062_s2 + $0x1d0] sm:$0xff] }
  0xf3   :  { %3860 = vmatprep.mubr.msk.f32.mxu0 %vm96_vm0, %v1427_v57  ;;  %3974 = vmatprep.mubr.msk.f32.mxu1 %vm96_vm0, %v2132_v58  ;;  %v2142_v56 = vld [vmem:[%s6063_s3 + $0x1d0] sm:$0xff] }
  0xf5   :  { %v5086_v5 = vpop.f32.mrb[6].mxu0  ;;  %v5088_v6 = vpop.f32.mrb[6].mxu1 }
  0xf6   :  { %v5092_v8 = vpop.f32.mrb[7].mxu0  ;;  %v5094_v9 = vpop.f32.mrb[7].mxu1  ;;  %3861 = vmatmul.mubr.msk.f32.gmra.mrb[112].mxu0 %vm96_vm0, %v1428_v1  ;;  %3975 = vmatmul.mubr.msk.f32.gmra.mrb[112].mxu1 %vm96_vm0, %v2133_v2 }
  0xf7   :  { %3863 = vmatprep.mubr.msk.f32.mxu0 %vm96_vm0, %v1429_v3  ;;  %3977 = vmatprep.mubr.msk.f32.mxu1 %vm96_vm0, %v2134_v4 }
  0xf9   :  { %v5114_v15 = vpop.f32.mrb[8].mxu0  ;;  %v5116_v16 = vpop.f32.mrb[8].mxu1 }
  0xfa   :  { %v5120_v18 = vpop.f32.mrb[9].mxu0  ;;  %v5122_v19 = vpop.f32.mrb[9].mxu1  ;;  %3864 = vmatmul.mubr.msk.f32.gmra.mrb[114].mxu0 %vm96_vm0, %v1430_v11  ;;  %3978 = vmatmul.mubr.msk.f32.gmra.mrb[114].mxu1 %vm96_vm0, %v2135_v12  ;;  %v1438_v11 = vld [vmem:[%s6062_s2 + $0x1d8] sm:$0xff] }
  0xfb   :  { %3866 = vmatprep.mubr.msk.f32.mxu0 %vm96_vm0, %v1431_v13  ;;  %3980 = vmatprep.mubr.msk.f32.mxu1 %vm96_vm0, %v2136_v14  ;;  %v2143_v12 = vld [vmem:[%s6063_s3 + $0x1d8] sm:$0xff]  ;;  %v1439_v13 = vld [vmem:[%s6062_s2 + $0x1e0] sm:$0xff] }
  0xfc   :  { %v2144_v14 = vld [vmem:[%s6063_s3 + $0x1e0] sm:$0xff] }
  0xfd   :  { %v5142_v25 = vpop.f32.mrb[10].mxu0  ;;  %v5144_v26 = vpop.f32.mrb[10].mxu1 }
  0xfe   :  { %v5148_v28 = vpop.f32.mrb[11].mxu0  ;;  %v5150_v29 = vpop.f32.mrb[11].mxu1  ;;  %3867 = vmatmul.mubr.msk.f32.gmra.mrb[116].mxu0 %vm96_vm0, %v1432_v21  ;;  %3981 = vmatmul.mubr.msk.f32.gmra.mrb[116].mxu1 %vm96_vm0, %v2137_v22 }
  0xff   :  { %3869 = vmatprep.mubr.msk.f32.mxu0 %vm96_vm0, %v1433_v23  ;;  %3983 = vmatprep.mubr.msk.f32.mxu1 %vm96_vm0, %v2138_v24 }
 0x101   :  { %v5170_v35 = vpop.f32.mrb[12].mxu0  ;;  %v5172_v36 = vpop.f32.mrb[12].mxu1 }
 0x102   :  { %v5176_v38 = vpop.f32.mrb[13].mxu0  ;;  %v5178_v45 = vpop.f32.mrb[13].mxu1  ;;  %3870 = vmatmul.mubr.msk.f32.gmra.mrb[118].mxu0 %vm96_vm0, %v1434_v31  ;;  %3984 = vmatmul.mubr.msk.f32.gmra.mrb[118].mxu1 %vm96_vm0, %v2139_v32  ;;  %v1442_v32 = vld [vmem:[%s6062_s2 + $0x1f8] sm:$0xff] }
 0x103   :  { %3872 = vmatprep.mubr.msk.f32.mxu0 %vm96_vm0, %v1435_v33  ;;  %3986 = vmatprep.mubr.msk.f32.mxu1 %vm96_vm0, %v2140_v34  ;;  %v1440_v33 = vld [vmem:[%s6062_s2 + $0x1e8] sm:$0xff] }
 0x104   :  { %v2145_v34 = vld [vmem:[%s6063_s3 + $0x1e8] sm:$0xff] }
 0x105   :  { %v5198_v57 = vpop.f32.mrb[14].mxu0  ;;  %v5200_v58 = vpop.f32.mrb[14].mxu1 }
 0x106   :  { %v5204_v2 = vpop.f32.mrb[15].mxu0  ;;  %v5206_v3 = vpop.f32.mrb[15].mxu1  ;;  %3873 = vmatmul.mubr.msk.f32.gmra.mrb[120].mxu0 %vm96_vm0, %v1436_v47  ;;  %3987 = vmatmul.mubr.msk.f32.gmra.mrb[120].mxu1 %vm96_vm0, %v2141_v48  ;;  %v1441_v47 = vld [vmem:[%s6062_s2 + $0x1f0] sm:$0xff] }
 0x107   :  { %3875 = vmatprep.mubr.msk.f32.mxu0 %vm96_vm0, %v1437_v55  ;;  %3989 = vmatprep.mubr.msk.f32.mxu1 %vm96_vm0, %v2142_v56  ;;  %v2146_v48 = vld [vmem:[%s6063_s3 + $0x1f0] sm:$0xff] }
 0x109   :  { %v5226_v21 = vpop.f32.mrb[16].mxu0  ;;  %v5228_v22 = vpop.f32.mrb[16].mxu1 }
 0x10a   :  { %v5232_v24 = vpop.f32.mrb[17].mxu0  ;;  %v5234_v31 = vpop.f32.mrb[17].mxu1  ;;  %3876 = vmatmul.mubr.msk.f32.gmra.mrb[122].mxu0 %vm96_vm0, %v1438_v11  ;;  %3990 = vmatmul.mubr.msk.f32.gmra.mrb[122].mxu1 %vm96_vm0, %v2143_v12  ;;  %v2147_v11 = vld [vmem:[%s6063_s3 + $0x1f8] sm:$0xff] }
 0x10b   :  { %3878 = vmatprep.mubr.msk.f32.mxu0 %vm96_vm0, %v1439_v13  ;;  %3992 = vmatprep.mubr.msk.f32.mxu1 %vm96_vm0, %v2144_v14 }
 0x10d   :  { %v5254_v55 = vpop.f32.mrb[18].mxu0  ;;  %v5256_v56 = vpop.f32.mrb[18].mxu1 }
 0x10e   :  { %v5260_v12 = vpop.f32.mrb[19].mxu0  ;;  %v5262_v13 = vpop.f32.mrb[19].mxu1  ;;  %3879 = vmatmul.mubr.msk.f32.gmra.mrb[124].mxu0 %vm96_vm0, %v1440_v33  ;;  %3993 = vmatmul.mubr.msk.f32.gmra.mrb[124].mxu1 %vm96_vm0, %v2145_v34 }
 0x10f   :  { %3881 = vmatprep.mubr.msk.f32.mxu0 %vm96_vm0, %v1441_v47  ;;  %3995 = vmatprep.mubr.msk.f32.mxu1 %vm96_vm0, %v2146_v48 }
 0x111   :  { %v5276_v23 = vpop.f32.mrb[20].mxu0  ;;  %v5278_v33 = vpop.f32.mrb[20].mxu1 }
 0x112   :  { %v5282_v14 = vpop.f32.mrb[21].mxu0  ;;  %v5284_v47 = vpop.f32.mrb[21].mxu1  ;;  %3882 = vmatmul.mubr.msk.f32.gmra.mrb[126].mxu0 %vm96_vm0, %v1442_v32  ;;  %3996 = vmatmul.mubr.msk.f32.gmra.mrb[126].mxu1 %vm96_vm0, %v2147_v11 }
 0x115   :  { %v5290_v4 = vpop.f32.mrb[22].mxu0  ;;  %v5292_v1 = vpop.f32.mrb[22].mxu1 }
 0x116   :  { %v5296_v37 = vpop.f32.mrb[23].mxu0  ;;  %v5298_v34 = vpop.f32.mrb[23].mxu1 }
 0x119   :  { %v5302_v32 = vpop.f32.mrb[24].mxu0  ;;  %v5304_v11 = vpop.f32.mrb[24].mxu1 }
 0x11a   :  { %6145 = vst [vmem:[#allocation2_spill] sm:$0xff] %v5304_v11  ;;  %v5308_v27 = vpop.f32.mrb[25].mxu0  ;;  %v5310_v20 = vpop.f32.mrb[25].mxu1 }
 0x11b   :  { %6146 = vst [vmem:[#allocation3_spill] sm:$0xff] %v5308_v27  ;;  %6147 = vst [vmem:[#allocation4_spill] sm:$0xff] %v5310_v20  ;;  %v6225_v20 = vmax.f32 %v5008_v42, %v5010_v43  ;;  %v6227_v43 = vmax.f32 %v5036_v52, %v5038_v53 }
 0x11d   :  { %v5314_v17 = vpop.f32.mrb[26].mxu0  ;;  %v5316_v10 = vpop.f32.mrb[26].mxu1 }
 0x11e   :  { %6148 = vst [vmem:[#allocation5_spill] sm:$0xff] %v5314_v17  ;;  %6149 = vst [vmem:[#allocation6_spill] sm:$0xff] %v5316_v10  ;;  %v5320_v7 = vpop.f32.mrb[27].mxu0  ;;  %v5322_v0 = vpop.f32.mrb[27].mxu1  ;;  %v6224_v17 = vmax.f32 %v5002_v39, %v5004_v40  ;;  %v6226_v39 = vmax.f32 %v5030_v49, %v5032_v50 }
 0x11f   :  { %6150 = vst [vmem:[#allocation7_spill] sm:$0xff] %v5320_v7  ;;  %6151 = vst [vmem:[#allocation8_spill] sm:$0xff] %v5322_v0 }
 0x121   :  { %v5326_v61 = vpop.f32.mrb[28].mxu0  ;;  %v5328_v54 = vpop.f32.mrb[28].mxu1 }
 0x122   :  { %6152 = vst [vmem:[#allocation9_spill] sm:$0xff] %v5326_v61  ;;  %6153 = vst [vmem:[#allocation10_spill] sm:$0xff] %v5328_v54  ;;  %v5332_v51 = vpop.f32.mrb[29].mxu0  ;;  %v5334_v44 = vpop.f32.mrb[29].mxu1 }
 0x123   :  { %6154 = vst [vmem:[#allocation11_spill] sm:$0xff] %v5332_v51  ;;  %6155 = vst [vmem:[#allocation12_spill] sm:$0xff] %v5334_v44 }
 0x125   :  { %v5338_v41 = vpop.f32.mrb[30].mxu0  ;;  %v5340_v10 = vpop.f32.mrb[30].mxu1 }
 0x126   :  { %6156 = vst [vmem:[#allocation13_spill] sm:$0xff] %v5338_v41  ;;  %6157 = vst [vmem:[#allocation14_spill] sm:$0xff] %v5340_v10  ;;  %v5344_v0 = vpop.f32.mrb[31].mxu0  ;;  %v5346_v7 = vpop.f32.mrb[31].mxu1 }
 0x127   :  { %6158 = vst [vmem:[#allocation15_spill] sm:$0xff] %v5344_v0  ;;  %6159 = vst [vmem:[#allocation16_spill] sm:$0xff] %v5346_v7 }
 0x129   :  { %v5350_v54 = vpop.f32.mrb[32].mxu0  ;;  %v5352_v61 = vpop.f32.mrb[32].mxu1 }
 0x12a   :  { %6160 = vst [vmem:[#allocation17_spill] sm:$0xff] %v5350_v54  ;;  %6161 = vst [vmem:[#allocation18_spill] sm:$0xff] %v5352_v61  ;;  %v5356_v44 = vpop.f32.mrb[33].mxu0  ;;  %v5358_v51 = vpop.f32.mrb[33].mxu1 }
 0x12b   :  { %6162 = vst [vmem:[#allocation19_spill] sm:$0xff] %v5356_v44  ;;  %6163 = vst [vmem:[#allocation20_spill] sm:$0xff] %v5358_v51 }
 0x12d   :  { %v5362_v10 = vpop.f32.mrb[34].mxu0  ;;  %v5364_v41 = vpop.f32.mrb[34].mxu1 }
 0x12e   :  { %6164 = vst [vmem:[#allocation21_spill] sm:$0xff] %v5362_v10  ;;  %6165 = vst [vmem:[#allocation22_spill] sm:$0xff] %v5364_v41  ;;  %v5368_v7 = vpop.f32.mrb[35].mxu0  ;;  %v5370_v0 = vpop.f32.mrb[35].mxu1 }
 0x12f   :  { %6166 = vst [vmem:[#allocation23_spill] sm:$0xff] %v5368_v7  ;;  %6167 = vst [vmem:[#allocation24_spill] sm:$0xff] %v5370_v0 }
 0x131   :  { %v5374_v61 = vpop.f32.mrb[36].mxu0  ;;  %v5376_v54 = vpop.f32.mrb[36].mxu1 }
 0x132   :  { %6168 = vst [vmem:[#allocation25_spill] sm:$0xff] %v5374_v61  ;;  %6169 = vst [vmem:[#allocation26_spill] sm:$0xff] %v5376_v54  ;;  %v5380_v51 = vpop.f32.mrb[37].mxu0  ;;  %v5382_v44 = vpop.f32.mrb[37].mxu1 }
 0x133   :  { %6170 = vst [vmem:[#allocation27_spill] sm:$0xff] %v5380_v51  ;;  %6171 = vst [vmem:[#allocation28_spill] sm:$0xff] %v5382_v44 }
 0x135   :  { %v5386_v41 = vpop.f32.mrb[38].mxu0  ;;  %v5388_v10 = vpop.f32.mrb[38].mxu1 }
 0x136   :  { %6172 = vst [vmem:[#allocation29_spill] sm:$0xff] %v5386_v41  ;;  %6173 = vst [vmem:[#allocation30_spill] sm:$0xff] %v5388_v10  ;;  %v5392_v0 = vpop.f32.mrb[39].mxu0  ;;  %v5394_v7 = vpop.f32.mrb[39].mxu1 }
 0x137   :  { %6174 = vst [vmem:[#allocation31_spill] sm:$0xff] %v5392_v0  ;;  %6175 = vst [vmem:[#allocation32_spill] sm:$0xff] %v5394_v7 }
 0x139   :  { %v5398_v54 = vpop.f32.mrb[40].mxu0  ;;  %v5400_v61 = vpop.f32.mrb[40].mxu1 }
 0x13a   :  { %6176 = vst [vmem:[#allocation33_spill] sm:$0xff] %v5398_v54  ;;  %6177 = vst [vmem:[#allocation34_spill] sm:$0xff] %v5400_v61  ;;  %v5404_v44 = vpop.f32.mrb[41].mxu0  ;;  %v5406_v51 = vpop.f32.mrb[41].mxu1 }
 0x13b   :  { %6178 = vst [vmem:[#allocation35_spill] sm:$0xff] %v5404_v44  ;;  %6179 = vst [vmem:[#allocation36_spill] sm:$0xff] %v5406_v51 }
 0x13d   :  { %v5410_v10 = vpop.f32.mrb[42].mxu0  ;;  %v5412_v41 = vpop.f32.mrb[42].mxu1 }
 0x13e   :  { %6180 = vst [vmem:[#allocation37_spill] sm:$0xff] %v5410_v10  ;;  %6181 = vst [vmem:[#allocation38_spill] sm:$0xff] %v5412_v41  ;;  %v5416_v7 = vpop.f32.mrb[43].mxu0  ;;  %v5418_v0 = vpop.f32.mrb[43].mxu1 }
 0x13f   :  { %6182 = vst [vmem:[#allocation39_spill] sm:$0xff] %v5416_v7  ;;  %6183 = vst [vmem:[#allocation40_spill] sm:$0xff] %v5418_v0 }
 0x141   :  { %v5422_v61 = vpop.f32.mrb[44].mxu0  ;;  %v5424_v54 = vpop.f32.mrb[44].mxu1 }
 0x142   :  { %6184 = vst [vmem:[#allocation41_spill] sm:$0xff] %v5422_v61  ;;  %6185 = vst [vmem:[#allocation42_spill] sm:$0xff] %v5424_v54  ;;  %v5428_v51 = vpop.f32.mrb[45].mxu0  ;;  %v5430_v44 = vpop.f32.mrb[45].mxu1 }
 0x143   :  { %6186 = vst [vmem:[#allocation43_spill] sm:$0xff] %v5428_v51  ;;  %6187 = vst [vmem:[#allocation44_spill] sm:$0xff] %v5430_v44 }
 0x145   :  { %v5434_v41 = vpop.f32.mrb[46].mxu0  ;;  %v5436_v10 = vpop.f32.mrb[46].mxu1 }
 0x146   :  { %6188 = vst [vmem:[#allocation45_spill] sm:$0xff] %v5434_v41  ;;  %6189 = vst [vmem:[#allocation46_spill] sm:$0xff] %v5436_v10  ;;  %v5440_v0 = vpop.f32.mrb[47].mxu0  ;;  %v5442_v7 = vpop.f32.mrb[47].mxu1 }
 0x147   :  { %6190 = vst [vmem:[#allocation47_spill] sm:$0xff] %v5440_v0  ;;  %6191 = vst [vmem:[#allocation48_spill] sm:$0xff] %v5442_v7 }
 0x149   :  { %v5446_v54 = vpop.f32.mrb[48].mxu0  ;;  %v5448_v61 = vpop.f32.mrb[48].mxu1 }
 0x14a   :  { %6192 = vst [vmem:[#allocation49_spill] sm:$0xff] %v5446_v54  ;;  %6193 = vst [vmem:[#allocation50_spill] sm:$0xff] %v5448_v61  ;;  %v5452_v44 = vpop.f32.mrb[49].mxu0  ;;  %v5454_v51 = vpop.f32.mrb[49].mxu1 }
 0x14b   :  { %6194 = vst [vmem:[#allocation51_spill] sm:$0xff] %v5452_v44  ;;  %6195 = vst [vmem:[#allocation52_spill] sm:$0xff] %v5454_v51 }
 0x14d   :  { %v5458_v10 = vpop.f32.mrb[50].mxu0  ;;  %v5460_v41 = vpop.f32.mrb[50].mxu1 }
 0x14e   :  { %6196 = vst [vmem:[#allocation53_spill] sm:$0xff] %v5458_v10  ;;  %6197 = vst [vmem:[#allocation54_spill] sm:$0xff] %v5460_v41  ;;  %v5464_v7 = vpop.f32.mrb[51].mxu0  ;;  %v5466_v0 = vpop.f32.mrb[51].mxu1 }
 0x14f   :  { %6198 = vst [vmem:[#allocation55_spill] sm:$0xff] %v5464_v7  ;;  %6199 = vst [vmem:[#allocation56_spill] sm:$0xff] %v5466_v0 }
 0x151   :  { %v5470_v61 = vpop.f32.mrb[52].mxu0  ;;  %v5472_v54 = vpop.f32.mrb[52].mxu1 }
 0x152   :  { %6200 = vst [vmem:[#allocation57_spill] sm:$0xff] %v5470_v61  ;;  %6201 = vst [vmem:[#allocation58_spill] sm:$0xff] %v5472_v54  ;;  %v5476_v51 = vpop.f32.mrb[53].mxu0  ;;  %v5478_v44 = vpop.f32.mrb[53].mxu1 }
 0x153   :  { %6202 = vst [vmem:[#allocation59_spill] sm:$0xff] %v5476_v51  ;;  %6203 = vst [vmem:[#allocation60_spill] sm:$0xff] %v5478_v44 }
 0x155   :  { %v5482_v41 = vpop.f32.mrb[54].mxu0  ;;  %v5484_v10 = vpop.f32.mrb[54].mxu1 }
 0x156   :  { %6204 = vst [vmem:[#allocation61_spill] sm:$0xff] %v5482_v41  ;;  %6205 = vst [vmem:[#allocation62_spill] sm:$0xff] %v5484_v10  ;;  %v5488_v0 = vpop.f32.mrb[55].mxu0  ;;  %v5490_v7 = vpop.f32.mrb[55].mxu1 }
 0x157   :  { %6206 = vst [vmem:[#allocation63_spill] sm:$0xff] %v5488_v0  ;;  %6207 = vst [vmem:[#allocation64_spill] sm:$0xff] %v5490_v7 }
 0x159   :  { %v5494_v54 = vpop.f32.mrb[56].mxu0  ;;  %v5496_v61 = vpop.f32.mrb[56].mxu1 }
 0x15a   :  { %6208 = vst [vmem:[#allocation65_spill] sm:$0xff] %v5494_v54  ;;  %6209 = vst [vmem:[#allocation66_spill] sm:$0xff] %v5496_v61  ;;  %v5500_v44 = vpop.f32.mrb[57].mxu0  ;;  %v5502_v51 = vpop.f32.mrb[57].mxu1 }
 0x15b   :  { %6210 = vst [vmem:[#allocation67_spill] sm:$0xff] %v5500_v44  ;;  %6211 = vst [vmem:[#allocation68_spill] sm:$0xff] %v5502_v51 }
 0x15d   :  { %v5506_v10 = vpop.f32.mrb[58].mxu0  ;;  %v5508_v41 = vpop.f32.mrb[58].mxu1 }
 0x15e   :  { %6212 = vst [vmem:[#allocation69_spill] sm:$0xff] %v5506_v10  ;;  %6213 = vst [vmem:[#allocation70_spill] sm:$0xff] %v5508_v41  ;;  %v5512_v7 = vpop.f32.mrb[59].mxu0  ;;  %v5514_v0 = vpop.f32.mrb[59].mxu1 }
 0x15f   :  { %6214 = vst [vmem:[#allocation71_spill] sm:$0xff] %v5512_v7  ;;  %6215 = vst [vmem:[#allocation72_spill] sm:$0xff] %v5514_v0 }
 0x161   :  { %v5518_v61 = vpop.f32.mrb[60].mxu0  ;;  %v5520_v54 = vpop.f32.mrb[60].mxu1 }
 0x162   :  { %6216 = vst [vmem:[#allocation73_spill] sm:$0xff] %v5518_v61  ;;  %6217 = vst [vmem:[#allocation74_spill] sm:$0xff] %v5520_v54  ;;  %v5524_v51 = vpop.f32.mrb[61].mxu0  ;;  %v5526_v44 = vpop.f32.mrb[61].mxu1 }
 0x163   :  { %6218 = vst [vmem:[#allocation75_spill] sm:$0xff] %v5524_v51  ;;  %6219 = vst [vmem:[#allocation76_spill] sm:$0xff] %v5526_v44 }
 0x165   :  { %v5530_v41 = vpop.f32.mrb[62].mxu0  ;;  %v5532_v10 = vpop.f32.mrb[62].mxu1 }
 0x166   :  { %6220 = vst [vmem:[#allocation77_spill] sm:$0xff] %v5530_v41  ;;  %6221 = vst [vmem:[#allocation78_spill] sm:$0xff] %v5532_v10  ;;  %v5536_v0 = vpop.f32.mrb[63].mxu0  ;;  %v5538_v7 = vpop.f32.mrb[63].mxu1 }
 0x167   :  { %6222 = vst [vmem:[#allocation79_spill] sm:$0xff] %v5536_v0  ;;  %6223 = vst [vmem:[#allocation80_spill] sm:$0xff] %v5538_v7 }
 0x169   :  { %v3790_v54 = vpop.f32.mrb[64].mxu0  ;;  %v3904_v61 = vpop.f32.mrb[64].mxu1 }
 0x16a   :  { %v2021_v46 = vmax.f32 %v6224_v17, %v3790_v54  ;;  %v1701_v44 = vpop.f32.mrb[65].mxu0  ;;  %v2406_v51 = vpop.f32.mrb[65].mxu1 }
 0x16b   :  { %v2020_v27 = vmax.f32 %v6225_v20, %v1701_v44 }
 0x16c   :  { %v2726_v10 = vmax.f32 %v2021_v46, %v3904_v61 }
 0x16d   :  { %v2725_v41 = vmax.f32 %v2020_v27, %v2406_v51  ;;  %v3793_v48 = vpop.f32.mrb[66].mxu0  ;;  %v3907_v7 = vpop.f32.mrb[66].mxu1 }
 0x16e   :  { %v2797_v0 = vadd.f32 %v5551_v30, %v2726_v10  ;;  %v2023_v40 = vmax.f32 %v6226_v39, %v3793_v48  ;;  %v1711_v54 = vpop.f32.mrb[67].mxu0  ;;  %v2416_v17 = vpop.f32.mrb[67].mxu1 }
 0x16f   :  { %v2796_v42 = vadd.f32 %v5551_v30, %v2725_v41  ;;  %v2022_v44 = vmax.f32 %v6227_v43, %v1711_v54  ;;  %v6228_v41 = vmax.f32 %v5058_v59, %v5060_v60 }
 0x170   :  { %v2861_v20 = vmax.f32 %v2797_v0, 0.0  ;;  %v2728_v61 = vmax.f32 %v2023_v40, %v3907_v7  ;;  %v6229_v0 = vmax.f32 %v5064_v62, %v5066_v63 }
 0x171   :  { %v2860_v51 = vmax.f32 %v2796_v42, 0.0  ;;  %v2727_v27 = vmax.f32 %v2022_v44, %v2416_v17  ;;  %v3796_v46 = vpop.f32.mrb[68].mxu0  ;;  %v3910_v11 = vpop.f32.mrb[68].mxu1  ;;  %v6230_v42 = vmax.f32 %v5086_v5, %v5088_v6 }
 0x172   :  { %2926 = vst.msk [vmem:[%s6065_s6 + $0x8] sm:$0xff] %vm2924_vm1, %v2861_v20  ;;  %v2799_v49 = vadd.f32 %v5551_v30, %v2728_v61  ;;  %v2025_v50 = vmax.f32 %v6228_v41, %v3796_v46  ;;  %v1721_v10 = vpop.f32.mrb[69].mxu0  ;;  %v2426_v52 = vpop.f32.mrb[69].mxu1  ;;  %v6232_v41 = vmax.f32 %v5114_v15, %v5116_v16 }
 0x173   :  { %2925 = vst.msk [vmem:[%s6065_s6] sm:$0xff] %vm2924_vm1, %v2860_v51  ;;  %v2798_v53 = vadd.f32 %v5551_v30, %v2727_v27  ;;  %v2024_v7 = vmax.f32 %v6229_v0, %v1721_v10 }
 0x174   :  { %v2863_v48 = vmax.f32 %v2799_v49, 0.0  ;;  %v2730_v39 = vmax.f32 %v2025_v50, %v3910_v11  ;;  %v6231_v11 = vmax.f32 %v5092_v8, %v5094_v9 }
 0x175   :  { %v2862_v40 = vmax.f32 %v2798_v53, 0.0  ;;  %v2729_v54 = vmax.f32 %v2024_v7, %v2426_v52  ;;  %v3799_v17 = vpop.f32.mrb[70].mxu0  ;;  %v3913_v59 = vpop.f32.mrb[70].mxu1  ;;  %v6233_v52 = vmax.f32 %v5120_v18, %v5122_v19 }
 0x176   :  { %2928 = vst.msk [vmem:[%s6065_s6 + $0x18] sm:$0xff] %vm2924_vm1, %v2863_v48  ;;  %v2801_v60 = vadd.f32 %v5551_v30, %v2730_v39  ;;  %v2027_v43 = vmax.f32 %v6230_v42, %v3799_v17  ;;  %v1731_v44 = vpop.f32.mrb[71].mxu0  ;;  %v2436_v62 = vpop.f32.mrb[71].mxu1 }
 0x177   :  { %2927 = vst.msk [vmem:[%s6065_s6 + $0x10] sm:$0xff] %vm2924_vm1, %v2862_v40  ;;  %v2800_v63 = vadd.f32 %v5551_v30, %v2729_v54  ;;  %v2026_v20 = vmax.f32 %v6231_v11, %v1731_v44  ;;  %v6234_v54 = vmax.f32 %v5142_v25, %v5144_v26 }
 0x178   :  { %v2865_v61 = vmax.f32 %v2801_v60, 0.0  ;;  %v2732_v51 = vmax.f32 %v2027_v43, %v3913_v59  ;;  %v6235_v60 = vmax.f32 %v5148_v28, %v5150_v29 }
 0x179   :  { %v2864_v27 = vmax.f32 %v2800_v63, 0.0  ;;  %v2731_v46 = vmax.f32 %v2026_v20, %v2436_v62  ;;  %v3802_v49 = vpop.f32.mrb[72].mxu0  ;;  %v3916_v5 = vpop.f32.mrb[72].mxu1  ;;  %v6236_v20 = vmax.f32 %v5170_v35, %v5172_v36 }
 0x17a   :  { %2930 = vst.msk [vmem:[%s6065_s6 + $0x28] sm:$0xff] %vm2924_vm1, %v2865_v61  ;;  %v2803_v6 = vadd.f32 %v5551_v30, %v2732_v51  ;;  %v2029_v50 = vmax.f32 %v6232_v41, %v3802_v49  ;;  %v1741_v10 = vpop.f32.mrb[73].mxu0  ;;  %v2446_v8 = vpop.f32.mrb[73].mxu1 }
 0x17b   :  { %2929 = vst.msk [vmem:[%s6065_s6 + $0x20] sm:$0xff] %vm2924_vm1, %v2864_v27  ;;  %v2802_v9 = vadd.f32 %v5551_v30, %v2731_v46  ;;  %v2028_v53 = vmax.f32 %v6233_v52, %v1741_v10  ;;  %v6237_v27 = vmax.f32 %v5176_v38, %v5178_v45  ;;  %v6238_v10 = vmax.f32 %v5198_v57, %v5200_v58 }
 0x17c   :  { %v2867_v0 = vmax.f32 %v2803_v6, 0.0  ;;  %v2734_v7 = vmax.f32 %v2029_v50, %v3916_v5  ;;  %v6239_v52 = vmax.f32 %v5204_v2, %v5206_v3 }
 0x17d   :  { %v2866_v48 = vmax.f32 %v2802_v9, 0.0  ;;  %v2733_v39 = vmax.f32 %v2028_v53, %v2446_v8  ;;  %v3805_v40 = vpop.f32.mrb[74].mxu0  ;;  %v3919_v15 = vpop.f32.mrb[74].mxu1 }
 0x17e   :  { %2932 = vst.msk [vmem:[%s6065_s6 + $0x38] sm:$0xff] %vm2924_vm1, %v2867_v0  ;;  %v2805_v16 = vadd.f32 %v5551_v30, %v2734_v7  ;;  %v2031_v17 = vmax.f32 %v6234_v54, %v3805_v40  ;;  %v1751_v59 = vpop.f32.mrb[75].mxu0  ;;  %v2456_v18 = vpop.f32.mrb[75].mxu1 }
 0x17f   :  { %2931 = vst.msk [vmem:[%s6065_s6 + $0x30] sm:$0xff] %vm2924_vm1, %v2866_v48  ;;  %v2804_v19 = vadd.f32 %v5551_v30, %v2733_v39  ;;  %v2030_v42 = vmax.f32 %v6235_v60, %v1751_v59 }
 0x180   :  { %v2869_v43 = vmax.f32 %v2805_v16, 0.0  ;;  %v2736_v44 = vmax.f32 %v2031_v17, %v3919_v15  ;;  %v6240_v15 = vmax.f32 %v5226_v21, %v5228_v22  ;;  %v6241_v17 = vmax.f32 %v5232_v24, %v5234_v31 }
 0x181   :  { %v2868_v62 = vmax.f32 %v2804_v19, 0.0  ;;  %v2735_v63 = vmax.f32 %v2030_v42, %v2456_v18  ;;  %v3808_v11 = vpop.f32.mrb[76].mxu0  ;;  %v3922_v25 = vpop.f32.mrb[76].mxu1 }
 0x182   :  { %2934 = vst.msk [vmem:[%s6065_s6 + $0x48] sm:$0xff] %vm2924_vm1, %v2869_v43  ;;  %v2807_v26 = vadd.f32 %v5551_v30, %v2736_v44  ;;  %v2033_v61 = vmax.f32 %v6236_v20, %v3808_v11  ;;  %v1761_v51 = vpop.f32.mrb[77].mxu0  ;;  %v2466_v28 = vpop.f32.mrb[77].mxu1  ;;  %v6242_v44 = vmax.f32 %v5254_v55, %v5256_v56  ;;  %v6243_v11 = vmax.f32 %v5260_v12, %v5262_v13 }
 0x183   :  { %2933 = vst.msk [vmem:[%s6065_s6 + $0x40] sm:$0xff] %vm2924_vm1, %v2868_v62  ;;  %v2806_v29 = vadd.f32 %v5551_v30, %v2735_v63  ;;  %v2032_v46 = vmax.f32 %v6237_v27, %v1761_v51 }
 0x184   :  { %v2871_v49 = vmax.f32 %v2807_v26, 0.0  ;;  %v2738_v5 = vmax.f32 %v2033_v61, %v3922_v25 }
 0x185   :  { %v2870_v6 = vmax.f32 %v2806_v29, 0.0  ;;  %v2737_v41 = vmax.f32 %v2032_v46, %v2466_v28  ;;  %v3811_v50 = vpop.f32.mrb[78].mxu0  ;;  %v3925_v35 = vpop.f32.mrb[78].mxu1  ;;  %v6244_v29 = vmax.f32 %v5276_v23, %v5278_v33 }
 0x186   :  { %2936 = vst.msk [vmem:[%s6065_s6 + $0x58] sm:$0xff] %vm2924_vm1, %v2871_v49  ;;  %v2809_v36 = vadd.f32 %v5551_v30, %v2738_v5  ;;  %v2035_v8 = vmax.f32 %v6238_v10, %v3811_v50  ;;  %v1771_v9 = vpop.f32.mrb[79].mxu0  ;;  %v2476_v38 = vpop.f32.mrb[79].mxu1  ;;  %v6245_v49 = vmax.f32 %v5282_v14, %v5284_v47  ;;  %v6246_v10 = vmax.f32 %v5290_v4, %v5292_v1 }
 0x187   :  { %2935 = vst.msk [vmem:[%s6065_s6 + $0x50] sm:$0xff] %vm2924_vm1, %v2870_v6  ;;  %v2808_v45 = vadd.f32 %v5551_v30, %v2737_v41  ;;  %v2034_v53 = vmax.f32 %v6239_v52, %v1771_v9 }
 0x188   :  { %v2873_v0 = vmax.f32 %v2809_v36, 0.0  ;;  %v2740_v7 = vmax.f32 %v2035_v8, %v3925_v35 }
 0x189   :  { %v2872_v48 = vmax.f32 %v2808_v45, 0.0  ;;  %v2739_v39 = vmax.f32 %v2034_v53, %v2476_v38  ;;  %v3814_v40 = vpop.f32.mrb[80].mxu0  ;;  %v3928_v57 = vpop.f32.mrb[80].mxu1  ;;  %v6247_v38 = vmax.f32 %v5296_v37, %v5298_v34 }
 0x18a   :  { %2938 = vst.msk [vmem:[%s6065_s6 + $0x68] sm:$0xff] %vm2924_vm1, %v2873_v0  ;;  %v2811_v58 = vadd.f32 %v5551_v30, %v2740_v7  ;;  %v2037_v16 = vmax.f32 %v6240_v15, %v3814_v40  ;;  %v1781_v54 = vpop.f32.mrb[81].mxu0  ;;  %v2486_v2 = vpop.f32.mrb[81].mxu1  ;;  %v6250_v15 = vld [vmem:[#allocation3_spill] sm:$0xff] }
 0x18b   :  { %2937 = vst.msk [vmem:[%s6065_s6 + $0x60] sm:$0xff] %vm2924_vm1, %v2872_v48  ;;  %v2810_v3 = vadd.f32 %v5551_v30, %v2739_v39  ;;  %v2036_v59 = vmax.f32 %v6241_v17, %v1781_v54  ;;  %v6248_v39 = vld [vmem:[#allocation2_spill] sm:$0xff] }
 0x18c   :  { %v2875_v18 = vmax.f32 %v2811_v58, 0.0  ;;  %v2742_v19 = vmax.f32 %v2037_v16, %v3928_v57  ;;  %v6249_v40 = vmax.f32 %v5302_v32, %v6248_v39  ;;  %v6251_v16 = vld [vmem:[#allocation4_spill] sm:$0xff] }
 0x18d   :  { %v2874_v60 = vmax.f32 %v2810_v3, 0.0  ;;  %v2741_v42 = vmax.f32 %v2036_v59, %v2486_v2  ;;  %v3817_v43 = vpop.f32.mrb[82].mxu0  ;;  %v3931_v21 = vpop.f32.mrb[82].mxu1  ;;  %v6252_v54 = vmax.f32 %v6250_v15, %v6251_v16 }
 0x18e   :  { %2940 = vst.msk [vmem:[%s6065_s6 + $0x78] sm:$0xff] %vm2924_vm1, %v2875_v18  ;;  %v2813_v22 = vadd.f32 %v5551_v30, %v2742_v19  ;;  %v2039_v62 = vmax.f32 %v6242_v44, %v3817_v43  ;;  %v1791_v63 = vpop.f32.mrb[83].mxu0  ;;  %v2496_v24 = vpop.f32.mrb[83].mxu1  ;;  %v6254_v43 = vld [vmem:[#allocation6_spill] sm:$0xff] }
 0x18f   :  { %2939 = vst.msk [vmem:[%s6065_s6 + $0x70] sm:$0xff] %vm2924_vm1, %v2874_v60  ;;  %v2812_v31 = vadd.f32 %v5551_v30, %v2741_v42  ;;  %v2038_v25 = vmax.f32 %v6243_v11, %v1791_v63  ;;  %v6253_v42 = vld [vmem:[#allocation5_spill] sm:$0xff] }
 0x190   :  { %v2877_v26 = vmax.f32 %v2813_v22, 0.0  ;;  %v2744_v20 = vmax.f32 %v2039_v62, %v3931_v21  ;;  %v6255_v21 = vmax.f32 %v6253_v42, %v6254_v43 }
 0x191   :  { %v2876_v61 = vmax.f32 %v2812_v31, 0.0  ;;  %v2743_v51 = vmax.f32 %v2038_v25, %v2496_v24  ;;  %v3820_v28 = vpop.f32.mrb[84].mxu0  ;;  %v3934_v55 = vpop.f32.mrb[84].mxu1  ;;  %v6256_v24 = vld [vmem:[#allocation7_spill] sm:$0xff]  ;;  %v6257_v31 = vld [vmem:[#allocation8_spill] sm:$0xff] }
 0x192   :  { %2942 = vst.msk [vmem:[%s6065_s6 + $0x88] sm:$0xff] %vm2924_vm1, %v2877_v26  ;;  %v2815_v56 = vadd.f32 %v5551_v30, %v2744_v20  ;;  %v2041_v27 = vmax.f32 %v6244_v29, %v3820_v28  ;;  %v1801_v46 = vpop.f32.mrb[85].mxu0  ;;  %v2506_v12 = vpop.f32.mrb[85].mxu1  ;;  %v6258_v11 = vmax.f32 %v6256_v24, %v6257_v31  ;;  %v6259_v29 = vld [vmem:[#allocation9_spill] sm:$0xff] }
 0x193   :  { %2941 = vst.msk [vmem:[%s6065_s6 + $0x80] sm:$0xff] %vm2924_vm1, %v2876_v61  ;;  %v2814_v13 = vadd.f32 %v5551_v30, %v2743_v51  ;;  %v2040_v5 = vmax.f32 %v6245_v49, %v1801_v46 }
 0x194   :  { %v2879_v6 = vmax.f32 %v2815_v56, 0.0  ;;  %v2746_v41 = vmax.f32 %v2041_v27, %v3934_v55  ;;  %v6260_v27 = vld [vmem:[#allocation10_spill] sm:$0xff] }
 0x195   :  { %v2878_v50 = vmax.f32 %v2814_v13, 0.0  ;;  %v2745_v35 = vmax.f32 %v2040_v5, %v2506_v12  ;;  %v3823_v36 = vpop.f32.mrb[86].mxu0  ;;  %v3937_v23 = vpop.f32.mrb[86].mxu1  ;;  %v6261_v46 = vmax.f32 %v6259_v29, %v6260_v27 }
 0x196   :  { %2944 = vst.msk [vmem:[%s6065_s6 + $0x98] sm:$0xff] %vm2924_vm1, %v2879_v6  ;;  %v2817_v33 = vadd.f32 %v5551_v30, %v2746_v41  ;;  %v2043_v8 = vmax.f32 %v6246_v10, %v3823_v36  ;;  %v1811_v9 = vpop.f32.mrb[87].mxu0  ;;  %v2516_v14 = vpop.f32.mrb[87].mxu1  ;;  %v6262_v6 = vld [vmem:[#allocation11_spill] sm:$0xff]  ;;  %v6263_v41 = vld [vmem:[#allocation12_spill] sm:$0xff] }
 0x197   :  { %2943 = vst.msk [vmem:[%s6065_s6 + $0x90] sm:$0xff] %vm2924_vm1, %v2878_v50  ;;  %v2816_v47 = vadd.f32 %v5551_v30, %v2745_v35  ;;  %v2042_v45 = vmax.f32 %v6247_v38, %v1811_v9  ;;  %v6264_v50 = vmax.f32 %v6262_v6, %v6263_v41  ;;  %v6266_v38 = vld [vmem:[#allocation14_spill] sm:$0xff] }
 0x198   :  { %v2881_v52 = vmax.f32 %v2817_v33, 0.0  ;;  %v2748_v53 = vmax.f32 %v2043_v8, %v3937_v23 }
 0x199   :  { %v2880_v0 = vmax.f32 %v2816_v47, 0.0  ;;  %v2747_v7 = vmax.f32 %v2042_v45, %v2516_v14  ;;  %v3826_v48 = vpop.f32.mrb[88].mxu0  ;;  %v3940_v1 = vpop.f32.mrb[88].mxu1  ;;  %v6265_v47 = vld [vmem:[#allocation13_spill] sm:$0xff] }
 0x19a   :  { %2946 = vst.msk [vmem:[%s6065_s6 + $0xa8] sm:$0xff] %vm2924_vm1, %v2881_v52  ;;  %v2819_v4 = vadd.f32 %v5551_v30, %v2748_v53  ;;  %v2045_v57 = vmax.f32 %v6249_v40, %v3826_v48  ;;  %v1821_v58 = vpop.f32.mrb[89].mxu0  ;;  %v2526_v37 = vpop.f32.mrb[89].mxu1  ;;  %v6267_v45 = vmax.f32 %v6265_v47, %v6266_v38  ;;  %v6268_v48 = vld [vmem:[#allocation15_spill] sm:$0xff] }
 0x19b   :  { %2945 = vst.msk [vmem:[%s6065_s6 + $0xa0] sm:$0xff] %vm2924_vm1, %v2880_v0  ;;  %v2818_v34 = vadd.f32 %v5551_v30, %v2747_v7  ;;  %v2044_v2 = vmax.f32 %v6252_v54, %v1821_v58  ;;  %v6271_v54 = vld [vmem:[#allocation17_spill] sm:$0xff] }
 0x19c   :  { %v2883_v3 = vmax.f32 %v2819_v4, 0.0  ;;  %v2750_v17 = vmax.f32 %v2045_v57, %v3940_v1  ;;  %v6269_v1 = vld [vmem:[#allocation16_spill] sm:$0xff] }
 0x19d   :  { %v2882_v59 = vmax.f32 %v2818_v34, 0.0  ;;  %v2749_v18 = vmax.f32 %v2044_v2, %v2526_v37  ;;  %v3829_v19 = vpop.f32.mrb[90].mxu0  ;;  %v3943_v32 = vpop.f32.mrb[90].mxu1  ;;  %v6270_v4 = vmax.f32 %v6268_v48, %v6269_v1  ;;  %v6272_v2 = vld [vmem:[#allocation18_spill] sm:$0xff] }
 0x19e   :  { %2948 = vst.msk [vmem:[%s6065_s6 + $0xb8] sm:$0xff] %vm2924_vm1, %v2883_v3  ;;  %v2821_v60 = vadd.f32 %v5551_v30, %v2750_v17  ;;  %v2047_v22 = vmax.f32 %v6255_v21, %v3829_v19  ;;  %v1831_v44 = vpop.f32.mrb[91].mxu0  ;;  %v2536_v62 = vpop.f32.mrb[91].mxu1  ;;  %v6273_v3 = vmax.f32 %v6271_v54, %v6272_v2 }
 0x19f   :  { %2947 = vst.msk [vmem:[%s6065_s6 + $0xb0] sm:$0xff] %vm2924_vm1, %v2882_v59  ;;  %v2820_v63 = vadd.f32 %v5551_v30, %v2749_v18  ;;  %v2046_v25 = vmax.f32 %v6258_v11, %v1831_v44  ;;  %v6277_v11 = vld [vmem:[#allocation21_spill] sm:$0xff] }
 0x1a0   :  { %v2885_v26 = vmax.f32 %v2821_v60, 0.0  ;;  %v2752_v20 = vmax.f32 %v2047_v22, %v3943_v32  ;;  %v6274_v32 = vld [vmem:[#allocation19_spill] sm:$0xff]  ;;  %v6275_v60 = vld [vmem:[#allocation20_spill] sm:$0xff] }
 0x1a1   :  { %v2884_v61 = vmax.f32 %v2820_v63, 0.0  ;;  %v2751_v51 = vmax.f32 %v2046_v25, %v2536_v62  ;;  %v3832_v28 = vpop.f32.mrb[92].mxu0  ;;  %v3946_v55 = vpop.f32.mrb[92].mxu1  ;;  %v6276_v42 = vmax.f32 %v6274_v32, %v6275_v60  ;;  %v6278_v25 = vld [vmem:[#allocation22_spill] sm:$0xff] }
 0x1a2   :  { %2950 = vst.msk [vmem:[%s6065_s6 + $0xc8] sm:$0xff] %vm2924_vm1, %v2885_v26  ;;  %v2823_v56 = vadd.f32 %v5551_v30, %v2752_v20  ;;  %v2049_v12 = vmax.f32 %v6261_v46, %v3832_v28  ;;  %v1841_v13 = vpop.f32.mrb[93].mxu0  ;;  %v2546_v49 = vpop.f32.mrb[93].mxu1  ;;  %v6279_v26 = vmax.f32 %v6277_v11, %v6278_v25 }
 0x1a3   :  { %2949 = vst.msk [vmem:[%s6065_s6 + $0xc0] sm:$0xff] %vm2924_vm1, %v2884_v61  ;;  %v2822_v5 = vadd.f32 %v5551_v30, %v2751_v51  ;;  %v2048_v35 = vmax.f32 %v6264_v50, %v1841_v13  ;;  %v6283_v50 = vld [vmem:[#allocation25_spill] sm:$0xff] }
 0x1a4   :  { %v2887_v36 = vmax.f32 %v2823_v56, 0.0  ;;  %v2754_v23 = vmax.f32 %v2049_v12, %v3946_v55  ;;  %v6280_v55 = vld [vmem:[#allocation23_spill] sm:$0xff]  ;;  %v6281_v56 = vld [vmem:[#allocation24_spill] sm:$0xff] }
 0x1a5   :  { %v2886_v33 = vmax.f32 %v2822_v5, 0.0  ;;  %v2753_v10 = vmax.f32 %v2048_v35, %v2546_v49  ;;  %v3835_v8 = vpop.f32.mrb[94].mxu0  ;;  %v3949_v9 = vpop.f32.mrb[94].mxu1  ;;  %v6282_v29 = vmax.f32 %v6280_v55, %v6281_v56  ;;  %v6284_v35 = vld [vmem:[#allocation26_spill] sm:$0xff] }
 0x1a6   :  { %2952 = vst.msk [vmem:[%s6065_s6 + $0xd8] sm:$0xff] %vm2924_vm1, %v2887_v36  ;;  %v2825_v14 = vadd.f32 %v5551_v30, %v2754_v23  ;;  %v2051_v52 = vmax.f32 %v6267_v45, %v3835_v8  ;;  %v1851_v53 = vpop.f32.mrb[95].mxu0  ;;  %v2556_v0 = vpop.f32.mrb[95].mxu1  ;;  %v6285_v36 = vmax.f32 %v6283_v50, %v6284_v35 }
 0x1a7   :  { %2951 = vst.msk [vmem:[%s6065_s6 + $0xd0] sm:$0xff] %vm2924_vm1, %v2886_v33  ;;  %v2824_v7 = vadd.f32 %v5551_v30, %v2753_v10  ;;  %v2050_v39 = vmax.f32 %v6270_v4, %v1851_v53  ;;  %v6289_v4 = vld [vmem:[#allocation29_spill] sm:$0xff] }
 0x1a8   :  { %v2889_v40 = vmax.f32 %v2825_v14, 0.0  ;;  %v2756_v57 = vmax.f32 %v2051_v52, %v3949_v9  ;;  %v6286_v9 = vld [vmem:[#allocation27_spill] sm:$0xff]  ;;  %v6287_v14 = vld [vmem:[#allocation28_spill] sm:$0xff] }
 0x1a9   :  { %v2888_v58 = vmax.f32 %v2824_v7, 0.0  ;;  %v2755_v37 = vmax.f32 %v2050_v39, %v2556_v0  ;;  %v3838_v34 = vpop.f32.mrb[96].mxu0  ;;  %v3952_v15 = vpop.f32.mrb[96].mxu1  ;;  %v6288_v47 = vmax.f32 %v6286_v9, %v6287_v14  ;;  %v6290_v39 = vld [vmem:[#allocation30_spill] sm:$0xff] }
 0x1aa   :  { %2954 = vst.msk [vmem:[%s6065_s6 + $0xe8] sm:$0xff] %vm2924_vm1, %v2889_v40  ;;  %v2827_v16 = vadd.f32 %v5551_v30, %v2756_v57  ;;  %v2053_v17 = vmax.f32 %v6273_v3, %v3838_v34  ;;  %v1861_v59 = vpop.f32.mrb[97].mxu0  ;;  %v2566_v18 = vpop.f32.mrb[97].mxu1  ;;  %v6291_v40 = vmax.f32 %v6289_v4, %v6290_v39 }
 0x1ab   :  { %2953 = vst.msk [vmem:[%s6065_s6 + $0xe0] sm:$0xff] %vm2924_vm1, %v2888_v58  ;;  %v2826_v19 = vadd.f32 %v5551_v30, %v2755_v37  ;;  %v2052_v43 = vmax.f32 %v6276_v42, %v1861_v59  ;;  %v6295_v42 = vld [vmem:[#allocation33_spill] sm:$0xff] }
 0x1ac   :  { %v2891_v21 = vmax.f32 %v2827_v16, 0.0  ;;  %v2758_v22 = vmax.f32 %v2053_v17, %v3952_v15  ;;  %v6292_v15 = vld [vmem:[#allocation31_spill] sm:$0xff]  ;;  %v6293_v16 = vld [vmem:[#allocation32_spill] sm:$0xff] }
 0x1ad   :  { %v2890_v44 = vmax.f32 %v2826_v19, 0.0  ;;  %v2757_v62 = vmax.f32 %v2052_v43, %v2566_v18  ;;  %v3841_v63 = vpop.f32.mrb[98].mxu0  ;;  %v3955_v24 = vpop.f32.mrb[98].mxu1  ;;  %v6294_v54 = vmax.f32 %v6292_v15, %v6293_v16  ;;  %v6296_v43 = vld [vmem:[#allocation34_spill] sm:$0xff] }
 0x1ae   :  { %2956 = vst.msk [vmem:[%s6065_s6 + $0xf8] sm:$0xff] %vm2924_vm1, %v2891_v21  ;;  %v2829_v31 = vadd.f32 %v5551_v30, %v2758_v22  ;;  %v2055_v20 = vmax.f32 %v6279_v26, %v3841_v63  ;;  %v1871_v61 = vpop.f32.mrb[99].mxu0  ;;  %v2576_v51 = vpop.f32.mrb[99].mxu1  ;;  %v6297_v21 = vmax.f32 %v6295_v42, %v6296_v43 }
 0x1af   :  { %2955 = vst.msk [vmem:[%s6065_s6 + $0xf0] sm:$0xff] %vm2924_vm1, %v2890_v44  ;;  %v2828_v28 = vadd.f32 %v5551_v30, %v2757_v62  ;;  %v2054_v27 = vmax.f32 %v6282_v29, %v1871_v61  ;;  %v6301_v29 = vld [vmem:[#allocation37_spill] sm:$0xff] }
 0x1b0   :  { %v2893_v46 = vmax.f32 %v2829_v31, 0.0  ;;  %v2760_v12 = vmax.f32 %v2055_v20, %v3955_v24  ;;  %v6298_v24 = vld [vmem:[#allocation35_spill] sm:$0xff]  ;;  %v6299_v31 = vld [vmem:[#allocation36_spill] sm:$0xff] }
 0x1b1   :  { %v2892_v13 = vmax.f32 %v2828_v28, 0.0  ;;  %v2759_v49 = vmax.f32 %v2054_v27, %v2576_v51  ;;  %v3844_v5 = vpop.f32.mrb[100].mxu0  ;;  %v3958_v6 = vpop.f32.mrb[100].mxu1  ;;  %v6300_v11 = vmax.f32 %v6298_v24, %v6299_v31  ;;  %v6302_v27 = vld [vmem:[#allocation38_spill] sm:$0xff] }
 0x1b2   :  { %2958 = vst.msk [vmem:[%s6065_s6 + $0x108] sm:$0xff] %vm2924_vm1, %v2893_v46  ;;  %v2831_v41 = vadd.f32 %v5551_v30, %v2760_v12  ;;  %v2057_v23 = vmax.f32 %v6285_v36, %v3844_v5  ;;  %v1881_v33 = vpop.f32.mrb[101].mxu0  ;;  %v2586_v10 = vpop.f32.mrb[101].mxu1  ;;  %v6303_v46 = vmax.f32 %v6301_v29, %v6302_v27 }
 0x1b3   :  { %2957 = vst.msk [vmem:[%s6065_s6 + $0x100] sm:$0xff] %vm2924_vm1, %v2892_v13  ;;  %v2830_v8 = vadd.f32 %v5551_v30, %v2759_v49  ;;  %v2056_v38 = vmax.f32 %v6288_v47, %v1881_v33  ;;  %v6307_v47 = vld [vmem:[#allocation41_spill] sm:$0xff] }
 0x1b4   :  { %v2895_v45 = vmax.f32 %v2831_v41, 0.0  ;;  %v2762_v52 = vmax.f32 %v2057_v23, %v3958_v6  ;;  %v6304_v6 = vld [vmem:[#allocation39_spill] sm:$0xff]  ;;  %v6305_v41 = vld [vmem:[#allocation40_spill] sm:$0xff] }
 0x1b5   :  { %v2894_v53 = vmax.f32 %v2830_v8, 0.0  ;;  %v2761_v0 = vmax.f32 %v2056_v38, %v2586_v10  ;;  %v3847_v7 = vpop.f32.mrb[102].mxu0  ;;  %v3961_v48 = vpop.f32.mrb[102].mxu1  ;;  %v6306_v50 = vmax.f32 %v6304_v6, %v6305_v41  ;;  %v6308_v38 = vld [vmem:[#allocation42_spill] sm:$0xff] }
 0x1b6   :  { %2960 = vst.msk [vmem:[%s6065_s6 + $0x118] sm:$0xff] %vm2924_vm1, %v2895_v45  ;;  %v2833_v1 = vadd.f32 %v5551_v30, %v2762_v52  ;;  %v2059_v57 = vmax.f32 %v6291_v40, %v3847_v7  ;;  %v1891_v58 = vpop.f32.mrb[103].mxu0  ;;  %v2596_v37 = vpop.f32.mrb[103].mxu1  ;;  %v6309_v45 = vmax.f32 %v6307_v47, %v6308_v38 }
 0x1b7   :  { %2959 = vst.msk [vmem:[%s6065_s6 + $0x110] sm:$0xff] %vm2924_vm1, %v2894_v53  ;;  %v2832_v34 = vadd.f32 %v5551_v30, %v2761_v0  ;;  %v2058_v2 = vmax.f32 %v6294_v54, %v1891_v58  ;;  %v6313_v54 = vld [vmem:[#allocation45_spill] sm:$0xff] }
 0x1b8   :  { %v2897_v3 = vmax.f32 %v2833_v1, 0.0  ;;  %v2764_v17 = vmax.f32 %v2059_v57, %v3961_v48  ;;  %v6310_v48 = vld [vmem:[#allocation43_spill] sm:$0xff]  ;;  %v6311_v1 = vld [vmem:[#allocation44_spill] sm:$0xff] }
 0x1b9   :  { %v2896_v59 = vmax.f32 %v2832_v34, 0.0  ;;  %v2763_v18 = vmax.f32 %v2058_v2, %v2596_v37  ;;  %v3850_v19 = vpop.f32.mrb[104].mxu0  ;;  %v3964_v32 = vpop.f32.mrb[104].mxu1  ;;  %v6312_v4 = vmax.f32 %v6310_v48, %v6311_v1  ;;  %v6314_v2 = vld [vmem:[#allocation46_spill] sm:$0xff] }
 0x1ba   :  { %2962 = vst.msk [vmem:[%s6065_s6 + $0x128] sm:$0xff] %vm2924_vm1, %v2897_v3  ;;  %v2835_v60 = vadd.f32 %v5551_v30, %v2764_v17  ;;  %v2061_v22 = vmax.f32 %v6297_v21, %v3850_v19  ;;  %v1901_v44 = vpop.f32.mrb[105].mxu0  ;;  %v2606_v62 = vpop.f32.mrb[105].mxu1  ;;  %v6315_v3 = vmax.f32 %v6313_v54, %v6314_v2 }
 0x1bb   :  { %2961 = vst.msk [vmem:[%s6065_s6 + $0x120] sm:$0xff] %vm2924_vm1, %v2896_v59  ;;  %v2834_v63 = vadd.f32 %v5551_v30, %v2763_v18  ;;  %v2060_v25 = vmax.f32 %v6300_v11, %v1901_v44  ;;  %v6319_v11 = vld [vmem:[#allocation49_spill] sm:$0xff] }
 0x1bc   :  { %v2899_v26 = vmax.f32 %v2835_v60, 0.0  ;;  %v2766_v20 = vmax.f32 %v2061_v22, %v3964_v32  ;;  %v6316_v32 = vld [vmem:[#allocation47_spill] sm:$0xff]  ;;  %v6317_v60 = vld [vmem:[#allocation48_spill] sm:$0xff] }
 0x1bd   :  { %v2898_v61 = vmax.f32 %v2834_v63, 0.0  ;;  %v2765_v51 = vmax.f32 %v2060_v25, %v2606_v62  ;;  %v3853_v28 = vpop.f32.mrb[106].mxu0  ;;  %v3967_v55 = vpop.f32.mrb[106].mxu1  ;;  %v6318_v42 = vmax.f32 %v6316_v32, %v6317_v60  ;;  %v6320_v25 = vld [vmem:[#allocation50_spill] sm:$0xff] }
 0x1be   :  { %2964 = vst.msk [vmem:[%s6065_s6 + $0x138] sm:$0xff] %vm2924_vm1, %v2899_v26  ;;  %v2837_v56 = vadd.f32 %v5551_v30, %v2766_v20  ;;  %v2063_v12 = vmax.f32 %v6303_v46, %v3853_v28  ;;  %v1911_v13 = vpop.f32.mrb[107].mxu0  ;;  %v2616_v49 = vpop.f32.mrb[107].mxu1  ;;  %v6321_v26 = vmax.f32 %v6319_v11, %v6320_v25 }
 0x1bf   :  { %2963 = vst.msk [vmem:[%s6065_s6 + $0x130] sm:$0xff] %vm2924_vm1, %v2898_v61  ;;  %v2836_v5 = vadd.f32 %v5551_v30, %v2765_v51  ;;  %v2062_v35 = vmax.f32 %v6306_v50, %v1911_v13  ;;  %v6325_v50 = vld [vmem:[#allocation53_spill] sm:$0xff] }
 0x1c0   :  { %v2901_v36 = vmax.f32 %v2837_v56, 0.0  ;;  %v2768_v23 = vmax.f32 %v2063_v12, %v3967_v55  ;;  %v6322_v55 = vld [vmem:[#allocation51_spill] sm:$0xff]  ;;  %v6323_v56 = vld [vmem:[#allocation52_spill] sm:$0xff] }
 0x1c1   :  { %v2900_v33 = vmax.f32 %v2836_v5, 0.0  ;;  %v2767_v10 = vmax.f32 %v2062_v35, %v2616_v49  ;;  %v3856_v8 = vpop.f32.mrb[108].mxu0  ;;  %v3970_v9 = vpop.f32.mrb[108].mxu1  ;;  %v6324_v29 = vmax.f32 %v6322_v55, %v6323_v56  ;;  %v6326_v35 = vld [vmem:[#allocation54_spill] sm:$0xff] }
 0x1c2   :  { %2966 = vst.msk [vmem:[%s6065_s6 + $0x148] sm:$0xff] %vm2924_vm1, %v2901_v36  ;;  %v2839_v14 = vadd.f32 %v5551_v30, %v2768_v23  ;;  %v2065_v52 = vmax.f32 %v6309_v45, %v3856_v8  ;;  %v1921_v53 = vpop.f32.mrb[109].mxu0  ;;  %v2626_v0 = vpop.f32.mrb[109].mxu1  ;;  %v6327_v36 = vmax.f32 %v6325_v50, %v6326_v35 }
 0x1c3   :  { %2965 = vst.msk [vmem:[%s6065_s6 + $0x140] sm:$0xff] %vm2924_vm1, %v2900_v33  ;;  %v2838_v7 = vadd.f32 %v5551_v30, %v2767_v10  ;;  %v2064_v39 = vmax.f32 %v6312_v4, %v1921_v53  ;;  %v6331_v4 = vld [vmem:[#allocation57_spill] sm:$0xff] }
 0x1c4   :  { %v2903_v40 = vmax.f32 %v2839_v14, 0.0  ;;  %v2770_v57 = vmax.f32 %v2065_v52, %v3970_v9  ;;  %v6328_v9 = vld [vmem:[#allocation55_spill] sm:$0xff]  ;;  %v6329_v14 = vld [vmem:[#allocation56_spill] sm:$0xff] }
 0x1c5   :  { %v2902_v58 = vmax.f32 %v2838_v7, 0.0  ;;  %v2769_v37 = vmax.f32 %v2064_v39, %v2626_v0  ;;  %v3859_v34 = vpop.f32.mrb[110].mxu0  ;;  %v3973_v15 = vpop.f32.mrb[110].mxu1  ;;  %v6330_v47 = vmax.f32 %v6328_v9, %v6329_v14  ;;  %v6332_v39 = vld [vmem:[#allocation58_spill] sm:$0xff] }
 0x1c6   :  { %2968 = vst.msk [vmem:[%s6065_s6 + $0x158] sm:$0xff] %vm2924_vm1, %v2903_v40  ;;  %v2841_v16 = vadd.f32 %v5551_v30, %v2770_v57  ;;  %v2067_v17 = vmax.f32 %v6315_v3, %v3859_v34  ;;  %v1931_v59 = vpop.f32.mrb[111].mxu0  ;;  %v2636_v18 = vpop.f32.mrb[111].mxu1  ;;  %v6333_v40 = vmax.f32 %v6331_v4, %v6332_v39 }
 0x1c7   :  { %2967 = vst.msk [vmem:[%s6065_s6 + $0x150] sm:$0xff] %vm2924_vm1, %v2902_v58  ;;  %v2840_v19 = vadd.f32 %v5551_v30, %v2769_v37  ;;  %v2066_v43 = vmax.f32 %v6318_v42, %v1931_v59  ;;  %v6337_v42 = vld [vmem:[#allocation61_spill] sm:$0xff] }
 0x1c8   :  { %v2905_v21 = vmax.f32 %v2841_v16, 0.0  ;;  %v2772_v22 = vmax.f32 %v2067_v17, %v3973_v15  ;;  %v6334_v15 = vld [vmem:[#allocation59_spill] sm:$0xff]  ;;  %v6335_v16 = vld [vmem:[#allocation60_spill] sm:$0xff] }
 0x1c9   :  { %v2904_v44 = vmax.f32 %v2840_v19, 0.0  ;;  %v2771_v62 = vmax.f32 %v2066_v43, %v2636_v18  ;;  %v3862_v63 = vpop.f32.mrb[112].mxu0  ;;  %v3976_v24 = vpop.f32.mrb[112].mxu1  ;;  %v6336_v54 = vmax.f32 %v6334_v15, %v6335_v16  ;;  %v6338_v43 = vld [vmem:[#allocation62_spill] sm:$0xff] }
 0x1ca   :  { %2970 = vst.msk [vmem:[%s6065_s6 + $0x168] sm:$0xff] %vm2924_vm1, %v2905_v21  ;;  %v2843_v31 = vadd.f32 %v5551_v30, %v2772_v22  ;;  %v2069_v20 = vmax.f32 %v6321_v26, %v3862_v63  ;;  %v1941_v61 = vpop.f32.mrb[113].mxu0  ;;  %v2646_v51 = vpop.f32.mrb[113].mxu1  ;;  %v6339_v21 = vmax.f32 %v6337_v42, %v6338_v43 }
 0x1cb   :  { %2969 = vst.msk [vmem:[%s6065_s6 + $0x160] sm:$0xff] %vm2924_vm1, %v2904_v44  ;;  %v2842_v28 = vadd.f32 %v5551_v30, %v2771_v62  ;;  %v2068_v27 = vmax.f32 %v6324_v29, %v1941_v61  ;;  %v6343_v29 = vld [vmem:[#allocation65_spill] sm:$0xff] }
 0x1cc   :  { %v2907_v46 = vmax.f32 %v2843_v31, 0.0  ;;  %v2774_v12 = vmax.f32 %v2069_v20, %v3976_v24  ;;  %v6340_v24 = vld [vmem:[#allocation63_spill] sm:$0xff]  ;;  %v6341_v31 = vld [vmem:[#allocation64_spill] sm:$0xff] }
 0x1cd   :  { %v2906_v13 = vmax.f32 %v2842_v28, 0.0  ;;  %v2773_v49 = vmax.f32 %v2068_v27, %v2646_v51  ;;  %v3865_v5 = vpop.f32.mrb[114].mxu0  ;;  %v3979_v6 = vpop.f32.mrb[114].mxu1  ;;  %v6342_v11 = vmax.f32 %v6340_v24, %v6341_v31  ;;  %v6344_v27 = vld [vmem:[#allocation66_spill] sm:$0xff] }
 0x1ce   :  { %2972 = vst.msk [vmem:[%s6065_s6 + $0x178] sm:$0xff] %vm2924_vm1, %v2907_v46  ;;  %v2845_v41 = vadd.f32 %v5551_v30, %v2774_v12  ;;  %v2071_v23 = vmax.f32 %v6327_v36, %v3865_v5  ;;  %v1951_v33 = vpop.f32.mrb[115].mxu0  ;;  %v2656_v10 = vpop.f32.mrb[115].mxu1  ;;  %v6345_v46 = vmax.f32 %v6343_v29, %v6344_v27 }
 0x1cf   :  { %2971 = vst.msk [vmem:[%s6065_s6 + $0x170] sm:$0xff] %vm2924_vm1, %v2906_v13  ;;  %v2844_v8 = vadd.f32 %v5551_v30, %v2773_v49  ;;  %v2070_v38 = vmax.f32 %v6330_v47, %v1951_v33  ;;  %v6349_v47 = vld [vmem:[#allocation69_spill] sm:$0xff] }
 0x1d0   :  { %v2909_v45 = vmax.f32 %v2845_v41, 0.0  ;;  %v2776_v52 = vmax.f32 %v2071_v23, %v3979_v6  ;;  %v6346_v6 = vld [vmem:[#allocation67_spill] sm:$0xff]  ;;  %v6347_v41 = vld [vmem:[#allocation68_spill] sm:$0xff] }
 0x1d1   :  { %v2908_v53 = vmax.f32 %v2844_v8, 0.0  ;;  %v2775_v0 = vmax.f32 %v2070_v38, %v2656_v10  ;;  %v3868_v7 = vpop.f32.mrb[116].mxu0  ;;  %v3982_v48 = vpop.f32.mrb[116].mxu1  ;;  %v6348_v50 = vmax.f32 %v6346_v6, %v6347_v41  ;;  %v6350_v38 = vld [vmem:[#allocation70_spill] sm:$0xff] }
 0x1d2   :  { %2974 = vst.msk [vmem:[%s6065_s6 + $0x188] sm:$0xff] %vm2924_vm1, %v2909_v45  ;;  %v2847_v1 = vadd.f32 %v5551_v30, %v2776_v52  ;;  %v2073_v57 = vmax.f32 %v6333_v40, %v3868_v7  ;;  %v1961_v58 = vpop.f32.mrb[117].mxu0  ;;  %v2666_v37 = vpop.f32.mrb[117].mxu1  ;;  %v6351_v45 = vmax.f32 %v6349_v47, %v6350_v38 }
 0x1d3   :  { %2973 = vst.msk [vmem:[%s6065_s6 + $0x180] sm:$0xff] %vm2924_vm1, %v2908_v53  ;;  %v2846_v34 = vadd.f32 %v5551_v30, %v2775_v0  ;;  %v2072_v2 = vmax.f32 %v6336_v54, %v1961_v58  ;;  %v6355_v54 = vld [vmem:[#allocation73_spill] sm:$0xff] }
 0x1d4   :  { %v2911_v3 = vmax.f32 %v2847_v1, 0.0  ;;  %v2778_v17 = vmax.f32 %v2073_v57, %v3982_v48  ;;  %v6352_v48 = vld [vmem:[#allocation71_spill] sm:$0xff]  ;;  %v6353_v1 = vld [vmem:[#allocation72_spill] sm:$0xff] }
 0x1d5   :  { %v2910_v59 = vmax.f32 %v2846_v34, 0.0  ;;  %v2777_v18 = vmax.f32 %v2072_v2, %v2666_v37  ;;  %v3871_v19 = vpop.f32.mrb[118].mxu0  ;;  %v3985_v32 = vpop.f32.mrb[118].mxu1  ;;  %v6354_v4 = vmax.f32 %v6352_v48, %v6353_v1  ;;  %v6356_v2 = vld [vmem:[#allocation74_spill] sm:$0xff] }
 0x1d6   :  { %2976 = vst.msk [vmem:[%s6065_s6 + $0x198] sm:$0xff] %vm2924_vm1, %v2911_v3  ;;  %v2849_v60 = vadd.f32 %v5551_v30, %v2778_v17  ;;  %v2075_v22 = vmax.f32 %v6339_v21, %v3871_v19  ;;  %v1971_v44 = vpop.f32.mrb[119].mxu0  ;;  %v2676_v62 = vpop.f32.mrb[119].mxu1  ;;  %v6357_v3 = vmax.f32 %v6355_v54, %v6356_v2 }
 0x1d7   :  { %2975 = vst.msk [vmem:[%s6065_s6 + $0x190] sm:$0xff] %vm2924_vm1, %v2910_v59  ;;  %v2848_v63 = vadd.f32 %v5551_v30, %v2777_v18  ;;  %v2074_v25 = vmax.f32 %v6342_v11, %v1971_v44  ;;  %v6361_v11 = vld [vmem:[#allocation77_spill] sm:$0xff] }
 0x1d8   :  { %v2913_v26 = vmax.f32 %v2849_v60, 0.0  ;;  %v2780_v20 = vmax.f32 %v2075_v22, %v3985_v32  ;;  %v6358_v32 = vld [vmem:[#allocation75_spill] sm:$0xff]  ;;  %v6359_v60 = vld [vmem:[#allocation76_spill] sm:$0xff] }
 0x1d9   :  { %v2912_v61 = vmax.f32 %v2848_v63, 0.0  ;;  %v2779_v51 = vmax.f32 %v2074_v25, %v2676_v62  ;;  %v3874_v28 = vpop.f32.mrb[120].mxu0  ;;  %v3988_v55 = vpop.f32.mrb[120].mxu1  ;;  %v6360_v42 = vmax.f32 %v6358_v32, %v6359_v60  ;;  %v6362_v25 = vld [vmem:[#allocation78_spill] sm:$0xff] }
 0x1da   :  { %2978 = vst.msk [vmem:[%s6065_s6 + $0x1a8] sm:$0xff] %vm2924_vm1, %v2913_v26  ;;  %v2851_v56 = vadd.f32 %v5551_v30, %v2780_v20  ;;  %v2077_v12 = vmax.f32 %v6345_v46, %v3874_v28  ;;  %v1981_v13 = vpop.f32.mrb[121].mxu0  ;;  %v2686_v49 = vpop.f32.mrb[121].mxu1  ;;  %v6363_v26 = vmax.f32 %v6361_v11, %v6362_v25 }
 0x1db   :  { %2977 = vst.msk [vmem:[%s6065_s6 + $0x1a0] sm:$0xff] %vm2924_vm1, %v2912_v61  ;;  %v2850_v5 = vadd.f32 %v5551_v30, %v2779_v51  ;;  %v2076_v35 = vmax.f32 %v6348_v50, %v1981_v13 }
 0x1dc   :  { %v2915_v36 = vmax.f32 %v2851_v56, 0.0  ;;  %v2782_v23 = vmax.f32 %v2077_v12, %v3988_v55  ;;  %v6364_v55 = vld [vmem:[#allocation79_spill] sm:$0xff]  ;;  %v6365_v56 = vld [vmem:[#allocation80_spill] sm:$0xff] }
 0x1dd   :  { %v2914_v33 = vmax.f32 %v2850_v5, 0.0  ;;  %v2781_v10 = vmax.f32 %v2076_v35, %v2686_v49  ;;  %v3877_v8 = vpop.f32.mrb[122].mxu0  ;;  %v3991_v9 = vpop.f32.mrb[122].mxu1  ;;  %v6366_v29 = vmax.f32 %v6364_v55, %v6365_v56 }
 0x1de   :  { %2980 = vst.msk [vmem:[%s6065_s6 + $0x1b8] sm:$0xff] %vm2924_vm1, %v2915_v36  ;;  %v2853_v14 = vadd.f32 %v5551_v30, %v2782_v23  ;;  %v2079_v52 = vmax.f32 %v6351_v45, %v3877_v8  ;;  %v1991_v53 = vpop.f32.mrb[123].mxu0  ;;  %v2696_v0 = vpop.f32.mrb[123].mxu1 }
 0x1df   :  { %2979 = vst.msk [vmem:[%s6065_s6 + $0x1b0] sm:$0xff] %vm2924_vm1, %v2914_v33  ;;  %v2852_v7 = vadd.f32 %v5551_v30, %v2781_v10  ;;  %v2078_v39 = vmax.f32 %v6354_v4, %v1991_v53 }
 0x1e0   :  { %v2917_v40 = vmax.f32 %v2853_v14, 0.0  ;;  %v2784_v57 = vmax.f32 %v2079_v52, %v3991_v9 }
 0x1e1   :  { %v2916_v58 = vmax.f32 %v2852_v7, 0.0  ;;  %v2783_v37 = vmax.f32 %v2078_v39, %v2696_v0  ;;  %v3880_v34 = vpop.f32.mrb[124].mxu0  ;;  %v3994_v15 = vpop.f32.mrb[124].mxu1 }
 0x1e2   :  { %2982 = vst.msk [vmem:[%s6065_s6 + $0x1c8] sm:$0xff] %vm2924_vm1, %v2917_v40  ;;  %v2855_v16 = vadd.f32 %v5551_v30, %v2784_v57  ;;  %v2081_v17 = vmax.f32 %v6357_v3, %v3880_v34  ;;  %v2001_v59 = vpop.f32.mrb[125].mxu0  ;;  %v2706_v18 = vpop.f32.mrb[125].mxu1 }
 0x1e3   :  { %2981 = vst.msk [vmem:[%s6065_s6 + $0x1c0] sm:$0xff] %vm2924_vm1, %v2916_v58  ;;  %v2854_v19 = vadd.f32 %v5551_v30, %v2783_v37  ;;  %v2080_v43 = vmax.f32 %v6360_v42, %v2001_v59 }
 0x1e4   :  { %v2919_v21 = vmax.f32 %v2855_v16, 0.0  ;;  %v2786_v22 = vmax.f32 %v2081_v17, %v3994_v15 }
 0x1e5   :  { %v2918_v44 = vmax.f32 %v2854_v19, 0.0  ;;  %v2785_v62 = vmax.f32 %v2080_v43, %v2706_v18  ;;  %v3883_v63 = vpop.f32.mrb[126].mxu0  ;;  %v3997_v24 = vpop.f32.mrb[126].mxu1 }
 0x1e6   :  { %2984 = vst.msk [vmem:[%s6065_s6 + $0x1d8] sm:$0xff] %vm2924_vm1, %v2919_v21  ;;  %v2857_v31 = vadd.f32 %v5551_v30, %v2786_v22  ;;  %v2083_v20 = vmax.f32 %v6363_v26, %v3883_v63  ;;  %v2011_v61 = vpop.f32.mrb[127].mxu0  ;;  %v2716_v51 = vpop.f32.mrb[127].mxu1 }
 0x1e7   :  { %2983 = vst.msk [vmem:[%s6065_s6 + $0x1d0] sm:$0xff] %vm2924_vm1, %v2918_v44  ;;  %v2856_v28 = vadd.f32 %v5551_v30, %v2785_v62  ;;  %v2082_v27 = vmax.f32 %v6366_v29, %v2011_v61 }
 0x1e8   :  { %v2921_v46 = vmax.f32 %v2857_v31, 0.0  ;;  %v2788_v12 = vmax.f32 %v2083_v20, %v3997_v24 }
 0x1e9   :  { %v2920_v13 = vmax.f32 %v2856_v28, 0.0  ;;  %v2787_v49 = vmax.f32 %v2082_v27, %v2716_v51 }
 0x1ea   :  { %2986 = vst.msk [vmem:[%s6065_s6 + $0x1e8] sm:$0xff] %vm2924_vm1, %v2921_v46  ;;  %v2859_v5 = vadd.f32 %v5551_v30, %v2788_v12 }
 0x1eb   :  { %2985 = vst.msk [vmem:[%s6065_s6 + $0x1e0] sm:$0xff] %vm2924_vm1, %v2920_v13  ;;  %v2858_v6 = vadd.f32 %v5551_v30, %v2787_v49 }
 0x1ec   :  { %v2923_v41 = vmax.f32 %v2859_v5, 0.0 }
 0x1ed   :  { %v2922_v50 = vmax.f32 %v2858_v6, 0.0 }
 0x1ee   :  { %2988 = vst.msk [vmem:[%s6065_s6 + $0x1f8] sm:$0xff] %vm2924_vm1, %v2923_v41 }
 0x1ef   :  { %2987 = vst.msk [vmem:[%s6065_s6 + $0x1f0] sm:$0xff] %vm2924_vm1, %v2922_v50 }

// kernel: encoder_forward.8
= control target key start
LH: loop header
LB: loop body
LE: loop exit
PB: predicated region body
PF: predicated region fallthrough
CT: control target
= control target key end

     0   :  { %v1224_v0 = vmov 0.0|0.0   ;;  %vm73_vm0 = vcmask 130048   ;;  %vm1029_vm1 = vcmask 261120   ;;  %s2081_s4 = inlined_call_operand.vmem [shape: f32[144,32], index: 4, kind: input, shape index: {}]   ;;  %s2082_s0 = inlined_call_operand.vmem [shape: f32[128,144], index: 0, kind: input, shape index: {}]   ;;  %s2083_s1 = inlined_call_operand.vmem [shape: f32[128,144], index: 1, kind: input, shape index: {}]   ;;  %s2084_s2 = inlined_call_operand.vmem [shape: f32[128,144], index: 2, kind: input, shape index: {}]   ;;  %s2085_s3 = inlined_call_operand.vmem [shape: f32[128,144], index: 3, kind: input, shape index: {}]   ;;  %s2086_s5 = inlined_call_operand.vmem [shape: f32[1,32], index: 5, kind: input, shape index: {}]   ;;  %s2087_s6 = inlined_call_operand.vmem [shape: f32[128,32], index: 6, kind: output, shape index: {}]  }
   0x1   :  { %1115 = vmatprep.subr.bf16.mxu0 %v1224_v0  ;;  %v23_v1 = vld [vmem:[%s2081_s4] sm:$0xff]  ;;  %v24_v2 = vld [vmem:[%s2081_s4 + $0x8] sm:$0xff]  ;;  %1142 = vmatprep.subr.bf16.mxu1 %v1224_v0  ;;  %v25_v3 = vld [vmem:[%s2081_s4 + $0x10] sm:$0xff] }
   0x2   :  { %v1271_v4 = vpack.c.bf16 %v24_v2, %v23_v1  ;;  %v26_v5 = vld [vmem:[%s2081_s4 + $0x18] sm:$0xff]  ;;  %v27_v7 = vld [vmem:[%s2081_s4 + $0x20] sm:$0xff]  ;;  %v28_v8 = vld [vmem:[%s2081_s4 + $0x28] sm:$0xff] }
   0x3   :  { %v1278_v6 = vpack.c.bf16 %v26_v5, %v25_v3  ;;  %v42_v9 = vld [vmem:[%s2082_s0 + $0x8] sm:$0xff]  ;;  %v1296_v11 = vpack.c.bf16 %v28_v8, %v27_v7  ;;  %v29_v12 = vld [vmem:[%s2081_s4 + $0x30] sm:$0xff]  ;;  %v30_v13 = vld [vmem:[%s2081_s4 + $0x38] sm:$0xff] }
   0x4   :  { %1117 = vmatpush1.bf16.msra.mxu0 %v1271_v4  ;;  %1144 = vmatpush1.bf16.msra.mxu1 %v1271_v4  ;;  %v268_v10 = vld [vmem:[%s2083_s1 + $0x8] sm:$0xff]  ;;  %v1310_v14 = vpack.c.bf16 %v30_v13, %v29_v12  ;;  %v31_v15 = vld [vmem:[%s2081_s4 + $0x40] sm:$0xff]  ;;  %v33_v18 = vld [vmem:[%s2081_s4 + $0x50] sm:$0xff] }
   0x5   :  { %1118 = vmatprep.subr.bf16.mxu0 %v1224_v0  ;;  %1145 = vmatprep.subr.bf16.mxu1 %v1224_v0  ;;  %v32_v16 = vld [vmem:[%s2081_s4 + $0x48] sm:$0xff]  ;;  %v34_v19 = vld [vmem:[%s2081_s4 + $0x58] sm:$0xff]  ;;  %v35_v21 = vld [vmem:[%s2081_s4 + $0x60] sm:$0xff] }
   0x6   :  { %1050 = vmatprep.mubr.msk.f32.mxu0 %vm73_vm0, %v42_v9  ;;  %1066 = vmatprep.mubr.msk.f32.mxu1 %vm73_vm0, %v268_v10  ;;  %v1322_v17 = vpack.c.bf16 %v32_v16, %v31_v15  ;;  %v1334_v20 = vpack.c.bf16 %v34_v19, %v33_v18  ;;  %v36_v22 = vld [vmem:[%s2081_s4 + $0x68] sm:$0xff]  ;;  %v37_v24 = vld [vmem:[%s2081_s4 + $0x70] sm:$0xff]  ;;  %v38_v25 = vld [vmem:[%s2081_s4 + $0x78] sm:$0xff] }
   0x7   :  { %v1346_v23 = vpack.c.bf16 %v36_v22, %v35_v21  ;;  %v1358_v26 = vpack.c.bf16 %v38_v25, %v37_v24  ;;  %v39_v27 = vld [vmem:[%s2081_s4 + $0x80] sm:$0xff]  ;;  %v40_v28 = vld [vmem:[%s2081_s4 + $0x88] sm:$0xff]  ;;  %v44_v32 = vld [vmem:[%s2082_s0 + $0x18] sm:$0xff] }
   0x8   :  { %1120 = vmatpush1.bf16.msra.mxu0 %v1278_v6  ;;  %1147 = vmatpush1.bf16.msra.mxu1 %v1278_v6  ;;  %v1370_v29 = vpack.c.bf16 %v40_v28, %v39_v27  ;;  %v41_v30 = vld [vmem:[%s2082_s0] sm:$0xff]  ;;  %v270_v33 = vld [vmem:[%s2083_s1 + $0x18] sm:$0xff]  ;;  %v43_v34 = vld [vmem:[%s2082_s0 + $0x10] sm:$0xff] }
   0x9   :  { %1121 = vmatprep.subr.bf16.mxu0 %v1224_v0  ;;  %1148 = vmatprep.subr.bf16.mxu1 %v1224_v0  ;;  %v267_v31 = vld [vmem:[%s2083_s1] sm:$0xff]  ;;  %v269_v35 = vld [vmem:[%s2083_s1 + $0x10] sm:$0xff]  ;;  %v46_v36 = vld [vmem:[%s2082_s0 + $0x28] sm:$0xff] }
   0xa   :  { %v272_v37 = vld [vmem:[%s2083_s1 + $0x28] sm:$0xff]  ;;  %v45_v38 = vld [vmem:[%s2082_s0 + $0x20] sm:$0xff]  ;;  %v48_v40 = vld [vmem:[%s2082_s0 + $0x38] sm:$0xff] }
   0xb   :  { %v271_v39 = vld [vmem:[%s2083_s1 + $0x20] sm:$0xff]  ;;  %v274_v41 = vld [vmem:[%s2083_s1 + $0x38] sm:$0xff]  ;;  %v47_v42 = vld [vmem:[%s2082_s0 + $0x30] sm:$0xff] }
   0xc   :  { %1123 = vmatpush1.bf16.msra.mxu0 %v1296_v11  ;;  %1150 = vmatpush1.bf16.msra.mxu1 %v1296_v11  ;;  %v273_v43 = vld [vmem:[%s2083_s1 + $0x30] sm:$0xff]  ;;  %v50_v44 = vld [vmem:[%s2082_s0 + $0x48] sm:$0xff]  ;;  %v49_v46 = vld [vmem:[%s2082_s0 + $0x40] sm:$0xff] }
   0xd   :  { %1124 = vmatprep.subr.bf16.mxu0 %v1224_v0  ;;  %1151 = vmatprep.subr.bf16.mxu1 %v1224_v0  ;;  %v276_v45 = vld [vmem:[%s2083_s1 + $0x48] sm:$0xff]  ;;  %v275_v47 = vld [vmem:[%s2083_s1 + $0x40] sm:$0xff]  ;;  %v52_v48 = vld [vmem:[%s2082_s0 + $0x58] sm:$0xff] }
   0xe   :  { %v278_v49 = vld [vmem:[%s2083_s1 + $0x58] sm:$0xff]  ;;  %v51_v50 = vld [vmem:[%s2082_s0 + $0x50] sm:$0xff]  ;;  %v54_v52 = vld [vmem:[%s2082_s0 + $0x68] sm:$0xff] }
   0xf   :  { %v277_v51 = vld [vmem:[%s2083_s1 + $0x50] sm:$0xff]  ;;  %v280_v53 = vld [vmem:[%s2083_s1 + $0x68] sm:$0xff]  ;;  %v53_v54 = vld [vmem:[%s2082_s0 + $0x60] sm:$0xff] }
  0x10   :  { %1126 = vmatpush1.bf16.msra.mxu0 %v1310_v14  ;;  %1153 = vmatpush1.bf16.msra.mxu1 %v1310_v14  ;;  %v279_v55 = vld [vmem:[%s2083_s1 + $0x60] sm:$0xff]  ;;  %v56_v56 = vld [vmem:[%s2082_s0 + $0x78] sm:$0xff]  ;;  %v55_v58 = vld [vmem:[%s2082_s0 + $0x70] sm:$0xff] }
  0x11   :  { %1127 = vmatprep.subr.bf16.mxu0 %v1224_v0  ;;  %1154 = vmatprep.subr.bf16.mxu1 %v1224_v0  ;;  %v282_v57 = vld [vmem:[%s2083_s1 + $0x78] sm:$0xff]  ;;  %v281_v59 = vld [vmem:[%s2083_s1 + $0x70] sm:$0xff]  ;;  %v58_v60 = vld [vmem:[%s2082_s0 + $0x88] sm:$0xff] }
  0x12   :  { %v284_v61 = vld [vmem:[%s2083_s1 + $0x88] sm:$0xff]  ;;  %v57_v62 = vld [vmem:[%s2082_s0 + $0x80] sm:$0xff]  ;;  %v60_v1 = vld [vmem:[%s2082_s0 + $0x98] sm:$0xff] }
  0x13   :  { %v283_v63 = vld [vmem:[%s2083_s1 + $0x80] sm:$0xff]  ;;  %v286_v2 = vld [vmem:[%s2083_s1 + $0x98] sm:$0xff]  ;;  %v59_v3 = vld [vmem:[%s2082_s0 + $0x90] sm:$0xff] }
  0x14   :  { %1129 = vmatpush1.bf16.msra.mxu0 %v1322_v17  ;;  %1156 = vmatpush1.bf16.msra.mxu1 %v1322_v17  ;;  %v62_v5 = vld [vmem:[%s2082_s0 + $0xa8] sm:$0xff]  ;;  %v287_v7 = vld [vmem:[%s2083_s1 + $0xa0] sm:$0xff]  ;;  %v64_v8 = vld [vmem:[%s2082_s0 + $0xb8] sm:$0xff] }
  0x15   :  { %1130 = vmatprep.subr.bf16.mxu0 %v1224_v0  ;;  %1157 = vmatprep.subr.bf16.mxu1 %v1224_v0  ;;  %v290_v9 = vld [vmem:[%s2083_s1 + $0xb8] sm:$0xff]  ;;  %v63_v10 = vld [vmem:[%s2082_s0 + $0xb0] sm:$0xff]  ;;  %v66_v12 = vld [vmem:[%s2082_s0 + $0xc8] sm:$0xff] }
  0x16   :  { %v292_v13 = vld [vmem:[%s2083_s1 + $0xc8] sm:$0xff]  ;;  %v291_v15 = vld [vmem:[%s2083_s1 + $0xc0] sm:$0xff]  ;;  %v68_v16 = vld [vmem:[%s2082_s0 + $0xd8] sm:$0xff] }
  0x17   :  { %v67_v18 = vld [vmem:[%s2082_s0 + $0xd0] sm:$0xff]  ;;  %v296_v21 = vld [vmem:[%s2083_s1 + $0xe8] sm:$0xff]  ;;  %v69_v22 = vld [vmem:[%s2082_s0 + $0xe0] sm:$0xff] }
  0x18   :  { %1132 = vmatpush1.bf16.msra.mxu0 %v1334_v20  ;;  %1159 = vmatpush1.bf16.msra.mxu1 %v1334_v20  ;;  %v293_v19 = vld [vmem:[%s2083_s1 + $0xd0] sm:$0xff]  ;;  %v72_v24 = vld [vmem:[%s2082_s0 + $0xf8] sm:$0xff]  ;;  %v509_v28 = vld [vmem:[%s2084_s2 + $0x8] sm:$0xff] }
  0x19   :  { %1133 = vmatprep.subr.bf16.mxu0 %v1224_v0  ;;  %1160 = vmatprep.subr.bf16.mxu1 %v1224_v0  ;;  %v298_v25 = vld [vmem:[%s2083_s1 + $0xf8] sm:$0xff]  ;;  %v297_v27 = vld [vmem:[%s2083_s1 + $0xf0] sm:$0xff] }
  0x1c   :  { %1135 = vmatpush1.bf16.msra.mxu0 %v1346_v23  ;;  %1162 = vmatpush1.bf16.msra.mxu1 %v1346_v23 }
  0x1d   :  { %1136 = vmatprep.subr.bf16.mxu0 %v1224_v0  ;;  %1163 = vmatprep.subr.bf16.mxu1 %v1224_v0 }
  0x20   :  { %1138 = vmatpush1.bf16.msra.mxu0 %v1358_v26  ;;  %1165 = vmatpush1.bf16.msra.mxu1 %v1358_v26 }
  0x21   :  { %1139 = vmatprep.subr.bf16.mxu0 %v1224_v0  ;;  %1166 = vmatprep.subr.bf16.mxu1 %v1224_v0 }
  0x24   :  { %1141 = vmatpush1.bf16.msra.mxu0 %v1370_v29  ;;  %1168 = vmatpush1.bf16.msra.mxu1 %v1370_v29 }
  0x25   :  { %1169 = vmatprep.subr.bf16.mxu0 %v1224_v0  ;;  %1196 = vmatprep.subr.bf16.mxu1 %v1224_v0 }
  0x27   :  { %187 = vmatmul.mubr.f32.vlgmr.msra.gmra.mrb[0].mxu0 %v41_v30  ;;  %412 = vmatmul.mubr.f32.vlgmr.msra.gmra.mrb[0].mxu1 %v267_v31  ;;  %v508_v30 = vld [vmem:[%s2084_s2] sm:$0xff] }
  0x28   :  { %1171 = vmatpush1.bf16.msra.mxu0 %v1271_v4  ;;  %1051 = vmatprep.mubr.msk.f32.mxu0 %vm73_vm0, %v44_v32  ;;  %v749_v31 = vld [vmem:[%s2085_s3] sm:$0xff]  ;;  %v511_v32 = vld [vmem:[%s2084_s2 + $0x18] sm:$0xff] }
  0x29   :  { %1198 = vmatpush1.bf16.msra.mxu1 %v1271_v4  ;;  %1067 = vmatprep.mubr.msk.f32.mxu1 %vm73_vm0, %v270_v33  ;;  %v285_v4 = vld [vmem:[%s2083_s1 + $0x90] sm:$0xff]  ;;  %v752_v33 = vld [vmem:[%s2085_s3 + $0x18] sm:$0xff] }
  0x2a   :  { %1172 = vmatprep.subr.bf16.mxu0 %v1224_v0  ;;  %1199 = vmatprep.subr.bf16.mxu1 %v1224_v0 }
  0x2b   :  { %192 = vmatmul.mubr.f32.gmra.mrb[2].mxu0 %v43_v34  ;;  %417 = vmatmul.mubr.f32.gmra.mrb[2].mxu1 %v269_v35  ;;  %v510_v34 = vld [vmem:[%s2084_s2 + $0x10] sm:$0xff] }
  0x2c   :  { %1052 = vmatprep.mubr.msk.f32.mxu0 %vm73_vm0, %v46_v36  ;;  %1068 = vmatprep.mubr.msk.f32.mxu1 %vm73_vm0, %v272_v37  ;;  %v751_v35 = vld [vmem:[%s2085_s3 + $0x10] sm:$0xff]  ;;  %v513_v36 = vld [vmem:[%s2084_s2 + $0x28] sm:$0xff] }
  0x2d   :  { %1174 = vmatpush1.bf16.msra.mxu0 %v1278_v6  ;;  %1201 = vmatpush1.bf16.msra.mxu1 %v1278_v6  ;;  %v61_v6 = vld [vmem:[%s2082_s0 + $0xa0] sm:$0xff]  ;;  %v754_v37 = vld [vmem:[%s2085_s3 + $0x28] sm:$0xff] }
  0x2e   :  { %1175 = vmatprep.subr.bf16.mxu0 %v1224_v0  ;;  %1202 = vmatprep.subr.bf16.mxu1 %v1224_v0 }
  0x2f   :  { %197 = vmatmul.mubr.f32.gmra.mrb[4].mxu0 %v45_v38  ;;  %422 = vmatmul.mubr.f32.gmra.mrb[4].mxu1 %v271_v39  ;;  %v512_v38 = vld [vmem:[%s2084_s2 + $0x20] sm:$0xff] }
  0x30   :  { %1053 = vmatprep.mubr.msk.f32.mxu0 %vm73_vm0, %v48_v40  ;;  %1069 = vmatprep.mubr.msk.f32.mxu1 %vm73_vm0, %v274_v41  ;;  %v753_v39 = vld [vmem:[%s2085_s3 + $0x20] sm:$0xff]  ;;  %v515_v40 = vld [vmem:[%s2084_s2 + $0x38] sm:$0xff] }
  0x31   :  { %1177 = vmatpush1.bf16.msra.mxu0 %v1296_v11  ;;  %1204 = vmatpush1.bf16.msra.mxu1 %v1296_v11  ;;  %v289_v11 = vld [vmem:[%s2083_s1 + $0xb0] sm:$0xff]  ;;  %v756_v41 = vld [vmem:[%s2085_s3 + $0x38] sm:$0xff] }
  0x32   :  { %1178 = vmatprep.subr.bf16.mxu0 %v1224_v0  ;;  %1205 = vmatprep.subr.bf16.mxu1 %v1224_v0 }
  0x33   :  { %202 = vmatmul.mubr.f32.gmra.mrb[6].mxu0 %v47_v42  ;;  %427 = vmatmul.mubr.f32.gmra.mrb[6].mxu1 %v273_v43  ;;  %v514_v42 = vld [vmem:[%s2084_s2 + $0x30] sm:$0xff] }
  0x34   :  { %1054 = vmatprep.mubr.msk.f32.mxu0 %vm73_vm0, %v50_v44  ;;  %1070 = vmatprep.mubr.msk.f32.mxu1 %vm73_vm0, %v276_v45  ;;  %v755_v43 = vld [vmem:[%s2085_s3 + $0x30] sm:$0xff]  ;;  %v517_v44 = vld [vmem:[%s2084_s2 + $0x48] sm:$0xff] }
  0x35   :  { %1180 = vmatpush1.bf16.msra.mxu0 %v1310_v14  ;;  %1207 = vmatpush1.bf16.msra.mxu1 %v1310_v14  ;;  %v65_v14 = vld [vmem:[%s2082_s0 + $0xc0] sm:$0xff]  ;;  %v758_v45 = vld [vmem:[%s2085_s3 + $0x48] sm:$0xff] }
  0x36   :  { %1181 = vmatprep.subr.bf16.mxu0 %v1224_v0  ;;  %1208 = vmatprep.subr.bf16.mxu1 %v1224_v0 }
  0x37   :  { %207 = vmatmul.mubr.f32.gmra.mrb[8].mxu0 %v49_v46  ;;  %432 = vmatmul.mubr.f32.gmra.mrb[8].mxu1 %v275_v47  ;;  %v516_v46 = vld [vmem:[%s2084_s2 + $0x40] sm:$0xff] }
  0x38   :  { %1055 = vmatprep.mubr.msk.f32.mxu0 %vm73_vm0, %v52_v48  ;;  %1071 = vmatprep.mubr.msk.f32.mxu1 %vm73_vm0, %v278_v49  ;;  %v757_v47 = vld [vmem:[%s2085_s3 + $0x40] sm:$0xff]  ;;  %v519_v48 = vld [vmem:[%s2084_s2 + $0x58] sm:$0xff] }
  0x39   :  { %1183 = vmatpush1.bf16.msra.mxu0 %v1322_v17  ;;  %1210 = vmatpush1.bf16.msra.mxu1 %v1322_v17  ;;  %v294_v17 = vld [vmem:[%s2083_s1 + $0xd8] sm:$0xff] }
  0x3a   :  { %1184 = vmatprep.subr.bf16.mxu0 %v1224_v0  ;;  %1211 = vmatprep.subr.bf16.mxu1 %v1224_v0  ;;  %v760_v49 = vld [vmem:[%s2085_s3 + $0x58] sm:$0xff] }
  0x3b   :  { %212 = vmatmul.mubr.f32.gmra.mrb[10].mxu0 %v51_v50  ;;  %437 = vmatmul.mubr.f32.gmra.mrb[10].mxu1 %v277_v51  ;;  %v518_v50 = vld [vmem:[%s2084_s2 + $0x50] sm:$0xff] }
  0x3c   :  { %1056 = vmatprep.mubr.msk.f32.mxu0 %vm73_vm0, %v54_v52  ;;  %1072 = vmatprep.mubr.msk.f32.mxu1 %vm73_vm0, %v280_v53  ;;  %v759_v51 = vld [vmem:[%s2085_s3 + $0x50] sm:$0xff]  ;;  %v521_v52 = vld [vmem:[%s2084_s2 + $0x68] sm:$0xff] }
  0x3d   :  { %1186 = vmatpush1.bf16.msra.mxu0 %v1334_v20  ;;  %1213 = vmatpush1.bf16.msra.mxu1 %v1334_v20  ;;  %v70_v20 = vld [vmem:[%s2082_s0 + $0xe8] sm:$0xff] }
  0x3e   :  { %1187 = vmatprep.subr.bf16.mxu0 %v1224_v0  ;;  %1214 = vmatprep.subr.bf16.mxu1 %v1224_v0  ;;  %v762_v53 = vld [vmem:[%s2085_s3 + $0x68] sm:$0xff] }
  0x3f   :  { %217 = vmatmul.mubr.f32.gmra.mrb[12].mxu0 %v53_v54  ;;  %442 = vmatmul.mubr.f32.gmra.mrb[12].mxu1 %v279_v55  ;;  %v520_v54 = vld [vmem:[%s2084_s2 + $0x60] sm:$0xff] }
  0x40   :  { %1057 = vmatprep.mubr.msk.f32.mxu0 %vm73_vm0, %v56_v56  ;;  %1073 = vmatprep.mubr.msk.f32.mxu1 %vm73_vm0, %v282_v57  ;;  %v761_v55 = vld [vmem:[%s2085_s3 + $0x60] sm:$0xff]  ;;  %v523_v56 = vld [vmem:[%s2084_s2 + $0x78] sm:$0xff] }
  0x41   :  { %1189 = vmatpush1.bf16.msra.mxu0 %v1346_v23  ;;  %1216 = vmatpush1.bf16.msra.mxu1 %v1346_v23  ;;  %v295_v23 = vld [vmem:[%s2083_s1 + $0xe0] sm:$0xff]  ;;  %v764_v57 = vld [vmem:[%s2085_s3 + $0x78] sm:$0xff] }
  0x42   :  { %1190 = vmatprep.subr.bf16.mxu0 %v1224_v0  ;;  %1217 = vmatprep.subr.bf16.mxu1 %v1224_v0 }
  0x43   :  { %222 = vmatmul.mubr.f32.gmra.mrb[14].mxu0 %v55_v58  ;;  %447 = vmatmul.mubr.f32.gmra.mrb[14].mxu1 %v281_v59  ;;  %v522_v58 = vld [vmem:[%s2084_s2 + $0x70] sm:$0xff] }
  0x44   :  { %1058 = vmatprep.mubr.msk.f32.mxu0 %vm73_vm0, %v58_v60  ;;  %1074 = vmatprep.mubr.msk.f32.mxu1 %vm73_vm0, %v284_v61  ;;  %v763_v59 = vld [vmem:[%s2085_s3 + $0x70] sm:$0xff]  ;;  %v525_v60 = vld [vmem:[%s2084_s2 + $0x88] sm:$0xff] }
  0x45   :  { %1192 = vmatpush1.bf16.msra.mxu0 %v1358_v26  ;;  %1219 = vmatpush1.bf16.msra.mxu1 %v1358_v26  ;;  %v71_v26 = vld [vmem:[%s2082_s0 + $0xf0] sm:$0xff]  ;;  %v766_v61 = vld [vmem:[%s2085_s3 + $0x88] sm:$0xff] }
  0x46   :  { %1193 = vmatprep.subr.bf16.mxu0 %v1224_v0  ;;  %1220 = vmatprep.subr.bf16.mxu1 %v1224_v0  ;;  %v288_v0 = vld [vmem:[%s2083_s1 + $0xa8] sm:$0xff] }
  0x47   :  { %227 = vmatmul.mubr.f32.gmra.mrb[16].mxu0 %v57_v62  ;;  %452 = vmatmul.mubr.f32.gmra.mrb[16].mxu1 %v283_v63  ;;  %v524_v62 = vld [vmem:[%s2084_s2 + $0x80] sm:$0xff] }
  0x48   :  { %1059 = vmatprep.mubr.msk.f32.mxu0 %vm73_vm0, %v60_v1  ;;  %1075 = vmatprep.mubr.msk.f32.mxu1 %vm73_vm0, %v286_v2  ;;  %v765_v63 = vld [vmem:[%s2085_s3 + $0x80] sm:$0xff]  ;;  %v527_v1 = vld [vmem:[%s2084_s2 + $0x98] sm:$0xff] }
  0x49   :  { %1195 = vmatpush1.bf16.msra.mxu0 %v1370_v29  ;;  %1222 = vmatpush1.bf16.msra.mxu1 %v1370_v29  ;;  %v750_v29 = vld [vmem:[%s2085_s3 + $0x8] sm:$0xff]  ;;  %v768_v2 = vld [vmem:[%s2085_s3 + $0x98] sm:$0xff] }
  0x4b   :  { %232 = vmatmul.mubr.f32.gmra.mrb[18].mxu0 %v59_v3  ;;  %457 = vmatmul.mubr.f32.gmra.mrb[18].mxu1 %v285_v4  ;;  %v526_v3 = vld [vmem:[%s2084_s2 + $0x90] sm:$0xff] }
  0x4c   :  { %1060 = vmatprep.mubr.msk.f32.mxu0 %vm73_vm0, %v62_v5  ;;  %1076 = vmatprep.mubr.msk.f32.mxu1 %vm73_vm0, %v288_v0  ;;  %v767_v4 = vld [vmem:[%s2085_s3 + $0x90] sm:$0xff]  ;;  %v529_v5 = vld [vmem:[%s2084_s2 + $0xa8] sm:$0xff] }
  0x4d   :  { %v770_v0 = vld [vmem:[%s2085_s3 + $0xa8] sm:$0xff] }
  0x4f   :  { %237 = vmatmul.mubr.f32.gmra.mrb[20].mxu0 %v61_v6  ;;  %462 = vmatmul.mubr.f32.gmra.mrb[20].mxu1 %v287_v7  ;;  %v528_v6 = vld [vmem:[%s2084_s2 + $0xa0] sm:$0xff] }
  0x50   :  { %1061 = vmatprep.mubr.msk.f32.mxu0 %vm73_vm0, %v64_v8  ;;  %1077 = vmatprep.mubr.msk.f32.mxu1 %vm73_vm0, %v290_v9  ;;  %v769_v7 = vld [vmem:[%s2085_s3 + $0xa0] sm:$0xff]  ;;  %v531_v8 = vld [vmem:[%s2084_s2 + $0xb8] sm:$0xff] }
  0x51   :  { %v772_v9 = vld [vmem:[%s2085_s3 + $0xb8] sm:$0xff] }
  0x53   :  { %242 = vmatmul.mubr.f32.gmra.mrb[22].mxu0 %v63_v10  ;;  %467 = vmatmul.mubr.f32.gmra.mrb[22].mxu1 %v289_v11  ;;  %v530_v10 = vld [vmem:[%s2084_s2 + $0xb0] sm:$0xff] }
  0x54   :  { %1062 = vmatprep.mubr.msk.f32.mxu0 %vm73_vm0, %v66_v12  ;;  %1078 = vmatprep.mubr.msk.f32.mxu1 %vm73_vm0, %v292_v13  ;;  %v771_v11 = vld [vmem:[%s2085_s3 + $0xb0] sm:$0xff]  ;;  %v533_v12 = vld [vmem:[%s2084_s2 + $0xc8] sm:$0xff] }
  0x55   :  { %v774_v13 = vld [vmem:[%s2085_s3 + $0xc8] sm:$0xff] }
  0x57   :  { %247 = vmatmul.mubr.f32.gmra.mrb[24].mxu0 %v65_v14  ;;  %472 = vmatmul.mubr.f32.gmra.mrb[24].mxu1 %v291_v15  ;;  %v532_v14 = vld [vmem:[%s2084_s2 + $0xc0] sm:$0xff] }
  0x58   :  { %1063 = vmatprep.mubr.msk.f32.mxu0 %vm73_vm0, %v68_v16  ;;  %1079 = vmatprep.mubr.msk.f32.mxu1 %vm73_vm0, %v294_v17  ;;  %v773_v15 = vld [vmem:[%s2085_s3 + $0xc0] sm:$0xff]  ;;  %v535_v16 = vld [vmem:[%s2084_s2 + $0xd8] sm:$0xff] }
  0x59   :  { %v776_v17 = vld [vmem:[%s2085_s3 + $0xd8] sm:$0xff] }
  0x5b   :  { %252 = vmatmul.mubr.f32.gmra.mrb[26].mxu0 %v67_v18  ;;  %477 = vmatmul.mubr.f32.gmra.mrb[26].mxu1 %v293_v19  ;;  %v534_v18 = vld [vmem:[%s2084_s2 + $0xd0] sm:$0xff] }
  0x5c   :  { %1064 = vmatprep.mubr.msk.f32.mxu0 %vm73_vm0, %v70_v20  ;;  %1080 = vmatprep.mubr.msk.f32.mxu1 %vm73_vm0, %v296_v21  ;;  %v775_v19 = vld [vmem:[%s2085_s3 + $0xd0] sm:$0xff]  ;;  %v537_v20 = vld [vmem:[%s2084_s2 + $0xe8] sm:$0xff] }
  0x5d   :  { %v778_v21 = vld [vmem:[%s2085_s3 + $0xe8] sm:$0xff] }
  0x5f   :  { %257 = vmatmul.mubr.f32.gmra.mrb[28].mxu0 %v69_v22  ;;  %482 = vmatmul.mubr.f32.gmra.mrb[28].mxu1 %v295_v23  ;;  %v536_v22 = vld [vmem:[%s2084_s2 + $0xe0] sm:$0xff] }
  0x60   :  { %1065 = vmatprep.mubr.msk.f32.mxu0 %vm73_vm0, %v72_v24  ;;  %1081 = vmatprep.mubr.msk.f32.mxu1 %vm73_vm0, %v298_v25  ;;  %v777_v23 = vld [vmem:[%s2085_s3 + $0xe0] sm:$0xff]  ;;  %v539_v24 = vld [vmem:[%s2084_s2 + $0xf8] sm:$0xff] }
  0x61   :  { %v780_v25 = vld [vmem:[%s2085_s3 + $0xf8] sm:$0xff] }
  0x63   :  { %262 = vmatmul.mubr.f32.gmra.mrb[30].mxu0 %v71_v26  ;;  %487 = vmatmul.mubr.f32.gmra.mrb[30].mxu1 %v297_v27  ;;  %v538_v26 = vld [vmem:[%s2084_s2 + $0xf0] sm:$0xff] }
  0x64   :  { %1082 = vmatprep.mubr.msk.f32.mxu0 %vm73_vm0, %v509_v28  ;;  %1098 = vmatprep.mubr.msk.f32.mxu1 %vm73_vm0, %v750_v29  ;;  %v779_v27 = vld [vmem:[%s2085_s3 + $0xf0] sm:$0xff] }
  0x67   :  { %653 = vmatmul.mubr.f32.vlgmr.msra.gmra.mrb[32].mxu0 %v508_v30  ;;  %894 = vmatmul.mubr.f32.vlgmr.msra.gmra.mrb[32].mxu1 %v749_v31 }
  0x68   :  { %1083 = vmatprep.mubr.msk.f32.mxu0 %vm73_vm0, %v511_v32  ;;  %1099 = vmatprep.mubr.msk.f32.mxu1 %vm73_vm0, %v752_v33 }
  0x6b   :  { %658 = vmatmul.mubr.f32.gmra.mrb[34].mxu0 %v510_v34  ;;  %899 = vmatmul.mubr.f32.gmra.mrb[34].mxu1 %v751_v35 }
  0x6c   :  { %1084 = vmatprep.mubr.msk.f32.mxu0 %vm73_vm0, %v513_v36  ;;  %1100 = vmatprep.mubr.msk.f32.mxu1 %vm73_vm0, %v754_v37 }
  0x6f   :  { %663 = vmatmul.mubr.f32.gmra.mrb[36].mxu0 %v512_v38  ;;  %904 = vmatmul.mubr.f32.gmra.mrb[36].mxu1 %v753_v39 }
  0x70   :  { %1085 = vmatprep.mubr.msk.f32.mxu0 %vm73_vm0, %v515_v40  ;;  %1101 = vmatprep.mubr.msk.f32.mxu1 %vm73_vm0, %v756_v41 }
  0x73   :  { %668 = vmatmul.mubr.f32.gmra.mrb[38].mxu0 %v514_v42  ;;  %909 = vmatmul.mubr.f32.gmra.mrb[38].mxu1 %v755_v43 }
  0x74   :  { %1086 = vmatprep.mubr.msk.f32.mxu0 %vm73_vm0, %v517_v44  ;;  %1102 = vmatprep.mubr.msk.f32.mxu1 %vm73_vm0, %v758_v45 }
  0x77   :  { %673 = vmatmul.mubr.f32.gmra.mrb[40].mxu0 %v516_v46  ;;  %914 = vmatmul.mubr.f32.gmra.mrb[40].mxu1 %v757_v47 }
  0x78   :  { %1087 = vmatprep.mubr.msk.f32.mxu0 %vm73_vm0, %v519_v48  ;;  %1103 = vmatprep.mubr.msk.f32.mxu1 %vm73_vm0, %v760_v49 }
  0x7b   :  { %678 = vmatmul.mubr.f32.gmra.mrb[42].mxu0 %v518_v50  ;;  %919 = vmatmul.mubr.f32.gmra.mrb[42].mxu1 %v759_v51 }
  0x7c   :  { %1088 = vmatprep.mubr.msk.f32.mxu0 %vm73_vm0, %v521_v52  ;;  %1104 = vmatprep.mubr.msk.f32.mxu1 %vm73_vm0, %v762_v53 }
  0x7f   :  { %683 = vmatmul.mubr.f32.gmra.mrb[44].mxu0 %v520_v54  ;;  %924 = vmatmul.mubr.f32.gmra.mrb[44].mxu1 %v761_v55 }
  0x80   :  { %1089 = vmatprep.mubr.msk.f32.mxu0 %vm73_vm0, %v523_v56  ;;  %1105 = vmatprep.mubr.msk.f32.mxu1 %vm73_vm0, %v764_v57 }
  0x83   :  { %688 = vmatmul.mubr.f32.gmra.mrb[46].mxu0 %v522_v58  ;;  %929 = vmatmul.mubr.f32.gmra.mrb[46].mxu1 %v763_v59 }
  0x84   :  { %1090 = vmatprep.mubr.msk.f32.mxu0 %vm73_vm0, %v525_v60  ;;  %1106 = vmatprep.mubr.msk.f32.mxu1 %vm73_vm0, %v766_v61 }
  0x87   :  { %693 = vmatmul.mubr.f32.gmra.mrb[48].mxu0 %v524_v62  ;;  %934 = vmatmul.mubr.f32.gmra.mrb[48].mxu1 %v765_v63 }
  0x88   :  { %1091 = vmatprep.mubr.msk.f32.mxu0 %vm73_vm0, %v527_v1  ;;  %1107 = vmatprep.mubr.msk.f32.mxu1 %vm73_vm0, %v768_v2 }
  0x8b   :  { %698 = vmatmul.mubr.f32.gmra.mrb[50].mxu0 %v526_v3  ;;  %939 = vmatmul.mubr.f32.gmra.mrb[50].mxu1 %v767_v4 }
  0x8c   :  { %1092 = vmatprep.mubr.msk.f32.mxu0 %vm73_vm0, %v529_v5  ;;  %1108 = vmatprep.mubr.msk.f32.mxu1 %vm73_vm0, %v770_v0 }
  0x8f   :  { %703 = vmatmul.mubr.f32.gmra.mrb[52].mxu0 %v528_v6  ;;  %944 = vmatmul.mubr.f32.gmra.mrb[52].mxu1 %v769_v7 }
  0x90   :  { %1093 = vmatprep.mubr.msk.f32.mxu0 %vm73_vm0, %v531_v8  ;;  %1109 = vmatprep.mubr.msk.f32.mxu1 %vm73_vm0, %v772_v9 }
  0x93   :  { %708 = vmatmul.mubr.f32.gmra.mrb[54].mxu0 %v530_v10  ;;  %949 = vmatmul.mubr.f32.gmra.mrb[54].mxu1 %v771_v11 }
  0x94   :  { %1094 = vmatprep.mubr.msk.f32.mxu0 %vm73_vm0, %v533_v12  ;;  %1110 = vmatprep.mubr.msk.f32.mxu1 %vm73_vm0, %v774_v13 }
  0x97   :  { %713 = vmatmul.mubr.f32.gmra.mrb[56].mxu0 %v532_v14  ;;  %954 = vmatmul.mubr.f32.gmra.mrb[56].mxu1 %v773_v15 }
  0x98   :  { %1095 = vmatprep.mubr.msk.f32.mxu0 %vm73_vm0, %v535_v16  ;;  %1111 = vmatprep.mubr.msk.f32.mxu1 %vm73_vm0, %v776_v17 }
  0x9b   :  { %718 = vmatmul.mubr.f32.gmra.mrb[58].mxu0 %v534_v18  ;;  %959 = vmatmul.mubr.f32.gmra.mrb[58].mxu1 %v775_v19 }
  0x9c   :  { %1096 = vmatprep.mubr.msk.f32.mxu0 %vm73_vm0, %v537_v20  ;;  %1112 = vmatprep.mubr.msk.f32.mxu1 %vm73_vm0, %v778_v21 }
  0x9f   :  { %723 = vmatmul.mubr.f32.gmra.mrb[60].mxu0 %v536_v22  ;;  %964 = vmatmul.mubr.f32.gmra.mrb[60].mxu1 %v777_v23 }
  0xa0   :  { %1097 = vmatprep.mubr.msk.f32.mxu0 %vm73_vm0, %v539_v24  ;;  %1113 = vmatprep.mubr.msk.f32.mxu1 %vm73_vm0, %v780_v25 }
  0xa3   :  { %728 = vmatmul.mubr.f32.gmra.mrb[62].mxu0 %v538_v26  ;;  %969 = vmatmul.mubr.f32.gmra.mrb[62].mxu1 %v779_v27 }
  0xfa   :  { %v1852_v28 = vpop.f32.mrb[0].mxu0  ;;  %v1854_v29 = vpop.f32.mrb[0].mxu1 }
  0xfb   :  { %v190_v30 = vpop.f32.mrb[1].mxu0  ;;  %v492_v31 = vmax.f32 %v1852_v28, %v1854_v29  ;;  %v415_v32 = vpop.f32.mrb[1].mxu1 }
  0xfe   :  { %v1858_v33 = vpop.f32.mrb[2].mxu0  ;;  %v1860_v34 = vpop.f32.mrb[2].mxu1 }
  0xff   :  { %v195_v35 = vpop.f32.mrb[3].mxu0  ;;  %v493_v36 = vmax.f32 %v1858_v33, %v1860_v34  ;;  %v420_v37 = vpop.f32.mrb[3].mxu1 }
 0x102   :  { %v1864_v38 = vpop.f32.mrb[4].mxu0  ;;  %v1866_v39 = vpop.f32.mrb[4].mxu1 }
 0x103   :  { %v200_v40 = vpop.f32.mrb[5].mxu0  ;;  %v494_v41 = vmax.f32 %v1864_v38, %v1866_v39  ;;  %v425_v42 = vpop.f32.mrb[5].mxu1 }
 0x106   :  { %v1870_v43 = vpop.f32.mrb[6].mxu0  ;;  %v1872_v44 = vpop.f32.mrb[6].mxu1 }
 0x107   :  { %v205_v45 = vpop.f32.mrb[7].mxu0  ;;  %v495_v46 = vmax.f32 %v1870_v43, %v1872_v44  ;;  %v430_v47 = vpop.f32.mrb[7].mxu1 }
 0x10a   :  { %v1876_v48 = vpop.f32.mrb[8].mxu0  ;;  %v1878_v49 = vpop.f32.mrb[8].mxu1 }
 0x10b   :  { %v210_v50 = vpop.f32.mrb[9].mxu0  ;;  %v496_v51 = vmax.f32 %v1876_v48, %v1878_v49  ;;  %v435_v52 = vpop.f32.mrb[9].mxu1 }
 0x10e   :  { %v1882_v53 = vpop.f32.mrb[10].mxu0  ;;  %v1884_v54 = vpop.f32.mrb[10].mxu1 }
 0x10f   :  { %v215_v55 = vpop.f32.mrb[11].mxu0  ;;  %v497_v56 = vmax.f32 %v1882_v53, %v1884_v54  ;;  %v440_v57 = vpop.f32.mrb[11].mxu1 }
 0x112   :  { %v1888_v58 = vpop.f32.mrb[12].mxu0  ;;  %v1890_v59 = vpop.f32.mrb[12].mxu1 }
 0x113   :  { %v220_v60 = vpop.f32.mrb[13].mxu0  ;;  %v498_v61 = vmax.f32 %v1888_v58, %v1890_v59  ;;  %v445_v62 = vpop.f32.mrb[13].mxu1 }
 0x116   :  { %v1894_v63 = vpop.f32.mrb[14].mxu0  ;;  %v1896_v1 = vpop.f32.mrb[14].mxu1 }
 0x117   :  { %v225_v2 = vpop.f32.mrb[15].mxu0  ;;  %v499_v3 = vmax.f32 %v1894_v63, %v1896_v1  ;;  %v450_v4 = vpop.f32.mrb[15].mxu1 }
 0x11a   :  { %v1900_v5 = vpop.f32.mrb[16].mxu0  ;;  %v1902_v0 = vpop.f32.mrb[16].mxu1 }
 0x11b   :  { %v230_v6 = vpop.f32.mrb[17].mxu0  ;;  %v500_v7 = vmax.f32 %v1900_v5, %v1902_v0  ;;  %v455_v8 = vpop.f32.mrb[17].mxu1 }
 0x11e   :  { %v1906_v9 = vpop.f32.mrb[18].mxu0  ;;  %v1908_v10 = vpop.f32.mrb[18].mxu1 }
 0x11f   :  { %v235_v11 = vpop.f32.mrb[19].mxu0  ;;  %v501_v12 = vmax.f32 %v1906_v9, %v1908_v10  ;;  %v460_v13 = vpop.f32.mrb[19].mxu1 }
 0x122   :  { %v1912_v14 = vpop.f32.mrb[20].mxu0  ;;  %v1914_v15 = vpop.f32.mrb[20].mxu1 }
 0x123   :  { %v240_v16 = vpop.f32.mrb[21].mxu0  ;;  %v502_v17 = vmax.f32 %v1912_v14, %v1914_v15  ;;  %v465_v18 = vpop.f32.mrb[21].mxu1 }
 0x124   :  { %v1954_v18 = vld [vmem:[%s2086_s5] ss:$0 sm:$0xff] }
 0x126   :  { %v1918_v19 = vpop.f32.mrb[22].mxu0  ;;  %v1920_v20 = vpop.f32.mrb[22].mxu1 }
 0x127   :  { %v245_v21 = vpop.f32.mrb[23].mxu0  ;;  %v503_v22 = vmax.f32 %v1918_v19, %v1920_v20  ;;  %v470_v23 = vpop.f32.mrb[23].mxu1 }
 0x12a   :  { %v1924_v24 = vpop.f32.mrb[24].mxu0  ;;  %v1926_v25 = vpop.f32.mrb[24].mxu1 }
 0x12b   :  { %v250_v26 = vpop.f32.mrb[25].mxu0  ;;  %v504_v27 = vmax.f32 %v1924_v24, %v1926_v25  ;;  %v475_v30 = vpop.f32.mrb[25].mxu1 }
 0x12e   :  { %v1930_v32 = vpop.f32.mrb[26].mxu0  ;;  %v1932_v35 = vpop.f32.mrb[26].mxu1 }
 0x12f   :  { %v255_v37 = vpop.f32.mrb[27].mxu0  ;;  %v505_v40 = vmax.f32 %v1930_v32, %v1932_v35  ;;  %v480_v42 = vpop.f32.mrb[27].mxu1 }
 0x132   :  { %v1936_v45 = vpop.f32.mrb[28].mxu0  ;;  %v1938_v47 = vpop.f32.mrb[28].mxu1 }
 0x133   :  { %v260_v50 = vpop.f32.mrb[29].mxu0  ;;  %v506_v52 = vmax.f32 %v1936_v45, %v1938_v47  ;;  %v485_v55 = vpop.f32.mrb[29].mxu1 }
 0x136   :  { %v1942_v57 = vpop.f32.mrb[30].mxu0  ;;  %v1944_v60 = vpop.f32.mrb[30].mxu1 }
 0x137   :  { %v265_v62 = vpop.f32.mrb[31].mxu0  ;;  %v507_v2 = vmax.f32 %v1942_v57, %v1944_v60  ;;  %v490_v4 = vpop.f32.mrb[31].mxu1 }
 0x13a   :  { %v654_v6 = vpop.f32.mrb[32].mxu0  ;;  %v895_v8 = vpop.f32.mrb[32].mxu1 }
 0x13b   :  { %v733_v11 = vmax.f32 %v492_v31, %v654_v6  ;;  %v656_v13 = vpop.f32.mrb[33].mxu0  ;;  %v897_v16 = vpop.f32.mrb[33].mxu1 }
 0x13d   :  { %v974_v21 = vmax.f32 %v733_v11, %v895_v8 }
 0x13e   :  { %v659_v23 = vpop.f32.mrb[34].mxu0  ;;  %v900_v26 = vpop.f32.mrb[34].mxu1 }
 0x13f   :  { %v997_v30 = vadd.f32 %v1954_v18, %v974_v21  ;;  %v734_v37 = vmax.f32 %v493_v36, %v659_v23  ;;  %v661_v42 = vpop.f32.mrb[35].mxu0  ;;  %v902_v50 = vpop.f32.mrb[35].mxu1 }
 0x141   :  { %v1013_v28 = vmax.f32 %v997_v30, 0.0  ;;  %v975_v29 = vmax.f32 %v734_v37, %v900_v26 }
 0x142   :  { %v664_v31 = vpop.f32.mrb[36].mxu0  ;;  %v905_v55 = vpop.f32.mrb[36].mxu1 }
 0x143   :  { %1030 = vst.msk [vmem:[%s2087_s6] sm:$0xff] %vm1029_vm1, %v1013_v28  ;;  %v998_v62 = vadd.f32 %v1954_v18, %v975_v29  ;;  %v735_v4 = vmax.f32 %v494_v41, %v664_v31  ;;  %v666_v33 = vpop.f32.mrb[37].mxu0  ;;  %v907_v34 = vpop.f32.mrb[37].mxu1 }
 0x145   :  { %v1014_v36 = vmax.f32 %v998_v62, 0.0  ;;  %v976_v6 = vmax.f32 %v735_v4, %v905_v55 }
 0x146   :  { %v669_v8 = vpop.f32.mrb[38].mxu0  ;;  %v910_v11 = vpop.f32.mrb[38].mxu1 }
 0x147   :  { %1031 = vst.msk [vmem:[%s2087_s6 + $0x8] sm:$0xff] %vm1029_vm1, %v1014_v36  ;;  %v999_v13 = vadd.f32 %v1954_v18, %v976_v6  ;;  %v736_v16 = vmax.f32 %v495_v46, %v669_v8  ;;  %v671_v21 = vpop.f32.mrb[39].mxu0  ;;  %v912_v38 = vpop.f32.mrb[39].mxu1 }
 0x149   :  { %v1015_v39 = vmax.f32 %v999_v13, 0.0  ;;  %v977_v41 = vmax.f32 %v736_v16, %v910_v11 }
 0x14a   :  { %v674_v23 = vpop.f32.mrb[40].mxu0  ;;  %v915_v26 = vpop.f32.mrb[40].mxu1 }
 0x14b   :  { %1032 = vst.msk [vmem:[%s2087_s6 + $0x10] sm:$0xff] %vm1029_vm1, %v1015_v39  ;;  %v1000_v30 = vadd.f32 %v1954_v18, %v977_v41  ;;  %v737_v37 = vmax.f32 %v496_v51, %v674_v23  ;;  %v676_v42 = vpop.f32.mrb[41].mxu0  ;;  %v917_v43 = vpop.f32.mrb[41].mxu1 }
 0x14d   :  { %v1016_v44 = vmax.f32 %v1000_v30, 0.0  ;;  %v978_v46 = vmax.f32 %v737_v37, %v915_v26 }
 0x14e   :  { %v679_v50 = vpop.f32.mrb[42].mxu0  ;;  %v920_v28 = vpop.f32.mrb[42].mxu1 }
 0x14f   :  { %1033 = vst.msk [vmem:[%s2087_s6 + $0x18] sm:$0xff] %vm1029_vm1, %v1016_v44  ;;  %v1001_v29 = vadd.f32 %v1954_v18, %v978_v46  ;;  %v738_v31 = vmax.f32 %v497_v56, %v679_v50  ;;  %v681_v55 = vpop.f32.mrb[43].mxu0  ;;  %v922_v48 = vpop.f32.mrb[43].mxu1 }
 0x151   :  { %v1017_v49 = vmax.f32 %v1001_v29, 0.0  ;;  %v979_v51 = vmax.f32 %v738_v31, %v920_v28 }
 0x152   :  { %v684_v62 = vpop.f32.mrb[44].mxu0  ;;  %v925_v4 = vpop.f32.mrb[44].mxu1 }
 0x153   :  { %1034 = vst.msk [vmem:[%s2087_s6 + $0x20] sm:$0xff] %vm1029_vm1, %v1017_v49  ;;  %v1002_v33 = vadd.f32 %v1954_v18, %v979_v51  ;;  %v739_v34 = vmax.f32 %v498_v61, %v684_v62  ;;  %v686_v36 = vpop.f32.mrb[45].mxu0  ;;  %v927_v53 = vpop.f32.mrb[45].mxu1 }
 0x155   :  { %v1018_v54 = vmax.f32 %v1002_v33, 0.0  ;;  %v980_v56 = vmax.f32 %v739_v34, %v925_v4 }
 0x156   :  { %v689_v6 = vpop.f32.mrb[46].mxu0  ;;  %v930_v8 = vpop.f32.mrb[46].mxu1 }
 0x157   :  { %1035 = vst.msk [vmem:[%s2087_s6 + $0x28] sm:$0xff] %vm1029_vm1, %v1018_v54  ;;  %v1003_v11 = vadd.f32 %v1954_v18, %v980_v56  ;;  %v740_v13 = vmax.f32 %v499_v3, %v689_v6  ;;  %v691_v16 = vpop.f32.mrb[47].mxu0  ;;  %v932_v58 = vpop.f32.mrb[47].mxu1 }
 0x159   :  { %v1019_v59 = vmax.f32 %v1003_v11, 0.0  ;;  %v981_v61 = vmax.f32 %v740_v13, %v930_v8 }
 0x15a   :  { %v694_v21 = vpop.f32.mrb[48].mxu0  ;;  %v935_v38 = vpop.f32.mrb[48].mxu1 }
 0x15b   :  { %1036 = vst.msk [vmem:[%s2087_s6 + $0x30] sm:$0xff] %vm1029_vm1, %v1019_v59  ;;  %v1004_v39 = vadd.f32 %v1954_v18, %v981_v61  ;;  %v741_v41 = vmax.f32 %v500_v7, %v694_v21  ;;  %v696_v23 = vpop.f32.mrb[49].mxu0  ;;  %v937_v63 = vpop.f32.mrb[49].mxu1 }
 0x15d   :  { %v1020_v1 = vmax.f32 %v1004_v39, 0.0  ;;  %v982_v3 = vmax.f32 %v741_v41, %v935_v38 }
 0x15e   :  { %v699_v26 = vpop.f32.mrb[50].mxu0  ;;  %v940_v30 = vpop.f32.mrb[50].mxu1 }
 0x15f   :  { %1037 = vst.msk [vmem:[%s2087_s6 + $0x38] sm:$0xff] %vm1029_vm1, %v1020_v1  ;;  %v1005_v37 = vadd.f32 %v1954_v18, %v982_v3  ;;  %v742_v42 = vmax.f32 %v501_v12, %v699_v26  ;;  %v701_v43 = vpop.f32.mrb[51].mxu0  ;;  %v942_v5 = vpop.f32.mrb[51].mxu1 }
 0x161   :  { %v1021_v0 = vmax.f32 %v1005_v37, 0.0  ;;  %v983_v7 = vmax.f32 %v742_v42, %v940_v30 }
 0x162   :  { %v704_v44 = vpop.f32.mrb[52].mxu0  ;;  %v945_v46 = vpop.f32.mrb[52].mxu1 }
 0x163   :  { %1038 = vst.msk [vmem:[%s2087_s6 + $0x40] sm:$0xff] %vm1029_vm1, %v1021_v0  ;;  %v1006_v50 = vadd.f32 %v1954_v18, %v983_v7  ;;  %v743_v28 = vmax.f32 %v502_v17, %v704_v44  ;;  %v706_v29 = vpop.f32.mrb[53].mxu0  ;;  %v947_v9 = vpop.f32.mrb[53].mxu1 }
 0x165   :  { %v1022_v10 = vmax.f32 %v1006_v50, 0.0  ;;  %v984_v12 = vmax.f32 %v743_v28, %v945_v46 }
 0x166   :  { %v709_v31 = vpop.f32.mrb[54].mxu0  ;;  %v950_v55 = vpop.f32.mrb[54].mxu1 }
 0x167   :  { %1039 = vst.msk [vmem:[%s2087_s6 + $0x48] sm:$0xff] %vm1029_vm1, %v1022_v10  ;;  %v1007_v48 = vadd.f32 %v1954_v18, %v984_v12  ;;  %v744_v49 = vmax.f32 %v503_v22, %v709_v31  ;;  %v711_v51 = vpop.f32.mrb[55].mxu0  ;;  %v952_v14 = vpop.f32.mrb[55].mxu1 }
 0x169   :  { %v1023_v15 = vmax.f32 %v1007_v48, 0.0  ;;  %v985_v17 = vmax.f32 %v744_v49, %v950_v55 }
 0x16a   :  { %v714_v62 = vpop.f32.mrb[56].mxu0  ;;  %v955_v4 = vpop.f32.mrb[56].mxu1 }
 0x16b   :  { %1040 = vst.msk [vmem:[%s2087_s6 + $0x50] sm:$0xff] %vm1029_vm1, %v1023_v15  ;;  %v1008_v33 = vadd.f32 %v1954_v18, %v985_v17  ;;  %v745_v34 = vmax.f32 %v504_v27, %v714_v62  ;;  %v716_v36 = vpop.f32.mrb[57].mxu0  ;;  %v957_v19 = vpop.f32.mrb[57].mxu1 }
 0x16d   :  { %v1024_v20 = vmax.f32 %v1008_v33, 0.0  ;;  %v986_v22 = vmax.f32 %v745_v34, %v955_v4 }
 0x16e   :  { %v719_v53 = vpop.f32.mrb[58].mxu0  ;;  %v960_v54 = vpop.f32.mrb[58].mxu1 }
 0x16f   :  { %1041 = vst.msk [vmem:[%s2087_s6 + $0x58] sm:$0xff] %vm1029_vm1, %v1024_v20  ;;  %v1009_v56 = vadd.f32 %v1954_v18, %v986_v22  ;;  %v746_v6 = vmax.f32 %v505_v40, %v719_v53  ;;  %v721_v8 = vpop.f32.mrb[59].mxu0  ;;  %v962_v24 = vpop.f32.mrb[59].mxu1 }
 0x171   :  { %v1025_v25 = vmax.f32 %v1009_v56, 0.0  ;;  %v987_v27 = vmax.f32 %v746_v6, %v960_v54 }
 0x172   :  { %v724_v11 = vpop.f32.mrb[60].mxu0  ;;  %v965_v13 = vpop.f32.mrb[60].mxu1 }
 0x173   :  { %1042 = vst.msk [vmem:[%s2087_s6 + $0x60] sm:$0xff] %vm1029_vm1, %v1025_v25  ;;  %v1010_v16 = vadd.f32 %v1954_v18, %v987_v27  ;;  %v747_v58 = vmax.f32 %v506_v52, %v724_v11  ;;  %v726_v59 = vpop.f32.mrb[61].mxu0  ;;  %v967_v32 = vpop.f32.mrb[61].mxu1 }
 0x175   :  { %v1026_v35 = vmax.f32 %v1010_v16, 0.0  ;;  %v988_v40 = vmax.f32 %v747_v58, %v965_v13 }
 0x176   :  { %v729_v61 = vpop.f32.mrb[62].mxu0  ;;  %v970_v21 = vpop.f32.mrb[62].mxu1 }
 0x177   :  { %1043 = vst.msk [vmem:[%s2087_s6 + $0x68] sm:$0xff] %vm1029_vm1, %v1026_v35  ;;  %v1011_v38 = vadd.f32 %v1954_v18, %v988_v40  ;;  %v748_v39 = vmax.f32 %v507_v2, %v729_v61  ;;  %v731_v41 = vpop.f32.mrb[63].mxu0  ;;  %v972_v45 = vpop.f32.mrb[63].mxu1 }
 0x179   :  { %v1027_v47 = vmax.f32 %v1011_v38, 0.0  ;;  %v989_v52 = vmax.f32 %v748_v39, %v970_v21 }
 0x17b   :  { %1044 = vst.msk [vmem:[%s2087_s6 + $0x70] sm:$0xff] %vm1029_vm1, %v1027_v47  ;;  %v1012_v23 = vadd.f32 %v1954_v18, %v989_v52 }
 0x17d   :  { %v1028_v63 = vmax.f32 %v1012_v23, 0.0 }
 0x17f   :  { %1045 = vst.msk [vmem:[%s2087_s6 + $0x78] sm:$0xff] %vm1029_vm1, %v1028_v63 }

// kernel: encoder_forward.9
= control target key start
LH: loop header
LB: loop body
LE: loop exit
PB: predicated region body
PF: predicated region fallthrough
CT: control target
= control target key end

     0   :  { %vm105_vm0 = vcmask 261120   ;;  %vm460_vm1 = vcmask 523264   ;;  %s1071_s1 = inlined_call_operand.vmem [shape: f32[288,64], index: 1, kind: input, shape index: {}]   ;;  %s1072_s0 = inlined_call_operand.vmem [shape: f32[128,288], index: 0, kind: input, shape index: {}]   ;;  %s1073_s2 = inlined_call_operand.vmem [shape: f32[1,64], index: 2, kind: input, shape index: {}]   ;;  %s1074_s3 = inlined_call_operand.vmem [shape: f32[128,64], index: 3, kind: output, shape index: {}]  }
   0x1   :  { %v78_v0 = vld [vmem:[%s1071_s1 + $0x80] sm:$0xff]  ;;  %v79_v1 = vld [vmem:[%s1071_s1 + $0x88] sm:$0xff]  ;;  %v80_v5 = vld [vmem:[%s1071_s1 + $0x90] sm:$0xff] }
   0x2   :  { %v62_v2 = vld [vmem:[%s1071_s1] sm:$0xff]  ;;  %v630_v3 = vpack.c.bf16 %v79_v1, %v78_v0  ;;  %v63_v4 = vld [vmem:[%s1071_s1 + $0x8] sm:$0xff]  ;;  %v81_v6 = vld [vmem:[%s1071_s1 + $0x98] sm:$0xff] }
   0x3   :  { %v632_v7 = vpack.c.bf16 %v63_v4, %v62_v2  ;;  %v634_v8 = vpack.c.bf16 %v81_v6, %v80_v5  ;;  %v64_v9 = vld [vmem:[%s1071_s1 + $0x10] sm:$0xff]  ;;  %v65_v10 = vld [vmem:[%s1071_s1 + $0x18] sm:$0xff]  ;;  %v82_v11 = vld [vmem:[%s1071_s1 + $0xa0] sm:$0xff] }
   0x4   :  { %631 = vmatprep.subr.bf16.mxu0 %v630_v3  ;;  %670 = vmatprep.subr.bf16.mxu1 %v630_v3  ;;  %v83_v12 = vld [vmem:[%s1071_s1 + $0xa8] sm:$0xff]  ;;  %v636_v13 = vpack.c.bf16 %v65_v10, %v64_v9  ;;  %v66_v15 = vld [vmem:[%s1071_s1 + $0x20] sm:$0xff]  ;;  %v84_v17 = vld [vmem:[%s1071_s1 + $0xb0] sm:$0xff] }
   0x5   :  { %633 = vmatpush3.bf16.msra.mxu0 %v632_v7  ;;  %678 = vmatpush3.bf16.msra.mxu1 %v632_v7  ;;  %v638_v14 = vpack.c.bf16 %v83_v12, %v82_v11  ;;  %v67_v16 = vld [vmem:[%s1071_s1 + $0x28] sm:$0xff]  ;;  %v85_v18 = vld [vmem:[%s1071_s1 + $0xb8] sm:$0xff]  ;;  %v68_v21 = vld [vmem:[%s1071_s1 + $0x30] sm:$0xff] }
   0x6   :  { %635 = vmatprep.subr.bf16.mxu0 %v634_v8  ;;  %671 = vmatprep.subr.bf16.mxu1 %v634_v8  ;;  %v640_v19 = vpack.c.bf16 %v67_v16, %v66_v15  ;;  %v642_v20 = vpack.c.bf16 %v85_v18, %v84_v17  ;;  %v69_v22 = vld [vmem:[%s1071_s1 + $0x38] sm:$0xff]  ;;  %v86_v23 = vld [vmem:[%s1071_s1 + $0xc0] sm:$0xff]  ;;  %v87_v24 = vld [vmem:[%s1071_s1 + $0xc8] sm:$0xff] }
   0x7   :  { %v15_v25 = vld [vmem:[%s1072_s0 + $0x8] sm:$0xff]  ;;  %v644_v27 = vpack.c.bf16 %v69_v22, %v68_v21  ;;  %v646_v28 = vpack.c.bf16 %v87_v24, %v86_v23  ;;  %v70_v29 = vld [vmem:[%s1071_s1 + $0x40] sm:$0xff]  ;;  %v88_v31 = vld [vmem:[%s1071_s1 + $0xd0] sm:$0xff] }
   0x8   :  { %218 = vmatprep.mubr.f32.mxu0 %v15_v25  ;;  %v51_v26 = vld [vmem:[%s1072_s0 + $0x128] sm:$0xff]  ;;  %v89_v32 = vld [vmem:[%s1071_s1 + $0xd8] sm:$0xff]  ;;  %v72_v35 = vld [vmem:[%s1071_s1 + $0x50] sm:$0xff] }
   0x9   :  { %637 = vmatpush3.bf16.msra.mxu0 %v636_v13  ;;  %679 = vmatpush3.bf16.msra.mxu1 %v636_v13  ;;  %v71_v30 = vld [vmem:[%s1071_s1 + $0x48] sm:$0xff]  ;;  %v650_v34 = vpack.c.bf16 %v89_v32, %v88_v31  ;;  %v73_v36 = vld [vmem:[%s1071_s1 + $0x58] sm:$0xff]  ;;  %v90_v37 = vld [vmem:[%s1071_s1 + $0xe0] sm:$0xff] }
   0xa   :  { %639 = vmatprep.subr.bf16.mxu0 %v638_v14  ;;  %672 = vmatprep.subr.bf16.mxu1 %v638_v14  ;;  %v648_v33 = vpack.c.bf16 %v71_v30, %v70_v29  ;;  %v91_v38 = vld [vmem:[%s1071_s1 + $0xe8] sm:$0xff]  ;;  %v652_v39 = vpack.c.bf16 %v73_v36, %v72_v35  ;;  %v74_v41 = vld [vmem:[%s1071_s1 + $0x60] sm:$0xff]  ;;  %v92_v43 = vld [vmem:[%s1071_s1 + $0xf0] sm:$0xff] }
   0xb   :  { %278 = vmatprep.mubr.f32.mxu1 %v51_v26  ;;  %v654_v40 = vpack.c.bf16 %v91_v38, %v90_v37  ;;  %v75_v42 = vld [vmem:[%s1071_s1 + $0x68] sm:$0xff]  ;;  %v93_v44 = vld [vmem:[%s1071_s1 + $0xf8] sm:$0xff]  ;;  %v76_v47 = vld [vmem:[%s1071_s1 + $0x70] sm:$0xff] }
   0xc   :  { %v656_v45 = vpack.c.bf16 %v75_v42, %v74_v41  ;;  %v658_v46 = vpack.c.bf16 %v93_v44, %v92_v43  ;;  %v77_v48 = vld [vmem:[%s1071_s1 + $0x78] sm:$0xff]  ;;  %v94_v49 = vld [vmem:[%s1071_s1 + $0x100] sm:$0xff]  ;;  %v95_v50 = vld [vmem:[%s1071_s1 + $0x108] sm:$0xff] }
   0xd   :  { %641 = vmatpush3.bf16.msra.mxu0 %v640_v19  ;;  %680 = vmatpush3.bf16.msra.mxu1 %v640_v19  ;;  %v660_v51 = vpack.c.bf16 %v77_v48, %v76_v47  ;;  %v662_v52 = vpack.c.bf16 %v95_v50, %v94_v49  ;;  %v96_v53 = vld [vmem:[%s1071_s1 + $0x110] sm:$0xff]  ;;  %v97_v54 = vld [vmem:[%s1071_s1 + $0x118] sm:$0xff]  ;;  %v14_v55 = vld [vmem:[%s1072_s0] sm:$0xff] }
   0xe   :  { %643 = vmatprep.subr.bf16.mxu0 %v642_v20  ;;  %673 = vmatprep.subr.bf16.mxu1 %v642_v20  ;;  %v50_v56 = vld [vmem:[%s1072_s0 + $0x120] sm:$0xff]  ;;  %v666_v59 = vpack.c.bf16 %v97_v54, %v96_v53  ;;  %v17_v60 = vld [vmem:[%s1072_s0 + $0x18] sm:$0xff]  ;;  %v20_v0 = vld [vmem:[%s1072_s0 + $0x30] sm:$0xff] }
   0xf   :  { %v18_v57 = vld [vmem:[%s1072_s0 + $0x20] sm:$0xff]  ;;  %v53_v61 = vld [vmem:[%s1072_s0 + $0x138] sm:$0xff]  ;;  %v56_v1 = vld [vmem:[%s1072_s0 + $0x150] sm:$0xff] }
  0x10   :  { %v54_v58 = vld [vmem:[%s1072_s0 + $0x140] sm:$0xff]  ;;  %v21_v62 = vld [vmem:[%s1072_s0 + $0x38] sm:$0xff]  ;;  %v24_v2 = vld [vmem:[%s1072_s0 + $0x50] sm:$0xff] }
  0x11   :  { %645 = vmatpush3.bf16.msra.mxu0 %v644_v27  ;;  %681 = vmatpush3.bf16.msra.mxu1 %v644_v27  ;;  %v57_v63 = vld [vmem:[%s1072_s0 + $0x158] sm:$0xff]  ;;  %v60_v3 = vld [vmem:[%s1072_s0 + $0x170] sm:$0xff]  ;;  %v23_v4 = vld [vmem:[%s1072_s0 + $0x48] sm:$0xff] }
  0x12   :  { %647 = vmatprep.subr.bf16.mxu0 %v646_v28  ;;  %674 = vmatprep.subr.bf16.mxu1 %v646_v28  ;;  %v59_v5 = vld [vmem:[%s1072_s0 + $0x168] sm:$0xff]  ;;  %v16_v7 = vld [vmem:[%s1072_s0 + $0x10] sm:$0xff]  ;;  %v26_v8 = vld [vmem:[%s1072_s0 + $0x60] sm:$0xff] }
  0x13   :  { %v27_v6 = vld [vmem:[%s1072_s0 + $0x68] sm:$0xff]  ;;  %v30_v10 = vld [vmem:[%s1072_s0 + $0x80] sm:$0xff]  ;;  %v29_v12 = vld [vmem:[%s1072_s0 + $0x78] sm:$0xff] }
  0x14   :  { %v19_v9 = vld [vmem:[%s1072_s0 + $0x28] sm:$0xff]  ;;  %v22_v11 = vld [vmem:[%s1072_s0 + $0x40] sm:$0xff]  ;;  %v25_v13 = vld [vmem:[%s1072_s0 + $0x58] sm:$0xff] }
  0x15   :  { %649 = vmatpush3.bf16.msra.mxu0 %v648_v33  ;;  %682 = vmatpush3.bf16.msra.mxu1 %v648_v33  ;;  %v33_v14 = vld [vmem:[%s1072_s0 + $0x98] sm:$0xff]  ;;  %v28_v15 = vld [vmem:[%s1072_s0 + $0x70] sm:$0xff]  ;;  %v31_v17 = vld [vmem:[%s1072_s0 + $0x88] sm:$0xff] }
  0x16   :  { %651 = vmatprep.subr.bf16.mxu0 %v650_v34  ;;  %675 = vmatprep.subr.bf16.mxu1 %v650_v34  ;;  %v32_v16 = vld [vmem:[%s1072_s0 + $0x90] sm:$0xff]  ;;  %v34_v19 = vld [vmem:[%s1072_s0 + $0xa0] sm:$0xff]  ;;  %v35_v20 = vld [vmem:[%s1072_s0 + $0xa8] sm:$0xff] }
  0x17   :  { %v36_v18 = vld [vmem:[%s1072_s0 + $0xb0] sm:$0xff]  ;;  %v37_v21 = vld [vmem:[%s1072_s0 + $0xb8] sm:$0xff]  ;;  %v39_v22 = vld [vmem:[%s1072_s0 + $0xc8] sm:$0xff] }
  0x18   :  { %v40_v23 = vld [vmem:[%s1072_s0 + $0xd0] sm:$0xff]  ;;  %v38_v24 = vld [vmem:[%s1072_s0 + $0xc0] sm:$0xff]  ;;  %v43_v25 = vld [vmem:[%s1072_s0 + $0xe8] sm:$0xff] }
  0x19   :  { %653 = vmatpush3.bf16.msra.mxu0 %v652_v39  ;;  %683 = vmatpush3.bf16.msra.mxu1 %v652_v39  ;;  %v42_v26 = vld [vmem:[%s1072_s0 + $0xe0] sm:$0xff]  ;;  %v41_v28 = vld [vmem:[%s1072_s0 + $0xd8] sm:$0xff]  ;;  %v52_v31 = vld [vmem:[%s1072_s0 + $0x130] sm:$0xff] }
  0x1a   :  { %655 = vmatprep.subr.bf16.mxu0 %v654_v40  ;;  %676 = vmatprep.subr.bf16.mxu1 %v654_v40  ;;  %v46_v27 = vld [vmem:[%s1072_s0 + $0x100] sm:$0xff]  ;;  %v49_v29 = vld [vmem:[%s1072_s0 + $0x118] sm:$0xff]  ;;  %v44_v32 = vld [vmem:[%s1072_s0 + $0xf0] sm:$0xff] }
  0x1b   :  { %v45_v30 = vld [vmem:[%s1072_s0 + $0xf8] sm:$0xff]  ;;  %v55_v33 = vld [vmem:[%s1072_s0 + $0x148] sm:$0xff]  ;;  %v48_v34 = vld [vmem:[%s1072_s0 + $0x110] sm:$0xff] }
  0x1c   :  { %v58_v35 = vld [vmem:[%s1072_s0 + $0x160] sm:$0xff]  ;;  %v47_v36 = vld [vmem:[%s1072_s0 + $0x108] sm:$0xff]  ;;  %v61_v37 = vld [vmem:[%s1072_s0 + $0x178] sm:$0xff] }
  0x1d   :  { %657 = vmatpush3.bf16.msra.mxu0 %v656_v45  ;;  %684 = vmatpush3.bf16.msra.mxu1 %v656_v45 }
  0x1e   :  { %659 = vmatprep.subr.bf16.mxu0 %v658_v46  ;;  %677 = vmatprep.subr.bf16.mxu1 %v658_v46 }
  0x21   :  { %661 = vmatpush3.bf16.msra.mxu0 %v660_v51  ;;  %685 = vmatpush3.bf16.msra.mxu1 %v660_v51 }
  0x22   :  { %663 = vmatprep.subr.bf16.mxu1 %v662_v52 }
  0x24   :  { %219 = vmatmul.mubr.f32.vlgmr.msra.gmra.mrb[0].mxu0 %v14_v55  ;;  %279 = vmatmul.mubr.f32.vlgmr.msra.gmra.mrb[0].mxu1 %v50_v56 }
  0x25   :  { %223 = vmatprep.mubr.f32.mxu0 %v18_v57  ;;  %283 = vmatprep.mubr.f32.mxu1 %v54_v58 }
  0x26   :  { %665 = vmatpush3.bf16.msra.mxu1 %v662_v52 }
  0x27   :  { %667 = vmatprep.subr.bf16.mxu1 %v666_v59 }
  0x28   :  { %224 = vmatmul.mubr.f32.gmra.mrb[2].mxu0 %v17_v60  ;;  %284 = vmatmul.mubr.f32.gmra.mrb[2].mxu1 %v53_v61  ;;  %v983_v60 = vld [vmem:[%s1073_s2] ss:$0 sm:$0xff] }
  0x29   :  { %228 = vmatprep.mubr.f32.mxu0 %v21_v62  ;;  %288 = vmatprep.mubr.f32.mxu1 %v57_v63 }
  0x2a   :  { %669 = vmatpush3.bf16.msra.mxu1 %v666_v59 }
  0x2c   :  { %229 = vmatmul.mubr.f32.gmra.mrb[4].mxu0 %v20_v0  ;;  %289 = vmatmul.mubr.f32.gmra.mrb[4].mxu1 %v56_v1 }
  0x2d   :  { %233 = vmatprep.mubr.f32.mxu0 %v24_v2  ;;  %293 = vmatprep.mubr.f32.mxu1 %v60_v3 }
  0x30   :  { %234 = vmatmul.mubr.f32.gmra.mrb[6].mxu0 %v23_v4  ;;  %294 = vmatmul.mubr.f32.gmra.mrb[6].mxu1 %v59_v5 }
  0x31   :  { %238 = vmatprep.mubr.f32.mxu0 %v27_v6  ;;  %606 = vmatprep.mubr.msk.f32.mxu1 %vm105_vm0, %v16_v7 }
  0x34   :  { %239 = vmatmul.mubr.f32.gmra.mrb[8].mxu0 %v26_v8  ;;  %607 = vmatmul.mubr.msk.f32.vlgmr.msra.gmra.mrb[8].mxu1 %vm105_vm0, %v19_v9 }
  0x35   :  { %243 = vmatprep.mubr.f32.mxu0 %v30_v10  ;;  %609 = vmatprep.mubr.msk.f32.mxu1 %vm105_vm0, %v22_v11 }
  0x38   :  { %244 = vmatmul.mubr.f32.gmra.mrb[10].mxu0 %v29_v12  ;;  %610 = vmatmul.mubr.msk.f32.gmra.mrb[10].mxu1 %vm105_vm0, %v25_v13 }
  0x39   :  { %248 = vmatprep.mubr.f32.mxu0 %v33_v14  ;;  %612 = vmatprep.mubr.msk.f32.mxu1 %vm105_vm0, %v28_v15 }
  0x3c   :  { %249 = vmatmul.mubr.f32.gmra.mrb[12].mxu0 %v32_v16  ;;  %613 = vmatmul.mubr.msk.f32.gmra.mrb[12].mxu1 %vm105_vm0, %v31_v17 }
  0x3d   :  { %253 = vmatprep.mubr.f32.mxu0 %v36_v18  ;;  %615 = vmatprep.mubr.msk.f32.mxu1 %vm105_vm0, %v34_v19 }
  0x40   :  { %254 = vmatmul.mubr.f32.gmra.mrb[14].mxu0 %v35_v20  ;;  %616 = vmatmul.mubr.msk.f32.gmra.mrb[14].mxu1 %vm105_vm0, %v37_v21 }
  0x41   :  { %258 = vmatprep.mubr.f32.mxu0 %v39_v22  ;;  %618 = vmatprep.mubr.msk.f32.mxu1 %vm105_vm0, %v40_v23 }
  0x44   :  { %259 = vmatmul.mubr.f32.gmra.mrb[16].mxu0 %v38_v24  ;;  %619 = vmatmul.mubr.msk.f32.gmra.mrb[16].mxu1 %vm105_vm0, %v43_v25 }
  0x45   :  { %263 = vmatprep.mubr.f32.mxu0 %v42_v26  ;;  %621 = vmatprep.mubr.msk.f32.mxu1 %vm105_vm0, %v46_v27 }
  0x48   :  { %264 = vmatmul.mubr.f32.gmra.mrb[18].mxu0 %v41_v28  ;;  %622 = vmatmul.mubr.msk.f32.gmra.mrb[18].mxu1 %vm105_vm0, %v49_v29 }
  0x49   :  { %268 = vmatprep.mubr.f32.mxu0 %v45_v30  ;;  %624 = vmatprep.mubr.msk.f32.mxu1 %vm105_vm0, %v52_v31 }
  0x4c   :  { %269 = vmatmul.mubr.f32.gmra.mrb[20].mxu0 %v44_v32  ;;  %625 = vmatmul.mubr.msk.f32.gmra.mrb[20].mxu1 %vm105_vm0, %v55_v33 }
  0x4d   :  { %273 = vmatprep.mubr.f32.mxu0 %v48_v34  ;;  %627 = vmatprep.mubr.msk.f32.mxu1 %vm105_vm0, %v58_v35 }
  0x50   :  { %274 = vmatmul.mubr.f32.gmra.mrb[22].mxu0 %v47_v36  ;;  %628 = vmatmul.mubr.msk.f32.gmra.mrb[22].mxu1 %vm105_vm0, %v61_v37 }
  0xf7   :  { %v530_v38 = vpop.f32.mrb[0].mxu0  ;;  %v566_v39 = vpop.f32.mrb[0].mxu1 }
  0xf8   :  { %v531_v40 = vpop.f32.mrb[1].mxu0  ;;  %v567_v41 = vpop.f32.mrb[1].mxu1 }
  0xf9   :  { %v532_v42 = vadd.f32 %v531_v40, %v530_v38  ;;  %v974_v43 = vadd.f32 %v567_v41, %v566_v39 }
  0xfb   :  { %v533_v44 = vpop.f32.mrb[2].mxu0  ;;  %v569_v45 = vpop.f32.mrb[2].mxu1  ;;  %v221_v2 = vadd.f32 %v532_v42, %v983_v60 }
  0xfc   :  { %v534_v46 = vpop.f32.mrb[3].mxu0  ;;  %v570_v47 = vpop.f32.mrb[3].mxu1 }
  0xfd   :  { %v535_v48 = vadd.f32 %v534_v46, %v533_v44  ;;  %v976_v49 = vadd.f32 %v570_v47, %v569_v45 }
  0xff   :  { %v536_v50 = vpop.f32.mrb[4].mxu0  ;;  %v572_v51 = vpop.f32.mrb[4].mxu1  ;;  %v226_v63 = vadd.f32 %v535_v48, %v983_v60 }
 0x100   :  { %v537_v52 = vpop.f32.mrb[5].mxu0  ;;  %v573_v53 = vpop.f32.mrb[5].mxu1 }
 0x101   :  { %v538_v54 = vadd.f32 %v537_v52, %v536_v50  ;;  %v978_v55 = vadd.f32 %v573_v53, %v572_v51 }
 0x103   :  { %v539_v56 = vpop.f32.mrb[6].mxu0  ;;  %v575_v57 = vpop.f32.mrb[6].mxu1  ;;  %v231_v13 = vadd.f32 %v538_v54, %v983_v60 }
 0x104   :  { %v540_v58 = vpop.f32.mrb[7].mxu0  ;;  %v576_v59 = vpop.f32.mrb[7].mxu1 }
 0x105   :  { %v541_v61 = vadd.f32 %v540_v58, %v539_v56  ;;  %v985_v62 = vadd.f32 %v576_v59, %v575_v57  ;;  %v286_v58 = vadd.f32 %v976_v49, %v983_v60 }
 0x107   :  { %v542_v0 = vpop.f32.mrb[8].mxu0  ;;  %v608_v1 = vpop.f32.mrb[8].mxu1  ;;  %v236_v9 = vadd.f32 %v541_v61, %v983_v60 }
 0x108   :  { %v371_v3 = vadd.f32 %v608_v1, %v226_v63  ;;  %v543_v4 = vpop.f32.mrb[9].mxu0  ;;  %v365_v5 = vpop.f32.mrb[9].mxu1  ;;  %v281_v1 = vadd.f32 %v974_v43, %v983_v60 }
 0x109   :  { %v544_v6 = vadd.f32 %v543_v4, %v542_v0  ;;  %v366_v7 = vadd.f32 %v365_v5, %v221_v2 }
 0x10a   :  { %v445_v8 = vmax.f32 %v371_v3, 0.0 }
 0x10b   :  { %v444_v10 = vmax.f32 %v366_v7, 0.0  ;;  %v545_v11 = vpop.f32.mrb[10].mxu0  ;;  %v611_v12 = vpop.f32.mrb[10].mxu1  ;;  %v241_v24 = vadd.f32 %v544_v6, %v983_v60 }
 0x10c   :  { %462 = vst.msk [vmem:[%s1074_s3 + $0x8] sm:$0xff] %vm460_vm1, %v445_v8  ;;  %v381_v14 = vadd.f32 %v611_v12, %v236_v9  ;;  %v546_v15 = vpop.f32.mrb[11].mxu0  ;;  %v375_v16 = vpop.f32.mrb[11].mxu1  ;;  %v296_v8 = vadd.f32 %v985_v62, %v983_v60 }
 0x10d   :  { %461 = vst.msk [vmem:[%s1074_s3] sm:$0xff] %vm460_vm1, %v444_v10  ;;  %v547_v17 = vadd.f32 %v546_v15, %v545_v11  ;;  %v376_v18 = vadd.f32 %v375_v16, %v231_v13  ;;  %v291_v13 = vadd.f32 %v978_v55, %v983_v60 }
 0x10e   :  { %v447_v19 = vmax.f32 %v381_v14, 0.0 }
 0x10f   :  { %v446_v20 = vmax.f32 %v376_v18, 0.0  ;;  %v548_v21 = vpop.f32.mrb[12].mxu0  ;;  %v246_v22 = vadd.f32 %v547_v17, %v983_v60  ;;  %v614_v23 = vpop.f32.mrb[12].mxu1 }
 0x110   :  { %464 = vst.msk [vmem:[%s1074_s3 + $0x18] sm:$0xff] %vm460_vm1, %v447_v19  ;;  %v549_v25 = vpop.f32.mrb[13].mxu0  ;;  %v385_v26 = vpop.f32.mrb[13].mxu1 }
 0x111   :  { %463 = vst.msk [vmem:[%s1074_s3 + $0x10] sm:$0xff] %vm460_vm1, %v446_v20  ;;  %v391_v27 = vadd.f32 %v614_v23, %v246_v22  ;;  %v550_v28 = vadd.f32 %v549_v25, %v548_v21  ;;  %v386_v29 = vadd.f32 %v385_v26, %v241_v24 }
 0x113   :  { %v449_v30 = vmax.f32 %v391_v27, 0.0  ;;  %v448_v31 = vmax.f32 %v386_v29, 0.0  ;;  %v551_v32 = vpop.f32.mrb[14].mxu0  ;;  %v617_v33 = vpop.f32.mrb[14].mxu1  ;;  %v251_v34 = vadd.f32 %v550_v28, %v983_v60 }
 0x114   :  { %v552_v35 = vpop.f32.mrb[15].mxu0  ;;  %v395_v36 = vpop.f32.mrb[15].mxu1 }
 0x115   :  { %466 = vst.msk [vmem:[%s1074_s3 + $0x28] sm:$0xff] %vm460_vm1, %v449_v30  ;;  %465 = vst.msk [vmem:[%s1074_s3 + $0x20] sm:$0xff] %vm460_vm1, %v448_v31  ;;  %v553_v37 = vadd.f32 %v552_v35, %v551_v32  ;;  %v396_v38 = vadd.f32 %v395_v36, %v251_v34 }
 0x117   :  { %v256_v39 = vadd.f32 %v553_v37, %v983_v60  ;;  %v450_v40 = vmax.f32 %v396_v38, 0.0  ;;  %v554_v41 = vpop.f32.mrb[16].mxu0  ;;  %v620_v42 = vpop.f32.mrb[16].mxu1 }
 0x118   :  { %v555_v44 = vpop.f32.mrb[17].mxu0  ;;  %v405_v45 = vpop.f32.mrb[17].mxu1 }
 0x119   :  { %v401_v46 = vadd.f32 %v617_v33, %v256_v39  ;;  %467 = vst.msk [vmem:[%s1074_s3 + $0x30] sm:$0xff] %vm460_vm1, %v450_v40  ;;  %v556_v47 = vadd.f32 %v555_v44, %v554_v41 }
 0x11b   :  { %v451_v48 = vmax.f32 %v401_v46, 0.0  ;;  %v557_v50 = vpop.f32.mrb[18].mxu0  ;;  %v261_v51 = vadd.f32 %v556_v47, %v983_v60  ;;  %v623_v52 = vpop.f32.mrb[18].mxu1 }
 0x11c   :  { %v558_v53 = vpop.f32.mrb[19].mxu0  ;;  %v415_v54 = vpop.f32.mrb[19].mxu1 }
 0x11d   :  { %468 = vst.msk [vmem:[%s1074_s3 + $0x38] sm:$0xff] %vm460_vm1, %v451_v48  ;;  %v406_v56 = vadd.f32 %v405_v45, %v261_v51  ;;  %v559_v57 = vadd.f32 %v558_v53, %v557_v50 }
 0x11f   :  { %v452_v59 = vmax.f32 %v406_v56, 0.0  ;;  %v266_v61 = vadd.f32 %v559_v57, %v983_v60  ;;  %v560_v63 = vpop.f32.mrb[20].mxu0  ;;  %v626_v0 = vpop.f32.mrb[20].mxu1 }
 0x120   :  { %v431_v2 = vadd.f32 %v626_v0, %v286_v58  ;;  %v561_v3 = vpop.f32.mrb[21].mxu0  ;;  %v425_v4 = vpop.f32.mrb[21].mxu1 }
 0x121   :  { %469 = vst.msk [vmem:[%s1074_s3 + $0x40] sm:$0xff] %vm460_vm1, %v452_v59  ;;  %v411_v5 = vadd.f32 %v620_v42, %v266_v61  ;;  %v562_v6 = vadd.f32 %v561_v3, %v560_v63  ;;  %v426_v7 = vadd.f32 %v425_v4, %v281_v1 }
 0x122   :  { %v457_v49 = vmax.f32 %v431_v2, 0.0 }
 0x123   :  { %v453_v9 = vmax.f32 %v411_v5, 0.0  ;;  %v271_v10 = vadd.f32 %v562_v6, %v983_v60  ;;  %v456_v11 = vmax.f32 %v426_v7, 0.0  ;;  %v563_v43 = vpop.f32.mrb[22].mxu0  ;;  %v629_v12 = vpop.f32.mrb[22].mxu1 }
 0x124   :  { %474 = vst.msk [vmem:[%s1074_s3 + $0x68] sm:$0xff] %vm460_vm1, %v457_v49  ;;  %v441_v14 = vadd.f32 %v629_v12, %v296_v8  ;;  %v564_v15 = vpop.f32.mrb[23].mxu0  ;;  %v435_v16 = vpop.f32.mrb[23].mxu1 }
 0x125   :  { %470 = vst.msk [vmem:[%s1074_s3 + $0x48] sm:$0xff] %vm460_vm1, %v453_v9  ;;  %v416_v62 = vadd.f32 %v415_v54, %v271_v10  ;;  %473 = vst.msk [vmem:[%s1074_s3 + $0x60] sm:$0xff] %vm460_vm1, %v456_v11  ;;  %v565_v55 = vadd.f32 %v564_v15, %v563_v43  ;;  %v436_v17 = vadd.f32 %v435_v16, %v291_v13 }
 0x126   :  { %v459_v18 = vmax.f32 %v441_v14, 0.0 }
 0x127   :  { %v454_v19 = vmax.f32 %v416_v62, 0.0  ;;  %v276_v20 = vadd.f32 %v565_v55, %v983_v60  ;;  %v458_v21 = vmax.f32 %v436_v17, 0.0 }
 0x128   :  { %476 = vst.msk [vmem:[%s1074_s3 + $0x78] sm:$0xff] %vm460_vm1, %v459_v18 }
 0x129   :  { %471 = vst.msk [vmem:[%s1074_s3 + $0x50] sm:$0xff] %vm460_vm1, %v454_v19  ;;  %v421_v22 = vadd.f32 %v623_v52, %v276_v20  ;;  %475 = vst.msk [vmem:[%s1074_s3 + $0x70] sm:$0xff] %vm460_vm1, %v458_v21 }
 0x12b   :  { %v455_v23 = vmax.f32 %v421_v22, 0.0 }
 0x12d   :  { %472 = vst.msk [vmem:[%s1074_s3 + $0x58] sm:$0xff] %vm460_vm1, %v455_v23 }

// kernel: encoder_forward.11
= control target key start
LH: loop header
LB: loop body
LE: loop exit
PB: predicated region body
PF: predicated region fallthrough
CT: control target
= control target key end

     0   :  { %vm498_vm0 = vmmov 0   ;;  %vm98_vm1 = vcmask 523264   ;;  %s759_s1 = inlined_call_operand.vmem [shape: f32[576,64], index: 1, kind: input, shape index: {}]   ;;  %s760_s0 = inlined_call_operand.vmem [shape: f32[8,576], index: 0, kind: input, shape index: {}]   ;;  %s761_s2 = inlined_call_operand.vmem [shape: f32[1,64], index: 2, kind: input, shape index: {}]   ;;  %s762_s3 = inlined_call_operand.vmem [shape: f32[8,64], index: 3, kind: output, shape index: {}]  }
   0x1   :  { %v35_v0 = vld [vmem:[%s759_s1 + $0x80] sm:$0xff]  ;;  %v36_v1 = vld [vmem:[%s759_s1 + $0x88] sm:$0xff]  ;;  %v37_v11 = vld [vmem:[%s759_s1 + $0x90] sm:$0xff] }
   0x2   :  { %v19_v2 = vld [vmem:[%s759_s1] sm:$0xff]  ;;  %v418_v3 = vpack.c.bf16 %v36_v1, %v35_v0  ;;  %v20_v4 = vld [vmem:[%s759_s1 + $0x8] sm:$0xff]  ;;  %v38_v13 = vld [vmem:[%s759_s1 + $0x98] sm:$0xff] }
   0x3   :  { %v67_v5 = vld [vmem:[%s759_s1 + $0x180] sm:$0xff]  ;;  %v68_v6 = vld [vmem:[%s759_s1 + $0x188] sm:$0xff]  ;;  %v420_v7 = vpack.c.bf16 %v20_v4, %v19_v2  ;;  %v21_v14 = vld [vmem:[%s759_s1 + $0x10] sm:$0xff]  ;;  %v422_v16 = vpack.c.bf16 %v38_v13, %v37_v11 }
   0x4   :  { %v450_v8 = vpack.c.bf16 %v68_v6, %v67_v5  ;;  %v51_v9 = vld [vmem:[%s759_s1 + $0x100] sm:$0xff]  ;;  %v52_v10 = vld [vmem:[%s759_s1 + $0x108] sm:$0xff]  ;;  %419 = vmatprep.subr.bf16.mxu0 %v418_v3  ;;  %v22_v15 = vld [vmem:[%s759_s1 + $0x18] sm:$0xff] }
   0x5   :  { %v452_v12 = vpack.c.bf16 %v52_v10, %v51_v9  ;;  %421 = vmatpush3.bf16.msra.mxu0 %v420_v7  ;;  %v424_v17 = vpack.c.bf16 %v22_v15, %v21_v14  ;;  %v69_v18 = vld [vmem:[%s759_s1 + $0x190] sm:$0xff]  ;;  %v70_v19 = vld [vmem:[%s759_s1 + $0x198] sm:$0xff]  ;;  %v39_v23 = vld [vmem:[%s759_s1 + $0xa0] sm:$0xff] }
   0x6   :  { %451 = vmatprep.subr.bf16.mxu1 %v450_v8  ;;  %v53_v20 = vld [vmem:[%s759_s1 + $0x110] sm:$0xff]  ;;  %v454_v21 = vpack.c.bf16 %v70_v19, %v69_v18  ;;  %v54_v22 = vld [vmem:[%s759_s1 + $0x118] sm:$0xff]  ;;  %v40_v24 = vld [vmem:[%s759_s1 + $0xa8] sm:$0xff]  ;;  %423 = vmatprep.subr.bf16.mxu0 %v422_v16 }
   0x7   :  { %453 = vmatpush3.bf16.msra.mxu1 %v452_v12  ;;  %v456_v25 = vpack.c.bf16 %v54_v22, %v53_v20  ;;  %v426_v26 = vpack.c.bf16 %v40_v24, %v39_v23  ;;  %v23_v27 = vld [vmem:[%s759_s1 + $0x20] sm:$0xff]  ;;  %v24_v28 = vld [vmem:[%s759_s1 + $0x28] sm:$0xff]  ;;  %v41_v35 = vld [vmem:[%s759_s1 + $0xb0] sm:$0xff] }
   0x8   :  { %v71_v29 = vld [vmem:[%s759_s1 + $0x1a0] sm:$0xff]  ;;  %455 = vmatprep.subr.bf16.mxu1 %v454_v21  ;;  %v72_v30 = vld [vmem:[%s759_s1 + $0x1a8] sm:$0xff]  ;;  %v428_v33 = vpack.c.bf16 %v24_v28, %v23_v27  ;;  %v42_v36 = vld [vmem:[%s759_s1 + $0xb8] sm:$0xff] }
   0x9   :  { %v55_v31 = vld [vmem:[%s759_s1 + $0x120] sm:$0xff]  ;;  %v56_v32 = vld [vmem:[%s759_s1 + $0x128] sm:$0xff]  ;;  %425 = vmatpush3.bf16.msra.mxu0 %v424_v17  ;;  %v458_v34 = vpack.c.bf16 %v72_v30, %v71_v29  ;;  %v25_v37 = vld [vmem:[%s759_s1 + $0x30] sm:$0xff]  ;;  %v430_v39 = vpack.c.bf16 %v42_v36, %v41_v35 }
   0xa   :  { %427 = vmatprep.subr.bf16.mxu0 %v426_v26  ;;  %v460_v38 = vpack.c.bf16 %v56_v32, %v55_v31  ;;  %v26_v40 = vld [vmem:[%s759_s1 + $0x38] sm:$0xff]  ;;  %v73_v41 = vld [vmem:[%s759_s1 + $0x1b0] sm:$0xff]  ;;  %v43_v46 = vld [vmem:[%s759_s1 + $0xc0] sm:$0xff] }
   0xb   :  { %457 = vmatpush3.bf16.msra.mxu1 %v456_v25  ;;  %v74_v42 = vld [vmem:[%s759_s1 + $0x1b8] sm:$0xff]  ;;  %v57_v44 = vld [vmem:[%s759_s1 + $0x130] sm:$0xff]  ;;  %v44_v47 = vld [vmem:[%s759_s1 + $0xc8] sm:$0xff]  ;;  %v432_v48 = vpack.c.bf16 %v26_v40, %v25_v37 }
   0xc   :  { %459 = vmatprep.subr.bf16.mxu1 %v458_v34  ;;  %v462_v43 = vpack.c.bf16 %v74_v42, %v73_v41  ;;  %v58_v45 = vld [vmem:[%s759_s1 + $0x138] sm:$0xff]  ;;  %v75_v49 = vld [vmem:[%s759_s1 + $0x1c0] sm:$0xff]  ;;  %v76_v50 = vld [vmem:[%s759_s1 + $0x1c8] sm:$0xff]  ;;  %v434_v52 = vpack.c.bf16 %v44_v47, %v43_v46 }
   0xd   :  { %429 = vmatpush3.bf16.msra.mxu0 %v428_v33  ;;  %v464_v51 = vpack.c.bf16 %v58_v45, %v57_v44  ;;  %v27_v53 = vld [vmem:[%s759_s1 + $0x40] sm:$0xff]  ;;  %v28_v54 = vld [vmem:[%s759_s1 + $0x48] sm:$0xff]  ;;  %v466_v56 = vpack.c.bf16 %v76_v50, %v75_v49  ;;  %v45_v58 = vld [vmem:[%s759_s1 + $0xd0] sm:$0xff]  ;;  %v499_v45 = vmov 0.0  }
   0xe   :  { %431 = vmatprep.subr.bf16.mxu0 %v430_v39  ;;  %v59_v55 = vld [vmem:[%s759_s1 + $0x140] sm:$0xff]  ;;  %v60_v57 = vld [vmem:[%s759_s1 + $0x148] sm:$0xff]  ;;  %v46_v59 = vld [vmem:[%s759_s1 + $0xd8] sm:$0xff]  ;;  %v436_v62 = vpack.c.bf16 %v28_v54, %v27_v53 }
   0xf   :  { %461 = vmatpush3.bf16.msra.mxu1 %v460_v38  ;;  %v77_v60 = vld [vmem:[%s759_s1 + $0x1d0] sm:$0xff]  ;;  %v78_v61 = vld [vmem:[%s759_s1 + $0x1d8] sm:$0xff]  ;;  %v468_v63 = vpack.c.bf16 %v60_v57, %v59_v55  ;;  %v438_v0 = vpack.c.bf16 %v46_v59, %v45_v58  ;;  %v47_v6 = vld [vmem:[%s759_s1 + $0xe0] sm:$0xff]  ;;  %v497_v38 = vmov 0.0|0.0  }
  0x10   :  { %463 = vmatprep.subr.bf16.mxu1 %v462_v43  ;;  %v29_v1 = vld [vmem:[%s759_s1 + $0x50] sm:$0xff]  ;;  %v30_v2 = vld [vmem:[%s759_s1 + $0x58] sm:$0xff]  ;;  %v470_v4 = vpack.c.bf16 %v78_v61, %v77_v60  ;;  %v48_v7 = vld [vmem:[%s759_s1 + $0xe8] sm:$0xff] }
  0x11   :  { %433 = vmatpush3.bf16.msra.mxu0 %v432_v48  ;;  %v61_v3 = vld [vmem:[%s759_s1 + $0x150] sm:$0xff]  ;;  %v62_v5 = vld [vmem:[%s759_s1 + $0x158] sm:$0xff]  ;;  %v79_v8 = vld [vmem:[%s759_s1 + $0x1e0] sm:$0xff]  ;;  %v440_v10 = vpack.c.bf16 %v30_v2, %v29_v1  ;;  %v442_v14 = vpack.c.bf16 %v48_v7, %v47_v6 }
  0x12   :  { %435 = vmatprep.subr.bf16.mxu0 %v434_v52  ;;  %v80_v9 = vld [vmem:[%s759_s1 + $0x1e8] sm:$0xff]  ;;  %v31_v11 = vld [vmem:[%s759_s1 + $0x60] sm:$0xff]  ;;  %v472_v13 = vpack.c.bf16 %v62_v5, %v61_v3  ;;  %v49_v19 = vld [vmem:[%s759_s1 + $0xf0] sm:$0xff] }
  0x13   :  { %465 = vmatpush3.bf16.msra.mxu1 %v464_v51  ;;  %v15_v12 = vld [vmem:[%s760_s0 + $0x8] sm:$0xff]  ;;  %v63_v16 = vld [vmem:[%s759_s1 + $0x160] sm:$0xff]  ;;  %v474_v18 = vpack.c.bf16 %v80_v9, %v79_v8  ;;  %v50_v20 = vld [vmem:[%s759_s1 + $0xf8] sm:$0xff] }
  0x14   :  { %467 = vmatprep.subr.bf16.mxu1 %v466_v56  ;;  %v32_v15 = vld [vmem:[%s759_s1 + $0x68] sm:$0xff]  ;;  %166 = vmatprep.mubr.f32.mxu0 %v15_v12  ;;  %v17_v21 = vld [vmem:[%s760_s0 + $0x18] sm:$0xff]  ;;  %v81_v22 = vld [vmem:[%s759_s1 + $0x1f0] sm:$0xff]  ;;  %v446_v26 = vpack.c.bf16 %v50_v20, %v49_v19 }
  0x15   :  { %437 = vmatpush3.bf16.msra.mxu0 %v436_v62  ;;  %v64_v17 = vld [vmem:[%s759_s1 + $0x168] sm:$0xff]  ;;  %v82_v23 = vld [vmem:[%s759_s1 + $0x1f8] sm:$0xff]  ;;  %236 = vmatprep.mubr.f32.mxu1 %v17_v21  ;;  %v444_v24 = vpack.c.bf16 %v32_v15, %v31_v11  ;;  %v33_v27 = vld [vmem:[%s759_s1 + $0x70] sm:$0xff] }
  0x16   :  { %439 = vmatprep.subr.bf16.mxu0 %v438_v0  ;;  %v476_v25 = vpack.c.bf16 %v64_v17, %v63_v16  ;;  %v34_v28 = vld [vmem:[%s759_s1 + $0x78] sm:$0xff]  ;;  %v478_v29 = vpack.c.bf16 %v82_v23, %v81_v22  ;;  %v65_v30 = vld [vmem:[%s759_s1 + $0x170] sm:$0xff]  ;;  %v83_v34 = vld [vmem:[%s759_s1 + $0x200] sm:$0xff] }
  0x17   :  { %469 = vmatpush3.bf16.msra.mxu1 %v468_v63  ;;  %v66_v31 = vld [vmem:[%s759_s1 + $0x178] sm:$0xff]  ;;  %v448_v32 = vpack.c.bf16 %v34_v28, %v33_v27  ;;  %v84_v35 = vld [vmem:[%s759_s1 + $0x208] sm:$0xff]  ;;  %v14_v36 = vld [vmem:[%s760_s0] sm:$0xff] }
  0x18   :  { %471 = vmatprep.subr.bf16.mxu1 %v470_v4  ;;  %v480_v33 = vpack.c.bf16 %v66_v31, %v65_v30  ;;  %v483_v37 = vpack.c.bf16 %v84_v35, %v83_v34  ;;  %v16_v39 = vld [vmem:[%s760_s0 + $0x10] sm:$0xff]  ;;  %v86_v41 = vld [vmem:[%s759_s1 + $0x218] sm:$0xff]  ;;  %v87_v43 = vld [vmem:[%s759_s1 + $0x220] sm:$0xff] }
  0x19   :  { %441 = vmatpush3.bf16.msra.mxu0 %v440_v10  ;;  %v85_v40 = vld [vmem:[%s759_s1 + $0x210] sm:$0xff]  ;;  %v88_v44 = vld [vmem:[%s759_s1 + $0x228] sm:$0xff]  ;;  %v90_v48 = vld [vmem:[%s759_s1 + $0x238] sm:$0xff] }
  0x1a   :  { %443 = vmatprep.subr.bf16.mxu0 %v442_v14  ;;  %v486_v42 = vpack.c.bf16 %v86_v41, %v85_v40  ;;  %v489_v46 = vpack.c.bf16 %v88_v44, %v87_v43  ;;  %v89_v47 = vld [vmem:[%s759_s1 + $0x230] sm:$0xff]  ;;  %v18_v50 = vld [vmem:[%s760_s0 + $0x20] sm:$0xff] }
  0x1b   :  { %473 = vmatpush3.bf16.msra.mxu1 %v472_v13  ;;  %v492_v49 = vpack.c.bf16 %v90_v48, %v89_v47  ;;  %v318_v52 = vld [vmem:[%s761_s2] ss:$0 sm:$0xff] }
  0x1c   :  { %475 = vmatprep.subr.bf16.mxu1 %v474_v18 }
  0x1d   :  { %445 = vmatpush3.bf16.msra.mxu0 %v444_v24 }
  0x1e   :  { %447 = vmatprep.subr.bf16.mxu0 %v446_v26 }
  0x1f   :  { %477 = vmatpush3.bf16.msra.mxu1 %v476_v25 }
  0x20   :  { %479 = vmatprep.subr.bf16.mxu1 %v478_v29 }
  0x21   :  { %449 = vmatpush3.bf16.msra.mxu0 %v448_v32 }
  0x22   :  { %482 = vmatprep.subr.bf16.mxu0 %v497_v38 }
  0x23   :  { %481 = vmatpush3.bf16.msra.mxu1 %v480_v33 }
  0x24   :  { %167 = vmatmul.mubr.f32.vlgmr.msra.gmra.mrb[0].mxu0 %v14_v36 }
  0x25   :  { %484 = vmatpush3.bf16.msra.mxu0 %v483_v37  ;;  %415 = vmatprep.mubr.msk.f32.mxu0 %vm498_vm0, %v499_v45 }
  0x26   :  { %237 = vmatmul.mubr.f32.vlgmr.msra.gmra.mrb[0].mxu1 %v16_v39  ;;  %485 = vmatprep.subr.bf16.mxu0 %v497_v38 }
  0x29   :  { %487 = vmatpush3.bf16.msra.mxu0 %v486_v42 }
  0x2a   :  { %488 = vmatprep.subr.bf16.mxu0 %v497_v38 }
  0x2d   :  { %490 = vmatpush3.bf16.msra.mxu0 %v489_v46 }
  0x2e   :  { %491 = vmatprep.subr.bf16.mxu0 %v497_v38 }
  0x31   :  { %493 = vmatpush3.bf16.msra.mxu0 %v492_v49 }
  0x34   :  { %416 = vmatmul.mubr.msk.f32.vlgmr.msra.gmra.mrb[2].mxu0 %vm98_vm1, %v18_v50 }
  0xf7   :  { %v352_v51 = vpop.f32.mrb[0].mxu0 }
  0xf8   :  { %v353_v53 = vpop.f32.mrb[1].mxu0 }
  0xf9   :  { %v387_v54 = vpop.f32.mrb[0].mxu1  ;;  %v354_v55 = vadd.f32 %v353_v53, %v352_v51 }
  0xfa   :  { %v388_v56 = vpop.f32.mrb[1].mxu1 }
  0xfb   :  { %v389_v57 = vadd.f32 %v388_v56, %v387_v54  ;;  %v169_v58 = vadd.f32 %v354_v55, %v318_v52 }
  0xfd   :  { %v239_v59 = vadd.f32 %v389_v57, %v169_v58 }
 0x107   :  { %v308_v60 = vpop.f32.mrb[2].mxu0 }
 0x108   :  { %v309_v61 = vadd.f32 %v308_v60, %v239_v59  ;;  %v417_v62 = vpop.f32.mrb[3].mxu0 }
 0x10a   :  { %v312_v63 = vmax.f32 %v309_v61, 0.0 }
 0x10c   :  { %313 = vst.msk [vmem:[%s762_s3] sm:$0xff] %vm98_vm1, %v312_v63 }

// kernel: encoder_forward.10
= control target key start
LH: loop header
LB: loop body
LE: loop exit
PB: predicated region body
PF: predicated region fallthrough
CT: control target
= control target key end

     0   :  { %vm1974_vm0 = vmmov 0   ;;  %vm110_vm1 = vcmask 523264   ;;  %s2699_s4 = inlined_call_operand.vmem [shape: f32[576,64], index: 4, kind: input, shape index: {}]   ;;  %s2700_s0 = inlined_call_operand.vmem [shape: f32[24,576], index: 0, kind: input, shape index: {}]   ;;  %s2701_s1 = inlined_call_operand.vmem [shape: f32[24,576], index: 1, kind: input, shape index: {}]   ;;  %s2702_s2 = inlined_call_operand.vmem [shape: f32[24,576], index: 2, kind: input, shape index: {}]   ;;  %s2703_s3 = inlined_call_operand.vmem [shape: f32[24,576], index: 3, kind: input, shape index: {}]   ;;  %s2704_s5 = inlined_call_operand.vmem [shape: f32[1,64], index: 5, kind: input, shape index: {}]   ;;  %s2705_s6 = inlined_call_operand.vmem [shape: f32[24,64], index: 6, kind: output, shape index: {}]  }
   0x1   :  { %v39_v0 = vld [vmem:[%s2699_s4 + $0x80] sm:$0xff]  ;;  %v40_v1 = vld [vmem:[%s2699_s4 + $0x88] sm:$0xff]  ;;  %v41_v11 = vld [vmem:[%s2699_s4 + $0x90] sm:$0xff] }
   0x2   :  { %v71_v2 = vld [vmem:[%s2699_s4 + $0x180] sm:$0xff]  ;;  %v2020_v3 = vpack.c.bf16 %v40_v1, %v39_v0  ;;  %v72_v4 = vld [vmem:[%s2699_s4 + $0x188] sm:$0xff]  ;;  %v42_v13 = vld [vmem:[%s2699_s4 + $0x98] sm:$0xff] }
   0x3   :  { %v23_v5 = vld [vmem:[%s2699_s4] sm:$0xff]  ;;  %v24_v6 = vld [vmem:[%s2699_s4 + $0x8] sm:$0xff]  ;;  %v2031_v7 = vpack.c.bf16 %v72_v4, %v71_v2  ;;  %v73_v14 = vld [vmem:[%s2699_s4 + $0x190] sm:$0xff]  ;;  %v2058_v16 = vpack.c.bf16 %v42_v13, %v41_v11 }
   0x4   :  { %v2033_v8 = vpack.c.bf16 %v24_v6, %v23_v5  ;;  %v55_v9 = vld [vmem:[%s2699_s4 + $0x100] sm:$0xff]  ;;  %v56_v10 = vld [vmem:[%s2699_s4 + $0x108] sm:$0xff]  ;;  %1667 = vmatprep.subr.bf16.mxu0 %v2020_v3  ;;  %v74_v15 = vld [vmem:[%s2699_s4 + $0x198] sm:$0xff] }
   0x5   :  { %v2045_v12 = vpack.c.bf16 %v56_v10, %v55_v9  ;;  %1699 = vmatprep.subr.bf16.mxu1 %v2031_v7  ;;  %v2060_v17 = vpack.c.bf16 %v74_v15, %v73_v14  ;;  %v25_v18 = vld [vmem:[%s2699_s4 + $0x10] sm:$0xff]  ;;  %v26_v19 = vld [vmem:[%s2699_s4 + $0x18] sm:$0xff]  ;;  %v43_v23 = vld [vmem:[%s2699_s4 + $0xa0] sm:$0xff] }
   0x6   :  { %1669 = vmatpush3.bf16.msra.mxu0 %v2033_v8  ;;  %v57_v20 = vld [vmem:[%s2699_s4 + $0x110] sm:$0xff]  ;;  %v2072_v21 = vpack.c.bf16 %v26_v19, %v25_v18  ;;  %v58_v22 = vld [vmem:[%s2699_s4 + $0x118] sm:$0xff]  ;;  %v44_v24 = vld [vmem:[%s2699_s4 + $0xa8] sm:$0xff] }
   0x7   :  { %1701 = vmatpush3.bf16.msra.mxu1 %v2045_v12  ;;  %1671 = vmatprep.subr.bf16.mxu0 %v2058_v16  ;;  %v2085_v25 = vpack.c.bf16 %v58_v22, %v57_v20  ;;  %v2087_v26 = vpack.c.bf16 %v44_v24, %v43_v23  ;;  %v75_v27 = vld [vmem:[%s2699_s4 + $0x1a0] sm:$0xff]  ;;  %v76_v28 = vld [vmem:[%s2699_s4 + $0x1a8] sm:$0xff]  ;;  %v45_v35 = vld [vmem:[%s2699_s4 + $0xb0] sm:$0xff] }
   0x8   :  { %1703 = vmatprep.subr.bf16.mxu1 %v2060_v17  ;;  %v27_v29 = vld [vmem:[%s2699_s4 + $0x20] sm:$0xff]  ;;  %v2098_v30 = vpack.c.bf16 %v76_v28, %v75_v27  ;;  %v28_v31 = vld [vmem:[%s2699_s4 + $0x28] sm:$0xff]  ;;  %v46_v36 = vld [vmem:[%s2699_s4 + $0xb8] sm:$0xff] }
   0x9   :  { %v59_v32 = vld [vmem:[%s2699_s4 + $0x120] sm:$0xff]  ;;  %v60_v33 = vld [vmem:[%s2699_s4 + $0x128] sm:$0xff]  ;;  %v2110_v34 = vpack.c.bf16 %v28_v31, %v27_v29  ;;  %v77_v37 = vld [vmem:[%s2699_s4 + $0x1b0] sm:$0xff]  ;;  %v2125_v39 = vpack.c.bf16 %v46_v36, %v45_v35 }
   0xa   :  { %1673 = vmatpush3.bf16.msra.mxu0 %v2072_v21  ;;  %v2123_v38 = vpack.c.bf16 %v60_v33, %v59_v32  ;;  %v78_v40 = vld [vmem:[%s2699_s4 + $0x1b8] sm:$0xff]  ;;  %v29_v41 = vld [vmem:[%s2699_s4 + $0x30] sm:$0xff]  ;;  %v47_v46 = vld [vmem:[%s2699_s4 + $0xc0] sm:$0xff] }
   0xb   :  { %1705 = vmatpush3.bf16.msra.mxu1 %v2085_v25  ;;  %1675 = vmatprep.subr.bf16.mxu0 %v2087_v26  ;;  %v30_v42 = vld [vmem:[%s2699_s4 + $0x38] sm:$0xff]  ;;  %v2137_v43 = vpack.c.bf16 %v78_v40, %v77_v37  ;;  %v61_v44 = vld [vmem:[%s2699_s4 + $0x130] sm:$0xff]  ;;  %v48_v47 = vld [vmem:[%s2699_s4 + $0xc8] sm:$0xff] }
   0xc   :  { %1707 = vmatprep.subr.bf16.mxu1 %v2098_v30  ;;  %v62_v45 = vld [vmem:[%s2699_s4 + $0x138] sm:$0xff]  ;;  %v79_v48 = vld [vmem:[%s2699_s4 + $0x1c0] sm:$0xff]  ;;  %v80_v49 = vld [vmem:[%s2699_s4 + $0x1c8] sm:$0xff]  ;;  %v2158_v50 = vpack.c.bf16 %v30_v42, %v29_v41  ;;  %v2164_v52 = vpack.c.bf16 %v48_v47, %v47_v46 }
   0xd   :  { %v2162_v51 = vpack.c.bf16 %v62_v45, %v61_v44  ;;  %v31_v53 = vld [vmem:[%s2699_s4 + $0x40] sm:$0xff]  ;;  %v32_v54 = vld [vmem:[%s2699_s4 + $0x48] sm:$0xff]  ;;  %v2176_v56 = vpack.c.bf16 %v80_v49, %v79_v48  ;;  %v49_v58 = vld [vmem:[%s2699_s4 + $0xd0] sm:$0xff] }
   0xe   :  { %1677 = vmatpush3.bf16.msra.mxu0 %v2110_v34  ;;  %v63_v55 = vld [vmem:[%s2699_s4 + $0x140] sm:$0xff]  ;;  %v64_v57 = vld [vmem:[%s2699_s4 + $0x148] sm:$0xff]  ;;  %v50_v59 = vld [vmem:[%s2699_s4 + $0xd8] sm:$0xff]  ;;  %v2194_v62 = vpack.c.bf16 %v32_v54, %v31_v53 }
   0xf   :  { %1709 = vmatpush3.bf16.msra.mxu1 %v2123_v38  ;;  %1679 = vmatprep.subr.bf16.mxu0 %v2125_v39  ;;  %v81_v60 = vld [vmem:[%s2699_s4 + $0x1d0] sm:$0xff]  ;;  %v82_v61 = vld [vmem:[%s2699_s4 + $0x1d8] sm:$0xff]  ;;  %v2198_v63 = vpack.c.bf16 %v64_v57, %v63_v55  ;;  %v2200_v0 = vpack.c.bf16 %v50_v59, %v49_v58  ;;  %v51_v9 = vld [vmem:[%s2699_s4 + $0xe0] sm:$0xff]  ;;  %v1973_v57 = vmov 0.0|0.0  }
  0x10   :  { %1711 = vmatprep.subr.bf16.mxu1 %v2137_v43  ;;  %v33_v1 = vld [vmem:[%s2699_s4 + $0x50] sm:$0xff]  ;;  %v34_v2 = vld [vmem:[%s2699_s4 + $0x58] sm:$0xff]  ;;  %v2212_v5 = vpack.c.bf16 %v82_v61, %v81_v60  ;;  %v52_v10 = vld [vmem:[%s2699_s4 + $0xe8] sm:$0xff] }
  0x11   :  { %v65_v4 = vld [vmem:[%s2699_s4 + $0x150] sm:$0xff]  ;;  %v66_v6 = vld [vmem:[%s2699_s4 + $0x158] sm:$0xff]  ;;  %v83_v11 = vld [vmem:[%s2699_s4 + $0x1e0] sm:$0xff]  ;;  %v2230_v14 = vpack.c.bf16 %v34_v2, %v33_v1  ;;  %v2242_v20 = vpack.c.bf16 %v52_v10, %v51_v9 }
  0x12   :  { %1681 = vmatpush3.bf16.msra.mxu0 %v2158_v50  ;;  %v84_v13 = vld [vmem:[%s2699_s4 + $0x1e8] sm:$0xff]  ;;  %v35_v15 = vld [vmem:[%s2699_s4 + $0x60] sm:$0xff]  ;;  %v2240_v19 = vpack.c.bf16 %v66_v6, %v65_v4  ;;  %v98_v24 = vld [vmem:[%s2700_s0 + $0x18] sm:$0xff] }
  0x13   :  { %1713 = vmatpush3.bf16.msra.mxu1 %v2162_v51  ;;  %1683 = vmatprep.subr.bf16.mxu0 %v2164_v52  ;;  %v36_v18 = vld [vmem:[%s2699_s4 + $0x68] sm:$0xff]  ;;  %v67_v22 = vld [vmem:[%s2699_s4 + $0x160] sm:$0xff]  ;;  %v2254_v27 = vpack.c.bf16 %v84_v13, %v83_v11  ;;  %v53_v29 = vld [vmem:[%s2699_s4 + $0xf0] sm:$0xff] }
  0x14   :  { %1715 = vmatprep.subr.bf16.mxu1 %v2176_v56  ;;  %v96_v23 = vld [vmem:[%s2700_s0 + $0x8] sm:$0xff]  ;;  %v54_v31 = vld [vmem:[%s2699_s4 + $0xf8] sm:$0xff]  ;;  %v85_v32 = vld [vmem:[%s2699_s4 + $0x1f0] sm:$0xff]  ;;  %264 = vmatprep.mubr.f32.mxu1 %v98_v24  ;;  %v2272_v35 = vpack.c.bf16 %v36_v18, %v35_v15 }
  0x15   :  { %v68_v28 = vld [vmem:[%s2699_s4 + $0x168] sm:$0xff]  ;;  %184 = vmatprep.mubr.f32.mxu0 %v96_v23  ;;  %v86_v33 = vld [vmem:[%s2699_s4 + $0x1f8] sm:$0xff]  ;;  %v2278_v37 = vpack.c.bf16 %v54_v31, %v53_v29  ;;  %v37_v40 = vld [vmem:[%s2699_s4 + $0x70] sm:$0xff]  ;;  %v1975_v29 = vmov 0.0  }
  0x16   :  { %1685 = vmatpush3.bf16.msra.mxu0 %v2194_v62  ;;  %v2276_v36 = vpack.c.bf16 %v68_v28, %v67_v22  ;;  %v38_v41 = vld [vmem:[%s2699_s4 + $0x78] sm:$0xff]  ;;  %v2287_v42 = vpack.c.bf16 %v86_v33, %v85_v32  ;;  %v69_v44 = vld [vmem:[%s2699_s4 + $0x170] sm:$0xff]  ;;  %v87_v48 = vld [vmem:[%s2699_s4 + $0x200] sm:$0xff] }
  0x17   :  { %1717 = vmatpush3.bf16.msra.mxu1 %v2198_v63  ;;  %1687 = vmatprep.subr.bf16.mxu0 %v2200_v0  ;;  %v70_v45 = vld [vmem:[%s2699_s4 + $0x178] sm:$0xff]  ;;  %v2296_v46 = vpack.c.bf16 %v38_v41, %v37_v40  ;;  %v88_v49 = vld [vmem:[%s2699_s4 + $0x208] sm:$0xff]  ;;  %v95_v53 = vld [vmem:[%s2700_s0] sm:$0xff] }
  0x18   :  { %1719 = vmatprep.subr.bf16.mxu1 %v2212_v5  ;;  %v2300_v47 = vpack.c.bf16 %v70_v45, %v69_v44  ;;  %v2313_v54 = vpack.c.bf16 %v88_v49, %v87_v48  ;;  %v97_v55 = vld [vmem:[%s2700_s0 + $0x10] sm:$0xff]  ;;  %v90_v59 = vld [vmem:[%s2699_s4 + $0x218] sm:$0xff]  ;;  %v103_v1 = vld [vmem:[%s2700_s0 + $0x40] sm:$0xff] }
  0x19   :  { %v89_v58 = vld [vmem:[%s2699_s4 + $0x210] sm:$0xff]  ;;  %v100_v2 = vld [vmem:[%s2700_s0 + $0x28] sm:$0xff]  ;;  %v102_v4 = vld [vmem:[%s2700_s0 + $0x38] sm:$0xff] }
  0x1a   :  { %1689 = vmatpush3.bf16.msra.mxu0 %v2230_v14  ;;  %v101_v60 = vld [vmem:[%s2700_s0 + $0x30] sm:$0xff]  ;;  %v2331_v61 = vpack.c.bf16 %v90_v59, %v89_v58  ;;  %v91_v6 = vld [vmem:[%s2699_s4 + $0x220] sm:$0xff]  ;;  %v92_v9 = vld [vmem:[%s2699_s4 + $0x228] sm:$0xff] }
  0x1b   :  { %1721 = vmatpush3.bf16.msra.mxu1 %v2240_v19  ;;  %1691 = vmatprep.subr.bf16.mxu0 %v2242_v20  ;;  %v106_v10 = vld [vmem:[%s2700_s0 + $0x58] sm:$0xff]  ;;  %v2355_v11 = vpack.c.bf16 %v92_v9, %v91_v6  ;;  %v108_v13 = vld [vmem:[%s2700_s0 + $0x68] sm:$0xff]  ;;  %v105_v15 = vld [vmem:[%s2700_s0 + $0x50] sm:$0xff] }
  0x1c   :  { %1723 = vmatprep.subr.bf16.mxu1 %v2254_v27  ;;  %v107_v18 = vld [vmem:[%s2700_s0 + $0x60] sm:$0xff]  ;;  %v93_v22 = vld [vmem:[%s2699_s4 + $0x230] sm:$0xff]  ;;  %v94_v23 = vld [vmem:[%s2699_s4 + $0x238] sm:$0xff] }
  0x1d   :  { %v2376_v24 = vpack.c.bf16 %v94_v23, %v93_v22  ;;  %v361_v28 = vld [vmem:[%s2701_s1 + $0x8] sm:$0xff]  ;;  %v99_v31 = vld [vmem:[%s2700_s0 + $0x20] sm:$0xff]  ;;  %v109_v33 = vld [vmem:[%s2700_s0 + $0x70] sm:$0xff] }
  0x1e   :  { %1693 = vmatpush3.bf16.msra.mxu0 %v2272_v35  ;;  %v104_v32 = vld [vmem:[%s2700_s0 + $0x48] sm:$0xff]  ;;  %v363_v40 = vld [vmem:[%s2701_s1 + $0x18] sm:$0xff]  ;;  %v360_v41 = vld [vmem:[%s2701_s1] sm:$0xff] }
  0x1f   :  { %1725 = vmatpush3.bf16.msra.mxu1 %v2276_v36  ;;  %1695 = vmatprep.subr.bf16.mxu0 %v2278_v37  ;;  %v366_v44 = vld [vmem:[%s2701_s1 + $0x30] sm:$0xff]  ;;  %v365_v45 = vld [vmem:[%s2701_s1 + $0x28] sm:$0xff]  ;;  %v371_v48 = vld [vmem:[%s2701_s1 + $0x58] sm:$0xff] }
  0x20   :  { %1727 = vmatprep.subr.bf16.mxu1 %v2287_v42  ;;  %v370_v49 = vld [vmem:[%s2701_s1 + $0x50] sm:$0xff]  ;;  %v368_v58 = vld [vmem:[%s2701_s1 + $0x40] sm:$0xff]  ;;  %v367_v59 = vld [vmem:[%s2701_s1 + $0x38] sm:$0xff] }
  0x21   :  { %v374_v6 = vld [vmem:[%s2701_s1 + $0x70] sm:$0xff]  ;;  %v630_v9 = vld [vmem:[%s2702_s2 + $0x18] sm:$0xff]  ;;  %v632_v22 = vld [vmem:[%s2702_s2 + $0x28] sm:$0xff] }
  0x22   :  { %1697 = vmatpush3.bf16.msra.mxu0 %v2296_v46  ;;  %v638_v23 = vld [vmem:[%s2702_s2 + $0x58] sm:$0xff] }
  0x23   :  { %1729 = vmatpush3.bf16.msra.mxu1 %v2300_v47  ;;  %1730 = vmatprep.subr.bf16.mxu0 %v1973_v57 }
  0x24   :  { %1743 = vmatprep.subr.bf16.mxu1 %v2020_v3 }
  0x25   :  { %185 = vmatmul.mubr.f32.vlgmr.msra.gmra.mrb[0].mxu0 %v95_v53  ;;  %v362_v53 = vld [vmem:[%s2701_s1 + $0x10] sm:$0xff] }
  0x26   :  { %265 = vmatmul.mubr.f32.vlgmr.msra.gmra.mrb[0].mxu1 %v97_v55  ;;  %1732 = vmatpush3.bf16.msra.mxu0 %v2313_v54  ;;  %v364_v55 = vld [vmem:[%s2701_s1 + $0x20] sm:$0xff] }
  0x27   :  { %1745 = vmatpush3.bf16.msra.mxu1 %v2033_v8  ;;  %1733 = vmatprep.subr.bf16.mxu0 %v1973_v57 }
  0x28   :  { %1747 = vmatprep.subr.bf16.mxu1 %v2058_v16  ;;  %189 = vmatprep.mubr.f32.mxu0 %v101_v60  ;;  %v373_v60 = vld [vmem:[%s2701_s1 + $0x68] sm:$0xff] }
  0x29   :  { %269 = vmatprep.mubr.f32.mxu1 %v103_v1  ;;  %190 = vmatmul.mubr.f32.gmra.mrb[2].mxu0 %v100_v2  ;;  %v369_v1 = vld [vmem:[%s2701_s1 + $0x48] sm:$0xff]  ;;  %v372_v2 = vld [vmem:[%s2701_s1 + $0x60] sm:$0xff] }
  0x2a   :  { %1735 = vmatpush3.bf16.msra.mxu0 %v2331_v61  ;;  %270 = vmatmul.mubr.f32.gmra.mrb[2].mxu1 %v102_v4  ;;  %v628_v4 = vld [vmem:[%s2702_s2 + $0x8] sm:$0xff] }
  0x2b   :  { %1749 = vmatpush3.bf16.msra.mxu1 %v2072_v21  ;;  %1736 = vmatprep.subr.bf16.mxu0 %v1973_v57 }
  0x2c   :  { %1751 = vmatprep.subr.bf16.mxu1 %v2087_v26  ;;  %194 = vmatprep.mubr.f32.mxu0 %v106_v10  ;;  %v627_v10 = vld [vmem:[%s2702_s2] sm:$0xff] }
  0x2d   :  { %274 = vmatprep.mubr.f32.mxu1 %v108_v13  ;;  %195 = vmatmul.mubr.f32.gmra.mrb[4].mxu0 %v105_v15  ;;  %v629_v13 = vld [vmem:[%s2702_s2 + $0x10] sm:$0xff] }
  0x2e   :  { %1738 = vmatpush3.bf16.msra.mxu0 %v2355_v11  ;;  %275 = vmatmul.mubr.f32.gmra.mrb[4].mxu1 %v107_v18  ;;  %v633_v15 = vld [vmem:[%s2702_s2 + $0x30] sm:$0xff]  ;;  %v635_v18 = vld [vmem:[%s2702_s2 + $0x40] sm:$0xff] }
  0x2f   :  { %1753 = vmatpush3.bf16.msra.mxu1 %v2110_v34  ;;  %1739 = vmatprep.subr.bf16.mxu0 %v1973_v57 }
  0x30   :  { %1755 = vmatprep.subr.bf16.mxu1 %v2125_v39  ;;  %1582 = vmatprep.mubr.msk.f32.mxu0 %vm1974_vm0, %v1975_v29 }
  0x31   :  { %448 = vmatprep.mubr.f32.mxu1 %v361_v28  ;;  %v640_v28 = vld [vmem:[%s2702_s2 + $0x68] sm:$0xff] }
  0x32   :  { %1741 = vmatpush3.bf16.msra.mxu0 %v2376_v24 }
  0x33   :  { %1757 = vmatpush3.bf16.msra.mxu1 %v2158_v50  ;;  %1775 = vmatprep.subr.bf16.mxu0 %v2031_v7 }
  0x34   :  { %1759 = vmatprep.subr.bf16.mxu1 %v2164_v52 }
  0x35   :  { %1583 = vmatmul.mubr.msk.f32.vlgmr.msra.gmra.mrb[6].mxu0 %vm110_vm1, %v99_v31  ;;  %v895_v31 = vld [vmem:[%s2703_s3 + $0x8] sm:$0xff] }
  0x36   :  { %1777 = vmatpush3.bf16.msra.mxu0 %v2045_v12  ;;  %1585 = vmatprep.mubr.msk.f32.mxu0 %vm1974_vm0, %v1975_v29 }
  0x37   :  { %1761 = vmatpush3.bf16.msra.mxu1 %v2194_v62  ;;  %1779 = vmatprep.subr.bf16.mxu0 %v2060_v17 }
  0x38   :  { %1763 = vmatprep.subr.bf16.mxu1 %v2200_v0 }
  0x39   :  { %1586 = vmatmul.mubr.msk.f32.gmra.mrb[8].mxu0 %vm110_vm1, %v104_v32 }
  0x3a   :  { %1781 = vmatpush3.bf16.msra.mxu0 %v2085_v25  ;;  %1588 = vmatprep.mubr.msk.f32.mxu0 %vm1974_vm0, %v1975_v29 }
  0x3b   :  { %1765 = vmatpush3.bf16.msra.mxu1 %v2230_v14  ;;  %1783 = vmatprep.subr.bf16.mxu0 %v2098_v30 }
  0x3c   :  { %1767 = vmatprep.subr.bf16.mxu1 %v2242_v20 }
  0x3d   :  { %1589 = vmatmul.mubr.msk.f32.gmra.mrb[10].mxu0 %vm110_vm1, %v109_v33 }
  0x3e   :  { %1785 = vmatpush3.bf16.msra.mxu0 %v2123_v38  ;;  %528 = vmatprep.mubr.f32.mxu0 %v363_v40 }
  0x3f   :  { %1769 = vmatpush3.bf16.msra.mxu1 %v2272_v35  ;;  %1787 = vmatprep.subr.bf16.mxu0 %v2137_v43 }
  0x40   :  { %1771 = vmatprep.subr.bf16.mxu1 %v2278_v37 }
  0x42   :  { %1789 = vmatpush3.bf16.msra.mxu0 %v2162_v51 }
  0x43   :  { %1773 = vmatpush3.bf16.msra.mxu1 %v2296_v46  ;;  %1791 = vmatprep.subr.bf16.mxu0 %v2176_v56 }
  0x44   :  { %1806 = vmatprep.subr.bf16.mxu1 %v1973_v57 }
  0x46   :  { %449 = vmatmul.mubr.f32.vlgmr.msra.gmra.mrb[6].mxu1 %v360_v41  ;;  %1793 = vmatpush3.bf16.msra.mxu0 %v2198_v63 }
  0x47   :  { %1808 = vmatpush3.bf16.msra.mxu1 %v2313_v54  ;;  %1795 = vmatprep.subr.bf16.mxu0 %v2212_v5 }
  0x48   :  { %1809 = vmatprep.subr.bf16.mxu1 %v1973_v57  ;;  %453 = vmatprep.mubr.f32.mxu1 %v366_v44 }
  0x4a   :  { %1797 = vmatpush3.bf16.msra.mxu0 %v2240_v19  ;;  %454 = vmatmul.mubr.f32.gmra.mrb[8].mxu1 %v365_v45 }
  0x4b   :  { %1811 = vmatpush3.bf16.msra.mxu1 %v2331_v61  ;;  %1799 = vmatprep.subr.bf16.mxu0 %v2254_v27 }
  0x4c   :  { %1812 = vmatprep.subr.bf16.mxu1 %v1973_v57  ;;  %458 = vmatprep.mubr.f32.mxu1 %v371_v48 }
  0x4e   :  { %1801 = vmatpush3.bf16.msra.mxu0 %v2276_v36  ;;  %459 = vmatmul.mubr.f32.gmra.mrb[10].mxu1 %v370_v49 }
  0x4f   :  { %1814 = vmatpush3.bf16.msra.mxu1 %v2355_v11  ;;  %1803 = vmatprep.subr.bf16.mxu0 %v2287_v42 }
  0x50   :  { %1815 = vmatprep.subr.bf16.mxu1 %v1973_v57  ;;  %1607 = vmatprep.mubr.msk.f32.mxu1 %vm1974_vm0, %v1975_v29 }
  0x52   :  { %1805 = vmatpush3.bf16.msra.mxu0 %v2300_v47 }
  0x53   :  { %1817 = vmatpush3.bf16.msra.mxu1 %v2376_v24  ;;  %1819 = vmatprep.subr.bf16.mxu0 %v2020_v3 }
  0x54   :  { %1851 = vmatprep.subr.bf16.mxu1 %v2031_v7 }
  0x55   :  { %529 = vmatmul.mubr.f32.vlgmr.msra.gmra.mrb[12].mxu0 %v362_v53 }
  0x56   :  { %1608 = vmatmul.mubr.msk.f32.vlgmr.msra.gmra.mrb[12].mxu1 %vm110_vm1, %v364_v55  ;;  %1821 = vmatpush3.bf16.msra.mxu0 %v2033_v8 }
  0x57   :  { %1853 = vmatpush3.bf16.msra.mxu1 %v2045_v12  ;;  %533 = vmatprep.mubr.f32.mxu0 %v368_v58 }
  0x58   :  { %1823 = vmatprep.subr.bf16.mxu0 %v2058_v16  ;;  %1855 = vmatprep.subr.bf16.mxu1 %v2060_v17 }
  0x59   :  { %534 = vmatmul.mubr.f32.gmra.mrb[14].mxu0 %v367_v59  ;;  %1610 = vmatprep.mubr.msk.f32.mxu1 %vm1974_vm0, %v1975_v29 }
  0x5a   :  { %1825 = vmatpush3.bf16.msra.mxu0 %v2072_v21  ;;  %538 = vmatprep.mubr.f32.mxu0 %v373_v60 }
  0x5b   :  { %1857 = vmatpush3.bf16.msra.mxu1 %v2085_v25  ;;  %1827 = vmatprep.subr.bf16.mxu0 %v2087_v26 }
  0x5c   :  { %1859 = vmatprep.subr.bf16.mxu1 %v2098_v30  ;;  %1611 = vmatmul.mubr.msk.f32.gmra.mrb[14].mxu1 %vm110_vm1, %v369_v1 }
  0x5d   :  { %539 = vmatmul.mubr.f32.gmra.mrb[16].mxu0 %v372_v2  ;;  %1613 = vmatprep.mubr.msk.f32.mxu1 %vm1974_vm0, %v1975_v29 }
  0x5e   :  { %1829 = vmatpush3.bf16.msra.mxu0 %v2110_v34  ;;  %715 = vmatprep.mubr.f32.mxu0 %v628_v4 }
  0x5f   :  { %1861 = vmatpush3.bf16.msra.mxu1 %v2123_v38  ;;  %1831 = vmatprep.subr.bf16.mxu0 %v2125_v39 }
  0x60   :  { %1863 = vmatprep.subr.bf16.mxu1 %v2137_v43  ;;  %1614 = vmatmul.mubr.msk.f32.gmra.mrb[16].mxu1 %vm110_vm1, %v374_v6 }
  0x61   :  { %795 = vmatprep.mubr.f32.mxu1 %v630_v9 }
  0x62   :  { %1833 = vmatpush3.bf16.msra.mxu0 %v2158_v50 }
  0x63   :  { %1865 = vmatpush3.bf16.msra.mxu1 %v2162_v51  ;;  %1835 = vmatprep.subr.bf16.mxu0 %v2164_v52 }
  0x64   :  { %1867 = vmatprep.subr.bf16.mxu1 %v2176_v56 }
  0x66   :  { %1837 = vmatpush3.bf16.msra.mxu0 %v2194_v62 }
  0x67   :  { %1869 = vmatpush3.bf16.msra.mxu1 %v2198_v63  ;;  %1839 = vmatprep.subr.bf16.mxu0 %v2200_v0 }
  0x68   :  { %1871 = vmatprep.subr.bf16.mxu1 %v2212_v5 }
  0x6a   :  { %1841 = vmatpush3.bf16.msra.mxu0 %v2230_v14 }
  0x6b   :  { %1873 = vmatpush3.bf16.msra.mxu1 %v2240_v19  ;;  %1843 = vmatprep.subr.bf16.mxu0 %v2242_v20 }
  0x6c   :  { %1875 = vmatprep.subr.bf16.mxu1 %v2254_v27 }
  0x6e   :  { %1845 = vmatpush3.bf16.msra.mxu0 %v2272_v35 }
  0x6f   :  { %1877 = vmatpush3.bf16.msra.mxu1 %v2276_v36  ;;  %1847 = vmatprep.subr.bf16.mxu0 %v2278_v37 }
  0x70   :  { %1879 = vmatprep.subr.bf16.mxu1 %v2287_v42 }
  0x72   :  { %1849 = vmatpush3.bf16.msra.mxu0 %v2296_v46 }
  0x73   :  { %1881 = vmatpush3.bf16.msra.mxu1 %v2300_v47  ;;  %1882 = vmatprep.subr.bf16.mxu0 %v1973_v57 }
  0x74   :  { %1895 = vmatprep.subr.bf16.mxu1 %v2020_v3  ;;  %v634_v3 = vld [vmem:[%s2702_s2 + $0x38] sm:$0xff] }
  0x75   :  { %716 = vmatmul.mubr.f32.vlgmr.msra.gmra.mrb[18].mxu0 %v627_v10 }
  0x76   :  { %796 = vmatmul.mubr.f32.vlgmr.msra.gmra.mrb[18].mxu1 %v629_v13  ;;  %1884 = vmatpush3.bf16.msra.mxu0 %v2313_v54 }
  0x77   :  { %1885 = vmatprep.subr.bf16.mxu0 %v1973_v57  ;;  %1897 = vmatpush3.bf16.msra.mxu1 %v2033_v8  ;;  %v637_v8 = vld [vmem:[%s2702_s2 + $0x50] sm:$0xff] }
  0x78   :  { %720 = vmatprep.mubr.f32.mxu0 %v633_v15  ;;  %800 = vmatprep.mubr.f32.mxu1 %v635_v18 }
  0x79   :  { %721 = vmatmul.mubr.f32.gmra.mrb[20].mxu0 %v632_v22  ;;  %1899 = vmatprep.subr.bf16.mxu1 %v2058_v16  ;;  %v639_v16 = vld [vmem:[%s2702_s2 + $0x60] sm:$0xff] }
  0x7a   :  { %1887 = vmatpush3.bf16.msra.mxu0 %v2331_v61  ;;  %801 = vmatmul.mubr.f32.gmra.mrb[20].mxu1 %v634_v3 }
  0x7b   :  { %1888 = vmatprep.subr.bf16.mxu0 %v1973_v57  ;;  %1901 = vmatpush3.bf16.msra.mxu1 %v2072_v21  ;;  %v631_v21 = vld [vmem:[%s2702_s2 + $0x20] sm:$0xff] }
  0x7c   :  { %725 = vmatprep.mubr.f32.mxu0 %v638_v23  ;;  %805 = vmatprep.mubr.f32.mxu1 %v640_v28 }
  0x7d   :  { %726 = vmatmul.mubr.f32.gmra.mrb[22].mxu0 %v637_v8  ;;  %1903 = vmatprep.subr.bf16.mxu1 %v2087_v26  ;;  %v636_v26 = vld [vmem:[%s2702_s2 + $0x48] sm:$0xff] }
  0x7e   :  { %1890 = vmatpush3.bf16.msra.mxu0 %v2355_v11  ;;  %806 = vmatmul.mubr.f32.gmra.mrb[22].mxu1 %v639_v16 }
  0x7f   :  { %1891 = vmatprep.subr.bf16.mxu0 %v1973_v57  ;;  %1905 = vmatpush3.bf16.msra.mxu1 %v2110_v34  ;;  %v905_v34 = vld [vmem:[%s2703_s3 + $0x58] sm:$0xff] }
  0x80   :  { %1632 = vmatprep.mubr.msk.f32.mxu0 %vm1974_vm0, %v1975_v29  ;;  %1907 = vmatprep.subr.bf16.mxu1 %v2125_v39  ;;  %v896_v39 = vld [vmem:[%s2703_s3 + $0x10] sm:$0xff] }
  0x81   :  { %982 = vmatprep.mubr.f32.mxu1 %v895_v31 }
  0x82   :  { %1893 = vmatpush3.bf16.msra.mxu0 %v2376_v24 }
  0x83   :  { %1927 = vmatprep.subr.bf16.mxu0 %v2031_v7  ;;  %1909 = vmatpush3.bf16.msra.mxu1 %v2158_v50  ;;  %v641_v7 = vld [vmem:[%s2702_s2 + $0x70] sm:$0xff]  ;;  %v898_v50 = vld [vmem:[%s2703_s3 + $0x20] sm:$0xff] }
  0x84   :  { %1911 = vmatprep.subr.bf16.mxu1 %v2164_v52  ;;  %v907_v52 = vld [vmem:[%s2703_s3 + $0x68] sm:$0xff] }
  0x85   :  { %1633 = vmatmul.mubr.msk.f32.vlgmr.msra.gmra.mrb[24].mxu0 %vm110_vm1, %v631_v21 }
  0x86   :  { %1929 = vmatpush3.bf16.msra.mxu0 %v2045_v12  ;;  %1635 = vmatprep.mubr.msk.f32.mxu0 %vm1974_vm0, %v1975_v29  ;;  %v897_v12 = vld [vmem:[%s2703_s3 + $0x18] sm:$0xff] }
  0x87   :  { %1931 = vmatprep.subr.bf16.mxu0 %v2060_v17  ;;  %1913 = vmatpush3.bf16.msra.mxu1 %v2194_v62  ;;  %v894_v17 = vld [vmem:[%s2703_s3] sm:$0xff] }
  0x88   :  { %1915 = vmatprep.subr.bf16.mxu1 %v2200_v0  ;;  %v906_v62 = vld [vmem:[%s2703_s3 + $0x60] sm:$0xff] }
  0x89   :  { %1636 = vmatmul.mubr.msk.f32.gmra.mrb[26].mxu0 %vm110_vm1, %v636_v26 }
  0x8a   :  { %1933 = vmatpush3.bf16.msra.mxu0 %v2085_v25  ;;  %1638 = vmatprep.mubr.msk.f32.mxu0 %vm1974_vm0, %v1975_v29  ;;  %v900_v25 = vld [vmem:[%s2703_s3 + $0x30] sm:$0xff] }
  0x8b   :  { %1935 = vmatprep.subr.bf16.mxu0 %v2098_v30  ;;  %1917 = vmatpush3.bf16.msra.mxu1 %v2230_v14  ;;  %v899_v30 = vld [vmem:[%s2703_s3 + $0x28] sm:$0xff] }
  0x8c   :  { %1919 = vmatprep.subr.bf16.mxu1 %v2242_v20 }
  0x8d   :  { %1639 = vmatmul.mubr.msk.f32.gmra.mrb[28].mxu0 %vm110_vm1, %v641_v7 }
  0x8e   :  { %1937 = vmatpush3.bf16.msra.mxu0 %v2123_v38  ;;  %1062 = vmatprep.mubr.f32.mxu0 %v897_v12  ;;  %v904_v38 = vld [vmem:[%s2703_s3 + $0x50] sm:$0xff] }
  0x8f   :  { %1939 = vmatprep.subr.bf16.mxu0 %v2137_v43  ;;  %1921 = vmatpush3.bf16.msra.mxu1 %v2272_v35  ;;  %v902_v43 = vld [vmem:[%s2703_s3 + $0x40] sm:$0xff] }
  0x90   :  { %1923 = vmatprep.subr.bf16.mxu1 %v2278_v37 }
  0x92   :  { %1941 = vmatpush3.bf16.msra.mxu0 %v2162_v51  ;;  %v901_v51 = vld [vmem:[%s2703_s3 + $0x38] sm:$0xff] }
  0x93   :  { %1943 = vmatprep.subr.bf16.mxu0 %v2176_v56  ;;  %1925 = vmatpush3.bf16.msra.mxu1 %v2296_v46  ;;  %v903_v56 = vld [vmem:[%s2703_s3 + $0x48] sm:$0xff] }
  0x94   :  { %1958 = vmatprep.subr.bf16.mxu1 %v1973_v57 }
  0x96   :  { %1945 = vmatpush3.bf16.msra.mxu0 %v2198_v63  ;;  %983 = vmatmul.mubr.f32.vlgmr.msra.gmra.mrb[24].mxu1 %v894_v17  ;;  %v908_v63 = vld [vmem:[%s2703_s3 + $0x70] sm:$0xff] }
  0x97   :  { %1947 = vmatprep.subr.bf16.mxu0 %v2212_v5  ;;  %1960 = vmatpush3.bf16.msra.mxu1 %v2313_v54 }
  0x98   :  { %1961 = vmatprep.subr.bf16.mxu1 %v1973_v57  ;;  %987 = vmatprep.mubr.f32.mxu1 %v900_v25 }
  0x9a   :  { %1949 = vmatpush3.bf16.msra.mxu0 %v2240_v19  ;;  %988 = vmatmul.mubr.f32.gmra.mrb[26].mxu1 %v899_v30 }
  0x9b   :  { %1951 = vmatprep.subr.bf16.mxu0 %v2254_v27  ;;  %1963 = vmatpush3.bf16.msra.mxu1 %v2331_v61 }
  0x9c   :  { %1964 = vmatprep.subr.bf16.mxu1 %v1973_v57  ;;  %992 = vmatprep.mubr.f32.mxu1 %v905_v34 }
  0x9e   :  { %1953 = vmatpush3.bf16.msra.mxu0 %v2276_v36  ;;  %993 = vmatmul.mubr.f32.gmra.mrb[28].mxu1 %v904_v38 }
  0x9f   :  { %1955 = vmatprep.subr.bf16.mxu0 %v2287_v42  ;;  %1966 = vmatpush3.bf16.msra.mxu1 %v2355_v11 }
  0xa0   :  { %1967 = vmatprep.subr.bf16.mxu1 %v1973_v57  ;;  %1657 = vmatprep.mubr.msk.f32.mxu1 %vm1974_vm0, %v1975_v29 }
  0xa2   :  { %1957 = vmatpush3.bf16.msra.mxu0 %v2300_v47 }
  0xa3   :  { %1969 = vmatpush3.bf16.msra.mxu1 %v2376_v24 }
  0xa5   :  { %1063 = vmatmul.mubr.f32.vlgmr.msra.gmra.mrb[30].mxu0 %v896_v39 }
  0xa6   :  { %1067 = vmatprep.mubr.f32.mxu0 %v902_v43  ;;  %1658 = vmatmul.mubr.msk.f32.vlgmr.msra.gmra.mrb[30].mxu1 %vm110_vm1, %v898_v50 }
  0xa7   :  { %1660 = vmatprep.mubr.msk.f32.mxu1 %vm1974_vm0, %v1975_v29 }
  0xa9   :  { %1068 = vmatmul.mubr.f32.gmra.mrb[32].mxu0 %v901_v51 }
  0xaa   :  { %1072 = vmatprep.mubr.f32.mxu0 %v907_v52  ;;  %1661 = vmatmul.mubr.msk.f32.gmra.mrb[32].mxu1 %vm110_vm1, %v903_v56 }
  0xab   :  { %1663 = vmatprep.mubr.msk.f32.mxu1 %vm1974_vm0, %v1975_v29 }
  0xad   :  { %1073 = vmatmul.mubr.f32.gmra.mrb[34].mxu0 %v906_v62 }
  0xae   :  { %1664 = vmatmul.mubr.msk.f32.gmra.mrb[34].mxu1 %vm110_vm1, %v908_v63 }
  0xf8   :  { %v1226_v0 = vpop.f32.mrb[0].mxu0 }
  0xf9   :  { %v1267_v5 = vpop.f32.mrb[0].mxu1  ;;  %v1227_v14 = vpop.f32.mrb[1].mxu0 }
  0xfa   :  { %v1228_v19 = vadd.f32 %v1227_v14, %v1226_v0  ;;  %v1268_v20 = vpop.f32.mrb[1].mxu1 }
  0xfb   :  { %v1269_v27 = vadd.f32 %v1268_v20, %v1267_v5 }
  0xfc   :  { %v1229_v35 = vpop.f32.mrb[2].mxu0 }
  0xfd   :  { %v1270_v36 = vpop.f32.mrb[2].mxu1  ;;  %v1230_v37 = vpop.f32.mrb[3].mxu0  ;;  %v267_v42 = vadd.f32 %v1269_v27, %v1228_v19 }
  0xfe   :  { %v1231_v46 = vadd.f32 %v1230_v37, %v1229_v35  ;;  %v1271_v47 = vpop.f32.mrb[3].mxu1 }
  0xff   :  { %v1272_v54 = vadd.f32 %v1271_v47, %v1270_v36 }
 0x100   :  { %v1232_v57 = vpop.f32.mrb[4].mxu0 }
 0x101   :  { %v1273_v61 = vpop.f32.mrb[4].mxu1  ;;  %v1233_v11 = vpop.f32.mrb[5].mxu0  ;;  %v272_v24 = vadd.f32 %v1272_v54, %v1231_v46 }
 0x102   :  { %v1234_v29 = vadd.f32 %v1233_v11, %v1232_v57  ;;  %v1274_v32 = vpop.f32.mrb[5].mxu1 }
 0x103   :  { %v1275_v33 = vadd.f32 %v1274_v32, %v1273_v61 }
 0x105   :  { %v277_v40 = vadd.f32 %v1275_v33, %v1234_v29 }
 0x108   :  { %v346_v41 = vpop.f32.mrb[6].mxu0 }
 0x109   :  { %v2675_v44 = vadd.f32 %v346_v41, %v267_v42  ;;  %v1584_v45 = vpop.f32.mrb[7].mxu0 }
 0x10c   :  { %v351_v48 = vpop.f32.mrb[8].mxu0 }
 0x10d   :  { %v2677_v49 = vadd.f32 %v351_v48, %v272_v24  ;;  %v1587_v53 = vpop.f32.mrb[9].mxu0 }
 0x110   :  { %v356_v55 = vpop.f32.mrb[10].mxu0 }
 0x111   :  { %v2679_v58 = vadd.f32 %v356_v55, %v277_v40  ;;  %v1590_v59 = vpop.f32.mrb[11].mxu0 }
 0x119   :  { %v1319_v60 = vpop.f32.mrb[6].mxu1 }
 0x11a   :  { %v1320_v1 = vpop.f32.mrb[7].mxu1 }
 0x11b   :  { %v1321_v2 = vadd.f32 %v1320_v1, %v1319_v60 }
 0x11d   :  { %v1322_v4 = vpop.f32.mrb[8].mxu1 }
 0x11e   :  { %v1323_v6 = vpop.f32.mrb[9].mxu1 }
 0x11f   :  { %v1324_v9 = vadd.f32 %v1323_v6, %v1322_v4 }
 0x121   :  { %v1325_v10 = vpop.f32.mrb[10].mxu1 }
 0x122   :  { %v1326_v13 = vpop.f32.mrb[11].mxu1 }
 0x123   :  { %v1327_v15 = vadd.f32 %v1326_v13, %v1325_v10 }
 0x128   :  { %v1360_v18 = vpop.f32.mrb[12].mxu0 }
 0x129   :  { %v1361_v22 = vpop.f32.mrb[13].mxu0  ;;  %v610_v3 = vpop.f32.mrb[12].mxu1 }
 0x12a   :  { %v1362_v23 = vadd.f32 %v1361_v22, %v1360_v18  ;;  %v1609_v28 = vpop.f32.mrb[13].mxu1 }
 0x12c   :  { %v1363_v8 = vpop.f32.mrb[14].mxu0  ;;  %v531_v16 = vadd.f32 %v1362_v23, %v1321_v2 }
 0x12d   :  { %v1364_v31 = vpop.f32.mrb[15].mxu0 }
 0x12e   :  { %v1365_v21 = vadd.f32 %v1364_v31, %v1363_v8  ;;  %v611_v26 = vadd.f32 %v610_v3, %v531_v16 }
 0x12f   :  { %v615_v7 = vpop.f32.mrb[14].mxu1 }
 0x130   :  { %v624_v12 = vmax.f32 %v2675_v44, %v611_v26  ;;  %v1366_v17 = vpop.f32.mrb[16].mxu0  ;;  %v536_v25 = vadd.f32 %v1365_v21, %v1324_v9  ;;  %v1612_v30 = vpop.f32.mrb[15].mxu1 }
 0x131   :  { %v1367_v34 = vpop.f32.mrb[17].mxu0  ;;  %v1193_v30 = vld [vmem:[%s2704_s5] ss:$0 sm:$0xff] }
 0x132   :  { %v1368_v38 = vadd.f32 %v1367_v34, %v1366_v17  ;;  %v616_v39 = vadd.f32 %v615_v7, %v536_v25 }
 0x133   :  { %v620_v43 = vpop.f32.mrb[16].mxu1 }
 0x134   :  { %v625_v50 = vmax.f32 %v2677_v49, %v616_v39  ;;  %v541_v51 = vadd.f32 %v1368_v38, %v1327_v15  ;;  %v1615_v52 = vpop.f32.mrb[17].mxu1 }
 0x136   :  { %v621_v56 = vadd.f32 %v620_v43, %v541_v51 }
 0x138   :  { %v626_v62 = vmax.f32 %v2679_v58, %v621_v56 }
 0x148   :  { %v1412_v63 = vpop.f32.mrb[18].mxu0 }
 0x149   :  { %v1453_v0 = vpop.f32.mrb[18].mxu1  ;;  %v1413_v5 = vpop.f32.mrb[19].mxu0 }
 0x14a   :  { %v1414_v14 = vadd.f32 %v1413_v5, %v1412_v63  ;;  %v1454_v19 = vpop.f32.mrb[19].mxu1 }
 0x14b   :  { %v1455_v20 = vadd.f32 %v1454_v19, %v1453_v0 }
 0x14c   :  { %v1415_v27 = vpop.f32.mrb[20].mxu0 }
 0x14d   :  { %v1456_v35 = vpop.f32.mrb[20].mxu1  ;;  %v1416_v36 = vpop.f32.mrb[21].mxu0  ;;  %v798_v37 = vadd.f32 %v1455_v20, %v1414_v14 }
 0x14e   :  { %v1417_v42 = vadd.f32 %v1416_v36, %v1415_v27  ;;  %v1457_v46 = vpop.f32.mrb[21].mxu1 }
 0x14f   :  { %v1458_v47 = vadd.f32 %v1457_v46, %v1456_v35 }
 0x150   :  { %v1418_v54 = vpop.f32.mrb[22].mxu0 }
 0x151   :  { %v1459_v57 = vpop.f32.mrb[22].mxu1  ;;  %v1419_v61 = vpop.f32.mrb[23].mxu0  ;;  %v803_v11 = vadd.f32 %v1458_v47, %v1417_v42 }
 0x152   :  { %v1420_v24 = vadd.f32 %v1419_v61, %v1418_v54  ;;  %v1460_v29 = vpop.f32.mrb[23].mxu1 }
 0x153   :  { %v1461_v32 = vadd.f32 %v1460_v29, %v1459_v57 }
 0x155   :  { %v808_v33 = vadd.f32 %v1461_v32, %v1420_v24 }
 0x158   :  { %v877_v40 = vpop.f32.mrb[24].mxu0 }
 0x159   :  { %v878_v41 = vadd.f32 %v877_v40, %v798_v37  ;;  %v1634_v44 = vpop.f32.mrb[25].mxu0 }
 0x15b   :  { %v891_v45 = vmax.f32 %v624_v12, %v878_v41 }
 0x15c   :  { %v882_v48 = vpop.f32.mrb[26].mxu0 }
 0x15d   :  { %v883_v49 = vadd.f32 %v882_v48, %v803_v11  ;;  %v1637_v53 = vpop.f32.mrb[27].mxu0 }
 0x15f   :  { %v892_v55 = vmax.f32 %v625_v50, %v883_v49 }
 0x160   :  { %v887_v58 = vpop.f32.mrb[28].mxu0 }
 0x161   :  { %v888_v59 = vadd.f32 %v887_v58, %v808_v33  ;;  %v1640_v60 = vpop.f32.mrb[29].mxu0 }
 0x163   :  { %v893_v1 = vmax.f32 %v626_v62, %v888_v59 }
 0x169   :  { %v1505_v2 = vpop.f32.mrb[24].mxu1 }
 0x16a   :  { %v1506_v4 = vpop.f32.mrb[25].mxu1 }
 0x16b   :  { %v1507_v6 = vadd.f32 %v1506_v4, %v1505_v2 }
 0x16d   :  { %v1508_v9 = vpop.f32.mrb[26].mxu1 }
 0x16e   :  { %v1509_v10 = vpop.f32.mrb[27].mxu1 }
 0x16f   :  { %v1510_v13 = vadd.f32 %v1509_v10, %v1508_v9 }
 0x171   :  { %v1511_v15 = vpop.f32.mrb[28].mxu1 }
 0x172   :  { %v1512_v18 = vpop.f32.mrb[29].mxu1 }
 0x173   :  { %v1513_v22 = vadd.f32 %v1512_v18, %v1511_v15 }
 0x178   :  { %v1546_v3 = vpop.f32.mrb[30].mxu0 }
 0x179   :  { %v1547_v23 = vpop.f32.mrb[31].mxu0  ;;  %v1144_v28 = vpop.f32.mrb[30].mxu1 }
 0x17a   :  { %v1548_v8 = vadd.f32 %v1547_v23, %v1546_v3  ;;  %v1659_v16 = vpop.f32.mrb[31].mxu1 }
 0x17c   :  { %v1549_v31 = vpop.f32.mrb[32].mxu0  ;;  %v1065_v21 = vadd.f32 %v1548_v8, %v1507_v6 }
 0x17d   :  { %v1550_v26 = vpop.f32.mrb[33].mxu0  ;;  %v1149_v7 = vpop.f32.mrb[32].mxu1 }
 0x17e   :  { %v1145_v12 = vadd.f32 %v1144_v28, %v1065_v21  ;;  %v1551_v17 = vadd.f32 %v1550_v26, %v1549_v31  ;;  %v1662_v25 = vpop.f32.mrb[33].mxu1 }
 0x180   :  { %v1158_v34 = vmax.f32 %v891_v45, %v1145_v12  ;;  %v1552_v38 = vpop.f32.mrb[34].mxu0  ;;  %v1070_v39 = vadd.f32 %v1551_v17, %v1510_v13 }
 0x181   :  { %v1553_v43 = vpop.f32.mrb[35].mxu0  ;;  %v1154_v50 = vpop.f32.mrb[34].mxu1 }
 0x182   :  { %v1168_v51 = vadd.f32 %v1193_v30, %v1158_v34  ;;  %v1150_v52 = vadd.f32 %v1149_v7, %v1070_v39  ;;  %v1554_v56 = vadd.f32 %v1553_v43, %v1552_v38  ;;  %v1665_v62 = vpop.f32.mrb[35].mxu1 }
 0x184   :  { %v1171_v63 = vmax.f32 %v1168_v51, 0.0  ;;  %v1159_v0 = vmax.f32 %v892_v55, %v1150_v52  ;;  %v1075_v5 = vadd.f32 %v1554_v56, %v1513_v22 }
 0x186   :  { %1174 = vst.msk [vmem:[%s2705_s6] sm:$0xff] %vm110_vm1, %v1171_v63  ;;  %v1169_v14 = vadd.f32 %v1193_v30, %v1159_v0  ;;  %v1155_v19 = vadd.f32 %v1154_v50, %v1075_v5 }
 0x188   :  { %v1172_v20 = vmax.f32 %v1169_v14, 0.0  ;;  %v1160_v27 = vmax.f32 %v893_v1, %v1155_v19 }
 0x18a   :  { %1175 = vst.msk [vmem:[%s2705_s6 + $0x8] sm:$0xff] %vm110_vm1, %v1172_v20  ;;  %v1170_v35 = vadd.f32 %v1193_v30, %v1160_v27 }
 0x18c   :  { %v1173_v36 = vmax.f32 %v1170_v35, 0.0 }
 0x18e   :  { %1176 = vst.msk [vmem:[%s2705_s6 + $0x10] sm:$0xff] %vm110_vm1, %v1173_v36 }

</bundles_post_ra>
